<compile_context>
chip_gen: v5e
topology: v5e:2x2
jax: 0.10.0
libtpu: 0.0.40
codegen_flags: <defaults>
</compile_context>

<pallas_src>
import jax
import jax.numpy as jnp
from jax.experimental import pallas as pl
from jax.experimental.pallas import tpu as pltpu


# ----------------------------------------------------------------------------
# Model dimensions (synthetic; ratios follow real SAM2: S1 = d/2, S0 = d/4)
# ----------------------------------------------------------------------------
C0, C1, C2 = 32, 64, 128      # trunk channels at strides 4 / 8 / 16
D_MODEL = 128                 # FPN / image-embedding channels
S1_CH, S0_CH = 64, 32         # high-res feature channels (stride 8 / stride 4)
PATCH = 4
K0 = 64                       # im2col channels per stride-4 position, padded 48 -> 64

ACT_DTYPE = jnp.bfloat16      # inter-stage activation storage (MXU operands)

# GELU hidden dtype: bf16 on v6e/v7x (bf16 VPU/EUP), f32 on v5e.
try:
    _HIDDEN_DTYPE = (jnp.float32
                     if "v5" in jax.devices()[0].device_kind.lower()
                     else jnp.bfloat16)
except Exception:  # pragma: no cover - CPU / init failure fallback
    _HIDDEN_DTYPE = jnp.float32

_COMPILER_PARAMS = pltpu.CompilerParams(
    dimension_semantics=("parallel",),
    vmem_limit_bytes=48 * 1024 * 1024,   # safe on v5e/v6e (128 MiB) and v7x (64 MiB)
)


# ----------------------------------------------------------------------------
# Pallas kernels
# ----------------------------------------------------------------------------
def _block_forward(x, wp, bp, g, beta, w1, b1, w2, b2):
    """Fused (proj -> LayerNorm -> MLP(GELU) -> residual) on one (rows, K) slab.

    bf16 MXU operands, f32 accumulation; LN / residual in f32.
    """
    bf = jnp.bfloat16
    t = jnp.dot(x.astype(bf), wp, preferred_element_type=jnp.float32) + bp
    mu = jnp.mean(t, axis=-1, keepdims=True)
    var = jnp.mean(jnp.square(t - mu), axis=-1, keepdims=True)
    n = (t - mu) * jax.lax.rsqrt(var + 1e-6) * g + beta
    h = jnp.dot(n.astype(bf), w1, preferred_element_type=jnp.float32) + b1
    # TODO(synk): real SAM2 uses exact (erf) GELU; tanh approximation used here.
    h = jax.nn.gelu(h.astype(_HIDDEN_DTYPE), approximate=True)
    y = jnp.dot(h.astype(bf), w2, preferred_element_type=jnp.float32) + b2
    return t + y


def _stage_kernel(x_ref, wp_ref, bp_ref, g_ref, be_ref,
                  w1_ref, b1_ref, w2_ref, b2_ref, o_ref):
    """Fused trunk stage on one (tm, n_sub*K) merged row-tile.

    Each input row packs `n_sub` spatial positions (K channels each) of one
    coarser cell; the kernel runs the per-position block on each lane-slice and
    concatenates the results along lanes, so the store is lane-dense and the
    2x2 merge for the next stage is a free reshape in the wrapper.
    """
    k = wp_ref.shape[0]
    n_sub = x_ref.shape[-1] // k
    x = x_ref[...]
    wp, bp = wp_ref[...], bp_ref[...]
    g, be = g_ref[...], be_ref[...]
    w1, b1 = w1_ref[...], b1_ref[...]
    w2, b2 = w2_ref[...], b2_ref[...]
    parts = []
    for s in range(n_sub):
        x_s = x[:, s * k:(s + 1) * k]
        parts.append(_block_forward(x_s, wp, bp, g, be, w1, b1, w2, b2))
    out = parts[0] if n_sub == 1 else jnp.concatenate(parts, axis=-1)
    o_ref[...] = out.astype(o_ref.dtype)


def _neck_kernel(f16_ref, f8_ref, f4_ref,
                 n16w_ref, n16b_ref, n8w_ref, n8b_ref, n4w_ref, n4b_ref,
                 s1w_ref, s1b_ref, s0w_ref, s0b_ref,
                 emb_ref, s1_ref, s0_ref):
    """Fused FPN neck + output heads on a tile of `tg` stride-16 cells.

    The hierarchical layout means nearest-neighbour 2x upsample == "add the
    parent row": every stride-8 sub-cell q shares lat16 of its cell, every
    stride-4 sub-pixel (q, r) shares td8_q.  Zero FLOPs, zero data movement,
    f32 all the way on the copy path.  All stores are lane-dense merged slabs.
    """
    bf = jnp.bfloat16
    c1 = n8w_ref.shape[0]
    c0 = n4w_ref.shape[0]
    f16 = f16_ref[...]
    f8 = f8_ref[...]
    f4 = f4_ref[...]
    n16w, n16b = n16w_ref[...], n16b_ref[...]
    n8w, n8b = n8w_ref[...], n8b_ref[...]
    n4w, n4b = n4w_ref[...], n4b_ref[...]
    s1w, s1b = s1w_ref[...], s1b_ref[...]
    s0w, s0b = s0w_ref[...], s0b_ref[...]

    lat16 = jnp.dot(f16, n16w, preferred_element_type=jnp.float32) + n16b  # (tg, D)
    emb_ref[...] = lat16.astype(emb_ref.dtype)

    s1_parts, s0_parts = [], []
    for q in range(4):                      # stride-8 sub-cells of each stride-16 cell
        lat8 = jnp.dot(f8[:, q * c1:(q + 1) * c1], n8w,
                       preferred_element_type=jnp.float32) + n8b
        td8 = lat8 + lat16                  # NN 2x upsample: shared parent row (f32)
        s1_parts.append(jnp.dot(td8.astype(bf), s1w,
                                preferred_element_type=jnp.float32) + s1b)
        for r in range(4):                  # stride-4 sub-pixels of each stride-8 cell
            j = q * 4 + r
            lat4 = jnp.dot(f4[:, j * c0:(j + 1) * c0], n4w,
                           preferred_element_type=jnp.float32) + n4b
            td4 = lat4 + td8                # second NN 2x upsample, still zero-FLOP
            s0_parts.append(jnp.dot(td4.astype(bf), s0w,
                                    preferred_element_type=jnp.float32) + s0b)

    s1_ref[...] = jnp.concatenate(s1_parts, axis=-1).astype(s1_ref.dtype)  # (tg, 4*S1)
    s0_ref[...] = jnp.concatenate(s0_parts, axis=-1).astype(s0_ref.dtype)  # (tg, 16*S0)


# ----------------------------------------------------------------------------
# Kernel wrappers
# ----------------------------------------------------------------------------
def _row_tile(m, cap):
    """Largest power-of-two row tile >= 8 that divides m, <= cap, with >= 2
    grid steps (megacore).  Falls back to the full extent (always legal)."""
    best = None
    t = 8
    while t <= min(cap, m // 2):
        if m % t == 0:
            best = t
        t *= 2
    return best if best is not None else m


def _const_spec(shape):
    return pl.BlockSpec(shape, lambda *_: (0,) * len(shape))


def pallas_stage(x, p, out_dtype=ACT_DTYPE, tile_cap=2048):
    m, kw = x.shape
    k, c = p["wp"].shape
    n_sub = kw // k
    out_cols = n_sub * c
    hdim = p["w1"].shape[1]
    tm = _row_tile(m, tile_cap)
    return pl.pallas_call(
        _stage_kernel,
        out_shape=jax.ShapeDtypeStruct((m, out_cols), out_dtype),
        grid=(m // tm,),
        in_specs=[
            pl.BlockSpec((tm, kw), lambda i: (i, 0)),
            _const_spec((k, c)), _const_spec((1, c)),
            _const_spec((1, c)), _const_spec((1, c)),
            _const_spec((c, hdim)), _const_spec((1, hdim)),
            _const_spec((hdim, c)), _const_spec((1, c)),
        ],
        out_specs=pl.BlockSpec((tm, out_cols), lambda i: (i, 0)),
        compiler_params=_COMPILER_PARAMS,
    )(x, p["wp"], p["bp"], p["ln_g"], p["ln_b"],
      p["w1"], p["b1"], p["w2"], p["b2"])


def pallas_neck(f16, f8m, f4m, p, out_dtype=jnp.float32, tile_cap=512):
    m = f16.shape[0]                         # batch * h16 * w16 (stride-16 cells)
    c2, d = p["n16w"].shape
    c1 = p["n8w"].shape[0]
    c0 = p["n4w"].shape[0]
    s1c = p["s1w"].shape[1]
    s0c = p["s0w"].shape[1]
    tg = _row_tile(m, tile_cap)

    def row_spec(width):
        return pl.BlockSpec((tg, width), lambda i: (i, 0))

    return pl.pallas_call(
        _neck_kernel,
        out_shape=(
            jax.ShapeDtypeStruct((m, d), out_dtype),
            jax.ShapeDtypeStruct((m, 4 * s1c), out_dtype),
            jax.ShapeDtypeStruct((m, 16 * s0c), out_dtype),
        ),
        grid=(m // tg,),
        in_specs=[
            row_spec(c2), row_spec(4 * c1), row_spec(16 * c0),
            _const_spec((c2, d)), _const_spec((1, d)),
            _const_spec((c1, d)), _const_spec((1, d)),
            _const_spec((c0, d)), _const_spec((1, d)),
            _const_spec((d, s1c)), _const_spec((1, s1c)),
            _const_spec((d, s0c)), _const_spec((1, s0c)),
        ],
        out_specs=(row_spec(d), row_spec(4 * s1c), row_spec(16 * s0c)),
        compiler_params=_COMPILER_PARAMS,
    )(f16, f8m, f4m,
      p["n16w"], p["n16b"], p["n8w"], p["n8b"], p["n4w"], p["n4b"],
      p["s1w"], p["s1b"], p["s0w"], p["s0b"])


# ----------------------------------------------------------------------------
# Parameter construction (deterministic, synthetic)
# ----------------------------------------------------------------------------
def _dense(key, k, n):
    w = (jax.random.normal(key, (k, n), jnp.float32) / (float(k) ** 0.5)).astype(
        jnp.bfloat16)                                   # MXU operand dtype
    b = jnp.zeros((1, n), jnp.float32)
    return w, b


def _stage_params(key, k_in, c):
    k0, k1, k2 = jax.random.split(key, 3)
    wp, bp = _dense(k0, k_in, c)
    w1, b1 = _dense(k1, c, 4 * c)
    w2, b2 = _dense(k2, 4 * c, c)
    return {"wp": wp, "bp": bp,
            "ln_g": jnp.ones((1, c), jnp.float32),
            "ln_b": jnp.zeros((1, c), jnp.float32),
            "w1": w1, "b1": b1, "w2": w2, "b2": b2}


def init_params(key):
    ks = jax.random.split(key, 8)
    p = {}
    p["stage4"] = _stage_params(ks[0], K0, C0)          # padded im2col K -> C0
    p["stage8"] = _stage_params(ks[1], 4 * C0, C1)      # merged 2x2 -> C1
    p["stage16"] = _stage_params(ks[2], 4 * C1, C2)     # merged 2x2 -> C2
    n16w, n16b = _dense(ks[3], C2, D_MODEL)
    n8w, n8b = _dense(ks[4], C1, D_MODEL)
    n4w, n4b = _dense(ks[5], C0, D_MODEL)
    s1w, s1b = _dense(ks[6], D_MODEL, S1_CH)
    s0w, s0b = _dense(ks[7], D_MODEL, S0_CH)
    p["neck"] = {"n16w": n16w, "n16b": n16b, "n8w": n8w, "n8b": n8b,
                 "n4w": n4w, "n4b": n4b, "s1w": s1w, "s1b": s1b,
                 "s0w": s0w, "s0b": s0b}
    return p


# ----------------------------------------------------------------------------
# Forward pass.  Layout glue is a single input permutation (hierarchical im2col)
# plus free contiguous reshapes between kernels; all hot math is in 4 kernels.
# ----------------------------------------------------------------------------
def sam2_image_encoder(image, params):
    """image: [B, 3, H, W] NCHW float32 -> (img_embedding, feats_s0, feats_s1) NCHW."""
    b, cin, h, w = image.shape
    h4, w4 = h // PATCH, w // PATCH
    h8, w8 = h4 // 2, w4 // 2
    h16, w16 = h8 // 2, w8 // 2
    n16 = h16 * w16
    n8 = 4 * n16
    k_raw = cin * PATCH * PATCH

    # Hierarchical (group-major) im2col: rows = stride-8 cells ordered
    # (b, r16, c16, dr8, dc8); channels = 4 stride-4 children x K0 (zero-padded
    # 48 -> 64 for aligned vector loads) -> lane-dense width 256.
    x = image.reshape(b, cin, h16, 2, 2, PATCH, w16, 2, 2, PATCH)
    #                 0    1   2   3  4    5     6   7  8    9
    x = x.transpose(0, 2, 6, 3, 7, 4, 8, 1, 5, 9)
    # -> (b, r16, c16, dr8, dc8, dr4, dc4, cin, py, px)
    x = x.reshape(b * n8, 4, k_raw)
    x = jnp.pad(x, ((0, 0), (0, 0), (0, K0 - k_raw)))
    x = x.reshape(b * n8, 4 * K0).astype(ACT_DTYPE)

    # Fused trunk stages.  Merged (group-major) outputs make every 2x2 merge a
    # free contiguous reshape -- no transposes, no extra HBM round trips.
    feat4m = pallas_stage(x, params["stage4"])                    # (b*n8,  4*C0=128)
    feat8m = pallas_stage(feat4m.reshape(b * n16, 16 * C0),
                          params["stage8"])                       # (b*n16, 4*C1=256)
    feat16 = pallas_stage(feat8m, params["stage16"])              # (b*n16, C2=128)

    # Fused FPN neck + heads, tiled over the stride-16 cell axis.
    emb, s1, s0 = pallas_neck(feat16, feat8m,
                              feat4m.reshape(b * n16, 16 * C0),
                              params["neck"])

    # Back to NCHW (single permutation per output; hierarchical -> raster).
    img_embedding = emb.reshape(b, h16, w16, D_MODEL).transpose(0, 3, 1, 2)
    feats_s1 = (s1.reshape(b, h16, w16, 2, 2, S1_CH)
                  .transpose(0, 5, 1, 3, 2, 4)
                  .reshape(b, S1_CH, h8, w8))
    feats_s0 = (s0.reshape(b, h16, w16, 2, 2, 2, 2, S0_CH)
                  .transpose(0, 7, 1, 3, 5, 2, 4, 6)
                  .reshape(b, S0_CH, h4, w4))
    return img_embedding, feats_s0, feats_s1


# ----------------------------------------------------------------------------
if __name__ == "__main__":
    key = jax.random.PRNGKey(0)
    k_img, k_par = jax.random.split(key)

    image = jax.random.normal(k_img, (2, 3, 64, 64), jnp.float32)   # NCHW
    params = init_params(k_par)

    fwd = jax.jit(sam2_image_encoder)
    img_embedding, feats_s0, feats_s1 = fwd(image, params)
    jax.block_until_ready((img_embedding, feats_s0, feats_s1))

    assert img_embedding.shape == (2, D_MODEL, 4, 4)
    assert feats_s0.shape == (2, S0_CH, 16, 16)
    assert feats_s1.shape == (2, S1_CH, 8, 8)
    assert img_embedding.dtype == jnp.float32
    assert feats_s0.dtype == jnp.float32 and feats_s1.dtype == jnp.float32
    print("KERNEL_OK")
</pallas_src>

<mosaic_0001>
module attributes {stable_mosaic.version = 11 : i64} {
  func.func @_stage_kernel(%arg0: i32, %arg1: memref<64x256xbf16, #tpu.memory_space<vmem>>, %arg2: memref<64x32xbf16, #tpu.memory_space<vmem>>, %arg3: memref<1x32xf32, #tpu.memory_space<vmem>>, %arg4: memref<1x32xf32, #tpu.memory_space<vmem>>, %arg5: memref<1x32xf32, #tpu.memory_space<vmem>>, %arg6: memref<32x128xbf16, #tpu.memory_space<vmem>>, %arg7: memref<1x128xf32, #tpu.memory_space<vmem>>, %arg8: memref<128x32xbf16, #tpu.memory_space<vmem>>, %arg9: memref<1x32xf32, #tpu.memory_space<vmem>>, %arg10: memref<64x128xbf16, #tpu.memory_space<vmem>>) attributes {dimension_semantics = [#tpu.dimension_semantics<parallel>], iteration_bounds = array<i64: 2>, scalar_prefetch = 0 : i64, scratch_operands = 0 : i64, tpu.core_type = #tpu.core_type<tc>, window_params = [{transform_indices = @transform_0, window_bounds = array<i64: 64, 256>}, {pipeline_mode = #tpu.pipeline_mode<synchronous>, transform_indices = @transform_1, window_bounds = array<i64: 64, 32>}, {pipeline_mode = #tpu.pipeline_mode<synchronous>, transform_indices = @transform_2, window_bounds = array<i64: 1, 32>}, {pipeline_mode = #tpu.pipeline_mode<synchronous>, transform_indices = @transform_3, window_bounds = array<i64: 1, 32>}, {pipeline_mode = #tpu.pipeline_mode<synchronous>, transform_indices = @transform_4, window_bounds = array<i64: 1, 32>}, {pipeline_mode = #tpu.pipeline_mode<synchronous>, transform_indices = @transform_5, window_bounds = array<i64: 32, 128>}, {pipeline_mode = #tpu.pipeline_mode<synchronous>, transform_indices = @transform_6, window_bounds = array<i64: 1, 128>}, {pipeline_mode = #tpu.pipeline_mode<synchronous>, transform_indices = @transform_7, window_bounds = array<i64: 128, 32>}, {pipeline_mode = #tpu.pipeline_mode<synchronous>, transform_indices = @transform_8, window_bounds = array<i64: 1, 32>}, {transform_indices = @transform_9, window_bounds = array<i64: 64, 128>}]} {
    %c0 = arith.constant 0 : index
    %c0_0 = arith.constant 0 : index
    %0 = vector.load %arg1[%c0, %c0_0] : memref<64x256xbf16, #tpu.memory_space<vmem>>, vector<64x256xbf16>
    %c0_1 = arith.constant 0 : index
    %c0_2 = arith.constant 0 : index
    %1 = vector.load %arg2[%c0_1, %c0_2] : memref<64x32xbf16, #tpu.memory_space<vmem>>, vector<64x32xbf16>
    %c0_3 = arith.constant 0 : index
    %c0_4 = arith.constant 0 : index
    %2 = vector.load %arg3[%c0_3, %c0_4] : memref<1x32xf32, #tpu.memory_space<vmem>>, vector<1x32xf32>
    %c0_5 = arith.constant 0 : index
    %c0_6 = arith.constant 0 : index
    %3 = vector.load %arg4[%c0_5, %c0_6] : memref<1x32xf32, #tpu.memory_space<vmem>>, vector<1x32xf32>
    %c0_7 = arith.constant 0 : index
    %c0_8 = arith.constant 0 : index
    %4 = vector.load %arg5[%c0_7, %c0_8] : memref<1x32xf32, #tpu.memory_space<vmem>>, vector<1x32xf32>
    %c0_9 = arith.constant 0 : index
    %c0_10 = arith.constant 0 : index
    %5 = vector.load %arg6[%c0_9, %c0_10] : memref<32x128xbf16, #tpu.memory_space<vmem>>, vector<32x128xbf16>
    %c0_11 = arith.constant 0 : index
    %c0_12 = arith.constant 0 : index
    %6 = vector.load %arg7[%c0_11, %c0_12] : memref<1x128xf32, #tpu.memory_space<vmem>>, vector<1x128xf32>
    %c0_13 = arith.constant 0 : index
    %c0_14 = arith.constant 0 : index
    %7 = vector.load %arg8[%c0_13, %c0_14] : memref<128x32xbf16, #tpu.memory_space<vmem>>, vector<128x32xbf16>
    %c0_15 = arith.constant 0 : index
    %c0_16 = arith.constant 0 : index
    %8 = vector.load %arg9[%c0_15, %c0_16] : memref<1x32xf32, #tpu.memory_space<vmem>>, vector<1x32xf32>
    %9 = vector.extract_strided_slice %0 {offsets = [0, 0], sizes = [64, 64], strides = [1, 1]} : vector<64x256xbf16> to vector<64x64xbf16>
    %cst = arith.constant dense<0.000000e+00> : vector<64x32xf32>
    %10 = tpu.matmul %9, %1, %cst {dimension_numbers = #tpu.dot_dimension_numbers<[1], [0], [0], [1], [0, 0, 1, 1], [], []>} : vector<64x64xbf16>, vector<64x32xbf16>, vector<64x32xf32> -> vector<64x32xf32>
    %11 = vector.broadcast %2 : vector<1x32xf32> to vector<64x32xf32>
    %12 = arith.addf %10, %11 : vector<64x32xf32>
    %cst_17 = arith.constant dense<0.000000e+00> : vector<64xf32>
    %13 = vector.multi_reduction <add>, %12, %cst_17 [1] : vector<64x32xf32> to vector<64xf32>
    %14 = vector.shape_cast %13 : vector<64xf32> to vector<64x1xf32>
    %cst_18 = arith.constant 3.200000e+01 : f32
    %15 = vector.broadcast %cst_18 : f32 to vector<64x1xf32>
    %16 = arith.divf %14, %15 : vector<64x1xf32>
    %17 = vector.broadcast %16 : vector<64x1xf32> to vector<64x32xf32>
    %18 = arith.subf %12, %17 : vector<64x32xf32>
    %19 = arith.mulf %18, %18 : vector<64x32xf32>
    %cst_19 = arith.constant dense<0.000000e+00> : vector<64xf32>
    %20 = vector.multi_reduction <add>, %19, %cst_19 [1] : vector<64x32xf32> to vector<64xf32>
    %21 = vector.shape_cast %20 : vector<64xf32> to vector<64x1xf32>
    %cst_20 = arith.constant 3.200000e+01 : f32
    %22 = vector.broadcast %cst_20 : f32 to vector<64x1xf32>
    %23 = arith.divf %21, %22 : vector<64x1xf32>
    %24 = vector.broadcast %16 : vector<64x1xf32> to vector<64x32xf32>
    %25 = arith.subf %12, %24 : vector<64x32xf32>
    %cst_21 = arith.constant 9.99999997E-7 : f32
    %26 = vector.broadcast %cst_21 : f32 to vector<64x1xf32>
    %27 = arith.addf %23, %26 : vector<64x1xf32>
    %28 = math.rsqrt %27 : vector<64x1xf32>
    %29 = vector.broadcast %28 : vector<64x1xf32> to vector<64x32xf32>
    %30 = arith.mulf %25, %29 : vector<64x32xf32>
    %31 = vector.broadcast %3 : vector<1x32xf32> to vector<64x32xf32>
    %32 = arith.mulf %30, %31 : vector<64x32xf32>
    %33 = vector.broadcast %4 : vector<1x32xf32> to vector<64x32xf32>
    %34 = arith.addf %32, %33 : vector<64x32xf32>
    %35 = arith.truncf %34 : vector<64x32xf32> to vector<64x32xbf16>
    %cst_22 = arith.constant dense<0.000000e+00> : vector<64x128xf32>
    %36 = tpu.matmul %35, %5, %cst_22 {dimension_numbers = #tpu.dot_dimension_numbers<[1], [0], [0], [1], [0, 0, 1, 1], [], []>} : vector<64x32xbf16>, vector<32x128xbf16>, vector<64x128xf32> -> vector<64x128xf32>
    %37 = vector.broadcast %6 : vector<1x128xf32> to vector<64x128xf32>
    %38 = arith.addf %36, %37 : vector<64x128xf32>
    %39 = arith.truncf %38 : vector<64x128xf32> to vector<64x128xbf16>
    %40 = arith.mulf %39, %39 : vector<64x128xbf16>
    %41 = arith.mulf %39, %40 : vector<64x128xbf16>
    %cst_23 = arith.constant 4.467770e-02 : bf16
    %42 = vector.broadcast %cst_23 : bf16 to vector<64x128xbf16>
    %43 = arith.mulf %42, %41 : vector<64x128xbf16>
    %44 = arith.addf %39, %43 : vector<64x128xbf16>
    %cst_24 = arith.constant 7.968750e-01 : bf16
    %45 = vector.broadcast %cst_24 : bf16 to vector<64x128xbf16>
    %46 = arith.mulf %45, %44 : vector<64x128xbf16>
    %47 = math.tanh %46 : vector<64x128xbf16>
    %cst_25 = arith.constant 1.000000e+00 : bf16
    %48 = vector.broadcast %cst_25 : bf16 to vector<64x128xbf16>
    %49 = arith.addf %48, %47 : vector<64x128xbf16>
    %cst_26 = arith.constant 5.000000e-01 : bf16
    %50 = vector.broadcast %cst_26 : bf16 to vector<64x128xbf16>
    %51 = arith.mulf %50, %49 : vector<64x128xbf16>
    %52 = arith.mulf %39, %51 : vector<64x128xbf16>
    %cst_27 = arith.constant dense<0.000000e+00> : vector<64x32xf32>
    %53 = tpu.matmul %52, %7, %cst_27 {dimension_numbers = #tpu.dot_dimension_numbers<[1], [0], [0], [1], [0, 0, 1, 1], [], []>} : vector<64x128xbf16>, vector<128x32xbf16>, vector<64x32xf32> -> vector<64x32xf32>
    %54 = vector.broadcast %8 : vector<1x32xf32> to vector<64x32xf32>
    %55 = arith.addf %53, %54 : vector<64x32xf32>
    %56 = arith.addf %12, %55 : vector<64x32xf32>
    %57 = vector.extract_strided_slice %0 {offsets = [0, 64], sizes = [64, 64], strides = [1, 1]} : vector<64x256xbf16> to vector<64x64xbf16>
    %cst_28 = arith.constant dense<0.000000e+00> : vector<64x32xf32>
    %58 = tpu.matmul %57, %1, %cst_28 {dimension_numbers = #tpu.dot_dimension_numbers<[1], [0], [0], [1], [0, 0, 1, 1], [], []>} : vector<64x64xbf16>, vector<64x32xbf16>, vector<64x32xf32> -> vector<64x32xf32>
    %59 = vector.broadcast %2 : vector<1x32xf32> to vector<64x32xf32>
    %60 = arith.addf %58, %59 : vector<64x32xf32>
    %cst_29 = arith.constant dense<0.000000e+00> : vector<64xf32>
    %61 = vector.multi_reduction <add>, %60, %cst_29 [1] : vector<64x32xf32> to vector<64xf32>
    %62 = vector.shape_cast %61 : vector<64xf32> to vector<64x1xf32>
    %cst_30 = arith.constant 3.200000e+01 : f32
    %63 = vector.broadcast %cst_30 : f32 to vector<64x1xf32>
    %64 = arith.divf %62, %63 : vector<64x1xf32>
    %65 = vector.broadcast %64 : vector<64x1xf32> to vector<64x32xf32>
    %66 = arith.subf %60, %65 : vector<64x32xf32>
    %67 = arith.mulf %66, %66 : vector<64x32xf32>
    %cst_31 = arith.constant dense<0.000000e+00> : vector<64xf32>
    %68 = vector.multi_reduction <add>, %67, %cst_31 [1] : vector<64x32xf32> to vector<64xf32>
    %69 = vector.shape_cast %68 : vector<64xf32> to vector<64x1xf32>
    %cst_32 = arith.constant 3.200000e+01 : f32
    %70 = vector.broadcast %cst_32 : f32 to vector<64x1xf32>
    %71 = arith.divf %69, %70 : vector<64x1xf32>
    %72 = vector.broadcast %64 : vector<64x1xf32> to vector<64x32xf32>
    %73 = arith.subf %60, %72 : vector<64x32xf32>
    %cst_33 = arith.constant 9.99999997E-7 : f32
    %74 = vector.broadcast %cst_33 : f32 to vector<64x1xf32>
    %75 = arith.addf %71, %74 : vector<64x1xf32>
    %76 = math.rsqrt %75 : vector<64x1xf32>
    %77 = vector.broadcast %76 : vector<64x1xf32> to vector<64x32xf32>
    %78 = arith.mulf %73, %77 : vector<64x32xf32>
    %79 = vector.broadcast %3 : vector<1x32xf32> to vector<64x32xf32>
    %80 = arith.mulf %78, %79 : vector<64x32xf32>
    %81 = vector.broadcast %4 : vector<1x32xf32> to vector<64x32xf32>
    %82 = arith.addf %80, %81 : vector<64x32xf32>
    %83 = arith.truncf %82 : vector<64x32xf32> to vector<64x32xbf16>
    %cst_34 = arith.constant dense<0.000000e+00> : vector<64x128xf32>
    %84 = tpu.matmul %83, %5, %cst_34 {dimension_numbers = #tpu.dot_dimension_numbers<[1], [0], [0], [1], [0, 0, 1, 1], [], []>} : vector<64x32xbf16>, vector<32x128xbf16>, vector<64x128xf32> -> vector<64x128xf32>
    %85 = vector.broadcast %6 : vector<1x128xf32> to vector<64x128xf32>
    %86 = arith.addf %84, %85 : vector<64x128xf32>
    %87 = arith.truncf %86 : vector<64x128xf32> to vector<64x128xbf16>
    %88 = arith.mulf %87, %87 : vector<64x128xbf16>
    %89 = arith.mulf %87, %88 : vector<64x128xbf16>
    %cst_35 = arith.constant 4.467770e-02 : bf16
    %90 = vector.broadcast %cst_35 : bf16 to vector<64x128xbf16>
    %91 = arith.mulf %90, %89 : vector<64x128xbf16>
    %92 = arith.addf %87, %91 : vector<64x128xbf16>
    %cst_36 = arith.constant 7.968750e-01 : bf16
    %93 = vector.broadcast %cst_36 : bf16 to vector<64x128xbf16>
    %94 = arith.mulf %93, %92 : vector<64x128xbf16>
    %95 = math.tanh %94 : vector<64x128xbf16>
    %cst_37 = arith.constant 1.000000e+00 : bf16
    %96 = vector.broadcast %cst_37 : bf16 to vector<64x128xbf16>
    %97 = arith.addf %96, %95 : vector<64x128xbf16>
    %cst_38 = arith.constant 5.000000e-01 : bf16
    %98 = vector.broadcast %cst_38 : bf16 to vector<64x128xbf16>
    %99 = arith.mulf %98, %97 : vector<64x128xbf16>
    %100 = arith.mulf %87, %99 : vector<64x128xbf16>
    %cst_39 = arith.constant dense<0.000000e+00> : vector<64x32xf32>
    %101 = tpu.matmul %100, %7, %cst_39 {dimension_numbers = #tpu.dot_dimension_numbers<[1], [0], [0], [1], [0, 0, 1, 1], [], []>} : vector<64x128xbf16>, vector<128x32xbf16>, vector<64x32xf32> -> vector<64x32xf32>
    %102 = vector.broadcast %8 : vector<1x32xf32> to vector<64x32xf32>
    %103 = arith.addf %101, %102 : vector<64x32xf32>
    %104 = arith.addf %60, %103 : vector<64x32xf32>
    %105 = vector.extract_strided_slice %0 {offsets = [0, 128], sizes = [64, 64], strides = [1, 1]} : vector<64x256xbf16> to vector<64x64xbf16>
    %cst_40 = arith.constant dense<0.000000e+00> : vector<64x32xf32>
    %106 = tpu.matmul %105, %1, %cst_40 {dimension_numbers = #tpu.dot_dimension_numbers<[1], [0], [0], [1], [0, 0, 1, 1], [], []>} : vector<64x64xbf16>, vector<64x32xbf16>, vector<64x32xf32> -> vector<64x32xf32>
    %107 = vector.broadcast %2 : vector<1x32xf32> to vector<64x32xf32>
    %108 = arith.addf %106, %107 : vector<64x32xf32>
    %cst_41 = arith.constant dense<0.000000e+00> : vector<64xf32>
    %109 = vector.multi_reduction <add>, %108, %cst_41 [1] : vector<64x32xf32> to vector<64xf32>
    %110 = vector.shape_cast %109 : vector<64xf32> to vector<64x1xf32>
    %cst_42 = arith.constant 3.200000e+01 : f32
    %111 = vector.broadcast %cst_42 : f32 to vector<64x1xf32>
    %112 = arith.divf %110, %111 : vector<64x1xf32>
    %113 = vector.broadcast %112 : vector<64x1xf32> to vector<64x32xf32>
    %114 = arith.subf %108, %113 : vector<64x32xf32>
    %115 = arith.mulf %114, %114 : vector<64x32xf32>
    %cst_43 = arith.constant dense<0.000000e+00> : vector<64xf32>
    %116 = vector.multi_reduction <add>, %115, %cst_43 [1] : vector<64x32xf32> to vector<64xf32>
    %117 = vector.shape_cast %116 : vector<64xf32> to vector<64x1xf32>
    %cst_44 = arith.constant 3.200000e+01 : f32
    %118 = vector.broadcast %cst_44 : f32 to vector<64x1xf32>
    %119 = arith.divf %117, %118 : vector<64x1xf32>
    %120 = vector.broadcast %112 : vector<64x1xf32> to vector<64x32xf32>
    %121 = arith.subf %108, %120 : vector<64x32xf32>
    %cst_45 = arith.constant 9.99999997E-7 : f32
    %122 = vector.broadcast %cst_45 : f32 to vector<64x1xf32>
    %123 = arith.addf %119, %122 : vector<64x1xf32>
    %124 = math.rsqrt %123 : vector<64x1xf32>
    %125 = vector.broadcast %124 : vector<64x1xf32> to vector<64x32xf32>
    %126 = arith.mulf %121, %125 : vector<64x32xf32>
    %127 = vector.broadcast %3 : vector<1x32xf32> to vector<64x32xf32>
    %128 = arith.mulf %126, %127 : vector<64x32xf32>
    %129 = vector.broadcast %4 : vector<1x32xf32> to vector<64x32xf32>
    %130 = arith.addf %128, %129 : vector<64x32xf32>
    %131 = arith.truncf %130 : vector<64x32xf32> to vector<64x32xbf16>
    %cst_46 = arith.constant dense<0.000000e+00> : vector<64x128xf32>
    %132 = tpu.matmul %131, %5, %cst_46 {dimension_numbers = #tpu.dot_dimension_numbers<[1], [0], [0], [1], [0, 0, 1, 1], [], []>} : vector<64x32xbf16>, vector<32x128xbf16>, vector<64x128xf32> -> vector<64x128xf32>
    %133 = vector.broadcast %6 : vector<1x128xf32> to vector<64x128xf32>
    %134 = arith.addf %132, %133 : vector<64x128xf32>
    %135 = arith.truncf %134 : vector<64x128xf32> to vector<64x128xbf16>
    %136 = arith.mulf %135, %135 : vector<64x128xbf16>
    %137 = arith.mulf %135, %136 : vector<64x128xbf16>
    %cst_47 = arith.constant 4.467770e-02 : bf16
    %138 = vector.broadcast %cst_47 : bf16 to vector<64x128xbf16>
    %139 = arith.mulf %138, %137 : vector<64x128xbf16>
    %140 = arith.addf %135, %139 : vector<64x128xbf16>
    %cst_48 = arith.constant 7.968750e-01 : bf16
    %141 = vector.broadcast %cst_48 : bf16 to vector<64x128xbf16>
    %142 = arith.mulf %141, %140 : vector<64x128xbf16>
    %143 = math.tanh %142 : vector<64x128xbf16>
    %cst_49 = arith.constant 1.000000e+00 : bf16
    %144 = vector.broadcast %cst_49 : bf16 to vector<64x128xbf16>
    %145 = arith.addf %144, %143 : vector<64x128xbf16>
    %cst_50 = arith.constant 5.000000e-01 : bf16
    %146 = vector.broadcast %cst_50 : bf16 to vector<64x128xbf16>
    %147 = arith.mulf %146, %145 : vector<64x128xbf16>
    %148 = arith.mulf %135, %147 : vector<64x128xbf16>
    %cst_51 = arith.constant dense<0.000000e+00> : vector<64x32xf32>
    %149 = tpu.matmul %148, %7, %cst_51 {dimension_numbers = #tpu.dot_dimension_numbers<[1], [0], [0], [1], [0, 0, 1, 1], [], []>} : vector<64x128xbf16>, vector<128x32xbf16>, vector<64x32xf32> -> vector<64x32xf32>
    %150 = vector.broadcast %8 : vector<1x32xf32> to vector<64x32xf32>
    %151 = arith.addf %149, %150 : vector<64x32xf32>
    %152 = arith.addf %108, %151 : vector<64x32xf32>
    %153 = vector.extract_strided_slice %0 {offsets = [0, 192], sizes = [64, 64], strides = [1, 1]} : vector<64x256xbf16> to vector<64x64xbf16>
    %cst_52 = arith.constant dense<0.000000e+00> : vector<64x32xf32>
    %154 = tpu.matmul %153, %1, %cst_52 {dimension_numbers = #tpu.dot_dimension_numbers<[1], [0], [0], [1], [0, 0, 1, 1], [], []>} : vector<64x64xbf16>, vector<64x32xbf16>, vector<64x32xf32> -> vector<64x32xf32>
    %155 = vector.broadcast %2 : vector<1x32xf32> to vector<64x32xf32>
    %156 = arith.addf %154, %155 : vector<64x32xf32>
    %cst_53 = arith.constant dense<0.000000e+00> : vector<64xf32>
    %157 = vector.multi_reduction <add>, %156, %cst_53 [1] : vector<64x32xf32> to vector<64xf32>
    %158 = vector.shape_cast %157 : vector<64xf32> to vector<64x1xf32>
    %cst_54 = arith.constant 3.200000e+01 : f32
    %159 = vector.broadcast %cst_54 : f32 to vector<64x1xf32>
    %160 = arith.divf %158, %159 : vector<64x1xf32>
    %161 = vector.broadcast %160 : vector<64x1xf32> to vector<64x32xf32>
    %162 = arith.subf %156, %161 : vector<64x32xf32>
    %163 = arith.mulf %162, %162 : vector<64x32xf32>
    %cst_55 = arith.constant dense<0.000000e+00> : vector<64xf32>
    %164 = vector.multi_reduction <add>, %163, %cst_55 [1] : vector<64x32xf32> to vector<64xf32>
    %165 = vector.shape_cast %164 : vector<64xf32> to vector<64x1xf32>
    %cst_56 = arith.constant 3.200000e+01 : f32
    %166 = vector.broadcast %cst_56 : f32 to vector<64x1xf32>
    %167 = arith.divf %165, %166 : vector<64x1xf32>
    %168 = vector.broadcast %160 : vector<64x1xf32> to vector<64x32xf32>
    %169 = arith.subf %156, %168 : vector<64x32xf32>
    %cst_57 = arith.constant 9.99999997E-7 : f32
    %170 = vector.broadcast %cst_57 : f32 to vector<64x1xf32>
    %171 = arith.addf %167, %170 : vector<64x1xf32>
    %172 = math.rsqrt %171 : vector<64x1xf32>
    %173 = vector.broadcast %172 : vector<64x1xf32> to vector<64x32xf32>
    %174 = arith.mulf %169, %173 : vector<64x32xf32>
    %175 = vector.broadcast %3 : vector<1x32xf32> to vector<64x32xf32>
    %176 = arith.mulf %174, %175 : vector<64x32xf32>
    %177 = vector.broadcast %4 : vector<1x32xf32> to vector<64x32xf32>
    %178 = arith.addf %176, %177 : vector<64x32xf32>
    %179 = arith.truncf %178 : vector<64x32xf32> to vector<64x32xbf16>
    %cst_58 = arith.constant dense<0.000000e+00> : vector<64x128xf32>
    %180 = tpu.matmul %179, %5, %cst_58 {dimension_numbers = #tpu.dot_dimension_numbers<[1], [0], [0], [1], [0, 0, 1, 1], [], []>} : vector<64x32xbf16>, vector<32x128xbf16>, vector<64x128xf32> -> vector<64x128xf32>
    %181 = vector.broadcast %6 : vector<1x128xf32> to vector<64x128xf32>
    %182 = arith.addf %180, %181 : vector<64x128xf32>
    %183 = arith.truncf %182 : vector<64x128xf32> to vector<64x128xbf16>
    %184 = arith.mulf %183, %183 : vector<64x128xbf16>
    %185 = arith.mulf %183, %184 : vector<64x128xbf16>
    %cst_59 = arith.constant 4.467770e-02 : bf16
    %186 = vector.broadcast %cst_59 : bf16 to vector<64x128xbf16>
    %187 = arith.mulf %186, %185 : vector<64x128xbf16>
    %188 = arith.addf %183, %187 : vector<64x128xbf16>
    %cst_60 = arith.constant 7.968750e-01 : bf16
    %189 = vector.broadcast %cst_60 : bf16 to vector<64x128xbf16>
    %190 = arith.mulf %189, %188 : vector<64x128xbf16>
    %191 = math.tanh %190 : vector<64x128xbf16>
    %cst_61 = arith.constant 1.000000e+00 : bf16
    %192 = vector.broadcast %cst_61 : bf16 to vector<64x128xbf16>
    %193 = arith.addf %192, %191 : vector<64x128xbf16>
    %cst_62 = arith.constant 5.000000e-01 : bf16
    %194 = vector.broadcast %cst_62 : bf16 to vector<64x128xbf16>
    %195 = arith.mulf %194, %193 : vector<64x128xbf16>
    %196 = arith.mulf %183, %195 : vector<64x128xbf16>
    %cst_63 = arith.constant dense<0.000000e+00> : vector<64x32xf32>
    %197 = tpu.matmul %196, %7, %cst_63 {dimension_numbers = #tpu.dot_dimension_numbers<[1], [0], [0], [1], [0, 0, 1, 1], [], []>} : vector<64x128xbf16>, vector<128x32xbf16>, vector<64x32xf32> -> vector<64x32xf32>
    %198 = vector.broadcast %8 : vector<1x32xf32> to vector<64x32xf32>
    %199 = arith.addf %197, %198 : vector<64x32xf32>
    %200 = arith.addf %156, %199 : vector<64x32xf32>
    %201 = tpu.concatenate %56, %104, %152, %200 in 1 : vector<64x32xf32>, vector<64x32xf32>, vector<64x32xf32>, vector<64x32xf32> -> vector<64x128xf32>
    %202 = arith.truncf %201 : vector<64x128xf32> to vector<64x128xbf16>
    %c0_64 = arith.constant 0 : index
    %c0_65 = arith.constant 0 : index
    %203 = vector.load %arg10[%c0_64, %c0_65] : memref<64x128xbf16, #tpu.memory_space<vmem>>, vector<64x128xbf16>
    tpu.vector_store %arg10[%c0_64, %c0_65], %202 {strides = array<i32>} : memref<64x128xbf16, #tpu.memory_space<vmem>>, vector<64x128xbf16>,
    return
  }
  func.func @transform_0(%arg0: i32) -> (i32, i32) {
    %c0_i32 = arith.constant 0 : i32
    %c0_i32_0 = arith.constant 0 : i32
    return %arg0, %c0_i32 : i32, i32
  }
  func.func @transform_1(%arg0: i32) -> (i32, i32) {
    %c0_i32 = arith.constant 0 : i32
    %c0_i32_0 = arith.constant 0 : i32
    %c0_i32_1 = arith.constant 0 : i32
    return %c0_i32, %c0_i32_0 : i32, i32
  }
  func.func @transform_2(%arg0: i32) -> (i32, i32) {
    %c0_i32 = arith.constant 0 : i32
    %c0_i32_0 = arith.constant 0 : i32
    %c0_i32_1 = arith.constant 0 : i32
    return %c0_i32, %c0_i32_0 : i32, i32
  }
  func.func @transform_3(%arg0: i32) -> (i32, i32) {
    %c0_i32 = arith.constant 0 : i32
    %c0_i32_0 = arith.constant 0 : i32
    %c0_i32_1 = arith.constant 0 : i32
    return %c0_i32, %c0_i32_0 : i32, i32
  }
  func.func @transform_4(%arg0: i32) -> (i32, i32) {
    %c0_i32 = arith.constant 0 : i32
    %c0_i32_0 = arith.constant 0 : i32
    %c0_i32_1 = arith.constant 0 : i32
    return %c0_i32, %c0_i32_0 : i32, i32
  }
  func.func @transform_5(%arg0: i32) -> (i32, i32) {
    %c0_i32 = arith.constant 0 : i32
    %c0_i32_0 = arith.constant 0 : i32
    %c0_i32_1 = arith.constant 0 : i32
    return %c0_i32, %c0_i32_0 : i32, i32
  }
  func.func @transform_6(%arg0: i32) -> (i32, i32) {
    %c0_i32 = arith.constant 0 : i32
    %c0_i32_0 = arith.constant 0 : i32
    %c0_i32_1 = arith.constant 0 : i32
    return %c0_i32, %c0_i32_0 : i32, i32
  }
  func.func @transform_7(%arg0: i32) -> (i32, i32) {
    %c0_i32 = arith.constant 0 : i32
    %c0_i32_0 = arith.constant 0 : i32
    %c0_i32_1 = arith.constant 0 : i32
    return %c0_i32, %c0_i32_0 : i32, i32
  }
  func.func @transform_8(%arg0: i32) -> (i32, i32) {
    %c0_i32 = arith.constant 0 : i32
    %c0_i32_0 = arith.constant 0 : i32
    %c0_i32_1 = arith.constant 0 : i32
    return %c0_i32, %c0_i32_0 : i32, i32
  }
  func.func @transform_9(%arg0: i32) -> (i32, i32) {
    %c0_i32 = arith.constant 0 : i32
    %c0_i32_0 = arith.constant 0 : i32
    return %arg0, %c0_i32 : i32, i32
  }
}

module attributes {stable_mosaic.version = 11 : i64} {
  func.func @_stage_kernel(%arg0: i32, %arg1: memref<16x512xbf16, #tpu.memory_space<vmem>>, %arg2: memref<128x64xbf16, #tpu.memory_space<vmem>>, %arg3: memref<1x64xf32, #tpu.memory_space<vmem>>, %arg4: memref<1x64xf32, #tpu.memory_space<vmem>>, %arg5: memref<1x64xf32, #tpu.memory_space<vmem>>, %arg6: memref<64x256xbf16, #tpu.memory_space<vmem>>, %arg7: memref<1x256xf32, #tpu.memory_space<vmem>>, %arg8: memref<256x64xbf16, #tpu.memory_space<vmem>>, %arg9: memref<1x64xf32, #tpu.memory_space<vmem>>, %arg10: memref<16x256xbf16, #tpu.memory_space<vmem>>) attributes {dimension_semantics = [#tpu.dimension_semantics<parallel>], iteration_bounds = array<i64: 2>, scalar_prefetch = 0 : i64, scratch_operands = 0 : i64, tpu.core_type = #tpu.core_type<tc>, window_params = [{transform_indices = @transform_0, window_bounds = array<i64: 16, 512>}, {pipeline_mode = #tpu.pipeline_mode<synchronous>, transform_indices = @transform_1, window_bounds = array<i64: 128, 64>}, {pipeline_mode = #tpu.pipeline_mode<synchronous>, transform_indices = @transform_2, window_bounds = array<i64: 1, 64>}, {pipeline_mode = #tpu.pipeline_mode<synchronous>, transform_indices = @transform_3, window_bounds = array<i64: 1, 64>}, {pipeline_mode = #tpu.pipeline_mode<synchronous>, transform_indices = @transform_4, window_bounds = array<i64: 1, 64>}, {pipeline_mode = #tpu.pipeline_mode<synchronous>, transform_indices = @transform_5, window_bounds = array<i64: 64, 256>}, {pipeline_mode = #tpu.pipeline_mode<synchronous>, transform_indices = @transform_6, window_bounds = array<i64: 1, 256>}, {pipeline_mode = #tpu.pipeline_mode<synchronous>, transform_indices = @transform_7, window_bounds = array<i64: 256, 64>}, {pipeline_mode = #tpu.pipeline_mode<synchronous>, transform_indices = @transform_8, window_bounds = array<i64: 1, 64>}, {transform_indices = @transform_9, window_bounds = array<i64: 16, 256>}]} {
    %c0 = arith.constant 0 : index
    %c0_0 = arith.constant 0 : index
    %0 = vector.load %arg1[%c0, %c0_0] : memref<16x512xbf16, #tpu.memory_space<vmem>>, vector<16x512xbf16>
    %c0_1 = arith.constant 0 : index
    %c0_2 = arith.constant 0 : index
    %1 = vector.load %arg2[%c0_1, %c0_2] : memref<128x64xbf16, #tpu.memory_space<vmem>>, vector<128x64xbf16>
    %c0_3 = arith.constant 0 : index
    %c0_4 = arith.constant 0 : index
    %2 = vector.load %arg3[%c0_3, %c0_4] : memref<1x64xf32, #tpu.memory_space<vmem>>, vector<1x64xf32>
    %c0_5 = arith.constant 0 : index
    %c0_6 = arith.constant 0 : index
    %3 = vector.load %arg4[%c0_5, %c0_6] : memref<1x64xf32, #tpu.memory_space<vmem>>, vector<1x64xf32>
    %c0_7 = arith.constant 0 : index
    %c0_8 = arith.constant 0 : index
    %4 = vector.load %arg5[%c0_7, %c0_8] : memref<1x64xf32, #tpu.memory_space<vmem>>, vector<1x64xf32>
    %c0_9 = arith.constant 0 : index
    %c0_10 = arith.constant 0 : index
    %5 = vector.load %arg6[%c0_9, %c0_10] : memref<64x256xbf16, #tpu.memory_space<vmem>>, vector<64x256xbf16>
    %c0_11 = arith.constant 0 : index
    %c0_12 = arith.constant 0 : index
    %6 = vector.load %arg7[%c0_11, %c0_12] : memref<1x256xf32, #tpu.memory_space<vmem>>, vector<1x256xf32>
    %c0_13 = arith.constant 0 : index
    %c0_14 = arith.constant 0 : index
    %7 = vector.load %arg8[%c0_13, %c0_14] : memref<256x64xbf16, #tpu.memory_space<vmem>>, vector<256x64xbf16>
    %c0_15 = arith.constant 0 : index
    %c0_16 = arith.constant 0 : index
    %8 = vector.load %arg9[%c0_15, %c0_16] : memref<1x64xf32, #tpu.memory_space<vmem>>, vector<1x64xf32>
    %9 = vector.extract_strided_slice %0 {offsets = [0, 0], sizes = [16, 128], strides = [1, 1]} : vector<16x512xbf16> to vector<16x128xbf16>
    %cst = arith.constant dense<0.000000e+00> : vector<16x64xf32>
    %10 = tpu.matmul %9, %1, %cst {dimension_numbers = #tpu.dot_dimension_numbers<[1], [0], [0], [1], [0, 0, 1, 1], [], []>} : vector<16x128xbf16>, vector<128x64xbf16>, vector<16x64xf32> -> vector<16x64xf32>
    %11 = vector.broadcast %2 : vector<1x64xf32> to vector<16x64xf32>
    %12 = arith.addf %10, %11 : vector<16x64xf32>
    %cst_17 = arith.constant dense<0.000000e+00> : vector<16xf32>
    %13 = vector.multi_reduction <add>, %12, %cst_17 [1] : vector<16x64xf32> to vector<16xf32>
    %14 = vector.shape_cast %13 : vector<16xf32> to vector<16x1xf32>
    %cst_18 = arith.constant 6.400000e+01 : f32
    %15 = vector.broadcast %cst_18 : f32 to vector<16x1xf32>
    %16 = arith.divf %14, %15 : vector<16x1xf32>
    %17 = vector.broadcast %16 : vector<16x1xf32> to vector<16x64xf32>
    %18 = arith.subf %12, %17 : vector<16x64xf32>
    %19 = arith.mulf %18, %18 : vector<16x64xf32>
    %cst_19 = arith.constant dense<0.000000e+00> : vector<16xf32>
    %20 = vector.multi_reduction <add>, %19, %cst_19 [1] : vector<16x64xf32> to vector<16xf32>
    %21 = vector.shape_cast %20 : vector<16xf32> to vector<16x1xf32>
    %cst_20 = arith.constant 6.400000e+01 : f32
    %22 = vector.broadcast %cst_20 : f32 to vector<16x1xf32>
    %23 = arith.divf %21, %22 : vector<16x1xf32>
    %24 = vector.broadcast %16 : vector<16x1xf32> to vector<16x64xf32>
    %25 = arith.subf %12, %24 : vector<16x64xf32>
    %cst_21 = arith.constant 9.99999997E-7 : f32
    %26 = vector.broadcast %cst_21 : f32 to vector<16x1xf32>
    %27 = arith.addf %23, %26 : vector<16x1xf32>
    %28 = math.rsqrt %27 : vector<16x1xf32>
    %29 = vector.broadcast %28 : vector<16x1xf32> to vector<16x64xf32>
    %30 = arith.mulf %25, %29 : vector<16x64xf32>
    %31 = vector.broadcast %3 : vector<1x64xf32> to vector<16x64xf32>
    %32 = arith.mulf %30, %31 : vector<16x64xf32>
    %33 = vector.broadcast %4 : vector<1x64xf32> to vector<16x64xf32>
    %34 = arith.addf %32, %33 : vector<16x64xf32>
    %35 = arith.truncf %34 : vector<16x64xf32> to vector<16x64xbf16>
    %cst_22 = arith.constant dense<0.000000e+00> : vector<16x256xf32>
    %36 = tpu.matmul %35, %5, %cst_22 {dimension_numbers = #tpu.dot_dimension_numbers<[1], [0], [0], [1], [0, 0, 1, 1], [], []>} : vector<16x64xbf16>, vector<64x256xbf16>, vector<16x256xf32> -> vector<16x256xf32>
    %37 = vector.broadcast %6 : vector<1x256xf32> to vector<16x256xf32>
    %38 = arith.addf %36, %37 : vector<16x256xf32>
    %39 = arith.truncf %38 : vector<16x256xf32> to vector<16x256xbf16>
    %40 = arith.mulf %39, %39 : vector<16x256xbf16>
    %41 = arith.mulf %39, %40 : vector<16x256xbf16>
    %cst_23 = arith.constant 4.467770e-02 : bf16
    %42 = vector.broadcast %cst_23 : bf16 to vector<16x256xbf16>
    %43 = arith.mulf %42, %41 : vector<16x256xbf16>
    %44 = arith.addf %39, %43 : vector<16x256xbf16>
    %cst_24 = arith.constant 7.968750e-01 : bf16
    %45 = vector.broadcast %cst_24 : bf16 to vector<16x256xbf16>
    %46 = arith.mulf %45, %44 : vector<16x256xbf16>
    %47 = math.tanh %46 : vector<16x256xbf16>
    %cst_25 = arith.constant 1.000000e+00 : bf16
    %48 = vector.broadcast %cst_25 : bf16 to vector<16x256xbf16>
    %49 = arith.addf %48, %47 : vector<16x256xbf16>
    %cst_26 = arith.constant 5.000000e-01 : bf16
    %50 = vector.broadcast %cst_26 : bf16 to vector<16x256xbf16>
    %51 = arith.mulf %50, %49 : vector<16x256xbf16>
    %52 = arith.mulf %39, %51 : vector<16x256xbf16>
    %cst_27 = arith.constant dense<0.000000e+00> : vector<16x64xf32>
    %53 = tpu.matmul %52, %7, %cst_27 {dimension_numbers = #tpu.dot_dimension_numbers<[1], [0], [0], [1], [0, 0, 1, 1], [], []>} : vector<16x256xbf16>, vector<256x64xbf16>, vector<16x64xf32> -> vector<16x64xf32>
    %54 = vector.broadcast %8 : vector<1x64xf32> to vector<16x64xf32>
    %55 = arith.addf %53, %54 : vector<16x64xf32>
    %56 = arith.addf %12, %55 : vector<16x64xf32>
    %57 = vector.extract_strided_slice %0 {offsets = [0, 128], sizes = [16, 128], strides = [1, 1]} : vector<16x512xbf16> to vector<16x128xbf16>
    %cst_28 = arith.constant dense<0.000000e+00> : vector<16x64xf32>
    %58 = tpu.matmul %57, %1, %cst_28 {dimension_numbers = #tpu.dot_dimension_numbers<[1], [0], [0], [1], [0, 0, 1, 1], [], []>} : vector<16x128xbf16>, vector<128x64xbf16>, vector<16x64xf32> -> vector<16x64xf32>
    %59 = vector.broadcast %2 : vector<1x64xf32> to vector<16x64xf32>
    %60 = arith.addf %58, %59 : vector<16x64xf32>
    %cst_29 = arith.constant dense<0.000000e+00> : vector<16xf32>
    %61 = vector.multi_reduction <add>, %60, %cst_29 [1] : vector<16x64xf32> to vector<16xf32>
    %62 = vector.shape_cast %61 : vector<16xf32> to vector<16x1xf32>
    %cst_30 = arith.constant 6.400000e+01 : f32
    %63 = vector.broadcast %cst_30 : f32 to vector<16x1xf32>
    %64 = arith.divf %62, %63 : vector<16x1xf32>
    %65 = vector.broadcast %64 : vector<16x1xf32> to vector<16x64xf32>
    %66 = arith.subf %60, %65 : vector<16x64xf32>
    %67 = arith.mulf %66, %66 : vector<16x64xf32>
    %cst_31 = arith.constant dense<0.000000e+00> : vector<16xf32>
    %68 = vector.multi_reduction <add>, %67, %cst_31 [1] : vector<16x64xf32> to vector<16xf32>
    %69 = vector.shape_cast %68 : vector<16xf32> to vector<16x1xf32>
    %cst_32 = arith.constant 6.400000e+01 : f32
    %70 = vector.broadcast %cst_32 : f32 to vector<16x1xf32>
    %71 = arith.divf %69, %70 : vector<16x1xf32>
    %72 = vector.broadcast %64 : vector<16x1xf32> to vector<16x64xf32>
    %73 = arith.subf %60, %72 : vector<16x64xf32>
    %cst_33 = arith.constant 9.99999997E-7 : f32
    %74 = vector.broadcast %cst_33 : f32 to vector<16x1xf32>
    %75 = arith.addf %71, %74 : vector<16x1xf32>
    %76 = math.rsqrt %75 : vector<16x1xf32>
    %77 = vector.broadcast %76 : vector<16x1xf32> to vector<16x64xf32>
    %78 = arith.mulf %73, %77 : vector<16x64xf32>
    %79 = vector.broadcast %3 : vector<1x64xf32> to vector<16x64xf32>
    %80 = arith.mulf %78, %79 : vector<16x64xf32>
    %81 = vector.broadcast %4 : vector<1x64xf32> to vector<16x64xf32>
    %82 = arith.addf %80, %81 : vector<16x64xf32>
    %83 = arith.truncf %82 : vector<16x64xf32> to vector<16x64xbf16>
    %cst_34 = arith.constant dense<0.000000e+00> : vector<16x256xf32>
    %84 = tpu.matmul %83, %5, %cst_34 {dimension_numbers = #tpu.dot_dimension_numbers<[1], [0], [0], [1], [0, 0, 1, 1], [], []>} : vector<16x64xbf16>, vector<64x256xbf16>, vector<16x256xf32> -> vector<16x256xf32>
    %85 = vector.broadcast %6 : vector<1x256xf32> to vector<16x256xf32>
    %86 = arith.addf %84, %85 : vector<16x256xf32>
    %87 = arith.truncf %86 : vector<16x256xf32> to vector<16x256xbf16>
    %88 = arith.mulf %87, %87 : vector<16x256xbf16>
    %89 = arith.mulf %87, %88 : vector<16x256xbf16>
    %cst_35 = arith.constant 4.467770e-02 : bf16
    %90 = vector.broadcast %cst_35 : bf16 to vector<16x256xbf16>
    %91 = arith.mulf %90, %89 : vector<16x256xbf16>
    %92 = arith.addf %87, %91 : vector<16x256xbf16>
    %cst_36 = arith.constant 7.968750e-01 : bf16
    %93 = vector.broadcast %cst_36 : bf16 to vector<16x256xbf16>
    %94 = arith.mulf %93, %92 : vector<16x256xbf16>
    %95 = math.tanh %94 : vector<16x256xbf16>
    %cst_37 = arith.constant 1.000000e+00 : bf16
    %96 = vector.broadcast %cst_37 : bf16 to vector<16x256xbf16>
    %97 = arith.addf %96, %95 : vector<16x256xbf16>
    %cst_38 = arith.constant 5.000000e-01 : bf16
    %98 = vector.broadcast %cst_38 : bf16 to vector<16x256xbf16>
    %99 = arith.mulf %98, %97 : vector<16x256xbf16>
    %100 = arith.mulf %87, %99 : vector<16x256xbf16>
    %cst_39 = arith.constant dense<0.000000e+00> : vector<16x64xf32>
    %101 = tpu.matmul %100, %7, %cst_39 {dimension_numbers = #tpu.dot_dimension_numbers<[1], [0], [0], [1], [0, 0, 1, 1], [], []>} : vector<16x256xbf16>, vector<256x64xbf16>, vector<16x64xf32> -> vector<16x64xf32>
    %102 = vector.broadcast %8 : vector<1x64xf32> to vector<16x64xf32>
    %103 = arith.addf %101, %102 : vector<16x64xf32>
    %104 = arith.addf %60, %103 : vector<16x64xf32>
    %105 = vector.extract_strided_slice %0 {offsets = [0, 256], sizes = [16, 128], strides = [1, 1]} : vector<16x512xbf16> to vector<16x128xbf16>
    %cst_40 = arith.constant dense<0.000000e+00> : vector<16x64xf32>
    %106 = tpu.matmul %105, %1, %cst_40 {dimension_numbers = #tpu.dot_dimension_numbers<[1], [0], [0], [1], [0, 0, 1, 1], [], []>} : vector<16x128xbf16>, vector<128x64xbf16>, vector<16x64xf32> -> vector<16x64xf32>
    %107 = vector.broadcast %2 : vector<1x64xf32> to vector<16x64xf32>
    %108 = arith.addf %106, %107 : vector<16x64xf32>
    %cst_41 = arith.constant dense<0.000000e+00> : vector<16xf32>
    %109 = vector.multi_reduction <add>, %108, %cst_41 [1] : vector<16x64xf32> to vector<16xf32>
    %110 = vector.shape_cast %109 : vector<16xf32> to vector<16x1xf32>
    %cst_42 = arith.constant 6.400000e+01 : f32
    %111 = vector.broadcast %cst_42 : f32 to vector<16x1xf32>
    %112 = arith.divf %110, %111 : vector<16x1xf32>
    %113 = vector.broadcast %112 : vector<16x1xf32> to vector<16x64xf32>
    %114 = arith.subf %108, %113 : vector<16x64xf32>
    %115 = arith.mulf %114, %114 : vector<16x64xf32>
    %cst_43 = arith.constant dense<0.000000e+00> : vector<16xf32>
    %116 = vector.multi_reduction <add>, %115, %cst_43 [1] : vector<16x64xf32> to vector<16xf32>
    %117 = vector.shape_cast %116 : vector<16xf32> to vector<16x1xf32>
    %cst_44 = arith.constant 6.400000e+01 : f32
    %118 = vector.broadcast %cst_44 : f32 to vector<16x1xf32>
    %119 = arith.divf %117, %118 : vector<16x1xf32>
    %120 = vector.broadcast %112 : vector<16x1xf32> to vector<16x64xf32>
    %121 = arith.subf %108, %120 : vector<16x64xf32>
    %cst_45 = arith.constant 9.99999997E-7 : f32
    %122 = vector.broadcast %cst_45 : f32 to vector<16x1xf32>
    %123 = arith.addf %119, %122 : vector<16x1xf32>
    %124 = math.rsqrt %123 : vector<16x1xf32>
    %125 = vector.broadcast %124 : vector<16x1xf32> to vector<16x64xf32>
    %126 = arith.mulf %121, %125 : vector<16x64xf32>
    %127 = vector.broadcast %3 : vector<1x64xf32> to vector<16x64xf32>
    %128 = arith.mulf %126, %127 : vector<16x64xf32>
    %129 = vector.broadcast %4 : vector<1x64xf32> to vector<16x64xf32>
    %130 = arith.addf %128, %129 : vector<16x64xf32>
    %131 = arith.truncf %130 : vector<16x64xf32> to vector<16x64xbf16>
    %cst_46 = arith.constant dense<0.000000e+00> : vector<16x256xf32>
    %132 = tpu.matmul %131, %5, %cst_46 {dimension_numbers = #tpu.dot_dimension_numbers<[1], [0], [0], [1], [0, 0, 1, 1], [], []>} : vector<16x64xbf16>, vector<64x256xbf16>, vector<16x256xf32> -> vector<16x256xf32>
    %133 = vector.broadcast %6 : vector<1x256xf32> to vector<16x256xf32>
    %134 = arith.addf %132, %133 : vector<16x256xf32>
    %135 = arith.truncf %134 : vector<16x256xf32> to vector<16x256xbf16>
    %136 = arith.mulf %135, %135 : vector<16x256xbf16>
    %137 = arith.mulf %135, %136 : vector<16x256xbf16>
    %cst_47 = arith.constant 4.467770e-02 : bf16
    %138 = vector.broadcast %cst_47 : bf16 to vector<16x256xbf16>
    %139 = arith.mulf %138, %137 : vector<16x256xbf16>
    %140 = arith.addf %135, %139 : vector<16x256xbf16>
    %cst_48 = arith.constant 7.968750e-01 : bf16
    %141 = vector.broadcast %cst_48 : bf16 to vector<16x256xbf16>
    %142 = arith.mulf %141, %140 : vector<16x256xbf16>
    %143 = math.tanh %142 : vector<16x256xbf16>
    %cst_49 = arith.constant 1.000000e+00 : bf16
    %144 = vector.broadcast %cst_49 : bf16 to vector<16x256xbf16>
    %145 = arith.addf %144, %143 : vector<16x256xbf16>
    %cst_50 = arith.constant 5.000000e-01 : bf16
    %146 = vector.broadcast %cst_50 : bf16 to vector<16x256xbf16>
    %147 = arith.mulf %146, %145 : vector<16x256xbf16>
    %148 = arith.mulf %135, %147 : vector<16x256xbf16>
    %cst_51 = arith.constant dense<0.000000e+00> : vector<16x64xf32>
    %149 = tpu.matmul %148, %7, %cst_51 {dimension_numbers = #tpu.dot_dimension_numbers<[1], [0], [0], [1], [0, 0, 1, 1], [], []>} : vector<16x256xbf16>, vector<256x64xbf16>, vector<16x64xf32> -> vector<16x64xf32>
    %150 = vector.broadcast %8 : vector<1x64xf32> to vector<16x64xf32>
    %151 = arith.addf %149, %150 : vector<16x64xf32>
    %152 = arith.addf %108, %151 : vector<16x64xf32>
    %153 = vector.extract_strided_slice %0 {offsets = [0, 384], sizes = [16, 128], strides = [1, 1]} : vector<16x512xbf16> to vector<16x128xbf16>
    %cst_52 = arith.constant dense<0.000000e+00> : vector<16x64xf32>
    %154 = tpu.matmul %153, %1, %cst_52 {dimension_numbers = #tpu.dot_dimension_numbers<[1], [0], [0], [1], [0, 0, 1, 1], [], []>} : vector<16x128xbf16>, vector<128x64xbf16>, vector<16x64xf32> -> vector<16x64xf32>
    %155 = vector.broadcast %2 : vector<1x64xf32> to vector<16x64xf32>
    %156 = arith.addf %154, %155 : vector<16x64xf32>
    %cst_53 = arith.constant dense<0.000000e+00> : vector<16xf32>
    %157 = vector.multi_reduction <add>, %156, %cst_53 [1] : vector<16x64xf32> to vector<16xf32>
    %158 = vector.shape_cast %157 : vector<16xf32> to vector<16x1xf32>
    %cst_54 = arith.constant 6.400000e+01 : f32
    %159 = vector.broadcast %cst_54 : f32 to vector<16x1xf32>
    %160 = arith.divf %158, %159 : vector<16x1xf32>
    %161 = vector.broadcast %160 : vector<16x1xf32> to vector<16x64xf32>
    %162 = arith.subf %156, %161 : vector<16x64xf32>
    %163 = arith.mulf %162, %162 : vector<16x64xf32>
    %cst_55 = arith.constant dense<0.000000e+00> : vector<16xf32>
    %164 = vector.multi_reduction <add>, %163, %cst_55 [1] : vector<16x64xf32> to vector<16xf32>
    %165 = vector.shape_cast %164 : vector<16xf32> to vector<16x1xf32>
    %cst_56 = arith.constant 6.400000e+01 : f32
    %166 = vector.broadcast %cst_56 : f32 to vector<16x1xf32>
    %167 = arith.divf %165, %166 : vector<16x1xf32>
    %168 = vector.broadcast %160 : vector<16x1xf32> to vector<16x64xf32>
    %169 = arith.subf %156, %168 : vector<16x64xf32>
    %cst_57 = arith.constant 9.99999997E-7 : f32
    %170 = vector.broadcast %cst_57 : f32 to vector<16x1xf32>
    %171 = arith.addf %167, %170 : vector<16x1xf32>
    %172 = math.rsqrt %171 : vector<16x1xf32>
    %173 = vector.broadcast %172 : vector<16x1xf32> to vector<16x64xf32>
    %174 = arith.mulf %169, %173 : vector<16x64xf32>
    %175 = vector.broadcast %3 : vector<1x64xf32> to vector<16x64xf32>
    %176 = arith.mulf %174, %175 : vector<16x64xf32>
    %177 = vector.broadcast %4 : vector<1x64xf32> to vector<16x64xf32>
    %178 = arith.addf %176, %177 : vector<16x64xf32>
    %179 = arith.truncf %178 : vector<16x64xf32> to vector<16x64xbf16>
    %cst_58 = arith.constant dense<0.000000e+00> : vector<16x256xf32>
    %180 = tpu.matmul %179, %5, %cst_58 {dimension_numbers = #tpu.dot_dimension_numbers<[1], [0], [0], [1], [0, 0, 1, 1], [], []>} : vector<16x64xbf16>, vector<64x256xbf16>, vector<16x256xf32> -> vector<16x256xf32>
    %181 = vector.broadcast %6 : vector<1x256xf32> to vector<16x256xf32>
    %182 = arith.addf %180, %181 : vector<16x256xf32>
    %183 = arith.truncf %182 : vector<16x256xf32> to vector<16x256xbf16>
    %184 = arith.mulf %183, %183 : vector<16x256xbf16>
    %185 = arith.mulf %183, %184 : vector<16x256xbf16>
    %cst_59 = arith.constant 4.467770e-02 : bf16
    %186 = vector.broadcast %cst_59 : bf16 to vector<16x256xbf16>
    %187 = arith.mulf %186, %185 : vector<16x256xbf16>
    %188 = arith.addf %183, %187 : vector<16x256xbf16>
    %cst_60 = arith.constant 7.968750e-01 : bf16
    %189 = vector.broadcast %cst_60 : bf16 to vector<16x256xbf16>
    %190 = arith.mulf %189, %188 : vector<16x256xbf16>
    %191 = math.tanh %190 : vector<16x256xbf16>
    %cst_61 = arith.constant 1.000000e+00 : bf16
    %192 = vector.broadcast %cst_61 : bf16 to vector<16x256xbf16>
    %193 = arith.addf %192, %191 : vector<16x256xbf16>
    %cst_62 = arith.constant 5.000000e-01 : bf16
    %194 = vector.broadcast %cst_62 : bf16 to vector<16x256xbf16>
    %195 = arith.mulf %194, %193 : vector<16x256xbf16>
    %196 = arith.mulf %183, %195 : vector<16x256xbf16>
    %cst_63 = arith.constant dense<0.000000e+00> : vector<16x64xf32>
    %197 = tpu.matmul %196, %7, %cst_63 {dimension_numbers = #tpu.dot_dimension_numbers<[1], [0], [0], [1], [0, 0, 1, 1], [], []>} : vector<16x256xbf16>, vector<256x64xbf16>, vector<16x64xf32> -> vector<16x64xf32>
    %198 = vector.broadcast %8 : vector<1x64xf32> to vector<16x64xf32>
    %199 = arith.addf %197, %198 : vector<16x64xf32>
    %200 = arith.addf %156, %199 : vector<16x64xf32>
    %201 = tpu.concatenate %56, %104, %152, %200 in 1 : vector<16x64xf32>, vector<16x64xf32>, vector<16x64xf32>, vector<16x64xf32> -> vector<16x256xf32>
    %202 = arith.truncf %201 : vector<16x256xf32> to vector<16x256xbf16>
    %c0_64 = arith.constant 0 : index
    %c0_65 = arith.constant 0 : index
    %203 = vector.load %arg10[%c0_64, %c0_65] : memref<16x256xbf16, #tpu.memory_space<vmem>>, vector<16x256xbf16>
    tpu.vector_store %arg10[%c0_64, %c0_65], %202 {strides = array<i32>} : memref<16x256xbf16, #tpu.memory_space<vmem>>, vector<16x256xbf16>,
    return
  }
  func.func @transform_0(%arg0: i32) -> (i32, i32) {
    %c0_i32 = arith.constant 0 : i32
    %c0_i32_0 = arith.constant 0 : i32
    return %arg0, %c0_i32 : i32, i32
  }
  func.func @transform_1(%arg0: i32) -> (i32, i32) {
    %c0_i32 = arith.constant 0 : i32
    %c0_i32_0 = arith.constant 0 : i32
    %c0_i32_1 = arith.constant 0 : i32
    return %c0_i32, %c0_i32_0 : i32, i32
  }
  func.func @transform_2(%arg0: i32) -> (i32, i32) {
    %c0_i32 = arith.constant 0 : i32
    %c0_i32_0 = arith.constant 0 : i32
    %c0_i32_1 = arith.constant 0 : i32
    return %c0_i32, %c0_i32_0 : i32, i32
  }
  func.func @transform_3(%arg0: i32) -> (i32, i32) {
    %c0_i32 = arith.constant 0 : i32
    %c0_i32_0 = arith.constant 0 : i32
    %c0_i32_1 = arith.constant 0 : i32
    return %c0_i32, %c0_i32_0 : i32, i32
  }
  func.func @transform_4(%arg0: i32) -> (i32, i32) {
    %c0_i32 = arith.constant 0 : i32
    %c0_i32_0 = arith.constant 0 : i32
    %c0_i32_1 = arith.constant 0 : i32
    return %c0_i32, %c0_i32_0 : i32, i32
  }
  func.func @transform_5(%arg0: i32) -> (i32, i32) {
    %c0_i32 = arith.constant 0 : i32
    %c0_i32_0 = arith.constant 0 : i32
    %c0_i32_1 = arith.constant 0 : i32
    return %c0_i32, %c0_i32_0 : i32, i32
  }
  func.func @transform_6(%arg0: i32) -> (i32, i32) {
    %c0_i32 = arith.constant 0 : i32
    %c0_i32_0 = arith.constant 0 : i32
    %c0_i32_1 = arith.constant 0 : i32
    return %c0_i32, %c0_i32_0 : i32, i32
  }
  func.func @transform_7(%arg0: i32) -> (i32, i32) {
    %c0_i32 = arith.constant 0 : i32
    %c0_i32_0 = arith.constant 0 : i32
    %c0_i32_1 = arith.constant 0 : i32
    return %c0_i32, %c0_i32_0 : i32, i32
  }
  func.func @transform_8(%arg0: i32) -> (i32, i32) {
    %c0_i32 = arith.constant 0 : i32
    %c0_i32_0 = arith.constant 0 : i32
    %c0_i32_1 = arith.constant 0 : i32
    return %c0_i32, %c0_i32_0 : i32, i32
  }
  func.func @transform_9(%arg0: i32) -> (i32, i32) {
    %c0_i32 = arith.constant 0 : i32
    %c0_i32_0 = arith.constant 0 : i32
    return %arg0, %c0_i32 : i32, i32
  }
}

module attributes {stable_mosaic.version = 11 : i64} {
  func.func @_stage_kernel(%arg0: i32, %arg1: memref<16x256xbf16, #tpu.memory_space<vmem>>, %arg2: memref<256x128xbf16, #tpu.memory_space<vmem>>, %arg3: memref<1x128xf32, #tpu.memory_space<vmem>>, %arg4: memref<1x128xf32, #tpu.memory_space<vmem>>, %arg5: memref<1x128xf32, #tpu.memory_space<vmem>>, %arg6: memref<128x512xbf16, #tpu.memory_space<vmem>>, %arg7: memref<1x512xf32, #tpu.memory_space<vmem>>, %arg8: memref<512x128xbf16, #tpu.memory_space<vmem>>, %arg9: memref<1x128xf32, #tpu.memory_space<vmem>>, %arg10: memref<16x128xbf16, #tpu.memory_space<vmem>>) attributes {dimension_semantics = [#tpu.dimension_semantics<parallel>], iteration_bounds = array<i64: 2>, scalar_prefetch = 0 : i64, scratch_operands = 0 : i64, tpu.core_type = #tpu.core_type<tc>, window_params = [{transform_indices = @transform_0, window_bounds = array<i64: 16, 256>}, {pipeline_mode = #tpu.pipeline_mode<synchronous>, transform_indices = @transform_1, window_bounds = array<i64: 256, 128>}, {pipeline_mode = #tpu.pipeline_mode<synchronous>, transform_indices = @transform_2, window_bounds = array<i64: 1, 128>}, {pipeline_mode = #tpu.pipeline_mode<synchronous>, transform_indices = @transform_3, window_bounds = array<i64: 1, 128>}, {pipeline_mode = #tpu.pipeline_mode<synchronous>, transform_indices = @transform_4, window_bounds = array<i64: 1, 128>}, {pipeline_mode = #tpu.pipeline_mode<synchronous>, transform_indices = @transform_5, window_bounds = array<i64: 128, 512>}, {pipeline_mode = #tpu.pipeline_mode<synchronous>, transform_indices = @transform_6, window_bounds = array<i64: 1, 512>}, {pipeline_mode = #tpu.pipeline_mode<synchronous>, transform_indices = @transform_7, window_bounds = array<i64: 512, 128>}, {pipeline_mode = #tpu.pipeline_mode<synchronous>, transform_indices = @transform_8, window_bounds = array<i64: 1, 128>}, {transform_indices = @transform_9, window_bounds = array<i64: 16, 128>}]} {
    %c0 = arith.constant 0 : index
    %c0_0 = arith.constant 0 : index
    %0 = vector.load %arg1[%c0, %c0_0] : memref<16x256xbf16, #tpu.memory_space<vmem>>, vector<16x256xbf16>
    %c0_1 = arith.constant 0 : index
    %c0_2 = arith.constant 0 : index
    %1 = vector.load %arg2[%c0_1, %c0_2] : memref<256x128xbf16, #tpu.memory_space<vmem>>, vector<256x128xbf16>
    %c0_3 = arith.constant 0 : index
    %c0_4 = arith.constant 0 : index
    %2 = vector.load %arg3[%c0_3, %c0_4] : memref<1x128xf32, #tpu.memory_space<vmem>>, vector<1x128xf32>
    %c0_5 = arith.constant 0 : index
    %c0_6 = arith.constant 0 : index
    %3 = vector.load %arg4[%c0_5, %c0_6] : memref<1x128xf32, #tpu.memory_space<vmem>>, vector<1x128xf32>
    %c0_7 = arith.constant 0 : index
    %c0_8 = arith.constant 0 : index
    %4 = vector.load %arg5[%c0_7, %c0_8] : memref<1x128xf32, #tpu.memory_space<vmem>>, vector<1x128xf32>
    %c0_9 = arith.constant 0 : index
    %c0_10 = arith.constant 0 : index
    %5 = vector.load %arg6[%c0_9, %c0_10] : memref<128x512xbf16, #tpu.memory_space<vmem>>, vector<128x512xbf16>
    %c0_11 = arith.constant 0 : index
    %c0_12 = arith.constant 0 : index
    %6 = vector.load %arg7[%c0_11, %c0_12] : memref<1x512xf32, #tpu.memory_space<vmem>>, vector<1x512xf32>
    %c0_13 = arith.constant 0 : index
    %c0_14 = arith.constant 0 : index
    %7 = vector.load %arg8[%c0_13, %c0_14] : memref<512x128xbf16, #tpu.memory_space<vmem>>, vector<512x128xbf16>
    %c0_15 = arith.constant 0 : index
    %c0_16 = arith.constant 0 : index
    %8 = vector.load %arg9[%c0_15, %c0_16] : memref<1x128xf32, #tpu.memory_space<vmem>>, vector<1x128xf32>
    %cst = arith.constant dense<0.000000e+00> : vector<16x128xf32>
    %9 = tpu.matmul %0, %1, %cst {dimension_numbers = #tpu.dot_dimension_numbers<[1], [0], [0], [1], [0, 0, 1, 1], [], []>} : vector<16x256xbf16>, vector<256x128xbf16>, vector<16x128xf32> -> vector<16x128xf32>
    %10 = vector.broadcast %2 : vector<1x128xf32> to vector<16x128xf32>
    %11 = arith.addf %9, %10 : vector<16x128xf32>
    %cst_17 = arith.constant dense<0.000000e+00> : vector<16xf32>
    %12 = vector.multi_reduction <add>, %11, %cst_17 [1] : vector<16x128xf32> to vector<16xf32>
    %13 = vector.shape_cast %12 : vector<16xf32> to vector<16x1xf32>
    %cst_18 = arith.constant 1.280000e+02 : f32
    %14 = vector.broadcast %cst_18 : f32 to vector<16x1xf32>
    %15 = arith.divf %13, %14 : vector<16x1xf32>
    %16 = vector.broadcast %15 : vector<16x1xf32> to vector<16x128xf32>
    %17 = arith.subf %11, %16 : vector<16x128xf32>
    %18 = arith.mulf %17, %17 : vector<16x128xf32>
    %cst_19 = arith.constant dense<0.000000e+00> : vector<16xf32>
    %19 = vector.multi_reduction <add>, %18, %cst_19 [1] : vector<16x128xf32> to vector<16xf32>
    %20 = vector.shape_cast %19 : vector<16xf32> to vector<16x1xf32>
    %cst_20 = arith.constant 1.280000e+02 : f32
    %21 = vector.broadcast %cst_20 : f32 to vector<16x1xf32>
    %22 = arith.divf %20, %21 : vector<16x1xf32>
    %23 = vector.broadcast %15 : vector<16x1xf32> to vector<16x128xf32>
    %24 = arith.subf %11, %23 : vector<16x128xf32>
    %cst_21 = arith.constant 9.99999997E-7 : f32
    %25 = vector.broadcast %cst_21 : f32 to vector<16x1xf32>
    %26 = arith.addf %22, %25 : vector<16x1xf32>
    %27 = math.rsqrt %26 : vector<16x1xf32>
    %28 = vector.broadcast %27 : vector<16x1xf32> to vector<16x128xf32>
    %29 = arith.mulf %24, %28 : vector<16x128xf32>
    %30 = vector.broadcast %3 : vector<1x128xf32> to vector<16x128xf32>
    %31 = arith.mulf %29, %30 : vector<16x128xf32>
    %32 = vector.broadcast %4 : vector<1x128xf32> to vector<16x128xf32>
    %33 = arith.addf %31, %32 : vector<16x128xf32>
    %34 = arith.truncf %33 : vector<16x128xf32> to vector<16x128xbf16>
    %cst_22 = arith.constant dense<0.000000e+00> : vector<16x512xf32>
    %35 = tpu.matmul %34, %5, %cst_22 {dimension_numbers = #tpu.dot_dimension_numbers<[1], [0], [0], [1], [0, 0, 1, 1], [], []>} : vector<16x128xbf16>, vector<128x512xbf16>, vector<16x512xf32> -> vector<16x512xf32>
    %36 = vector.broadcast %6 : vector<1x512xf32> to vector<16x512xf32>
    %37 = arith.addf %35, %36 : vector<16x512xf32>
    %38 = arith.truncf %37 : vector<16x512xf32> to vector<16x512xbf16>
    %39 = arith.mulf %38, %38 : vector<16x512xbf16>
    %40 = arith.mulf %38, %39 : vector<16x512xbf16>
    %cst_23 = arith.constant 4.467770e-02 : bf16
    %41 = vector.broadcast %cst_23 : bf16 to vector<16x512xbf16>
    %42 = arith.mulf %41, %40 : vector<16x512xbf16>
    %43 = arith.addf %38, %42 : vector<16x512xbf16>
    %cst_24 = arith.constant 7.968750e-01 : bf16
    %44 = vector.broadcast %cst_24 : bf16 to vector<16x512xbf16>
    %45 = arith.mulf %44, %43 : vector<16x512xbf16>
    %46 = math.tanh %45 : vector<16x512xbf16>
    %cst_25 = arith.constant 1.000000e+00 : bf16
    %47 = vector.broadcast %cst_25 : bf16 to vector<16x512xbf16>
    %48 = arith.addf %47, %46 : vector<16x512xbf16>
    %cst_26 = arith.constant 5.000000e-01 : bf16
    %49 = vector.broadcast %cst_26 : bf16 to vector<16x512xbf16>
    %50 = arith.mulf %49, %48 : vector<16x512xbf16>
    %51 = arith.mulf %38, %50 : vector<16x512xbf16>
    %cst_27 = arith.constant dense<0.000000e+00> : vector<16x128xf32>
    %52 = tpu.matmul %51, %7, %cst_27 {dimension_numbers = #tpu.dot_dimension_numbers<[1], [0], [0], [1], [0, 0, 1, 1], [], []>} : vector<16x512xbf16>, vector<512x128xbf16>, vector<16x128xf32> -> vector<16x128xf32>
    %53 = vector.broadcast %8 : vector<1x128xf32> to vector<16x128xf32>
    %54 = arith.addf %52, %53 : vector<16x128xf32>
    %55 = arith.addf %11, %54 : vector<16x128xf32>
    %56 = arith.truncf %55 : vector<16x128xf32> to vector<16x128xbf16>
    %c0_28 = arith.constant 0 : index
    %c0_29 = arith.constant 0 : index
    %57 = vector.load %arg10[%c0_28, %c0_29] : memref<16x128xbf16, #tpu.memory_space<vmem>>, vector<16x128xbf16>
    tpu.vector_store %arg10[%c0_28, %c0_29], %56 {strides = array<i32>} : memref<16x128xbf16, #tpu.memory_space<vmem>>, vector<16x128xbf16>,
    return
  }
  func.func @transform_0(%arg0: i32) -> (i32, i32) {
    %c0_i32 = arith.constant 0 : i32
    %c0_i32_0 = arith.constant 0 : i32
    return %arg0, %c0_i32 : i32, i32
  }
  func.func @transform_1(%arg0: i32) -> (i32, i32) {
    %c0_i32 = arith.constant 0 : i32
    %c0_i32_0 = arith.constant 0 : i32
    %c0_i32_1 = arith.constant 0 : i32
    return %c0_i32, %c0_i32_0 : i32, i32
  }
  func.func @transform_2(%arg0: i32) -> (i32, i32) {
    %c0_i32 = arith.constant 0 : i32
    %c0_i32_0 = arith.constant 0 : i32
    %c0_i32_1 = arith.constant 0 : i32
    return %c0_i32, %c0_i32_0 : i32, i32
  }
  func.func @transform_3(%arg0: i32) -> (i32, i32) {
    %c0_i32 = arith.constant 0 : i32
    %c0_i32_0 = arith.constant 0 : i32
    %c0_i32_1 = arith.constant 0 : i32
    return %c0_i32, %c0_i32_0 : i32, i32
  }
  func.func @transform_4(%arg0: i32) -> (i32, i32) {
    %c0_i32 = arith.constant 0 : i32
    %c0_i32_0 = arith.constant 0 : i32
    %c0_i32_1 = arith.constant 0 : i32
    return %c0_i32, %c0_i32_0 : i32, i32
  }
  func.func @transform_5(%arg0: i32) -> (i32, i32) {
    %c0_i32 = arith.constant 0 : i32
    %c0_i32_0 = arith.constant 0 : i32
    %c0_i32_1 = arith.constant 0 : i32
    return %c0_i32, %c0_i32_0 : i32, i32
  }
  func.func @transform_6(%arg0: i32) -> (i32, i32) {
    %c0_i32 = arith.constant 0 : i32
    %c0_i32_0 = arith.constant 0 : i32
    %c0_i32_1 = arith.constant 0 : i32
    return %c0_i32, %c0_i32_0 : i32, i32
  }
  func.func @transform_7(%arg0: i32) -> (i32, i32) {
    %c0_i32 = arith.constant 0 : i32
    %c0_i32_0 = arith.constant 0 : i32
    %c0_i32_1 = arith.constant 0 : i32
    return %c0_i32, %c0_i32_0 : i32, i32
  }
  func.func @transform_8(%arg0: i32) -> (i32, i32) {
    %c0_i32 = arith.constant 0 : i32
    %c0_i32_0 = arith.constant 0 : i32
    %c0_i32_1 = arith.constant 0 : i32
    return %c0_i32, %c0_i32_0 : i32, i32
  }
  func.func @transform_9(%arg0: i32) -> (i32, i32) {
    %c0_i32 = arith.constant 0 : i32
    %c0_i32_0 = arith.constant 0 : i32
    return %arg0, %c0_i32 : i32, i32
  }
}

module attributes {stable_mosaic.version = 11 : i64} {
  func.func @_neck_kernel(%arg0: i32, %arg1: memref<16x128xbf16, #tpu.memory_space<vmem>>, %arg2: memref<16x256xbf16, #tpu.memory_space<vmem>>, %arg3: memref<16x512xbf16, #tpu.memory_space<vmem>>, %arg4: memref<128x128xbf16, #tpu.memory_space<vmem>>, %arg5: memref<1x128xf32, #tpu.memory_space<vmem>>, %arg6: memref<64x128xbf16, #tpu.memory_space<vmem>>, %arg7: memref<1x128xf32, #tpu.memory_space<vmem>>, %arg8: memref<32x128xbf16, #tpu.memory_space<vmem>>, %arg9: memref<1x128xf32, #tpu.memory_space<vmem>>, %arg10: memref<128x64xbf16, #tpu.memory_space<vmem>>, %arg11: memref<1x64xf32, #tpu.memory_space<vmem>>, %arg12: memref<128x32xbf16, #tpu.memory_space<vmem>>, %arg13: memref<1x32xf32, #tpu.memory_space<vmem>>, %arg14: memref<16x128xf32, #tpu.memory_space<vmem>>, %arg15: memref<16x256xf32, #tpu.memory_space<vmem>>, %arg16: memref<16x512xf32, #tpu.memory_space<vmem>>) attributes {dimension_semantics = [#tpu.dimension_semantics<parallel>], iteration_bounds = array<i64: 2>, scalar_prefetch = 0 : i64, scratch_operands = 0 : i64, tpu.core_type = #tpu.core_type<tc>, window_params = [{transform_indices = @transform_0, window_bounds = array<i64: 16, 128>}, {transform_indices = @transform_1, window_bounds = array<i64: 16, 256>}, {transform_indices = @transform_2, window_bounds = array<i64: 16, 512>}, {pipeline_mode = #tpu.pipeline_mode<synchronous>, transform_indices = @transform_3, window_bounds = array<i64: 128, 128>}, {pipeline_mode = #tpu.pipeline_mode<synchronous>, transform_indices = @transform_4, window_bounds = array<i64: 1, 128>}, {pipeline_mode = #tpu.pipeline_mode<synchronous>, transform_indices = @transform_5, window_bounds = array<i64: 64, 128>}, {pipeline_mode = #tpu.pipeline_mode<synchronous>, transform_indices = @transform_6, window_bounds = array<i64: 1, 128>}, {pipeline_mode = #tpu.pipeline_mode<synchronous>, transform_indices = @transform_7, window_bounds = array<i64: 32, 128>}, {pipeline_mode = #tpu.pipeline_mode<synchronous>, transform_indices = @transform_8, window_bounds = array<i64: 1, 128>}, {pipeline_mode = #tpu.pipeline_mode<synchronous>, transform_indices = @transform_9, window_bounds = array<i64: 128, 64>}, {pipeline_mode = #tpu.pipeline_mode<synchronous>, transform_indices = @transform_10, window_bounds = array<i64: 1, 64>}, {pipeline_mode = #tpu.pipeline_mode<synchronous>, transform_indices = @transform_11, window_bounds = array<i64: 128, 32>}, {pipeline_mode = #tpu.pipeline_mode<synchronous>, transform_indices = @transform_12, window_bounds = array<i64: 1, 32>}, {transform_indices = @transform_13, window_bounds = array<i64: 16, 128>}, {transform_indices = @transform_14, window_bounds = array<i64: 16, 256>}, {transform_indices = @transform_15, window_bounds = array<i64: 16, 512>}]} {
    %c0 = arith.constant 0 : index
    %c0_0 = arith.constant 0 : index
    %0 = vector.load %arg1[%c0, %c0_0] : memref<16x128xbf16, #tpu.memory_space<vmem>>, vector<16x128xbf16>
    %c0_1 = arith.constant 0 : index
    %c0_2 = arith.constant 0 : index
    %1 = vector.load %arg2[%c0_1, %c0_2] : memref<16x256xbf16, #tpu.memory_space<vmem>>, vector<16x256xbf16>
    %c0_3 = arith.constant 0 : index
    %c0_4 = arith.constant 0 : index
    %2 = vector.load %arg3[%c0_3, %c0_4] : memref<16x512xbf16, #tpu.memory_space<vmem>>, vector<16x512xbf16>
    %c0_5 = arith.constant 0 : index
    %c0_6 = arith.constant 0 : index
    %3 = vector.load %arg4[%c0_5, %c0_6] : memref<128x128xbf16, #tpu.memory_space<vmem>>, vector<128x128xbf16>
    %c0_7 = arith.constant 0 : index
    %c0_8 = arith.constant 0 : index
    %4 = vector.load %arg5[%c0_7, %c0_8] : memref<1x128xf32, #tpu.memory_space<vmem>>, vector<1x128xf32>
    %c0_9 = arith.constant 0 : index
    %c0_10 = arith.constant 0 : index
    %5 = vector.load %arg6[%c0_9, %c0_10] : memref<64x128xbf16, #tpu.memory_space<vmem>>, vector<64x128xbf16>
    %c0_11 = arith.constant 0 : index
    %c0_12 = arith.constant 0 : index
    %6 = vector.load %arg7[%c0_11, %c0_12] : memref<1x128xf32, #tpu.memory_space<vmem>>, vector<1x128xf32>
    %c0_13 = arith.constant 0 : index
    %c0_14 = arith.constant 0 : index
    %7 = vector.load %arg8[%c0_13, %c0_14] : memref<32x128xbf16, #tpu.memory_space<vmem>>, vector<32x128xbf16>
    %c0_15 = arith.constant 0 : index
    %c0_16 = arith.constant 0 : index
    %8 = vector.load %arg9[%c0_15, %c0_16] : memref<1x128xf32, #tpu.memory_space<vmem>>, vector<1x128xf32>
    %c0_17 = arith.constant 0 : index
    %c0_18 = arith.constant 0 : index
    %9 = vector.load %arg10[%c0_17, %c0_18] : memref<128x64xbf16, #tpu.memory_space<vmem>>, vector<128x64xbf16>
    %c0_19 = arith.constant 0 : index
    %c0_20 = arith.constant 0 : index
    %10 = vector.load %arg11[%c0_19, %c0_20] : memref<1x64xf32, #tpu.memory_space<vmem>>, vector<1x64xf32>
    %c0_21 = arith.constant 0 : index
    %c0_22 = arith.constant 0 : index
    %11 = vector.load %arg12[%c0_21, %c0_22] : memref<128x32xbf16, #tpu.memory_space<vmem>>, vector<128x32xbf16>
    %c0_23 = arith.constant 0 : index
    %c0_24 = arith.constant 0 : index
    %12 = vector.load %arg13[%c0_23, %c0_24] : memref<1x32xf32, #tpu.memory_space<vmem>>, vector<1x32xf32>
    %cst = arith.constant dense<0.000000e+00> : vector<16x128xf32>
    %13 = tpu.matmul %0, %3, %cst {dimension_numbers = #tpu.dot_dimension_numbers<[1], [0], [0], [1], [0, 0, 1, 1], [], []>} : vector<16x128xbf16>, vector<128x128xbf16>, vector<16x128xf32> -> vector<16x128xf32>
    %14 = vector.broadcast %4 : vector<1x128xf32> to vector<16x128xf32>
    %15 = arith.addf %13, %14 : vector<16x128xf32>
    %c0_25 = arith.constant 0 : index
    %c0_26 = arith.constant 0 : index
    %16 = vector.load %arg14[%c0_25, %c0_26] : memref<16x128xf32, #tpu.memory_space<vmem>>, vector<16x128xf32>
    tpu.vector_store %arg14[%c0_25, %c0_26], %15 {strides = array<i32>} : memref<16x128xf32, #tpu.memory_space<vmem>>, vector<16x128xf32>,
    %17 = vector.extract_strided_slice %1 {offsets = [0, 0], sizes = [16, 64], strides = [1, 1]} : vector<16x256xbf16> to vector<16x64xbf16>
    %cst_27 = arith.constant dense<0.000000e+00> : vector<16x128xf32>
    %18 = tpu.matmul %17, %5, %cst_27 {dimension_numbers = #tpu.dot_dimension_numbers<[1], [0], [0], [1], [0, 0, 1, 1], [], []>} : vector<16x64xbf16>, vector<64x128xbf16>, vector<16x128xf32> -> vector<16x128xf32>
    %19 = vector.broadcast %6 : vector<1x128xf32> to vector<16x128xf32>
    %20 = arith.addf %18, %19 : vector<16x128xf32>
    %21 = arith.addf %20, %15 : vector<16x128xf32>
    %22 = arith.truncf %21 : vector<16x128xf32> to vector<16x128xbf16>
    %cst_28 = arith.constant dense<0.000000e+00> : vector<16x64xf32>
    %23 = tpu.matmul %22, %9, %cst_28 {dimension_numbers = #tpu.dot_dimension_numbers<[1], [0], [0], [1], [0, 0, 1, 1], [], []>} : vector<16x128xbf16>, vector<128x64xbf16>, vector<16x64xf32> -> vector<16x64xf32>
    %24 = vector.broadcast %10 : vector<1x64xf32> to vector<16x64xf32>
    %25 = arith.addf %23, %24 : vector<16x64xf32>
    %26 = vector.extract_strided_slice %2 {offsets = [0, 0], sizes = [16, 32], strides = [1, 1]} : vector<16x512xbf16> to vector<16x32xbf16>
    %cst_29 = arith.constant dense<0.000000e+00> : vector<16x128xf32>
    %27 = tpu.matmul %26, %7, %cst_29 {dimension_numbers = #tpu.dot_dimension_numbers<[1], [0], [0], [1], [0, 0, 1, 1], [], []>} : vector<16x32xbf16>, vector<32x128xbf16>, vector<16x128xf32> -> vector<16x128xf32>
    %28 = vector.broadcast %8 : vector<1x128xf32> to vector<16x128xf32>
    %29 = arith.addf %27, %28 : vector<16x128xf32>
    %30 = arith.addf %29, %21 : vector<16x128xf32>
    %31 = arith.truncf %30 : vector<16x128xf32> to vector<16x128xbf16>
    %cst_30 = arith.constant dense<0.000000e+00> : vector<16x32xf32>
    %32 = tpu.matmul %31, %11, %cst_30 {dimension_numbers = #tpu.dot_dimension_numbers<[1], [0], [0], [1], [0, 0, 1, 1], [], []>} : vector<16x128xbf16>, vector<128x32xbf16>, vector<16x32xf32> -> vector<16x32xf32>
    %33 = vector.broadcast %12 : vector<1x32xf32> to vector<16x32xf32>
    %34 = arith.addf %32, %33 : vector<16x32xf32>
    %35 = vector.extract_strided_slice %2 {offsets = [0, 32], sizes = [16, 32], strides = [1, 1]} : vector<16x512xbf16> to vector<16x32xbf16>
    %cst_31 = arith.constant dense<0.000000e+00> : vector<16x128xf32>
    %36 = tpu.matmul %35, %7, %cst_31 {dimension_numbers = #tpu.dot_dimension_numbers<[1], [0], [0], [1], [0, 0, 1, 1], [], []>} : vector<16x32xbf16>, vector<32x128xbf16>, vector<16x128xf32> -> vector<16x128xf32>
    %37 = vector.broadcast %8 : vector<1x128xf32> to vector<16x128xf32>
    %38 = arith.addf %36, %37 : vector<16x128xf32>
    %39 = arith.addf %38, %21 : vector<16x128xf32>
    %40 = arith.truncf %39 : vector<16x128xf32> to vector<16x128xbf16>
    %cst_32 = arith.constant dense<0.000000e+00> : vector<16x32xf32>
    %41 = tpu.matmul %40, %11, %cst_32 {dimension_numbers = #tpu.dot_dimension_numbers<[1], [0], [0], [1], [0, 0, 1, 1], [], []>} : vector<16x128xbf16>, vector<128x32xbf16>, vector<16x32xf32> -> vector<16x32xf32>
    %42 = vector.broadcast %12 : vector<1x32xf32> to vector<16x32xf32>
    %43 = arith.addf %41, %42 : vector<16x32xf32>
    %44 = vector.extract_strided_slice %2 {offsets = [0, 64], sizes = [16, 32], strides = [1, 1]} : vector<16x512xbf16> to vector<16x32xbf16>
    %cst_33 = arith.constant dense<0.000000e+00> : vector<16x128xf32>
    %45 = tpu.matmul %44, %7, %cst_33 {dimension_numbers = #tpu.dot_dimension_numbers<[1], [0], [0], [1], [0, 0, 1, 1], [], []>} : vector<16x32xbf16>, vector<32x128xbf16>, vector<16x128xf32> -> vector<16x128xf32>
    %46 = vector.broadcast %8 : vector<1x128xf32> to vector<16x128xf32>
    %47 = arith.addf %45, %46 : vector<16x128xf32>
    %48 = arith.addf %47, %21 : vector<16x128xf32>
    %49 = arith.truncf %48 : vector<16x128xf32> to vector<16x128xbf16>
    %cst_34 = arith.constant dense<0.000000e+00> : vector<16x32xf32>
    %50 = tpu.matmul %49, %11, %cst_34 {dimension_numbers = #tpu.dot_dimension_numbers<[1], [0], [0], [1], [0, 0, 1, 1], [], []>} : vector<16x128xbf16>, vector<128x32xbf16>, vector<16x32xf32> -> vector<16x32xf32>
    %51 = vector.broadcast %12 : vector<1x32xf32> to vector<16x32xf32>
    %52 = arith.addf %50, %51 : vector<16x32xf32>
    %53 = vector.extract_strided_slice %2 {offsets = [0, 96], sizes = [16, 32], strides = [1, 1]} : vector<16x512xbf16> to vector<16x32xbf16>
    %cst_35 = arith.constant dense<0.000000e+00> : vector<16x128xf32>
    %54 = tpu.matmul %53, %7, %cst_35 {dimension_numbers = #tpu.dot_dimension_numbers<[1], [0], [0], [1], [0, 0, 1, 1], [], []>} : vector<16x32xbf16>, vector<32x128xbf16>, vector<16x128xf32> -> vector<16x128xf32>
    %55 = vector.broadcast %8 : vector<1x128xf32> to vector<16x128xf32>
    %56 = arith.addf %54, %55 : vector<16x128xf32>
    %57 = arith.addf %56, %21 : vector<16x128xf32>
    %58 = arith.truncf %57 : vector<16x128xf32> to vector<16x128xbf16>
    %cst_36 = arith.constant dense<0.000000e+00> : vector<16x32xf32>
    %59 = tpu.matmul %58, %11, %cst_36 {dimension_numbers = #tpu.dot_dimension_numbers<[1], [0], [0], [1], [0, 0, 1, 1], [], []>} : vector<16x128xbf16>, vector<128x32xbf16>, vector<16x32xf32> -> vector<16x32xf32>
    %60 = vector.broadcast %12 : vector<1x32xf32> to vector<16x32xf32>
    %61 = arith.addf %59, %60 : vector<16x32xf32>
    %62 = vector.extract_strided_slice %1 {offsets = [0, 64], sizes = [16, 64], strides = [1, 1]} : vector<16x256xbf16> to vector<16x64xbf16>
    %cst_37 = arith.constant dense<0.000000e+00> : vector<16x128xf32>
    %63 = tpu.matmul %62, %5, %cst_37 {dimension_numbers = #tpu.dot_dimension_numbers<[1], [0], [0], [1], [0, 0, 1, 1], [], []>} : vector<16x64xbf16>, vector<64x128xbf16>, vector<16x128xf32> -> vector<16x128xf32>
    %64 = vector.broadcast %6 : vector<1x128xf32> to vector<16x128xf32>
    %65 = arith.addf %63, %64 : vector<16x128xf32>
    %66 = arith.addf %65, %15 : vector<16x128xf32>
    %67 = arith.truncf %66 : vector<16x128xf32> to vector<16x128xbf16>
    %cst_38 = arith.constant dense<0.000000e+00> : vector<16x64xf32>
    %68 = tpu.matmul %67, %9, %cst_38 {dimension_numbers = #tpu.dot_dimension_numbers<[1], [0], [0], [1], [0, 0, 1, 1], [], []>} : vector<16x128xbf16>, vector<128x64xbf16>, vector<16x64xf32> -> vector<16x64xf32>
    %69 = vector.broadcast %10 : vector<1x64xf32> to vector<16x64xf32>
    %70 = arith.addf %68, %69 : vector<16x64xf32>
    %71 = vector.extract_strided_slice %2 {offsets = [0, 128], sizes = [16, 32], strides = [1, 1]} : vector<16x512xbf16> to vector<16x32xbf16>
    %cst_39 = arith.constant dense<0.000000e+00> : vector<16x128xf32>
    %72 = tpu.matmul %71, %7, %cst_39 {dimension_numbers = #tpu.dot_dimension_numbers<[1], [0], [0], [1], [0, 0, 1, 1], [], []>} : vector<16x32xbf16>, vector<32x128xbf16>, vector<16x128xf32> -> vector<16x128xf32>
    %73 = vector.broadcast %8 : vector<1x128xf32> to vector<16x128xf32>
    %74 = arith.addf %72, %73 : vector<16x128xf32>
    %75 = arith.addf %74, %66 : vector<16x128xf32>
    %76 = arith.truncf %75 : vector<16x128xf32> to vector<16x128xbf16>
    %cst_40 = arith.constant dense<0.000000e+00> : vector<16x32xf32>
    %77 = tpu.matmul %76, %11, %cst_40 {dimension_numbers = #tpu.dot_dimension_numbers<[1], [0], [0], [1], [0, 0, 1, 1], [], []>} : vector<16x128xbf16>, vector<128x32xbf16>, vector<16x32xf32> -> vector<16x32xf32>
    %78 = vector.broadcast %12 : vector<1x32xf32> to vector<16x32xf32>
    %79 = arith.addf %77, %78 : vector<16x32xf32>
    %80 = vector.extract_strided_slice %2 {offsets = [0, 160], sizes = [16, 32], strides = [1, 1]} : vector<16x512xbf16> to vector<16x32xbf16>
    %cst_41 = arith.constant dense<0.000000e+00> : vector<16x128xf32>
    %81 = tpu.matmul %80, %7, %cst_41 {dimension_numbers = #tpu.dot_dimension_numbers<[1], [0], [0], [1], [0, 0, 1, 1], [], []>} : vector<16x32xbf16>, vector<32x128xbf16>, vector<16x128xf32> -> vector<16x128xf32>
    %82 = vector.broadcast %8 : vector<1x128xf32> to vector<16x128xf32>
    %83 = arith.addf %81, %82 : vector<16x128xf32>
    %84 = arith.addf %83, %66 : vector<16x128xf32>
    %85 = arith.truncf %84 : vector<16x128xf32> to vector<16x128xbf16>
    %cst_42 = arith.constant dense<0.000000e+00> : vector<16x32xf32>
    %86 = tpu.matmul %85, %11, %cst_42 {dimension_numbers = #tpu.dot_dimension_numbers<[1], [0], [0], [1], [0, 0, 1, 1], [], []>} : vector<16x128xbf16>, vector<128x32xbf16>, vector<16x32xf32> -> vector<16x32xf32>
    %87 = vector.broadcast %12 : vector<1x32xf32> to vector<16x32xf32>
    %88 = arith.addf %86, %87 : vector<16x32xf32>
    %89 = vector.extract_strided_slice %2 {offsets = [0, 192], sizes = [16, 32], strides = [1, 1]} : vector<16x512xbf16> to vector<16x32xbf16>
    %cst_43 = arith.constant dense<0.000000e+00> : vector<16x128xf32>
    %90 = tpu.matmul %89, %7, %cst_43 {dimension_numbers = #tpu.dot_dimension_numbers<[1], [0], [0], [1], [0, 0, 1, 1], [], []>} : vector<16x32xbf16>, vector<32x128xbf16>, vector<16x128xf32> -> vector<16x128xf32>
    %91 = vector.broadcast %8 : vector<1x128xf32> to vector<16x128xf32>
    %92 = arith.addf %90, %91 : vector<16x128xf32>
    %93 = arith.addf %92, %66 : vector<16x128xf32>
    %94 = arith.truncf %93 : vector<16x128xf32> to vector<16x128xbf16>
    %cst_44 = arith.constant dense<0.000000e+00> : vector<16x32xf32>
    %95 = tpu.matmul %94, %11, %cst_44 {dimension_numbers = #tpu.dot_dimension_numbers<[1], [0], [0], [1], [0, 0, 1, 1], [], []>} : vector<16x128xbf16>, vector<128x32xbf16>, vector<16x32xf32> -> vector<16x32xf32>
    %96 = vector.broadcast %12 : vector<1x32xf32> to vector<16x32xf32>
    %97 = arith.addf %95, %96 : vector<16x32xf32>
    %98 = vector.extract_strided_slice %2 {offsets = [0, 224], sizes = [16, 32], strides = [1, 1]} : vector<16x512xbf16> to vector<16x32xbf16>
    %cst_45 = arith.constant dense<0.000000e+00> : vector<16x128xf32>
    %99 = tpu.matmul %98, %7, %cst_45 {dimension_numbers = #tpu.dot_dimension_numbers<[1], [0], [0], [1], [0, 0, 1, 1], [], []>} : vector<16x32xbf16>, vector<32x128xbf16>, vector<16x128xf32> -> vector<16x128xf32>
    %100 = vector.broadcast %8 : vector<1x128xf32> to vector<16x128xf32>
    %101 = arith.addf %99, %100 : vector<16x128xf32>
    %102 = arith.addf %101, %66 : vector<16x128xf32>
    %103 = arith.truncf %102 : vector<16x128xf32> to vector<16x128xbf16>
    %cst_46 = arith.constant dense<0.000000e+00> : vector<16x32xf32>
    %104 = tpu.matmul %103, %11, %cst_46 {dimension_numbers = #tpu.dot_dimension_numbers<[1], [0], [0], [1], [0, 0, 1, 1], [], []>} : vector<16x128xbf16>, vector<128x32xbf16>, vector<16x32xf32> -> vector<16x32xf32>
    %105 = vector.broadcast %12 : vector<1x32xf32> to vector<16x32xf32>
    %106 = arith.addf %104, %105 : vector<16x32xf32>
    %107 = vector.extract_strided_slice %1 {offsets = [0, 128], sizes = [16, 64], strides = [1, 1]} : vector<16x256xbf16> to vector<16x64xbf16>
    %cst_47 = arith.constant dense<0.000000e+00> : vector<16x128xf32>
    %108 = tpu.matmul %107, %5, %cst_47 {dimension_numbers = #tpu.dot_dimension_numbers<[1], [0], [0], [1], [0, 0, 1, 1], [], []>} : vector<16x64xbf16>, vector<64x128xbf16>, vector<16x128xf32> -> vector<16x128xf32>
    %109 = vector.broadcast %6 : vector<1x128xf32> to vector<16x128xf32>
    %110 = arith.addf %108, %109 : vector<16x128xf32>
    %111 = arith.addf %110, %15 : vector<16x128xf32>
    %112 = arith.truncf %111 : vector<16x128xf32> to vector<16x128xbf16>
    %cst_48 = arith.constant dense<0.000000e+00> : vector<16x64xf32>
    %113 = tpu.matmul %112, %9, %cst_48 {dimension_numbers = #tpu.dot_dimension_numbers<[1], [0], [0], [1], [0, 0, 1, 1], [], []>} : vector<16x128xbf16>, vector<128x64xbf16>, vector<16x64xf32> -> vector<16x64xf32>
    %114 = vector.broadcast %10 : vector<1x64xf32> to vector<16x64xf32>
    %115 = arith.addf %113, %114 : vector<16x64xf32>
    %116 = vector.extract_strided_slice %2 {offsets = [0, 256], sizes = [16, 32], strides = [1, 1]} : vector<16x512xbf16> to vector<16x32xbf16>
    %cst_49 = arith.constant dense<0.000000e+00> : vector<16x128xf32>
    %117 = tpu.matmul %116, %7, %cst_49 {dimension_numbers = #tpu.dot_dimension_numbers<[1], [0], [0], [1], [0, 0, 1, 1], [], []>} : vector<16x32xbf16>, vector<32x128xbf16>, vector<16x128xf32> -> vector<16x128xf32>
    %118 = vector.broadcast %8 : vector<1x128xf32> to vector<16x128xf32>
    %119 = arith.addf %117, %118 : vector<16x128xf32>
    %120 = arith.addf %119, %111 : vector<16x128xf32>
    %121 = arith.truncf %120 : vector<16x128xf32> to vector<16x128xbf16>
    %cst_50 = arith.constant dense<0.000000e+00> : vector<16x32xf32>
    %122 = tpu.matmul %121, %11, %cst_50 {dimension_numbers = #tpu.dot_dimension_numbers<[1], [0], [0], [1], [0, 0, 1, 1], [], []>} : vector<16x128xbf16>, vector<128x32xbf16>, vector<16x32xf32> -> vector<16x32xf32>
    %123 = vector.broadcast %12 : vector<1x32xf32> to vector<16x32xf32>
    %124 = arith.addf %122, %123 : vector<16x32xf32>
    %125 = vector.extract_strided_slice %2 {offsets = [0, 288], sizes = [16, 32], strides = [1, 1]} : vector<16x512xbf16> to vector<16x32xbf16>
    %cst_51 = arith.constant dense<0.000000e+00> : vector<16x128xf32>
    %126 = tpu.matmul %125, %7, %cst_51 {dimension_numbers = #tpu.dot_dimension_numbers<[1], [0], [0], [1], [0, 0, 1, 1], [], []>} : vector<16x32xbf16>, vector<32x128xbf16>, vector<16x128xf32> -> vector<16x128xf32>
    %127 = vector.broadcast %8 : vector<1x128xf32> to vector<16x128xf32>
    %128 = arith.addf %126, %127 : vector<16x128xf32>
    %129 = arith.addf %128, %111 : vector<16x128xf32>
    %130 = arith.truncf %129 : vector<16x128xf32> to vector<16x128xbf16>
    %cst_52 = arith.constant dense<0.000000e+00> : vector<16x32xf32>
    %131 = tpu.matmul %130, %11, %cst_52 {dimension_numbers = #tpu.dot_dimension_numbers<[1], [0], [0], [1], [0, 0, 1, 1], [], []>} : vector<16x128xbf16>, vector<128x32xbf16>, vector<16x32xf32> -> vector<16x32xf32>
    %132 = vector.broadcast %12 : vector<1x32xf32> to vector<16x32xf32>
    %133 = arith.addf %131, %132 : vector<16x32xf32>
    %134 = vector.extract_strided_slice %2 {offsets = [0, 320], sizes = [16, 32], strides = [1, 1]} : vector<16x512xbf16> to vector<16x32xbf16>
    %cst_53 = arith.constant dense<0.000000e+00> : vector<16x128xf32>
    %135 = tpu.matmul %134, %7, %cst_53 {dimension_numbers = #tpu.dot_dimension_numbers<[1], [0], [0], [1], [0, 0, 1, 1], [], []>} : vector<16x32xbf16>, vector<32x128xbf16>, vector<16x128xf32> -> vector<16x128xf32>
    %136 = vector.broadcast %8 : vector<1x128xf32> to vector<16x128xf32>
    %137 = arith.addf %135, %136 : vector<16x128xf32>
    %138 = arith.addf %137, %111 : vector<16x128xf32>
    %139 = arith.truncf %138 : vector<16x128xf32> to vector<16x128xbf16>
    %cst_54 = arith.constant dense<0.000000e+00> : vector<16x32xf32>
    %140 = tpu.matmul %139, %11, %cst_54 {dimension_numbers = #tpu.dot_dimension_numbers<[1], [0], [0], [1], [0, 0, 1, 1], [], []>} : vector<16x128xbf16>, vector<128x32xbf16>, vector<16x32xf32> -> vector<16x32xf32>
    %141 = vector.broadcast %12 : vector<1x32xf32> to vector<16x32xf32>
    %142 = arith.addf %140, %141 : vector<16x32xf32>
    %143 = vector.extract_strided_slice %2 {offsets = [0, 352], sizes = [16, 32], strides = [1, 1]} : vector<16x512xbf16> to vector<16x32xbf16>
    %cst_55 = arith.constant dense<0.000000e+00> : vector<16x128xf32>
    %144 = tpu.matmul %143, %7, %cst_55 {dimension_numbers = #tpu.dot_dimension_numbers<[1], [0], [0], [1], [0, 0, 1, 1], [], []>} : vector<16x32xbf16>, vector<32x128xbf16>, vector<16x128xf32> -> vector<16x128xf32>
    %145 = vector.broadcast %8 : vector<1x128xf32> to vector<16x128xf32>
    %146 = arith.addf %144, %145 : vector<16x128xf32>
    %147 = arith.addf %146, %111 : vector<16x128xf32>
    %148 = arith.truncf %147 : vector<16x128xf32> to vector<16x128xbf16>
    %cst_56 = arith.constant dense<0.000000e+00> : vector<16x32xf32>
    %149 = tpu.matmul %148, %11, %cst_56 {dimension_numbers = #tpu.dot_dimension_numbers<[1], [0], [0], [1], [0, 0, 1, 1], [], []>} : vector<16x128xbf16>, vector<128x32xbf16>, vector<16x32xf32> -> vector<16x32xf32>
    %150 = vector.broadcast %12 : vector<1x32xf32> to vector<16x32xf32>
    %151 = arith.addf %149, %150 : vector<16x32xf32>
    %152 = vector.extract_strided_slice %1 {offsets = [0, 192], sizes = [16, 64], strides = [1, 1]} : vector<16x256xbf16> to vector<16x64xbf16>
    %cst_57 = arith.constant dense<0.000000e+00> : vector<16x128xf32>
    %153 = tpu.matmul %152, %5, %cst_57 {dimension_numbers = #tpu.dot_dimension_numbers<[1], [0], [0], [1], [0, 0, 1, 1], [], []>} : vector<16x64xbf16>, vector<64x128xbf16>, vector<16x128xf32> -> vector<16x128xf32>
    %154 = vector.broadcast %6 : vector<1x128xf32> to vector<16x128xf32>
    %155 = arith.addf %153, %154 : vector<16x128xf32>
    %156 = arith.addf %155, %15 : vector<16x128xf32>
    %157 = arith.truncf %156 : vector<16x128xf32> to vector<16x128xbf16>
    %cst_58 = arith.constant dense<0.000000e+00> : vector<16x64xf32>
    %158 = tpu.matmul %157, %9, %cst_58 {dimension_numbers = #tpu.dot_dimension_numbers<[1], [0], [0], [1], [0, 0, 1, 1], [], []>} : vector<16x128xbf16>, vector<128x64xbf16>, vector<16x64xf32> -> vector<16x64xf32>
    %159 = vector.broadcast %10 : vector<1x64xf32> to vector<16x64xf32>
    %160 = arith.addf %158, %159 : vector<16x64xf32>
    %161 = vector.extract_strided_slice %2 {offsets = [0, 384], sizes = [16, 32], strides = [1, 1]} : vector<16x512xbf16> to vector<16x32xbf16>
    %cst_59 = arith.constant dense<0.000000e+00> : vector<16x128xf32>
    %162 = tpu.matmul %161, %7, %cst_59 {dimension_numbers = #tpu.dot_dimension_numbers<[1], [0], [0], [1], [0, 0, 1, 1], [], []>} : vector<16x32xbf16>, vector<32x128xbf16>, vector<16x128xf32> -> vector<16x128xf32>
    %163 = vector.broadcast %8 : vector<1x128xf32> to vector<16x128xf32>
    %164 = arith.addf %162, %163 : vector<16x128xf32>
    %165 = arith.addf %164, %156 : vector<16x128xf32>
    %166 = arith.truncf %165 : vector<16x128xf32> to vector<16x128xbf16>
    %cst_60 = arith.constant dense<0.000000e+00> : vector<16x32xf32>
    %167 = tpu.matmul %166, %11, %cst_60 {dimension_numbers = #tpu.dot_dimension_numbers<[1], [0], [0], [1], [0, 0, 1, 1], [], []>} : vector<16x128xbf16>, vector<128x32xbf16>, vector<16x32xf32> -> vector<16x32xf32>
    %168 = vector.broadcast %12 : vector<1x32xf32> to vector<16x32xf32>
    %169 = arith.addf %167, %168 : vector<16x32xf32>
    %170 = vector.extract_strided_slice %2 {offsets = [0, 416], sizes = [16, 32], strides = [1, 1]} : vector<16x512xbf16> to vector<16x32xbf16>
    %cst_61 = arith.constant dense<0.000000e+00> : vector<16x128xf32>
    %171 = tpu.matmul %170, %7, %cst_61 {dimension_numbers = #tpu.dot_dimension_numbers<[1], [0], [0], [1], [0, 0, 1, 1], [], []>} : vector<16x32xbf16>, vector<32x128xbf16>, vector<16x128xf32> -> vector<16x128xf32>
    %172 = vector.broadcast %8 : vector<1x128xf32> to vector<16x128xf32>
    %173 = arith.addf %171, %172 : vector<16x128xf32>
    %174 = arith.addf %173, %156 : vector<16x128xf32>
    %175 = arith.truncf %174 : vector<16x128xf32> to vector<16x128xbf16>
    %cst_62 = arith.constant dense<0.000000e+00> : vector<16x32xf32>
    %176 = tpu.matmul %175, %11, %cst_62 {dimension_numbers = #tpu.dot_dimension_numbers<[1], [0], [0], [1], [0, 0, 1, 1], [], []>} : vector<16x128xbf16>, vector<128x32xbf16>, vector<16x32xf32> -> vector<16x32xf32>
    %177 = vector.broadcast %12 : vector<1x32xf32> to vector<16x32xf32>
    %178 = arith.addf %176, %177 : vector<16x32xf32>
    %179 = vector.extract_strided_slice %2 {offsets = [0, 448], sizes = [16, 32], strides = [1, 1]} : vector<16x512xbf16> to vector<16x32xbf16>
    %cst_63 = arith.constant dense<0.000000e+00> : vector<16x128xf32>
    %180 = tpu.matmul %179, %7, %cst_63 {dimension_numbers = #tpu.dot_dimension_numbers<[1], [0], [0], [1], [0, 0, 1, 1], [], []>} : vector<16x32xbf16>, vector<32x128xbf16>, vector<16x128xf32> -> vector<16x128xf32>
    %181 = vector.broadcast %8 : vector<1x128xf32> to vector<16x128xf32>
    %182 = arith.addf %180, %181 : vector<16x128xf32>
    %183 = arith.addf %182, %156 : vector<16x128xf32>
    %184 = arith.truncf %183 : vector<16x128xf32> to vector<16x128xbf16>
    %cst_64 = arith.constant dense<0.000000e+00> : vector<16x32xf32>
    %185 = tpu.matmul %184, %11, %cst_64 {dimension_numbers = #tpu.dot_dimension_numbers<[1], [0], [0], [1], [0, 0, 1, 1], [], []>} : vector<16x128xbf16>, vector<128x32xbf16>, vector<16x32xf32> -> vector<16x32xf32>
    %186 = vector.broadcast %12 : vector<1x32xf32> to vector<16x32xf32>
    %187 = arith.addf %185, %186 : vector<16x32xf32>
    %188 = vector.extract_strided_slice %2 {offsets = [0, 480], sizes = [16, 32], strides = [1, 1]} : vector<16x512xbf16> to vector<16x32xbf16>
    %cst_65 = arith.constant dense<0.000000e+00> : vector<16x128xf32>
    %189 = tpu.matmul %188, %7, %cst_65 {dimension_numbers = #tpu.dot_dimension_numbers<[1], [0], [0], [1], [0, 0, 1, 1], [], []>} : vector<16x32xbf16>, vector<32x128xbf16>, vector<16x128xf32> -> vector<16x128xf32>
    %190 = vector.broadcast %8 : vector<1x128xf32> to vector<16x128xf32>
    %191 = arith.addf %189, %190 : vector<16x128xf32>
    %192 = arith.addf %191, %156 : vector<16x128xf32>
    %193 = arith.truncf %192 : vector<16x128xf32> to vector<16x128xbf16>
    %cst_66 = arith.constant dense<0.000000e+00> : vector<16x32xf32>
    %194 = tpu.matmul %193, %11, %cst_66 {dimension_numbers = #tpu.dot_dimension_numbers<[1], [0], [0], [1], [0, 0, 1, 1], [], []>} : vector<16x128xbf16>, vector<128x32xbf16>, vector<16x32xf32> -> vector<16x32xf32>
    %195 = vector.broadcast %12 : vector<1x32xf32> to vector<16x32xf32>
    %196 = arith.addf %194, %195 : vector<16x32xf32>
    %197 = tpu.concatenate %25, %70, %115, %160 in 1 : vector<16x64xf32>, vector<16x64xf32>, vector<16x64xf32>, vector<16x64xf32> -> vector<16x256xf32>
    %c0_67 = arith.constant 0 : index
    %c0_68 = arith.constant 0 : index
    %198 = vector.load %arg15[%c0_67, %c0_68] : memref<16x256xf32, #tpu.memory_space<vmem>>, vector<16x256xf32>
    tpu.vector_store %arg15[%c0_67, %c0_68], %197 {strides = array<i32>} : memref<16x256xf32, #tpu.memory_space<vmem>>, vector<16x256xf32>,
    %199 = tpu.concatenate %34, %43, %52, %61, %79, %88, %97, %106, %124, %133, %142, %151, %169, %178, %187, %196 in 1 : vector<16x32xf32>, vector<16x32xf32>, vector<16x32xf32>, vector<16x32xf32>, vector<16x32xf32>, vector<16x32xf32>, vector<16x32xf32>, vector<16x32xf32>, vector<16x32xf32>, vector<16x32xf32>, vector<16x32xf32>, vector<16x32xf32>, vector<16x32xf32>, vector<16x32xf32>, vector<16x32xf32>, vector<16x32xf32> -> vector<16x512xf32>
    %c0_69 = arith.constant 0 : index
    %c0_70 = arith.constant 0 : index
    %200 = vector.load %arg16[%c0_69, %c0_70] : memref<16x512xf32, #tpu.memory_space<vmem>>, vector<16x512xf32>
    tpu.vector_store %arg16[%c0_69, %c0_70], %199 {strides = array<i32>} : memref<16x512xf32, #tpu.memory_space<vmem>>, vector<16x512xf32>,
    return
  }
  func.func @transform_0(%arg0: i32) -> (i32, i32) {
    %c0_i32 = arith.constant 0 : i32
    %c0_i32_0 = arith.constant 0 : i32
    return %arg0, %c0_i32 : i32, i32
  }
  func.func @transform_1(%arg0: i32) -> (i32, i32) {
    %c0_i32 = arith.constant 0 : i32
    %c0_i32_0 = arith.constant 0 : i32
    return %arg0, %c0_i32 : i32, i32
  }
  func.func @transform_2(%arg0: i32) -> (i32, i32) {
    %c0_i32 = arith.constant 0 : i32
    %c0_i32_0 = arith.constant 0 : i32
    return %arg0, %c0_i32 : i32, i32
  }
  func.func @transform_3(%arg0: i32) -> (i32, i32) {
    %c0_i32 = arith.constant 0 : i32
    %c0_i32_0 = arith.constant 0 : i32
    %c0_i32_1 = arith.constant 0 : i32
    return %c0_i32, %c0_i32_0 : i32, i32
  }
  func.func @transform_4(%arg0: i32) -> (i32, i32) {
    %c0_i32 = arith.constant 0 : i32
    %c0_i32_0 = arith.constant 0 : i32
    %c0_i32_1 = arith.constant 0 : i32
    return %c0_i32, %c0_i32_0 : i32, i32
  }
  func.func @transform_5(%arg0: i32) -> (i32, i32) {
    %c0_i32 = arith.constant 0 : i32
    %c0_i32_0 = arith.constant 0 : i32
    %c0_i32_1 = arith.constant 0 : i32
    return %c0_i32, %c0_i32_0 : i32, i32
  }
  func.func @transform_6(%arg0: i32) -> (i32, i32) {
    %c0_i32 = arith.constant 0 : i32
    %c0_i32_0 = arith.constant 0 : i32
    %c0_i32_1 = arith.constant 0 : i32
    return %c0_i32, %c0_i32_0 : i32, i32
  }
  func.func @transform_7(%arg0: i32) -> (i32, i32) {
    %c0_i32 = arith.constant 0 : i32
    %c0_i32_0 = arith.constant 0 : i32
    %c0_i32_1 = arith.constant 0 : i32
    return %c0_i32, %c0_i32_0 : i32, i32
  }
  func.func @transform_8(%arg0: i32) -> (i32, i32) {
    %c0_i32 = arith.constant 0 : i32
    %c0_i32_0 = arith.constant 0 : i32
    %c0_i32_1 = arith.constant 0 : i32
    return %c0_i32, %c0_i32_0 : i32, i32
  }
  func.func @transform_9(%arg0: i32) -> (i32, i32) {
    %c0_i32 = arith.constant 0 : i32
    %c0_i32_0 = arith.constant 0 : i32
    %c0_i32_1 = arith.constant 0 : i32
    return %c0_i32, %c0_i32_0 : i32, i32
  }
  func.func @transform_10(%arg0: i32) -> (i32, i32) {
    %c0_i32 = arith.constant 0 : i32
    %c0_i32_0 = arith.constant 0 : i32
    %c0_i32_1 = arith.constant 0 : i32
    return %c0_i32, %c0_i32_0 : i32, i32
  }
  func.func @transform_11(%arg0: i32) -> (i32, i32) {
    %c0_i32 = arith.constant 0 : i32
    %c0_i32_0 = arith.constant 0 : i32
    %c0_i32_1 = arith.constant 0 : i32
    return %c0_i32, %c0_i32_0 : i32, i32
  }
  func.func @transform_12(%arg0: i32) -> (i32, i32) {
    %c0_i32 = arith.constant 0 : i32
    %c0_i32_0 = arith.constant 0 : i32
    %c0_i32_1 = arith.constant 0 : i32
    return %c0_i32, %c0_i32_0 : i32, i32
  }
  func.func @transform_13(%arg0: i32) -> (i32, i32) {
    %c0_i32 = arith.constant 0 : i32
    %c0_i32_0 = arith.constant 0 : i32
    return %arg0, %c0_i32 : i32, i32
  }
  func.func @transform_14(%arg0: i32) -> (i32, i32) {
    %c0_i32 = arith.constant 0 : i32
    %c0_i32_0 = arith.constant 0 : i32
    return %arg0, %c0_i32 : i32, i32
  }
  func.func @transform_15(%arg0: i32) -> (i32, i32) {
    %c0_i32 = arith.constant 0 : i32
    %c0_i32_0 = arith.constant 0 : i32
    return %arg0, %c0_i32 : i32, i32
  }
}

</mosaic_0001>

<bundles_post_ra>
// kernel: sam2_image_encoder.4
= control target key start
LH: loop header
LB: loop body
LE: loop exit
PB: predicated region body
PF: predicated region fallthrough
CT: control target
= control target key end

     0   :  { %s3329_s30 = smov 0   ;;  %s4731_s0 = inlined_call_operand.vmem [shape: bf16[128,256], index: 0, kind: input, shape index: {}]   ;;  %s4732_s1 = inlined_call_operand.vmem [shape: bf16[64,32], index: 1, kind: input, shape index: {}]   ;;  %s4733_s2 = inlined_call_operand.vmem [shape: f32[1,32], index: 2, kind: input, shape index: {}]   ;;  %s4734_s3 = inlined_call_operand.vmem [shape: f32[1,32], index: 3, kind: input, shape index: {}]   ;;  %s4735_s4 = inlined_call_operand.vmem [shape: f32[1,32], index: 4, kind: input, shape index: {}]   ;;  %s4736_s5 = inlined_call_operand.vmem [shape: bf16[32,128], index: 5, kind: input, shape index: {}]   ;;  %s4737_s6 = inlined_call_operand.vmem [shape: f32[1,128], index: 6, kind: input, shape index: {}]   ;;  %s4738_s7 = inlined_call_operand.vmem [shape: bf16[128,32], index: 7, kind: input, shape index: {}]   ;;  %s4739_s8 = inlined_call_operand.vmem [shape: f32[1,32], index: 8, kind: input, shape index: {}]   ;;  %s4740_s9 = inlined_call_operand.vmem [shape: bf16[128,128], index: 9, kind: output, shape index: {}]  }
   0x1 LB: > { %s2870_s10 = sadd.s32 4294967295, %s3273_s30   ;;  %p2874_p0 = scmp.ge.s32.totalorder %s3273_s30, 1  ;;  %s3273_s30 = sphi %s3329_s30, %s19_s30  }
   0x2   : > { %p289_p1 = scmp.lt.s32.totalorder %s3273_s30, 3 }
   0x4   : > { %p290_p2 = pnand %p2874_p0, %p289_p1 }
   0x6   : > { %293 = sbr.rel (%p290_p2) target bundleno = 1927 (0x787), region = 56 }
   0xb   : > { %v3014_v0 = vld [vmem:[%s4732_s1 + $0x18] sm:$0xff]  ;;  %s2875_s13 = sshll.u32 %s2870_s10, 3  ;;  %v3013_v1 = vld [vmem:[%s4732_s1 + $0x10] sm:$0xff]  ;;  %v3012_v2 = vld [vmem:[%s4732_s1 + $0x8] sm:$0xff]  ;;  %s3275_s24 = smov 64   ;;  %vm428_vm0 = vcmask 523264  }
   0xc   : > { %p327_p3 = scmp.lt.s32.totalorder %s2875_s13, 15  ;;  %445 = vmatpush.bf16.msra.mxu0 %v3014_v0  ;;  %1068 = vmatpush.bf16.msra.mxu3 %v3014_v0  ;;  %v3011_v9 = vld [vmem:[%s4732_s1] sm:$0xff]  ;;  %vm470_vm1 = vcmask 261120   ;;  %v3276_v42 = vmov 32.0   ;;  %s3277_s17 = smov 32  }
   0xd   : > { %v3377_v18 = vld [vmem:[%s4733_s2] ss:$0 sm:$0xff]  ;;  %3125 = vrcp.f32 %v3276_v42  ;;  %s3278_s28 = smov 96  }
   0xe   : > { %s4806_s13 = smov (!%p327_p3, %s2875_s13), 15 }
   0xf   : > { %s3002_s16 = sshll.u32 %s4806_s13, 3  ;;  %s2879_s29 = sshll.u32 %s4806_s13, 2 }
  0x10   : > { %446 = vmatpush.bf16.msra.mxu0 %v3013_v1  ;;  %s3352_s21 = scalar_lea.vmem %s4731_s0, %s3002_s16  ;;  %1069 = vmatpush.bf16.msra.mxu3 %v3013_v1 }
  0x11   : > { %v2882_v3 = vld [vmem:[%s3352_s21] sm:$0xf]  ;;  %v3004_v4 = vld [vmem:[%s3352_s21 + $0x4] sm:$0xf0]  ;;  %v2886_v10 = vld [vmem:[%s3352_s21 + $0x10] sm:$0xf] }
  0x12   : > { %v2883_v5 = vor.u32 %v3004_v4, %v2882_v3  ;;  %v2890_v6 = vld [vmem:[%s3352_s21 + $0x20] sm:$0xf]  ;;  %v3008_v7 = vld [vmem:[%s3352_s21 + $0x24] sm:$0xf0]  ;;  %v3006_v11 = vld [vmem:[%s3352_s21 + $0x14] sm:$0xf0] }
  0x13   : > { %v2891_v8 = vor.u32 %v3008_v7, %v2890_v6  ;;  %v2887_v12 = vor.u32 %v3006_v11, %v2886_v10  ;;  %v2894_v13 = vld [vmem:[%s3352_s21 + $0x30] sm:$0xf]  ;;  %v3010_v14 = vld [vmem:[%s3352_s21 + $0x34] sm:$0xf0]  ;;  %v3126_v43 = vpop.eup %3125 }
  0x14   : > { %447 = vmatpush.bf16.msra.mxu0 %v3012_v2  ;;  %1044 = vrot.lane.b32.xlu0 %v2883_v5, %s3275_s24  ;;  %v2895_v15 = vor.u32 %v3010_v14, %v2894_v13  ;;  %v496_v44 = vmul.f32 32.0, %v3126_v43  ;;  %vm500_vm2 = vweird.f32 %v3126_v43 }
  0x15   : > { %1048 = vrot.lane.b32.xlu1 %v2891_v8, %s3275_s24  ;;  %1070 = vmatpush.bf16.msra.mxu3 %v3012_v2 }
  0x16   : > { %v497_v45 = vsub.f32 1.0, %v496_v44 }
  0x18   : > { %448 = vmatpush.bf16.msra.mxu0 %v3011_v9  ;;  %v498_v46 = vmul.f32 %v3126_v43, %v497_v45 }
  0x19   : > { %1071 = vmatpush.bf16.msra.mxu3 %v3011_v9 }
  0x1a   : > { %v499_v47 = vadd.f32 %v3126_v43, %v498_v46 }
  0x1b   : > { %2912 = vmatmul.msk.bf16.vlgmr.msra.gmra.mxu0 %vm428_vm0, %v2883_v5 }
  0x1c   : > { %1046 = vrot.lane.b32.xlu0 %v2887_v12, %s3275_s24  ;;  %v3417_v48 = vsel %vm500_vm2, %v3126_v43, %v499_v47 }
  0x1d   : > { %1615 = vmatpush.bf16.msrb.mxu3 %v3014_v0  ;;  %1050 = vrot.lane.b32.xlu1 %v2895_v15, %s3275_s24 }
  0x21   : > { %1616 = vmatpush.bf16.msrb.mxu3 %v3013_v1 }
  0x25   : > { %1617 = vmatpush.bf16.msrb.mxu3 %v3012_v2 }
  0x29   : > { %1618 = vmatpush.bf16.msrb.mxu3 %v3011_v9 }
  0x2b   : > { %2913 = vmatmul.msk.bf16.gmra.mxu0 %vm428_vm0, %v2887_v12 }
  0x3b   : > { %2914 = vmatmul.msk.bf16.gmra.mxu0 %vm428_vm0, %v2891_v8 }
  0x4b   : > { %2915 = vmatmul.msk.bf16.gmra.mxu0 %vm428_vm0, %v2895_v15 }
  0x86   : > { %v1045_v16 = vpop.permute.xlu0 %1044 }
  0x87   : > { %2960 = vmatmul.msk.bf16.vlgmr.msra.gmra.mxu3 %vm428_vm0, %v1045_v16  ;;  %v1049_v25 = vpop.permute.xlu1 %1048 }
  0x8e   : > { %v1047_v17 = vpop.permute.xlu0 %1046 }
  0x8f   : > { %v1051_v32 = vpop.permute.xlu1 %1050 }
  0x97   : > { %2961 = vmatmul.msk.bf16.gmra.mxu3 %vm428_vm0, %v1047_v17 }
  0x98   : > { %v450_v19 = vpop.f32.mrf.mxu0 }
  0x99   : > { %v3381_v20 = vadd.f32 %v3377_v18, %v450_v19 }
  0x9b   : > { %4751 = vst [vmem:[#allocation2_spill] sm:$0xff] %v3381_v20  ;;  %v471_v21 = vsel %vm470_vm1, %v3381_v20, 0.0 }
  0x9c   : > { %472 = vadd.xlane.f32.xlu2 %v471_v21 }
  0xa0   : > { %v452_v22 = vpop.f32.mrf.mxu0 }
  0xa1   : > { %v3386_v23 = vadd.f32 %v3377_v18, %v452_v22 }
  0xa3   : > { %4752 = vst [vmem:[#allocation3_spill] sm:$0xff] %v3386_v23  ;;  %v474_v24 = vsel %vm470_vm1, %v3386_v23, 0.0 }
  0xa4   : > { %475 = vadd.xlane.f32.xlu2 %v474_v24 }
  0xa7   : > { %2962 = vmatmul.msk.bf16.gmra.mxu3 %vm428_vm0, %v1049_v25 }
  0xa8   : > { %v455_v26 = vpop.f32.mrf.mxu0 }
  0xa9   : > { %v3392_v27 = vadd.f32 %v3377_v18, %v455_v26 }
  0xab   : > { %4753 = vst [vmem:[#allocation4_spill] sm:$0xff] %v3392_v27  ;;  %v477_v28 = vsel %vm470_vm1, %v3392_v27, 0.0 }
  0xac   : > { %478 = vadd.xlane.f32.xlu0 %v477_v28 }
  0xb0   : > { %v457_v29 = vpop.f32.mrf.mxu0 }
  0xb1   : > { %v3397_v30 = vadd.f32 %v3377_v18, %v457_v29 }
  0xb3   : > { %4754 = vst [vmem:[#allocation5_spill] sm:$0xff] %v3397_v30  ;;  %v480_v31 = vsel %vm470_vm1, %v3397_v30, 0.0 }
  0xb4   : > { %481 = vadd.xlane.f32.xlu1 %v480_v31 }
  0xb7   : > { %2963 = vmatmul.msk.bf16.gmra.mxu3 %vm428_vm0, %v1051_v32 }
  0xb8   : > { %v460_v33 = vpop.f32.mrf.mxu0 }
  0xb9   : > { %v3403_v34 = vadd.f32 %v3377_v18, %v460_v33 }
  0xbb   : > { %4755 = vst [vmem:[#allocation6_spill] sm:$0xff] %v3403_v34  ;;  %v483_v35 = vsel %vm470_vm1, %v3403_v34, 0.0 }
  0xbc   : > { %484 = vadd.xlane.f32.xlu2 %v483_v35 }
  0xc0   : > { %v462_v36 = vpop.f32.mrf.mxu0 }
  0xc1   : > { %v3408_v37 = vadd.f32 %v3377_v18, %v462_v36 }
  0xc3   : > { %4756 = vst [vmem:[#allocation7_spill] sm:$0xff] %v3408_v37  ;;  %v486_v38 = vsel %vm470_vm1, %v3408_v37, 0.0 }
  0xc4   : > { %487 = vadd.xlane.f32.xlu2 %v486_v38 }
  0xc8   : > { %v465_v39 = vpop.f32.mrf.mxu0 }
  0xc9   : > { %v3413_v40 = vadd.f32 %v3377_v18, %v465_v39 }
  0xcb   : > { %4757 = vst [vmem:[#allocation8_spill] sm:$0xff] %v3413_v40  ;;  %v489_v41 = vsel %vm470_vm1, %v3413_v40, 0.0 }
  0xcc   : > { %490 = vadd.xlane.f32.xlu2 %v489_v41 }
  0xd0   : > { %v467_v61 = vpop.f32.mrf.mxu0 }
  0xd1   : > { %v3435_v0 = vadd.f32 %v3377_v18, %v467_v61 }
  0xd3   : > { %4758 = vst [vmem:[#allocation9_spill] sm:$0xff] %v3435_v0  ;;  %v492_v5 = vsel %vm470_vm1, %v3435_v0, 0.0 }
 0x10a   : > { %v1073_v51 = vpop.f32.mrf.mxu3 }
 0x10b   : > { %v3450_v9 = vadd.f32 %v3377_v18, %v1073_v51 }
 0x10d   : > { %v1093_v13 = vsel %vm470_vm1, %v3450_v9, 0.0 }
 0x10f   : > { %v473_v49 = vpop.xlane.xlu2 %472 }
 0x110   : > { %v502_v50 = vmul.f32 %v3417_v48, %v473_v49 }
 0x112   : > { %v3421_v52 = vsub.f32 %v3381_v20, %v502_v50  ;;  %v1075_v58 = vpop.f32.mrf.mxu3 }
 0x113   : > { %v3447_v8 = vadd.f32 %v3377_v18, %v1075_v58 }
 0x114   : > { %v518_v53 = vmul.f32 %v3421_v52, %v3421_v52 }
 0x115   : > { %v1096_v12 = vsel %vm470_vm1, %v3447_v8, 0.0 }
 0x116   : > { %v526_v54 = vsel %vm470_vm1, %v518_v53, 0.0 }
 0x117   : > { %527 = vadd.xlane.f32.xlu2 %v526_v54  ;;  %v476_v55 = vpop.xlane.xlu2 %475  ;;  %v3511_v54 = vld [vmem:[%s4736_s5 + $0x8] sm:$0xff] }
 0x118   : > { %v503_v56 = vmul.f32 %v3417_v48, %v476_v55  ;;  %713 = vmatpush.bf16.msra.mxu1 %v3511_v54  ;;  %2397 = vmatpush.bf16.msra.mxu3 %v3511_v54 }
 0x11a   : > { %v3428_v57 = vsub.f32 %v3386_v23, %v503_v56  ;;  %v1078_v3 = vpop.f32.mrf.mxu3 }
 0x11b   : > { %v3464_v19 = vadd.f32 %v3377_v18, %v1078_v3 }
 0x11c   : > { %v519_v59 = vmul.f32 %v3428_v57, %v3428_v57 }
 0x11d   : > { %v1099_v22 = vsel %vm470_vm1, %v3464_v19, 0.0 }
 0x11e   : > { %v529_v60 = vsel %vm470_vm1, %v519_v59, 0.0  ;;  %v3519_v59 = vld [vmem:[%s4736_s5] sm:$0xff] }
 0x11f   : > { %v479_v62 = vpop.xlane.xlu0 %478  ;;  %530 = vadd.xlane.f32.xlu2 %v529_v60  ;;  %714 = vmatpush.bf16.msra.mxu1 %v3519_v59 }
 0x120   : > { %v504_v63 = vmul.f32 %v3417_v48, %v479_v62  ;;  %2398 = vmatpush.bf16.msra.mxu3 %v3519_v59 }
 0x122   : > { %v3438_v1 = vsub.f32 %v3392_v27, %v504_v63  ;;  %v1080_v16 = vpop.f32.mrf.mxu3 }
 0x123   : > { %v3476_v29 = vadd.f32 %v3377_v18, %v1080_v16  ;;  %1307 = vmatpush.bf16.msrb.mxu1 %v3511_v54 }
 0x124   : > { %v520_v2 = vmul.f32 %v3438_v1, %v3438_v1 }
 0x125   : > { %v1102_v33 = vsel %vm470_vm1, %v3476_v29, 0.0 }
 0x126   : > { %v532_v4 = vsel %vm470_vm1, %v520_v2, 0.0 }
 0x127   : > { %v482_v6 = vpop.xlane.xlu1 %481  ;;  %533 = vadd.xlane.f32.xlu0 %v532_v4  ;;  %493 = vadd.xlane.f32.xlu2 %v492_v5 }
 0x128   : > { %v505_v7 = vmul.f32 %v3417_v48, %v482_v6  ;;  %1308 = vmatpush.bf16.msrb.mxu1 %v3519_v59 }
 0x12a   : > { %v3453_v10 = vsub.f32 %v3397_v30, %v505_v7  ;;  %v1083_v31 = vpop.f32.mrf.mxu3 }
 0x12b   : > { %v3488_v41 = vadd.f32 %v3377_v18, %v1083_v31 }
 0x12c   : > { %v521_v11 = vmul.f32 %v3453_v10, %v3453_v10 }
 0x12d   : > { %v1105_v44 = vsel %vm470_vm1, %v3488_v41, 0.0 }
 0x12e   : > { %v535_v14 = vsel %vm470_vm1, %v521_v11, 0.0 }
 0x12f   : > { %536 = vadd.xlane.f32.xlu1 %v535_v14  ;;  %1097 = vadd.xlane.f32.xlu0 %v1096_v12  ;;  %v485_v15 = vpop.xlane.xlu2 %484 }
 0x130   : > { %1094 = vadd.xlane.f32.xlu2 %v1093_v13  ;;  %v506_v17 = vmul.f32 %v3417_v48, %v485_v15 }
 0x132   : > { %v3467_v21 = vsub.f32 %v3403_v34, %v506_v17  ;;  %v1085_v43 = vpop.f32.mrf.mxu3 }
 0x133   : > { %v3499_v47 = vadd.f32 %v3377_v18, %v1085_v43 }
 0x134   : > { %v522_v24 = vmul.f32 %v3467_v21, %v3467_v21 }
 0x135   : > { %v1108_v49 = vsel %vm470_vm1, %v3499_v47, 0.0 }
 0x136   : > { %v538_v25 = vsel %vm470_vm1, %v522_v24, 0.0 }
 0x137   : > { %1100 = vadd.xlane.f32.xlu0 %v1099_v22  ;;  %539 = vadd.xlane.f32.xlu1 %v538_v25  ;;  %v488_v26 = vpop.xlane.xlu2 %487 }
 0x138   : > { %v507_v28 = vmul.f32 %v3417_v48, %v488_v26 }
 0x13a   : > { %v3479_v32 = vsub.f32 %v3408_v37, %v507_v28  ;;  %v1088_v50 = vpop.f32.mrf.mxu3 }
 0x13b   : > { %v3504_v51 = vadd.f32 %v3377_v18, %v1088_v50  ;;  %v3549_v50 = vld [vmem:[%s4734_s3] ss:$0 sm:$0xff] }
 0x13c   : > { %v523_v35 = vmul.f32 %v3479_v32, %v3479_v32 }
 0x13d   : > { %v1111_v53 = vsel %vm470_vm1, %v3504_v51, 0.0 }
 0x13e   : > { %v541_v36 = vsel %vm470_vm1, %v523_v35, 0.0 }
 0x13f   : > { %1103 = vadd.xlane.f32.xlu1 %v1102_v33  ;;  %542 = vadd.xlane.f32.xlu2 %v541_v36  ;;  %v491_v38 = vpop.xlane.xlu2 %490 }
 0x140   : > { %v508_v39 = vmul.f32 %v3417_v48, %v491_v38 }
 0x142   : > { %v3491_v42 = vsub.f32 %v3413_v40, %v508_v39 }
 0x144   : > { %v524_v45 = vmul.f32 %v3491_v42, %v3491_v42 }
 0x146   : > { %v544_v46 = vsel %vm470_vm1, %v524_v45, 0.0 }
 0x147   : > { %1106 = vadd.xlane.f32.xlu1 %v1105_v44  ;;  %545 = vadd.xlane.f32.xlu2 %v544_v46 }
 0x14f   : > { %1109 = vadd.xlane.f32.xlu2 %v1108_v49 }
 0x157   : > { %1112 = vadd.xlane.f32.xlu2 %v1111_v53 }
 0x18a   : > { %v528_v55 = vpop.xlane.xlu2 %527 }
 0x18b   : > { %v550_v56 = vmul.f32 %v528_v55, %v3417_v48 }
 0x18d   : > { %v558_v58 = vadd.f32 1e-06, %v550_v56 }
 0x18f   : > { %3127 = vrsqrt.f32 %v558_v58  ;;  %vm572_vm4 = vweird.f32 %v558_v58 }
 0x192   : > { %v531_v60 = vpop.xlane.xlu2 %530 }
 0x193   : > { %v551_v61 = vmul.f32 %v531_v60, %v3417_v48 }
 0x195   : > { %v3128_v62 = vpop.eup %3127  ;;  %v559_v63 = vadd.f32 1e-06, %v551_v61 }
 0x196   : > { %v567_v2 = vmul.f32 %v3128_v62, %v558_v58  ;;  %vm573_vm3 = vweird.f32 %v3128_v62 }
 0x197   : > { %3129 = vrsqrt.f32 %v559_v63  ;;  %vm574_vm5 = vmor %vm572_vm4, %vm573_vm3  ;;  %vm582_vm7 = vweird.f32 %v559_v63 }
 0x198   : > { %v568_v3 = vmul.f32 %v3128_v62, %v567_v2 }
 0x19a   : > { %v569_v4 = vmul.f32 0.5, %v568_v3  ;;  %v534_v5 = vpop.xlane.xlu0 %533  ;;  %v494_v6 = vpop.xlane.xlu2 %493  ;;  %v3566_v3 = vld [vmem:[%s4735_s4] ss:$0 sm:$0xff] }
 0x19b   : > { %v552_v7 = vmul.f32 %v534_v5, %v3417_v48  ;;  %v509_v11 = vmul.f32 %v3417_v48, %v494_v6 }
 0x19c   : > { %v570_v12 = vsub.f32 1.5, %v569_v4 }
 0x19d   : > { %v3130_v13 = vpop.eup %3129  ;;  %v3528_v14 = vadd.f32 1e-06, %v552_v7  ;;  %v3531_v15 = vsub.f32 %v3435_v0, %v509_v11  ;;  %v1090_v11 = vpop.f32.mrf.mxu3 }
 0x19e   : > { %v571_v16 = vmul.f32 %v3128_v62, %v570_v12  ;;  %v577_v17 = vmul.f32 %v3130_v13, %v559_v63  ;;  %vm583_vm6 = vweird.f32 %v3130_v13 }
 0x19f   : > { %3131 = vrsqrt.f32 %v3528_v14  ;;  %v525_v22 = vmul.f32 %v3531_v15, %v3531_v15  ;;  %vm584_vm8 = vmor %vm582_vm7, %vm583_vm6  ;;  %vm592_vm10 = vweird.f32 %v3528_v14 }
 0x1a0   : > { %v578_v24 = vmul.f32 %v3130_v13, %v577_v17  ;;  %v575_v26 = vsel %vm574_vm5, %v3128_v62, %v571_v16 }
 0x1a1   : > { %v547_v25 = vsel %vm470_vm1, %v525_v22, 0.0  ;;  %v646_v45 = vmul.f32 %v575_v26, %v3421_v52 }
 0x1a2   : > { %v579_v28 = vmul.f32 0.5, %v578_v24  ;;  %v537_v31 = vpop.xlane.xlu1 %536  ;;  %v1098_v33 = vpop.xlane.xlu0 %1097  ;;  %548 = vadd.xlane.f32.xlu0 %v547_v25 }
 0x1a3   : > { %v553_v35 = vmul.f32 %v537_v31, %v3417_v48  ;;  %v1118_v36 = vmul.f32 %v1098_v33, %v3417_v48  ;;  %v1095_v38 = vpop.xlane.xlu2 %1094  ;;  %v657_v2 = vmul.f32 %v3549_v50, %v646_v45  ;;  %v3579_v33 = vadd.f32 %v3377_v18, %v1090_v11 }
 0x1a4   : > { %v580_v39 = vsub.f32 1.5, %v579_v28  ;;  %v1117_v43 = vmul.f32 %v1095_v38, %v3417_v48 }
 0x1a5   : > { %v3132_v44 = vpop.eup %3131  ;;  %v3541_v46 = vadd.f32 1e-06, %v553_v35  ;;  %v3544_v49 = vsub.f32 %v3447_v8, %v1118_v36  ;;  %v668_v25 = vadd.f32 %v3566_v3, %v657_v2  ;;  %v1114_v18 = vsel %vm470_vm1, %v3579_v33, 0.0 }
 0x1a6   : > { %v581_v53 = vmul.f32 %v3130_v13, %v580_v39  ;;  %v587_v55 = vmul.f32 %v3132_v44, %v3528_v14  ;;  %v3553_v56 = vsub.f32 %v3450_v9, %v1117_v43  ;;  %vm593_vm9 = vweird.f32 %v3132_v44 }
 0x1a7   : > { %3133 = vrsqrt.f32 %v3541_v46  ;;  %v1134_v52 = vmul.f32 %v3544_v49, %v3544_v49  ;;  %vm594_vm11 = vmor %vm592_vm10, %vm593_vm9  ;;  %vm602_vm13 = vweird.f32 %v3541_v46 }
 0x1a8   : > { %v585_v58 = vsel %vm584_vm8, %v3130_v13, %v581_v53  ;;  %v588_v60 = vmul.f32 %v3132_v44, %v587_v55  ;;  %v1133_v61 = vmul.f32 %v3553_v56, %v3553_v56 }
 0x1a9   : > { %v647_v62 = vmul.f32 %v585_v58, %v3428_v57  ;;  %v1144_v63 = vsel %vm470_vm1, %v1134_v52, 0.0 }
 0x1aa   : > { %v589_v4 = vmul.f32 0.5, %v588_v60  ;;  %v1101_v5 = vpop.xlane.xlu0 %1100  ;;  %1145 = vadd.xlane.f32.xlu1 %v1144_v63  ;;  %v540_v6 = vpop.xlane.xlu1 %539  ;;  %v1141_v7 = vsel %vm470_vm1, %v1133_v61, 0.0 }
 0x1ab   : > { %v1119_v12 = vmul.f32 %v1101_v5, %v3417_v48  ;;  %v554_v57 = vmul.f32 %v540_v6, %v3417_v48  ;;  %1142 = vadd.xlane.f32.xlu0 %v1141_v7  ;;  %v658_v13 = vmul.f32 %v3549_v50, %v647_v62 }
 0x1ac   : > { %v590_v16 = vsub.f32 1.5, %v589_v4 }
 0x1ad   : > { %v3134_v17 = vpop.eup %3133  ;;  %v3573_v22 = vsub.f32 %v3464_v19, %v1119_v12  ;;  %v562_v24 = vadd.f32 1e-06, %v554_v57  ;;  %v669_v26 = vadd.f32 %v3566_v3, %v658_v13 }
 0x1ae   : > { %v591_v28 = vmul.f32 %v3132_v44, %v590_v16  ;;  %v597_v31 = vmul.f32 %v3134_v17, %v3541_v46  ;;  %vm603_vm12 = vweird.f32 %v3134_v17 }
 0x1af   : > { %3135 = vrsqrt.f32 %v562_v24  ;;  %v676_v35 = vpack.c.bf16 %v669_v26, %v668_v25  ;;  %v1135_v36 = vmul.f32 %v3573_v22, %v3573_v22  ;;  %vm604_vm14 = vmor %vm602_vm13, %vm603_vm12  ;;  %vm612_vm2 = vweird.f32 %v562_v24 }
 0x1b0   : > { %v598_v38 = vmul.f32 %v3134_v17, %v597_v31  ;;  %v595_v43 = vsel %vm594_vm11, %v3132_v44, %v591_v28 }
 0x1b1   : > { %2924 = vmatmul.msk.bf16.vlgmr.msra.gmra.mxu1 %vm470_vm1, %v676_v35  ;;  %v1147_v39 = vsel %vm470_vm1, %v1135_v36, 0.0  ;;  %v648_v61 = vmul.f32 %v595_v43, %v3438_v1 }
 0x1b2   : > { %v599_v45 = vmul.f32 0.5, %v598_v38  ;;  %1148 = vadd.xlane.f32.xlu1 %v1147_v39  ;;  %v1104_v53 = vpop.xlane.xlu1 %1103  ;;  %v543_v55 = vpop.xlane.xlu2 %542 }
 0x1b3   : > { %v1120_v52 = vmul.f32 %v1104_v53, %v3417_v48  ;;  %1115 = vadd.xlane.f32.xlu0 %v1114_v18  ;;  %v555_v58 = vmul.f32 %v543_v55, %v3417_v48  ;;  %v659_v1 = vmul.f32 %v3549_v50, %v648_v61 }
 0x1b4   : > { %v600_v14 = vsub.f32 1.5, %v599_v45 }
 0x1b5   : > { %v3136_v60 = vpop.eup %3135  ;;  %v3592_v62 = vsub.f32 %v3476_v29, %v1120_v52  ;;  %v563_v44 = vadd.f32 1e-06, %v555_v58 }
 0x1b6   : > { %v601_v63 = vmul.f32 %v3134_v17, %v600_v14  ;;  %v607_v2 = vmul.f32 %v3136_v60, %v562_v24  ;;  %vm613_vm15 = vweird.f32 %v3136_v60 }
 0x1b7   : > { %3137 = vrsqrt.f32 %v563_v44  ;;  %v1136_v4 = vmul.f32 %v3592_v62, %v3592_v62  ;;  %vm614_vm3 = vmor %vm612_vm2, %vm613_vm15  ;;  %vm622_vm5 = vweird.f32 %v563_v44 }
 0x1b8   : > { %v605_v5 = vsel %vm604_vm14, %v3134_v17, %v601_v63  ;;  %v608_v6 = vmul.f32 %v3136_v60, %v607_v2  ;;  %v670_v17 = vadd.f32 %v3566_v3, %v659_v1 }
 0x1b9   : > { %v649_v7 = vmul.f32 %v605_v5, %v3453_v10  ;;  %v1150_v11 = vsel %vm470_vm1, %v1136_v4, 0.0 }
 0x1ba   : > { %v609_v12 = vmul.f32 0.5, %v608_v6  ;;  %v1107_v57 = vpop.xlane.xlu1 %1106  ;;  %1151 = vadd.xlane.f32.xlu2 %v1150_v11  ;;  %v546_v13 = vpop.xlane.xlu2 %545 }
 0x1bb   : > { %v1121_v46 = vmul.f32 %v1107_v57, %v3417_v48  ;;  %v660_v16 = vmul.f32 %v3549_v50, %v649_v7  ;;  %v556_v57 = vmul.f32 %v546_v13, %v3417_v48 }
 0x1bc   : > { %v610_v25 = vsub.f32 1.5, %v609_v12 }
 0x1bd   : > { %v3138_v26 = vpop.eup %3137  ;;  %v3603_v28 = vsub.f32 %v3488_v41, %v1121_v46  ;;  %v671_v10 = vadd.f32 %v3566_v3, %v660_v16  ;;  %v564_v46 = vadd.f32 1e-06, %v556_v57 }
 0x1be   : > { %v611_v31 = vmul.f32 %v3136_v60, %v610_v25  ;;  %v617_v35 = vmul.f32 %v3138_v26, %v563_v44  ;;  %vm623_vm4 = vweird.f32 %v3138_v26 }
 0x1bf   : > { %v677_v36 = vpack.c.bf16 %v671_v10, %v670_v17  ;;  %v1137_v38 = vmul.f32 %v3603_v28, %v3603_v28  ;;  %vm624_vm6 = vmor %vm622_vm5, %vm623_vm4  ;;  %3139 = vrsqrt.f32 %v564_v46  ;;  %vm632_vm8 = vweird.f32 %v564_v46 }
 0x1c0   : > { %v618_v39 = vmul.f32 %v3138_v26, %v617_v35  ;;  %v615_v45 = vsel %vm614_vm3, %v3136_v60, %v611_v31 }
 0x1c1   : > { %2925 = vmatmul.msk.bf16.gmra.mxu1 %vm470_vm1, %v677_v36  ;;  %v1153_v43 = vsel %vm470_vm1, %v1137_v38, 0.0  ;;  %v650_v58 = vmul.f32 %v615_v45, %v3467_v21 }
 0x1c2   : > { %v619_v53 = vmul.f32 0.5, %v618_v39  ;;  %1154 = vadd.xlane.f32.xlu0 %v1153_v43  ;;  %v1110_v18 = vpop.xlane.xlu2 %1109 }
 0x1c3   : > { %v1122_v55 = vmul.f32 %v1110_v18, %v3417_v48  ;;  %v661_v4 = vmul.f32 %v3549_v50, %v650_v58 }
 0x1c4   : > { %v620_v52 = vsub.f32 1.5, %v619_v53 }
 0x1c5   : > { %v3614_v14 = vsub.f32 %v3499_v47, %v1122_v55  ;;  %v672_v44 = vadd.f32 %v3566_v3, %v661_v4  ;;  %v3140_v16 = vpop.eup %3139 }
 0x1c6   : > { %v621_v24 = vmul.f32 %v3138_v26, %v620_v52  ;;  %v627_v25 = vmul.f32 %v3140_v16, %v564_v46  ;;  %vm633_vm7 = vweird.f32 %v3140_v16 }
 0x1c7   : > { %v1138_v61 = vmul.f32 %v3614_v14, %v3614_v14  ;;  %vm634_vm9 = vmor %vm632_vm8, %vm633_vm7 }
 0x1c8   : > { %v625_v63 = vsel %vm624_vm6, %v3138_v26, %v621_v24  ;;  %v628_v26 = vmul.f32 %v3140_v16, %v627_v25  ;;  %v3650_v25 = vld [vmem:[%s4737_s6] ss:$0 sm:$0xff] }
 0x1c9   : > { %v651_v60 = vmul.f32 %v625_v63, %v3479_v32  ;;  %v1156_v2 = vsel %vm470_vm1, %v1138_v61, 0.0 }
 0x1ca   : > { %1157 = vadd.xlane.f32.xlu1 %v1156_v2  ;;  %v1113_v5 = vpop.xlane.xlu2 %1112  ;;  %v629_v31 = vmul.f32 0.5, %v628_v26 }
 0x1cb   : > { %v1123_v21 = vmul.f32 %v1113_v5, %v3417_v48  ;;  %v662_v6 = vmul.f32 %v3549_v50, %v651_v60 }
 0x1cc   : > { %v630_v36 = vsub.f32 1.5, %v629_v31 }
 0x1cd   : > { %v3624_v7 = vsub.f32 %v3504_v51, %v1123_v21  ;;  %v673_v11 = vadd.f32 %v3566_v3, %v662_v6 }
 0x1ce   : > { %v631_v13 = vmul.f32 %v3140_v16, %v630_v36 }
 0x1cf   : > { %v678_v1 = vpack.c.bf16 %v673_v11, %v672_v44  ;;  %v1139_v32 = vmul.f32 %v3624_v7, %v3624_v7 }
 0x1d0   : > { %v635_v24 = vsel %vm634_vm9, %v3140_v16, %v631_v13 }
 0x1d1   : > { %2926 = vmatmul.msk.bf16.gmra.mxu1 %vm470_vm1, %v678_v1  ;;  %v1159_v12 = vsel %vm470_vm1, %v1139_v32, 0.0  ;;  %v652_v4 = vmul.f32 %v635_v24, %v3491_v42 }
 0x1d2   : > { %1160 = vadd.xlane.f32.xlu2 %v1159_v12 }
 0x1d3   : > { %v663_v26 = vmul.f32 %v3549_v50, %v652_v4 }
 0x215   : > { %v549_v17 = vpop.xlane.xlu0 %548 }
 0x216   : > { %v557_v10 = vmul.f32 %v549_v17, %v3417_v48 }
 0x218   : > { %v565_v35 = vadd.f32 1e-06, %v557_v10 }
 0x21a   : > { %3141 = vrsqrt.f32 %v565_v35  ;;  %vm642_vm11 = vweird.f32 %v565_v35 }
 0x21d   : > { %v1146_v38 = vpop.xlane.xlu1 %1145 }
 0x21e   : > { %v1166_v39 = vmul.f32 %v1146_v38, %v3417_v48  ;;  %v1143_v43 = vpop.xlane.xlu0 %1142 }
 0x21f   : > { %v1165_v45 = vmul.f32 %v1143_v43, %v3417_v48 }
 0x220   : > { %v3142_v53 = vpop.eup %3141  ;;  %v1174_v18 = vadd.f32 1e-06, %v1166_v39 }
 0x221   : > { %v637_v55 = vmul.f32 %v3142_v53, %v565_v35  ;;  %v1173_v52 = vadd.f32 1e-06, %v1165_v45  ;;  %vm643_vm10 = vweird.f32 %v3142_v53 }
 0x222   : > { %3143 = vrsqrt.f32 %v1174_v18  ;;  %vm644_vm12 = vmor %vm642_vm11, %vm643_vm10  ;;  %vm1197_vm15 = vweird.f32 %v1174_v18 }
 0x223   : > { %v638_v58 = vmul.f32 %v3142_v53, %v637_v55  ;;  %3145 = vrsqrt.f32 %v1173_v52  ;;  %v674_v55 = vadd.f32 %v3566_v3, %v663_v26  ;;  %vm1187_vm3 = vweird.f32 %v1173_v52 }
 0x225   : > { %v639_v61 = vmul.f32 0.5, %v638_v58  ;;  %v1149_v63 = vpop.xlane.xlu1 %1148 }
 0x226   : > { %v1167_v60 = vmul.f32 %v1149_v63, %v3417_v48  ;;  %v1116_v2 = vpop.xlane.xlu0 %1115 }
 0x227   : > { %v640_v5 = vsub.f32 1.5, %v639_v61  ;;  %v1124_v21 = vmul.f32 %v1116_v2, %v3417_v48 }
 0x228   : > { %v3144_v6 = vpop.eup %3143  ;;  %v3639_v44 = vadd.f32 1e-06, %v1167_v60 }
 0x229   : > { %v3146_v11 = vpop.eup %3145  ;;  %v641_v1 = vmul.f32 %v3142_v53, %v640_v5  ;;  %v1192_v32 = vmul.f32 %v3144_v6, %v1174_v18  ;;  %v3642_v12 = vsub.f32 %v3579_v33, %v1124_v21  ;;  %vm1198_vm13 = vweird.f32 %v3144_v6 }
 0x22a   : > { %v1182_v57 = vmul.f32 %v3146_v11, %v1173_v52  ;;  %3147 = vrsqrt.f32 %v3639_v44  ;;  %vm1188_vm14 = vweird.f32 %v3146_v11  ;;  %vm1199_vm2 = vmor %vm1197_vm15, %vm1198_vm13  ;;  %vm1207_vm7 = vweird.f32 %v3639_v44 }
 0x22b   : > { %v645_v46 = vsel %vm644_vm12, %v3142_v53, %v641_v1  ;;  %v1193_v42 = vmul.f32 %v3144_v6, %v1192_v32  ;;  %v1140_v16 = vmul.f32 %v3642_v12, %v3642_v12  ;;  %vm1189_vm4 = vmor %vm1187_vm3, %vm1188_vm14 }
 0x22c   : > { %v653_v17 = vmul.f32 %v645_v46, %v3531_v15  ;;  %v1183_v10 = vmul.f32 %v3146_v11, %v1182_v57 }
 0x22d   : > { %v1194_v31 = vmul.f32 0.5, %v1193_v42  ;;  %v1162_v35 = vsel %vm470_vm1, %v1140_v16, 0.0  ;;  %v1152_v36 = vpop.xlane.xlu2 %1151 }
 0x22e   : > { %v1184_v38 = vmul.f32 0.5, %v1183_v10  ;;  %1163 = vadd.xlane.f32.xlu0 %v1162_v35  ;;  %v1168_v39 = vmul.f32 %v1152_v36, %v3417_v48  ;;  %v716_v43 = vpop.f32.mrf.mxu1  ;;  %v664_v45 = vmul.f32 %v3549_v50, %v653_v17 }
 0x22f   : > { %v1195_v53 = vsub.f32 1.5, %v1194_v31  ;;  %v717_v13 = vadd.f32 %v3650_v25, %v716_v43 }
 0x230   : > { %v3659_v58 = vpop.eup %3147  ;;  %v1185_v15 = vsub.f32 1.5, %v1184_v38  ;;  %v3661_v24 = vadd.f32 1e-06, %v1168_v39  ;;  %v675_v61 = vadd.f32 %v3566_v3, %v664_v45 }
 0x231   : > { %v1196_v63 = vmul.f32 %v3144_v6, %v1195_v53  ;;  %v1202_v60 = vmul.f32 %v3659_v58, %v3639_v44  ;;  %v736_v2 = vpack.c.bf16 %v717_v13, %v717_v13  ;;  %v3695_v13 = vld [vmem:[%s4738_s7 + $0x30] sm:$0xff]  ;;  %vm1208_vm5 = vweird.f32 %v3659_v58 }
 0x232   : > { %v1186_v4 = vmul.f32 %v3146_v11, %v1185_v15  ;;  %3149 = vrsqrt.f32 %v3661_v24  ;;  %v679_v5 = vpack.c.bf16 %v675_v61, %v674_v55  ;;  %vm3722_vm8 = vmor %vm1207_vm7, %vm1208_vm5  ;;  %vm1217_vm9 = vweird.f32 %v3661_v24 }
 0x233   : > { %v1200_v21 = vsel %vm1199_vm2, %v3144_v6, %v1196_v63  ;;  %v1203_v1 = vmul.f32 %v3659_v58, %v1202_v60  ;;  %v3668_v32 = vunpack.c.l.bf16 %v736_v2 }
 0x234   : > { %v1190_v57 = vsel %vm1189_vm4, %v3146_v11, %v1186_v4  ;;  %2927 = vmatmul.msk.bf16.gmra.mxu1 %vm470_vm1, %v679_v5  ;;  %v1262_v18 = vmul.f32 %v1200_v21, %v3544_v49  ;;  %v3680_v11 = vld [vmem:[%s4738_s7 + $0x38] sm:$0xff] }
 0x235   : > { %v752_v46 = vmul.f32 %v3668_v32, %v3668_v32  ;;  %v1155_v42 = vpop.xlane.xlu0 %1154  ;;  %v1261_v52 = vmul.f32 %v1190_v57, %v3553_v56  ;;  %v1204_v16 = vmul.f32 0.5, %v1203_v1  ;;  %1007 = vmatpush.bf16.msra.mxu2 %v3680_v11  ;;  %1550 = vmatpush.bf16.msrb.mxu0 %v3680_v11 }
 0x236   : > { %v1169_v26 = vmul.f32 %v1155_v42, %v3417_v48  ;;  %v718_v6 = vpop.f32.mrf.mxu1  ;;  %v1270_v56 = vmul.f32 %v3549_v50, %v1262_v18  ;;  %2097 = vmatpush.bf16.msra.mxu1 %v3680_v11  ;;  %v3713_v42 = vld [vmem:[%s4738_s7 + $0x28] sm:$0xff] }
 0x237   : > { %v760_v17 = vpack.c.bf16 %v752_v46, %v752_v46  ;;  %v719_v10 = vadd.f32 %v3650_v25, %v718_v6  ;;  %v1205_v38 = vsub.f32 1.5, %v1204_v16  ;;  %v1269_v43 = vmul.f32 %v3549_v50, %v1261_v52 }
 0x238   : > { %v3150_v31 = vpop.eup %3149  ;;  %v3682_v49 = vadd.f32 1e-06, %v1169_v26  ;;  %v1278_v60 = vadd.f32 %v3566_v3, %v1270_v56 }
 0x239   : > { %v1212_v35 = vmul.f32 %v3150_v31, %v3661_v24  ;;  %v768_v36 = vunpack.c.l.bf16 %v760_v17  ;;  %v737_v39 = vpack.c.bf16 %v719_v10, %v719_v10  ;;  %1008 = vmatpush.bf16.msra.mxu2 %v3695_v13  ;;  %1551 = vmatpush.bf16.msrb.mxu0 %v3695_v13  ;;  %v1206_v2 = vmul.f32 %v3659_v58, %v1205_v38 }
 0x23a   : > { %3151 = vrsqrt.f32 %v3682_v49  ;;  %v1277_v1 = vadd.f32 %v3566_v3, %v1269_v43  ;;  %2098 = vmatpush.bf16.msra.mxu1 %v3695_v13  ;;  %vm1218_vm6 = vweird.f32 %v3150_v31  ;;  %v3740_v43 = vld [vmem:[%s4738_s7 + $0x20] sm:$0xff]  ;;  %vm1227_vm15 = vweird.f32 %v3682_v49 }
 0x23b   : > { %v1213_v45 = vmul.f32 %v3150_v31, %v1212_v35  ;;  %v776_v53 = vmul.f32 %v768_v36, %v3668_v32  ;;  %v3697_v55 = vunpack.c.l.bf16 %v737_v39  ;;  %vm1219_vm10 = vmor %vm1217_vm9, %vm1218_vm6  ;;  %v1210_v24 = vsel %vm3722_vm8, %v3659_v58, %v1206_v2 }
 0x23c   : > { %v1285_v56 = vpack.c.bf16 %v1278_v60, %v1277_v1  ;;  %v1263_v58 = vmul.f32 %v1210_v24, %v3573_v22 }
 0x23d   : > { %v1214_v15 = vmul.f32 0.5, %v1213_v45  ;;  %v784_v61 = vpack.c.bf16 %v776_v53, %v776_v53  ;;  %v1158_v63 = vpop.xlane.xlu1 %1157  ;;  %v753_v4 = vmul.f32 %v3697_v55, %v3697_v55  ;;  %1009 = vmatpush.bf16.msra.mxu2 %v3713_v42  ;;  %1552 = vmatpush.bf16.msrb.mxu0 %v3713_v42 }
 0x23e   : > { %v1170_v5 = vmul.f32 %v1158_v63, %v3417_v48  ;;  %v721_v21 = vpop.f32.mrf.mxu1  ;;  %2099 = vmatpush.bf16.msra.mxu1 %v3713_v42 }
 0x23f   : > { %v1215_v57 = vsub.f32 1.5, %v1214_v15  ;;  %v792_v18 = vunpack.c.l.bf16 %v784_v61  ;;  %v722_v46 = vadd.f32 %v3650_v25, %v721_v21  ;;  %v761_v16 = vpack.c.bf16 %v753_v4, %v753_v4 }
 0x240   : > { %v3715_v52 = vpop.eup %3151  ;;  %v3718_v26 = vadd.f32 1e-06, %v1170_v5 }
 0x241   : > { %v1216_v17 = vmul.f32 %v3150_v31, %v1215_v57  ;;  %v800_v10 = vmul.f32 0.044677734, %v792_v18  ;;  %v1222_v35 = vmul.f32 %v3715_v52, %v3682_v49  ;;  %v769_v44 = vunpack.c.l.bf16 %v761_v16  ;;  %1010 = vmatpush.bf16.msra.mxu2 %v3740_v43  ;;  %1553 = vmatpush.bf16.msrb.mxu0 %v3740_v43 }
 0x242   : > { %3153 = vrsqrt.f32 %v3718_v26  ;;  %v738_v36 = vpack.c.bf16 %v722_v46, %v722_v46  ;;  %2100 = vmatpush.bf16.msra.mxu1 %v3740_v43  ;;  %vm1228_vm12 = vweird.f32 %v3715_v52  ;;  %vm1237_vm13 = vweird.f32 %v3718_v26 }
 0x243   : > { %v1220_v38 = vsel %vm1219_vm10, %v3150_v31, %v1216_v17  ;;  %v808_v39 = vpack.c.bf16 %v800_v10, %v800_v10  ;;  %v1223_v45 = vmul.f32 %v3715_v52, %v1222_v35  ;;  %v777_v53 = vmul.f32 %v769_v44, %v3697_v55  ;;  %vm3818_vm2 = vmor %vm1227_vm15, %vm1228_vm12 }
 0x244   : > { %v3744_v15 = vunpack.c.l.bf16 %v738_v36  ;;  %2964 = vmatmul.msk.bf16.vlgmr.msrb.gmra.mxu1 %vm470_vm1, %v1285_v56  ;;  %v1264_v61 = vmul.f32 %v1220_v38, %v3592_v62  ;;  %v3759_v62 = vld [vmem:[%s4738_s7 + $0x18] sm:$0xff]  ;;  %v1271_v10 = vmul.f32 %v3549_v50, %v1263_v58  ;;  %v3774_v56 = vld [vmem:[%s4738_s7 + $0x10] sm:$0xff] }
 0x245   : > { %v816_v63 = vunpack.c.l.bf16 %v808_v39  ;;  %v785_v31 = vpack.c.bf16 %v777_v53, %v777_v53  ;;  %v1224_v1 = vmul.f32 0.5, %v1223_v45  ;;  %1011 = vmatpush.bf16.msra.mxu2 %v3759_v62  ;;  %1554 = vmatpush.bf16.msrb.mxu0 %v3759_v62 }
 0x246   : > { %v754_v60 = vmul.f32 %v3744_v15, %v3744_v15  ;;  %v723_v2 = vpop.f32.mrf.mxu1  ;;  %v1272_v16 = vmul.f32 %v3549_v50, %v1264_v61  ;;  %2101 = vmatpush.bf16.msra.mxu1 %v3759_v62 }
 0x247   : > { %v824_v4 = vadd.f32 %v816_v63, %v3668_v32  ;;  %v724_v5 = vadd.f32 %v3650_v25, %v723_v2  ;;  %v793_v22 = vunpack.c.l.bf16 %v785_v31  ;;  %v1225_v24 = vsub.f32 1.5, %v1224_v1 }
 0x248   : > { %v3761_v21 = vpop.eup %3153  ;;  %v762_v57 = vpack.c.bf16 %v754_v60, %v754_v60  ;;  %v1280_v63 = vadd.f32 %v3566_v3, %v1272_v16  ;;  %v1279_v2 = vadd.f32 %v3566_v3, %v1271_v10 }
 0x249   : > { %v832_v18 = vpack.c.bf16 %v824_v4, %v824_v4  ;;  %v1232_v46 = vmul.f32 %v3761_v21, %v3718_v26  ;;  %v801_v6 = vmul.f32 0.044677734, %v793_v22  ;;  %v739_v36 = vpack.c.bf16 %v724_v5, %v724_v5  ;;  %1012 = vmatpush.bf16.msra.mxu2 %v3774_v56  ;;  %1555 = vmatpush.bf16.msrb.mxu0 %v3774_v56 }
 0x24a   : > { %v770_v17 = vunpack.c.l.bf16 %v762_v57  ;;  %vm1238_vm11 = vweird.f32 %v3761_v21  ;;  %2102 = vmatpush.bf16.msra.mxu1 %v3774_v56  ;;  %v3791_v57 = vld [vmem:[%s4738_s7 + $0x8] sm:$0xff]  ;;  %v1286_v10 = vpack.c.bf16 %v1280_v63, %v1279_v2 }
 0x24b   : > { %v840_v35 = vunpack.c.l.bf16 %v832_v18  ;;  %v1233_v44 = vmul.f32 %v3761_v21, %v1232_v46  ;;  %v809_v38 = vpack.c.bf16 %v801_v6, %v801_v6  ;;  %v3777_v61 = vunpack.c.l.bf16 %v739_v36  ;;  %vm3802_vm14 = vmor %vm1237_vm13, %vm1238_vm11 }
 0x24c   : > { %v778_v39 = vmul.f32 %v770_v17, %v3744_v15  ;;  %v1226_v18 = vmul.f32 %v3715_v52, %v1225_v24 }
 0x24d   : > { %v848_v45 = vmul.f32 0.796875, %v840_v35  ;;  %v1234_v53 = vmul.f32 0.5, %v1233_v44  ;;  %v817_v58 = vunpack.c.l.bf16 %v809_v38  ;;  %v755_v1 = vmul.f32 %v3777_v61, %v3777_v61  ;;  %1013 = vmatpush.bf16.msra.mxu2 %v3791_v57  ;;  %1556 = vmatpush.bf16.msrb.mxu0 %v3791_v57 }
 0x24e   : > { %v786_v31 = vpack.c.bf16 %v778_v39, %v778_v39  ;;  %v726_v60 = vpop.f32.mrf.mxu1  ;;  %2103 = vmatpush.bf16.msra.mxu1 %v3791_v57  ;;  %v1230_v49 = vsel %vm3818_vm2, %v3715_v52, %v1226_v18 }
 0x24f   : > { %v856_v4 = vpack.c.bf16 %v848_v45, %v848_v45  ;;  %v1235_v5 = vsub.f32 1.5, %v1234_v53  ;;  %v727_v22 = vadd.f32 %v3650_v25, %v726_v60  ;;  %v825_v46 = vadd.f32 %v817_v58, %v3697_v55  ;;  %v3814_v45 = vld [vmem:[%s4738_s7] sm:$0xff] }
 0x250   : > { %v794_v16 = vunpack.c.l.bf16 %v786_v31  ;;  %v763_v17 = vpack.c.bf16 %v755_v1, %v755_v1 }
 0x251   : > { %v1236_v6 = vmul.f32 %v3761_v21, %v1235_v5  ;;  %v833_v35 = vpack.c.bf16 %v825_v46, %v825_v46  ;;  %v740_v24 = vpack.c.bf16 %v727_v22, %v727_v22  ;;  %v864_v38 = vunpack.c.l.bf16 %v856_v4  ;;  %1014 = vmatpush.bf16.msra.mxu2 %v3814_v45  ;;  %1557 = vmatpush.bf16.msrb.mxu0 %v3814_v45  ;;  %v3255_v22 = vld [vmem:[%s4732_s1 + $0x18] sm:$0xff] }
 0x252   : > { %v802_v36 = vmul.f32 0.044677734, %v794_v16  ;;  %v771_v39 = vunpack.c.l.bf16 %v763_v17  ;;  %2104 = vmatpush.bf16.msra.mxu1 %v3814_v45  ;;  %v1265_v46 = vmul.f32 %v1230_v49, %v3603_v28 }
 0x253   : > { %v1240_v26 = vsel %vm3802_vm14, %v3761_v21, %v1236_v6  ;;  %v841_v63 = vunpack.c.l.bf16 %v833_v35  ;;  %v3822_v31 = vunpack.c.l.bf16 %v740_v24  ;;  %3155 = vtanh.f32 %v864_v38 }
 0x254   : > { %v810_v58 = vpack.c.bf16 %v802_v36, %v802_v36  ;;  %2965 = vmatmul.msk.bf16.gmra.mxu1 %vm470_vm1, %v1286_v10  ;;  %v779_v21 = vmul.f32 %v771_v39, %v3777_v61  ;;  %v1266_v2 = vmul.f32 %v1240_v26, %v3614_v14 }
 0x255   : > { %v849_v60 = vmul.f32 0.796875, %v841_v63  ;;  %v756_v5 = vmul.f32 %v3822_v31, %v3822_v31  ;;  %2158 = vmatpush.bf16.msra.mxu0 %v3255_v22  ;;  %1854 = vmatpush.bf16.msrb.mxu2 %v3511_v54  ;;  %v3256_v54 = vld [vmem:[%s4732_s1 + $0x10] sm:$0xff]  ;;  %v1273_v63 = vmul.f32 %v3549_v50, %v1265_v46 }
 0x256   : > { %v818_v4 = vunpack.c.l.bf16 %v810_v58  ;;  %v728_v1 = vpop.f32.mrf.mxu1  ;;  %v787_v52 = vpack.c.bf16 %v779_v21, %v779_v21  ;;  %v1274_v36 = vmul.f32 %v3549_v50, %v1266_v2 }
 0x257   : > { %v729_v18 = vadd.f32 %v3650_v25, %v728_v1  ;;  %v857_v14 = vpack.c.bf16 %v849_v60, %v849_v60  ;;  %v764_v6 = vpack.c.bf16 %v756_v5, %v756_v5 }
 0x258   : > { %v826_v16 = vadd.f32 %v818_v4, %v3744_v15  ;;  %v795_v17 = vunpack.c.l.bf16 %v787_v52  ;;  %v1282_v4 = vadd.f32 %v3566_v3, %v1274_v36 }
 0x259   : > { %v741_v10 = vpack.c.bf16 %v729_v18, %v729_v18  ;;  %v772_v44 = vunpack.c.l.bf16 %v764_v6  ;;  %v865_v24 = vunpack.c.l.bf16 %v857_v14  ;;  %2159 = vmatpush.bf16.msra.mxu0 %v3256_v54  ;;  %1855 = vmatpush.bf16.msrb.mxu2 %v3519_v59  ;;  %v3156_v38 = vpop.eup %3155  ;;  %v3257_v59 = vld [vmem:[%s4732_s1 + $0x8] sm:$0xff]  ;;  %v1281_v18 = vadd.f32 %v3566_v3, %v1273_v63 }
 0x25a   : > { %v834_v35 = vpack.c.bf16 %v826_v16, %v826_v16  ;;  %v803_v28 = vmul.f32 0.044677734, %v795_v17  ;;  %v880_v21 = vpack.c.bf16 %v3156_v38, %v3156_v38 }
 0x25b   : > { %v3847_v26 = vunpack.c.l.bf16 %v741_v10  ;;  %v780_v53 = vmul.f32 %v772_v44, %v3822_v31  ;;  %3157 = vtanh.f32 %v865_v24  ;;  %v1287_v10 = vpack.c.bf16 %v1282_v4, %v1281_v18  ;;  %v3258_v44 = vld [vmem:[%s4732_s1] sm:$0xff] }
 0x25c   : > { %v842_v39 = vunpack.c.l.bf16 %v834_v35  ;;  %v811_v58 = vpack.c.bf16 %v803_v28, %v803_v28  ;;  %v888_v22 = vunpack.c.l.bf16 %v880_v21 }
 0x25d   : > { %v757_v49 = vmul.f32 %v3847_v26, %v3847_v26  ;;  %v788_v2 = vpack.c.bf16 %v780_v53, %v780_v53  ;;  %2160 = vmatpush.bf16.msra.mxu0 %v3257_v59 }
 0x25e   : > { %v850_v60 = vmul.f32 0.796875, %v842_v39  ;;  %v819_v5 = vunpack.c.l.bf16 %v811_v58  ;;  %v896_v16 = vadd.f32 1.0, %v888_v22 }
 0x25f   : > { %v765_v1 = vpack.c.bf16 %v757_v49, %v757_v49  ;;  %v796_v50 = vunpack.c.l.bf16 %v788_v2 }
 0x260   : > { %v858_v52 = vpack.c.bf16 %v850_v60, %v850_v60  ;;  %v827_v46 = vadd.f32 %v819_v5, %v3777_v61  ;;  %v904_v38 = vpack.c.bf16 %v896_v16, %v896_v16 }
 0x261   : > { %v773_v14 = vunpack.c.l.bf16 %v765_v1  ;;  %v3158_v6 = vpop.eup %3157  ;;  %v804_v17 = vmul.f32 0.044677734, %v796_v50  ;;  %2161 = vmatpush.bf16.msra.mxu0 %v3258_v44 }
 0x262   : > { %v866_v35 = vunpack.c.l.bf16 %v858_v52  ;;  %v835_v36 = vpack.c.bf16 %v827_v46, %v827_v46  ;;  %v881_v54 = vpack.c.bf16 %v3158_v6, %v3158_v6  ;;  %v912_v63 = vunpack.c.l.bf16 %v904_v38 }
 0x263   : > { %v781_v24 = vmul.f32 %v773_v14, %v3847_v26  ;;  %v812_v28 = vpack.c.bf16 %v804_v17, %v804_v17 }
 0x264   : > { %2966 = vmatmul.msk.bf16.gmra.mxu1 %vm470_vm1, %v1287_v10  ;;  %3159 = vtanh.f32 %v866_v35  ;;  %v843_v3 = vunpack.c.l.bf16 %v835_v36  ;;  %v889_v53 = vunpack.c.l.bf16 %v881_v54  ;;  %v920_v2 = vmul.f32 0.5, %v912_v63 }
 0x265   : > { %v789_v39 = vpack.c.bf16 %v781_v24, %v781_v24  ;;  %v820_v58 = vunpack.c.l.bf16 %v812_v28 }
 0x266   : > { %v851_v49 = vmul.f32 0.796875, %v843_v3  ;;  %v897_v60 = vadd.f32 1.0, %v889_v53  ;;  %v928_v46 = vpack.c.bf16 %v920_v2, %v920_v2 }
 0x267   : > { %v797_v21 = vunpack.c.l.bf16 %v789_v39  ;;  %v828_v4 = vadd.f32 %v820_v58, %v3822_v31 }
 0x268   : > { %v859_v59 = vpack.c.bf16 %v851_v49, %v851_v49  ;;  %v905_v1 = vpack.c.bf16 %v897_v60, %v897_v60  ;;  %v936_v54 = vunpack.c.l.bf16 %v928_v46 }
 0x269   : > { %v805_v5 = vmul.f32 0.044677734, %v797_v21  ;;  %v836_v52 = vpack.c.bf16 %v828_v4, %v828_v4 }
 0x26a   : > { %v3160_v22 = vpop.eup %3159  ;;  %v913_v18 = vunpack.c.l.bf16 %v905_v1  ;;  %v867_v14 = vunpack.c.l.bf16 %v859_v59  ;;  %v944_v21 = vmul.f32 %v936_v54, %v3668_v32 }
 0x26b   : > { %v813_v50 = vpack.c.bf16 %v805_v5, %v805_v5  ;;  %v844_v16 = vunpack.c.l.bf16 %v836_v52  ;;  %v882_v6 = vpack.c.bf16 %v3160_v22, %v3160_v22 }
 0x26c   : > { %v921_v10 = vmul.f32 0.5, %v913_v18  ;;  %3161 = vtanh.f32 %v867_v14 }
 0x26d   : > { %v821_v17 = vunpack.c.l.bf16 %v813_v50  ;;  %v852_v35 = vmul.f32 0.796875, %v844_v16  ;;  %v890_v44 = vunpack.c.l.bf16 %v882_v6 }
 0x26e   : > { %v929_v24 = vpack.c.bf16 %v921_v10, %v921_v10 }
 0x26f   : > { %v829_v36 = vadd.f32 %v821_v17, %v3847_v26  ;;  %v860_v38 = vpack.c.bf16 %v852_v35, %v852_v35  ;;  %v898_v28 = vadd.f32 1.0, %v890_v44 }
 0x270   : > { %v937_v39 = vunpack.c.l.bf16 %v929_v24 }
 0x271   : > { %v837_v3 = vpack.c.bf16 %v829_v36, %v829_v36  ;;  %v906_v53 = vpack.c.bf16 %v898_v28, %v898_v28  ;;  %v868_v63 = vunpack.c.l.bf16 %v860_v38 }
 0x272   : > { %v3162_v58 = vpop.eup %3161  ;;  %v945_v60 = vmul.f32 %v937_v39, %v3697_v55 }
 0x273   : > { %v845_v49 = vunpack.c.l.bf16 %v837_v3  ;;  %v883_v2 = vpack.c.bf16 %v3162_v58, %v3162_v58  ;;  %v914_v4 = vunpack.c.l.bf16 %v906_v53  ;;  %3163 = vtanh.f32 %v868_v63 }
 0x274   : > { %v952_v5 = vpack.c.bf16 %v945_v60, %v944_v21 }
 0x275   : > { %v853_v59 = vmul.f32 0.796875, %v845_v49  ;;  %v891_v1 = vunpack.c.l.bf16 %v883_v2  ;;  %v922_v50 = vmul.f32 0.5, %v914_v4  ;;  %v1161_v49 = vpop.xlane.xlu2 %1160 }
 0x276   : > { %1015 = vmatmul.bf16.vlgmr.msra.gmra.mxu2 %v952_v5  ;;  %v1171_v60 = vmul.f32 %v1161_v49, %v3417_v48 }
 0x277   : > { %v861_v22 = vpack.c.bf16 %v853_v59, %v853_v59  ;;  %v899_v52 = vadd.f32 1.0, %v891_v1  ;;  %2640 = vmatpush.bf16.msra.mxu2 %v3680_v11  ;;  %v930_v6 = vpack.c.bf16 %v922_v50, %v922_v50 }
 0x278   : > { %v1179_v4 = vadd.f32 1e-06, %v1171_v60 }
 0x279   : > { %v869_v18 = vunpack.c.l.bf16 %v861_v22  ;;  %v3164_v46 = vpop.eup %3163  ;;  %v907_v14 = vpack.c.bf16 %v899_v52, %v899_v52  ;;  %v938_v44 = vunpack.c.l.bf16 %v930_v6 }
 0x27a   : > { %v884_v16 = vpack.c.bf16 %v3164_v46, %v3164_v46  ;;  %vm1247_vm4 = vweird.f32 %v1179_v4 }
 0x27b   : > { %3165 = vtanh.f32 %v869_v18  ;;  %v915_v32 = vunpack.c.l.bf16 %v907_v14  ;;  %2641 = vmatpush.bf16.msra.mxu2 %v3695_v13  ;;  %v946_v28 = vmul.f32 %v938_v44, %v3744_v15 }
 0x27c   : > { %v892_v55 = vunpack.c.l.bf16 %v884_v16  ;;  %3167 = vrsqrt.f32 %v1179_v4 }
 0x27d   : > { %v923_v17 = vmul.f32 0.5, %v915_v32 }
 0x27e   : > { %v900_v10 = vadd.f32 1.0, %v892_v55 }
 0x27f   : > { %v931_v35 = vpack.c.bf16 %v923_v17, %v923_v17  ;;  %2642 = vmatpush.bf16.msra.mxu2 %v3713_v42 }
 0x280   : > { %v908_v24 = vpack.c.bf16 %v900_v10, %v900_v10 }
 0x281   : > { %v3166_v36 = vpop.eup %3165  ;;  %v939_v54 = vunpack.c.l.bf16 %v931_v35 }
 0x282   : > { %v885_v11 = vpack.c.bf16 %v3166_v36, %v3166_v36  ;;  %v916_v38 = vunpack.c.l.bf16 %v908_v24 }
 0x283   : > { %v947_v3 = vmul.f32 %v939_v54, %v3777_v61  ;;  %2643 = vmatpush.bf16.msra.mxu2 %v3740_v43 }
 0x284   : > { %v893_v39 = vunpack.c.l.bf16 %v885_v11  ;;  %v924_v63 = vmul.f32 0.5, %v916_v38  ;;  %v3259_v38 = vld [vmem:[%s4734_s3] ss:$0 sm:$0xff] }
 0x285   : > { %v953_v13 = vpack.c.bf16 %v947_v3, %v946_v28 }
 0x286   : > { %v901_v53 = vadd.f32 1.0, %v893_v39  ;;  %v932_v21 = vpack.c.bf16 %v924_v63, %v924_v63 }
 0x287   : > { %1020 = vmatmul.bf16.gmra.mxu2 %v953_v13 }
 0x288   : > { %v909_v58 = vpack.c.bf16 %v901_v53, %v901_v53  ;;  %2644 = vmatpush.bf16.msra.mxu2 %v3759_v62  ;;  %v940_v61 = vunpack.c.l.bf16 %v932_v21  ;;  %v3168_v62 = vpop.eup %3167 }
 0x289   : > { %v1242_v22 = vmul.f32 %v3168_v62, %v1179_v4  ;;  %vm1248_vm3 = vweird.f32 %v3168_v62 }
 0x28a   : > { %v917_v42 = vunpack.c.l.bf16 %v909_v58  ;;  %v948_v43 = vmul.f32 %v940_v61, %v3822_v31  ;;  %vm1249_vm5 = vmor %vm1247_vm4, %vm1248_vm3  ;;  %v3260_v58 = vld [vmem:[%s4735_s4] ss:$0 sm:$0xff] }
 0x28b   : > { %v1243_v52 = vmul.f32 %v3168_v62, %v1242_v22 }
 0x28c   : > { %v925_v2 = vmul.f32 0.5, %v917_v42  ;;  %2645 = vmatpush.bf16.msra.mxu2 %v3774_v56 }
 0x28d   : > { %v1244_v46 = vmul.f32 0.5, %v1243_v52 }
 0x28e   : > { %v933_v15 = vpack.c.bf16 %v925_v2, %v925_v2 }
 0x28f   : > { %v1245_v14 = vsub.f32 1.5, %v1244_v46 }
 0x290   : > { %v941_v59 = vunpack.c.l.bf16 %v933_v15  ;;  %2646 = vmatpush.bf16.msra.mxu2 %v3791_v57 }
 0x291   : > { %v1246_v16 = vmul.f32 %v3168_v62, %v1245_v14 }
 0x292   : > { %v949_v5 = vmul.f32 %v941_v59, %v3847_v26 }
 0x293   : > { %v1250_v32 = vsel %vm1249_vm5, %v3168_v62, %v1246_v16 }
 0x294   : > { %v954_v1 = vpack.c.bf16 %v949_v5, %v948_v43  ;;  %2647 = vmatpush.bf16.msra.mxu2 %v3814_v45  ;;  %v1267_v10 = vmul.f32 %v1250_v32, %v3624_v7 }
 0x296   : > { %v1275_v28 = vmul.f32 %v3259_v38, %v1267_v10 }
 0x297   : > { %1025 = vmatmul.bf16.gmra.mxu2 %v954_v1 }
 0x2a1   : > { %v1164_v50 = vpop.xlane.xlu0 %1163 }
 0x2a2   : > { %v1172_v56 = vmul.f32 %v1164_v50, %v3417_v48 }
 0x2a4   : > { %v1180_v18 = vadd.f32 1e-06, %v1172_v56 }
 0x2a6   : > { %3169 = vrsqrt.f32 %v1180_v18  ;;  %vm1257_vm7 = vweird.f32 %v1180_v18 }
 0x2ac   : > { %v3170_v57 = vpop.eup %3169 }
 0x2ad   : > { %v1252_v31 = vmul.f32 %v3170_v57, %v1180_v18  ;;  %vm1258_vm6 = vweird.f32 %v3170_v57 }
 0x2ae   : > { %vm1259_vm8 = vmor %vm1257_vm7, %vm1258_vm6 }
 0x2af   : > { %v1253_v26 = vmul.f32 %v3170_v57, %v1252_v31 }
 0x2b1   : > { %v1254_v45 = vmul.f32 0.5, %v1253_v26  ;;  %v731_v6 = vpop.f32.mrf.mxu1 }
 0x2b2   : > { %v732_v55 = vadd.f32 %v3650_v25, %v731_v6 }
 0x2b3   : > { %v1255_v17 = vsub.f32 1.5, %v1254_v45 }
 0x2b4   : > { %v742_v35 = vpack.c.bf16 %v732_v55, %v732_v55 }
 0x2b5   : > { %v1256_v44 = vmul.f32 %v3170_v57, %v1255_v17 }
 0x2b6   : > { %v3884_v36 = vunpack.c.l.bf16 %v742_v35 }
 0x2b7   : > { %v1260_v24 = vsel %vm1259_vm8, %v3170_v57, %v1256_v44 }
 0x2b8   : > { %v1268_v54 = vmul.f32 %v1260_v24, %v3642_v12  ;;  %v758_v11 = vmul.f32 %v3884_v36, %v3884_v36  ;;  %v1283_v12 = vadd.f32 %v3260_v58, %v1275_v28 }
 0x2b9   : > { %v733_v3 = vpop.f32.mrf.mxu1 }
 0x2ba   : > { %v766_v39 = vpack.c.bf16 %v758_v11, %v758_v11  ;;  %v734_v7 = vadd.f32 %v3650_v25, %v733_v3  ;;  %v1276_v13 = vmul.f32 %v3259_v38, %v1268_v54 }
 0x2bc   : > { %v774_v53 = vunpack.c.l.bf16 %v766_v39  ;;  %v743_v63 = vpack.c.bf16 %v734_v7, %v734_v7  ;;  %v1284_v49 = vadd.f32 %v3260_v58, %v1276_v13 }
 0x2be   : > { %v782_v42 = vmul.f32 %v774_v53, %v3884_v36  ;;  %v3897_v21 = vunpack.c.l.bf16 %v743_v63  ;;  %v1288_v60 = vpack.c.bf16 %v1284_v49, %v1283_v12 }
 0x2c0   : > { %v790_v2 = vpack.c.bf16 %v782_v42, %v782_v42  ;;  %v759_v15 = vmul.f32 %v3897_v21, %v3897_v21  ;;  %2967 = vmatmul.msk.bf16.gmra.mxu1 %vm470_vm1, %v1288_v60 }
 0x2c1   : > { %v1310_v61 = vpop.f32.mrf.mxu1 }
 0x2c2   : > { %v798_v4 = vunpack.c.l.bf16 %v790_v2  ;;  %v767_v59 = vpack.c.bf16 %v759_v15, %v759_v15  ;;  %v1311_v43 = vadd.f32 %v3650_v25, %v1310_v61 }
 0x2c4   : > { %v806_v5 = vmul.f32 0.044677734, %v798_v4  ;;  %v775_v1 = vunpack.c.l.bf16 %v767_v59  ;;  %v1330_v62 = vpack.c.bf16 %v1311_v43, %v1311_v43 }
 0x2c6   : > { %v814_v22 = vpack.c.bf16 %v806_v5, %v806_v5  ;;  %v783_v52 = vmul.f32 %v775_v1, %v3897_v21  ;;  %v3904_v50 = vunpack.c.l.bf16 %v1330_v62 }
 0x2c8   : > { %v822_v56 = vunpack.c.l.bf16 %v814_v22  ;;  %v791_v18 = vpack.c.bf16 %v783_v52, %v783_v52  ;;  %v1346_v46 = vmul.f32 %v3904_v50, %v3904_v50 }
 0x2c9   : > { %v1312_v14 = vpop.f32.mrf.mxu1 }
 0x2ca   : > { %v830_v57 = vadd.f32 %v822_v56, %v3884_v36  ;;  %v799_v16 = vunpack.c.l.bf16 %v791_v18  ;;  %v1354_v31 = vpack.c.bf16 %v1346_v46, %v1346_v46  ;;  %v1313_v26 = vadd.f32 %v3650_v25, %v1312_v14 }
 0x2cc   : > { %v838_v32 = vpack.c.bf16 %v830_v57, %v830_v57  ;;  %v807_v45 = vmul.f32 0.044677734, %v799_v16  ;;  %v1362_v6 = vunpack.c.l.bf16 %v1354_v31  ;;  %v1331_v55 = vpack.c.bf16 %v1313_v26, %v1313_v26 }
 0x2ce   : > { %v846_v17 = vunpack.c.l.bf16 %v838_v32  ;;  %v815_v10 = vpack.c.bf16 %v807_v45, %v807_v45  ;;  %v1370_v35 = vmul.f32 %v1362_v6, %v3904_v50  ;;  %v3911_v44 = vunpack.c.l.bf16 %v1331_v55 }
 0x2d0   : > { %v854_v24 = vmul.f32 0.796875, %v846_v17  ;;  %v823_v54 = vunpack.c.l.bf16 %v815_v10  ;;  %v1378_v11 = vpack.c.bf16 %v1370_v35, %v1370_v35  ;;  %v1347_v38 = vmul.f32 %v3911_v44, %v3911_v44 }
 0x2d1   : > { %v1315_v28 = vpop.f32.mrf.mxu1 }
 0x2d2   : > { %v862_v3 = vpack.c.bf16 %v854_v24, %v854_v24  ;;  %v831_v39 = vadd.f32 %v823_v54, %v3897_v21  ;;  %v1386_v7 = vunpack.c.l.bf16 %v1378_v11  ;;  %v1355_v13 = vpack.c.bf16 %v1347_v38, %v1347_v38 }
 0x2d3   : > { %v1316_v53 = vadd.f32 %v3650_v25, %v1315_v28 }
 0x2d4   : > { %v839_v63 = vpack.c.bf16 %v831_v39, %v831_v39  ;;  %v1394_v58 = vmul.f32 0.044677734, %v1386_v7  ;;  %v1363_v12 = vunpack.c.l.bf16 %v1355_v13  ;;  %v870_v49 = vunpack.c.l.bf16 %v862_v3 }
 0x2d5   : > { %v1332_v42 = vpack.c.bf16 %v1316_v53, %v1316_v53 }
 0x2d6   : > { %v847_v60 = vunpack.c.l.bf16 %v839_v63  ;;  %v1402_v2 = vpack.c.bf16 %v1394_v58, %v1394_v58  ;;  %v1371_v15 = vmul.f32 %v1363_v12, %v3911_v44  ;;  %3171 = vtanh.f32 %v870_v49 }
 0x2d7   : > { %v3918_v61 = vunpack.c.l.bf16 %v1332_v42 }
 0x2d8   : > { %v855_v4 = vmul.f32 0.796875, %v847_v60  ;;  %v1410_v59 = vunpack.c.l.bf16 %v1402_v2  ;;  %v1379_v43 = vpack.c.bf16 %v1371_v15, %v1371_v15 }
 0x2d9   : > { %v1348_v5 = vmul.f32 %v3918_v61, %v3918_v61  ;;  %v1317_v1 = vpop.f32.mrf.mxu1 }
 0x2da   : > { %v863_v62 = vpack.c.bf16 %v855_v4, %v855_v4  ;;  %v1418_v22 = vadd.f32 %v1410_v59, %v3904_v50  ;;  %v1387_v52 = vunpack.c.l.bf16 %v1379_v43  ;;  %v1318_v56 = vadd.f32 %v3650_v25, %v1317_v1 }
 0x2db   : > { %v1356_v18 = vpack.c.bf16 %v1348_v5, %v1348_v5 }
 0x2dc   : > { %v3172_v46 = vpop.eup %3171  ;;  %v1426_v14 = vpack.c.bf16 %v1418_v22, %v1418_v22  ;;  %v1395_v57 = vmul.f32 0.044677734, %v1387_v52  ;;  %v1333_v16 = vpack.c.bf16 %v1318_v56, %v1318_v56  ;;  %v871_v31 = vunpack.c.l.bf16 %v863_v62 }
 0x2dd   : > { %v1364_v26 = vunpack.c.l.bf16 %v1356_v18  ;;  %v886_v32 = vpack.c.bf16 %v3172_v46, %v3172_v46 }
 0x2de   : > { %v1434_v45 = vunpack.c.l.bf16 %v1426_v14  ;;  %v1403_v6 = vpack.c.bf16 %v1395_v57, %v1395_v57  ;;  %v3924_v55 = vunpack.c.l.bf16 %v1333_v16  ;;  %3173 = vtanh.f32 %v871_v31 }
 0x2df   : > { %v1372_v17 = vmul.f32 %v1364_v26, %v3918_v61  ;;  %v894_v10 = vunpack.c.l.bf16 %v886_v32 }
 0x2e0   : > { %v1442_v35 = vmul.f32 0.796875, %v1434_v45  ;;  %v1411_v24 = vunpack.c.l.bf16 %v1403_v6  ;;  %v1349_v54 = vmul.f32 %v3924_v55, %v3924_v55 }
 0x2e1   : > { %v1380_v11 = vpack.c.bf16 %v1372_v17, %v1372_v17  ;;  %v1320_v38 = vpop.f32.mrf.mxu1  ;;  %v902_v28 = vadd.f32 1.0, %v894_v10 }
 0x2e2   : > { %v1450_v3 = vpack.c.bf16 %v1442_v35, %v1442_v35  ;;  %v1419_v39 = vadd.f32 %v1411_v24, %v3911_v44  ;;  %v1357_v7 = vpack.c.bf16 %v1349_v54, %v1349_v54  ;;  %v1321_v13 = vadd.f32 %v3650_v25, %v1320_v38 }
 0x2e3   : > { %v1388_v53 = vunpack.c.l.bf16 %v1380_v11  ;;  %v910_v63 = vpack.c.bf16 %v902_v28, %v902_v28 }
 0x2e4   : > { %v3174_v58 = vpop.eup %3173  ;;  %v1458_v12 = vunpack.c.l.bf16 %v1450_v3  ;;  %v1427_v49 = vpack.c.bf16 %v1419_v39, %v1419_v39  ;;  %v1365_v42 = vunpack.c.l.bf16 %v1357_v7  ;;  %v1334_v60 = vpack.c.bf16 %v1321_v13, %v1321_v13 }
 0x2e5   : > { %v1396_v2 = vmul.f32 0.044677734, %v1388_v53  ;;  %v887_v15 = vpack.c.bf16 %v3174_v58, %v3174_v58  ;;  %v918_v4 = vunpack.c.l.bf16 %v910_v63 }
 0x2e6   : > { %3175 = vtanh.f32 %v1458_v12  ;;  %v1435_v59 = vunpack.c.l.bf16 %v1427_v49  ;;  %v1373_v43 = vmul.f32 %v1365_v42, %v3924_v55  ;;  %v3932_v5 = vunpack.c.l.bf16 %v1334_v60 }
 0x2e7   : > { %v1404_v1 = vpack.c.bf16 %v1396_v2, %v1396_v2  ;;  %v895_v62 = vunpack.c.l.bf16 %v887_v15  ;;  %v926_v22 = vmul.f32 0.5, %v918_v4 }
 0x2e8   : > { %v1443_v52 = vmul.f32 0.796875, %v1435_v59  ;;  %v1381_v56 = vpack.c.bf16 %v1373_v43, %v1373_v43  ;;  %v1350_v18 = vmul.f32 %v3932_v5, %v3932_v5 }
 0x2e9   : > { %v1412_v46 = vunpack.c.l.bf16 %v1404_v1  ;;  %v1322_v14 = vpop.f32.mrf.mxu1  ;;  %v903_v57 = vadd.f32 1.0, %v895_v62  ;;  %v934_v17 = vpack.c.bf16 %v926_v22, %v926_v22 }
 0x2ea   : > { %v1451_v16 = vpack.c.bf16 %v1443_v52, %v1443_v52  ;;  %v1389_v31 = vunpack.c.l.bf16 %v1381_v56  ;;  %v1358_v26 = vpack.c.bf16 %v1350_v18, %v1350_v18  ;;  %v1323_v32 = vadd.f32 %v3650_v25, %v1322_v14 }
 0x2eb   : > { %v1420_v45 = vadd.f32 %v1412_v46, %v3918_v61  ;;  %v911_v6 = vpack.c.bf16 %v903_v57, %v903_v57  ;;  %v942_v42 = vunpack.c.l.bf16 %v934_v17  ;;  %v3003_v17 = vld [vmem:[%s3352_s21 + $0x4] sm:$0xf] }
 0x2ec   : > { %v3176_v10 = vpop.eup %3175  ;;  %v1459_v35 = vunpack.c.l.bf16 %v1451_v16  ;;  %v1397_v24 = vmul.f32 0.044677734, %v1389_v31  ;;  %v1366_v54 = vunpack.c.l.bf16 %v1358_v26  ;;  %v1335_v11 = vpack.c.bf16 %v1323_v32, %v1323_v32 }
 0x2ed   : > { %v1428_v38 = vpack.c.bf16 %v1420_v45, %v1420_v45  ;;  %v919_v28 = vunpack.c.l.bf16 %v911_v6  ;;  %v1474_v3 = vpack.c.bf16 %v3176_v10, %v3176_v10  ;;  %v950_v14 = vmul.f32 %v942_v42, %v3884_v36  ;;  %v2968_v10 = vld [vmem:[%s3352_s21 + $0x8] sm:$0xf0] }
 0x2ee   : > { %3177 = vtanh.f32 %v1459_v35  ;;  %v1405_v39 = vpack.c.bf16 %v1397_v24, %v1397_v24  ;;  %v1374_v7 = vmul.f32 %v1366_v54, %v3932_v5  ;;  %v3939_v13 = vunpack.c.l.bf16 %v1335_v11 }
 0x2ef   : > { %v1436_v53 = vunpack.c.l.bf16 %v1428_v38  ;;  %v927_v25 = vmul.f32 0.5, %v919_v28  ;;  %v1482_v63 = vunpack.c.l.bf16 %v1474_v3  ;;  %v2971_v54 = vor.u32 %v3003_v17, %v2968_v10 }
 0x2f0   : > { %v1413_v58 = vunpack.c.l.bf16 %v1405_v39  ;;  %v1382_v12 = vpack.c.bf16 %v1374_v7, %v1374_v7  ;;  %v1351_v49 = vmul.f32 %v3939_v13, %v3939_v13 }
 0x2f1   : > { %v1444_v60 = vmul.f32 0.796875, %v1436_v53  ;;  %v935_v2 = vpack.c.bf16 %v927_v25, %v927_v25  ;;  %v1490_v15 = vadd.f32 1.0, %v1482_v63  ;;  %2984 = vmatmul.msk.bf16.vlgmr.msrb.gmra.mxu3 %vm428_vm0, %v2971_v54  ;;  %2134 = vrot.lane.b32.xlu1 %v2971_v54, %s3275_s24 }
 0x2f2   : > { %v1421_v4 = vadd.f32 %v1413_v58, %v3924_v55  ;;  %v1390_v59 = vunpack.c.l.bf16 %v1382_v12  ;;  %v1359_v43 = vpack.c.bf16 %v1351_v49, %v1351_v49 }
 0x2f3   : > { %v1452_v1 = vpack.c.bf16 %v1444_v60, %v1444_v60  ;;  %v943_v62 = vunpack.c.l.bf16 %v935_v2  ;;  %v1498_v22 = vpack.c.bf16 %v1490_v15, %v1490_v15 }
 0x2f4   : > { %v3178_v52 = vpop.eup %3177  ;;  %v1429_v56 = vpack.c.bf16 %v1421_v4, %v1421_v4  ;;  %v1398_v18 = vmul.f32 0.044677734, %v1390_v59  ;;  %v1367_v46 = vunpack.c.l.bf16 %v1359_v43 }
 0x2f5   : > { %v951_v57 = vmul.f32 %v943_v62, %v3897_v21  ;;  %v1475_v16 = vpack.c.bf16 %v3178_v52, %v3178_v52  ;;  %v1506_v31 = vunpack.c.l.bf16 %v1498_v22  ;;  %v1460_v26 = vunpack.c.l.bf16 %v1452_v1 }
 0x2f6   : > { %v1437_v32 = vunpack.c.l.bf16 %v1429_v56  ;;  %v1406_v45 = vpack.c.bf16 %v1398_v18, %v1398_v18  ;;  %v1375_v6 = vmul.f32 %v1367_v46, %v3939_v13 }
 0x2f7   : > { %v955_v35 = vpack.c.bf16 %v951_v57, %v950_v14  ;;  %v1483_v24 = vunpack.c.l.bf16 %v1475_v16  ;;  %3179 = vtanh.f32 %v1460_v26  ;;  %v1514_v3 = vmul.f32 0.5, %v1506_v31 }
 0x2f8   : > { %v1445_v11 = vmul.f32 0.796875, %v1437_v32  ;;  %v1414_v38 = vunpack.c.l.bf16 %v1406_v45  ;;  %v1383_v28 = vpack.c.bf16 %v1375_v6, %v1375_v6 }
 0x2f9   : > { %1030 = vmatmul.bf16.gmra.mxu2 %v955_v35  ;;  %v1491_v36 = vadd.f32 1.0, %v1483_v24  ;;  %v1522_v49 = vpack.c.bf16 %v1514_v3, %v1514_v3 }
 0x2fa   : > { %v1453_v21 = vpack.c.bf16 %v1445_v11, %v1445_v11  ;;  %v1422_v39 = vadd.f32 %v1414_v38, %v3932_v5  ;;  %v1391_v7 = vunpack.c.l.bf16 %v1383_v28 }
 0x2fb   : > { %v1499_v53 = vpack.c.bf16 %v1491_v36, %v1491_v36  ;;  %v1530_v62 = vunpack.c.l.bf16 %v1522_v49 }
 0x2fc   : > { %v1430_v25 = vpack.c.bf16 %v1422_v39, %v1422_v39  ;;  %v1399_v63 = vmul.f32 0.044677734, %v1391_v7  ;;  %v1461_v58 = vunpack.c.l.bf16 %v1453_v21 }
 0x2fd   : > { %v1507_v12 = vunpack.c.l.bf16 %v1499_v53  ;;  %v3180_v42 = vpop.eup %3179  ;;  %v1538_v31 = vmul.f32 %v1530_v62, %v3904_v50 }
 0x2fe   : > { %v1438_v60 = vunpack.c.l.bf16 %v1430_v25  ;;  %v1407_v2 = vpack.c.bf16 %v1399_v63, %v1399_v63  ;;  %3181 = vtanh.f32 %v1461_v58  ;;  %v1476_v4 = vpack.c.bf16 %v3180_v42, %v3180_v42 }
 0x2ff   : > { %v1515_v15 = vmul.f32 0.5, %v1507_v12 }
 0x300   : > { %v1446_v59 = vmul.f32 0.796875, %v1438_v60  ;;  %v1415_v43 = vunpack.c.l.bf16 %v1407_v2  ;;  %v1484_v22 = vunpack.c.l.bf16 %v1476_v4 }
 0x301   : > { %v1523_v1 = vpack.c.bf16 %v1515_v15, %v1515_v15 }
 0x302   : > { %v1454_v52 = vpack.c.bf16 %v1446_v59, %v1446_v59  ;;  %v1423_v56 = vadd.f32 %v1415_v43, %v3939_v13  ;;  %v1492_v46 = vadd.f32 1.0, %v1484_v22 }
 0x303   : > { %v1531_v18 = vunpack.c.l.bf16 %v1523_v1 }
 0x304   : > { %v3182_v14 = vpop.eup %3181  ;;  %v1431_v57 = vpack.c.bf16 %v1423_v56, %v1423_v56  ;;  %v1462_v16 = vunpack.c.l.bf16 %v1454_v52  ;;  %v1500_v45 = vpack.c.bf16 %v1492_v46, %v1492_v46 }
 0x305   : > { %v1539_v26 = vmul.f32 %v1531_v18, %v3911_v44  ;;  %v1477_v32 = vpack.c.bf16 %v3182_v14, %v3182_v14  ;;  %v2976_v14 = vld [vmem:[%s3352_s21 + $0x28] sm:$0xf0] }
 0x306   : > { %v1439_v6 = vunpack.c.l.bf16 %v1431_v57  ;;  %3183 = vtanh.f32 %v1462_v16  ;;  %v1508_v35 = vunpack.c.l.bf16 %v1500_v45  ;;  %v2972_v45 = vld [vmem:[%s3352_s21 + $0x18] sm:$0xf0] }
 0x307   : > { %v1546_v17 = vpack.c.bf16 %v1539_v26, %v1538_v31  ;;  %v1485_v10 = vunpack.c.l.bf16 %v1477_v32  ;;  %v3005_v32 = vld [vmem:[%s3352_s21 + $0x14] sm:$0xf] }
 0x308   : > { %v1447_v24 = vmul.f32 0.796875, %v1439_v6  ;;  %v1516_v11 = vmul.f32 0.5, %v1508_v35  ;;  %v2975_v6 = vor.u32 %v3005_v32, %v2972_v45 }
 0x309   : > { %1558 = vmatmul.bf16.vlgmr.msrb.gmra.mxu0 %v1546_v17  ;;  %v1493_v54 = vadd.f32 1.0, %v1485_v10  ;;  %v3009_v17 = vld [vmem:[%s3352_s21 + $0x34] sm:$0xf]  ;;  %v2980_v10 = vld [vmem:[%s3352_s21 + $0x38] sm:$0xf0] }
 0x30a   : > { %v1455_v38 = vpack.c.bf16 %v1447_v24, %v1447_v24  ;;  %v1524_v39 = vpack.c.bf16 %v1516_v11, %v1516_v11  ;;  %2136 = vrot.lane.b32.xlu2 %v2975_v6, %s3275_s24  ;;  %2985 = vmatmul.msk.bf16.gmra.mxu3 %vm428_vm0, %v2975_v6  ;;  %v2983_v35 = vor.u32 %v3009_v17, %v2980_v10 }
 0x30b   : > { %v1501_v28 = vpack.c.bf16 %v1493_v54, %v1493_v54 }
 0x30c   : > { %v3184_v36 = vpop.eup %3183  ;;  %v1463_v3 = vunpack.c.l.bf16 %v1455_v38  ;;  %v1532_v25 = vunpack.c.l.bf16 %v1524_v39  ;;  %2140 = vrot.lane.b32.xlu1 %v2983_v35, %s3275_s24 }
 0x30d   : > { %v1509_v21 = vunpack.c.l.bf16 %v1501_v28  ;;  %v1478_v50 = vpack.c.bf16 %v3184_v36, %v3184_v36 }
 0x30e   : > { %3185 = vtanh.f32 %v1463_v3  ;;  %v1540_v42 = vmul.f32 %v1532_v25, %v3918_v61  ;;  %v3007_v61 = vld [vmem:[%s3352_s21 + $0x24] sm:$0xf] }
 0x30f   : > { %v1517_v44 = vmul.f32 0.5, %v1509_v21  ;;  %v1486_v7 = vunpack.c.l.bf16 %v1478_v50 }
 0x311   : > { %v1525_v53 = vpack.c.bf16 %v1517_v44, %v1517_v44  ;;  %v1494_v63 = vadd.f32 1.0, %v1486_v7 }
 0x313   : > { %v1533_v58 = vunpack.c.l.bf16 %v1525_v53  ;;  %v1502_v12 = vpack.c.bf16 %v1494_v63, %v1494_v63 }
 0x314   : > { %v3186_v49 = vpop.eup %3185 }
 0x315   : > { %v1541_v60 = vmul.f32 %v1533_v58, %v3924_v55  ;;  %v1479_v2 = vpack.c.bf16 %v3186_v49, %v3186_v49  ;;  %v1510_v15 = vunpack.c.l.bf16 %v1502_v12  ;;  %v2979_v55 = vor.u32 %v3007_v61, %v2976_v14 }
 0x317   : > { %v1547_v4 = vpack.c.bf16 %v1541_v60, %v1540_v42  ;;  %v1487_v59 = vunpack.c.l.bf16 %v1479_v2  ;;  %v1518_v1 = vmul.f32 0.5, %v1510_v15  ;;  %2138 = vrot.lane.b32.xlu0 %v2979_v55, %s3275_s24 }
 0x319   : > { %1563 = vmatmul.bf16.gmra.mxu0 %v1547_v4  ;;  %v1495_v43 = vadd.f32 1.0, %v1487_v59  ;;  %v1526_v52 = vpack.c.bf16 %v1518_v1, %v1518_v1 }
 0x31a   : > { %2986 = vmatmul.msk.bf16.gmra.mxu3 %vm428_vm0, %v2979_v55 }
 0x31b   : > { %v1503_v62 = vpack.c.bf16 %v1495_v43, %v1495_v43  ;;  %v1534_v46 = vunpack.c.l.bf16 %v1526_v52 }
 0x31d   : > { %v1511_v22 = vunpack.c.l.bf16 %v1503_v62  ;;  %v1542_v16 = vmul.f32 %v1534_v46, %v3932_v5  ;;  %v3261_v5 = vld [vmem:[%s4737_s6] ss:$0 sm:$0xff] }
 0x31f   : > { %v1519_v56 = vmul.f32 0.5, %v1511_v22 }
 0x321   : > { %v1527_v18 = vpack.c.bf16 %v1519_v56, %v1519_v56 }
 0x323   : > { %v1535_v57 = vunpack.c.l.bf16 %v1527_v18 }
 0x325   : > { %v1543_v31 = vmul.f32 %v1535_v57, %v3939_v13 }
 0x327   : > { %v1548_v26 = vpack.c.bf16 %v1543_v31, %v1542_v16 }
 0x329   : > { %1568 = vmatmul.bf16.gmra.mxu0 %v1548_v26 }
 0x32a   : > { %2987 = vmatmul.msk.bf16.gmra.mxu3 %vm428_vm0, %v2983_v35 }
 0x33d   : > { %v1325_v24 = vpop.f32.mrf.mxu1 }
 0x33e   : > { %v1326_v13 = vadd.f32 %v3261_v5, %v1325_v24 }
 0x340   : > { %v1336_v54 = vpack.c.bf16 %v1326_v13, %v1326_v13 }
 0x342   : > { %v1344_v11 = vunpack.c.l.bf16 %v1336_v54 }
 0x344   : > { %v1352_v38 = vmul.f32 %v1344_v11, %v1344_v11 }
 0x345   : > { %v1327_v28 = vpop.f32.mrf.mxu1 }
 0x346   : > { %v1360_v36 = vpack.c.bf16 %v1352_v38, %v1352_v38  ;;  %v1328_v3 = vadd.f32 %v3261_v5, %v1327_v28 }
 0x348   : > { %v1368_v21 = vunpack.c.l.bf16 %v1360_v36  ;;  %v1337_v39 = vpack.c.bf16 %v1328_v3, %v1328_v3 }
 0x34a   : > { %v1376_v50 = vmul.f32 %v1368_v21, %v1344_v11  ;;  %v1345_v44 = vunpack.c.l.bf16 %v1337_v39 }
 0x34c   : > { %v1384_v7 = vpack.c.bf16 %v1376_v50, %v1376_v50  ;;  %v1353_v53 = vmul.f32 %v1345_v44, %v1345_v44  ;;  %v3977_v50 = vld [vmem:[%s4733_s2] ss:$0 sm:$0xff] }
 0x34e   : > { %v1392_v25 = vunpack.c.l.bf16 %v1384_v7  ;;  %v1361_v63 = vpack.c.bf16 %v1353_v53, %v1353_v53 }
 0x350   : > { %v1400_v58 = vmul.f32 0.044677734, %v1392_v25  ;;  %v1369_v12 = vunpack.c.l.bf16 %v1361_v63 }
 0x352   : > { %v1408_v49 = vpack.c.bf16 %v1400_v58, %v1400_v58  ;;  %v1377_v42 = vmul.f32 %v1369_v12, %v1345_v44 }
 0x354   : > { %v1416_v60 = vunpack.c.l.bf16 %v1408_v49  ;;  %v1385_v2 = vpack.c.bf16 %v1377_v42, %v1377_v42  ;;  %v3987_v42 = vld [vmem:[%s4739_s8] ss:$0 sm:$0xff] }
 0x356   : > { %v1424_v15 = vadd.f32 %v1416_v60, %v1344_v11  ;;  %v1393_v4 = vunpack.c.l.bf16 %v1385_v2 }
 0x358   : > { %v1432_v59 = vpack.c.bf16 %v1424_v15, %v1424_v15  ;;  %v1401_v43 = vmul.f32 0.044677734, %v1393_v4 }
 0x35a   : > { %v1440_v1 = vunpack.c.l.bf16 %v1432_v59  ;;  %v1409_v62 = vpack.c.bf16 %v1401_v43, %v1401_v43 }
 0x35c   : > { %v1448_v22 = vmul.f32 0.796875, %v1440_v1  ;;  %v1417_v52 = vunpack.c.l.bf16 %v1409_v62 }
 0x35e   : > { %v1456_v56 = vpack.c.bf16 %v1448_v22, %v1448_v22  ;;  %v1425_v18 = vadd.f32 %v1417_v52, %v1345_v44 }
 0x360   : > { %v1433_v46 = vpack.c.bf16 %v1425_v18, %v1425_v18  ;;  %v1464_v61 = vunpack.c.l.bf16 %v1456_v56 }
 0x362   : > { %v1441_v14 = vunpack.c.l.bf16 %v1433_v46  ;;  %3187 = vtanh.f32 %v1464_v61 }
 0x364   : > { %v1449_v55 = vmul.f32 0.796875, %v1441_v14 }
 0x366   : > { %v1457_v57 = vpack.c.bf16 %v1449_v55, %v1449_v55 }
 0x368   : > { %v3188_v16 = vpop.eup %3187  ;;  %v1465_v31 = vunpack.c.l.bf16 %v1457_v57 }
 0x369   : > { %v1480_v26 = vpack.c.bf16 %v3188_v16, %v3188_v16 }
 0x36a   : > { %3189 = vtanh.f32 %v1465_v31 }
 0x36b   : > { %v1488_v32 = vunpack.c.l.bf16 %v1480_v26 }
 0x36d   : > { %v1496_v45 = vadd.f32 1.0, %v1488_v32 }
 0x36f   : > { %v1504_v6 = vpack.c.bf16 %v1496_v45, %v1496_v45 }
 0x370   : > { %v3190_v17 = vpop.eup %3189 }
 0x371   : > { %v1481_v10 = vpack.c.bf16 %v3190_v17, %v3190_v17  ;;  %v1512_v35 = vunpack.c.l.bf16 %v1504_v6 }
 0x373   : > { %v1489_v24 = vunpack.c.l.bf16 %v1481_v10  ;;  %v1520_v13 = vmul.f32 0.5, %v1512_v35 }
 0x374   : > { %v1620_v3 = vpop.f32.mrf.mxu3 }
 0x375   : > { %v1497_v5 = vadd.f32 1.0, %v1489_v24  ;;  %v1528_v28 = vpack.c.bf16 %v1520_v13, %v1520_v13  ;;  %v3980_v7 = vadd.f32 %v3977_v50, %v1620_v3 }
 0x377   : > { %v1505_v54 = vpack.c.bf16 %v1497_v5, %v1497_v5  ;;  %v1536_v39 = vunpack.c.l.bf16 %v1528_v28  ;;  %v1640_v25 = vsel %vm470_vm1, %v3980_v7, 0.0 }
 0x378   : > { %1641 = vadd.xlane.f32.xlu1 %v1640_v25 }
 0x379   : > { %v1513_v38 = vunpack.c.l.bf16 %v1505_v54  ;;  %v1544_v63 = vmul.f32 %v1536_v39, %v1344_v11 }
 0x37b   : > { %v1521_v36 = vmul.f32 0.5, %v1513_v38 }
 0x37c   : > { %v1622_v26 = vpop.f32.mrf.mxu3 }
 0x37d   : > { %v1529_v21 = vpack.c.bf16 %v1521_v36, %v1521_v36  ;;  %v4033_v35 = vadd.f32 %v3977_v50, %v1622_v26 }
 0x37f   : > { %v1537_v53 = vunpack.c.l.bf16 %v1529_v21  ;;  %v1643_v5 = vsel %vm470_vm1, %v4033_v35, 0.0 }
 0x381   : > { %v1545_v58 = vmul.f32 %v1537_v53, %v1345_v44  ;;  %v2135_v44 = vpop.permute.xlu1 %2134 }
 0x383   : > { %v1549_v12 = vpack.c.bf16 %v1545_v58, %v1544_v63 }
 0x385   : > { %1573 = vmatmul.bf16.gmra.mxu0 %v1549_v12 }
 0x386   : > { %v1559_v49 = vpop.f32.mrf.mxu0 }
 0x387   : > { %v1560_v60 = vadd.f32 %v3987_v42, %v1559_v49 }
 0x389   : > { %v3992_v4 = vadd.f32 %v1560_v60, %v3450_v9  ;;  %v2139_v18 = vpop.permute.xlu0 %2138  ;;  %v2141_v46 = vpop.permute.xlu1 %2140 }
 0x38d   : > { %v1625_v10 = vpop.f32.mrf.mxu3 }
 0x38e   : > { %v1561_v2 = vpop.f32.mrf.mxu0  ;;  %v4043_v13 = vadd.f32 %v3977_v50, %v1625_v10 }
 0x38f   : > { %v1562_v15 = vadd.f32 %v3987_v42, %v1561_v2 }
 0x390   : > { %v1646_v36 = vsel %vm470_vm1, %v4043_v13, 0.0 }
 0x391   : > { %v3995_v11 = vadd.f32 %v1562_v15, %v3447_v8  ;;  %v2137_v8 = vpop.permute.xlu2 %2136 }
 0x393   : > { %v3060_v59 = vpack.i.bf16 %v3995_v11, %v3992_v4 }
 0x395   : > { %2992 = vmatmul.msk.bf16.vlgmr.msra.gmra.mxu0 %vm428_vm0, %v2135_v44  ;;  %v1627_v54 = vpop.f32.mrf.mxu3 }
 0x396   : > { %v1564_v43 = vpop.f32.mrf.mxu0  ;;  %v4053_v21 = vadd.f32 %v3977_v50, %v1627_v54 }
 0x397   : > { %v1565_v1 = vadd.f32 %v3987_v42, %v1564_v43 }
 0x398   : > { %v1649_v63 = vsel %vm470_vm1, %v4053_v21, 0.0 }
 0x399   : > { %v4003_v52 = vadd.f32 %v1565_v1, %v3464_v19 }
 0x39d   : > { %v1630_v53 = vpop.f32.mrf.mxu3 }
 0x39e   : > { %v1566_v62 = vpop.f32.mrf.mxu0  ;;  %v4063_v49 = vadd.f32 %v3977_v50, %v1630_v53 }
 0x39f   : > { %v1567_v22 = vadd.f32 %v3987_v42, %v1566_v62 }
 0x3a0   : > { %v1652_v44 = vsel %vm470_vm1, %v4063_v49, 0.0 }
 0x3a1   : > { %v4006_v9 = vadd.f32 %v1567_v22, %v3476_v29 }
 0x3a5   : > { %2993 = vmatmul.msk.bf16.gmra.mxu0 %vm428_vm0, %v2137_v8  ;;  %v1632_v43 = vpop.f32.mrf.mxu3 }
 0x3a6   : > { %v4013_v61 = vpop.f32.mrf.mxu0  ;;  %v4077_v22 = vadd.f32 %v3977_v50, %v1632_v43 }
 0x3ae   : > { %v4015_v14 = vpop.f32.mrf.mxu0 }
 0x3b5   : > { %2994 = vmatmul.msk.bf16.gmra.mxu0 %vm428_vm0, %v2139_v18 }
 0x3c5   : > { %2995 = vmatmul.msk.bf16.gmra.mxu0 %vm428_vm0, %v2141_v46 }
 0x3eb   : > { %v1642_v12 = vpop.xlane.xlu1 %1641 }
 0x3ec   : > { %v1664_v60 = vmul.f32 %v1642_v12, %v3417_v48 }
 0x3ee   : > { %v4074_v62 = vsub.f32 %v3980_v7, %v1664_v60 }
 0x3f0   : > { %v1680_v18 = vmul.f32 %v4074_v62, %v4074_v62 }
 0x402   : > { %v1574_v19 = vpop.f32.mrf.mxu0 }
 0x403   : > { %v1575_v29 = vadd.f32 %v3987_v42, %v1574_v19  ;;  %v1655_v19 = vsel %vm470_vm1, %v4077_v22, 0.0 }
 0x405   : > { %v4020_v16 = vadd.f32 %v1575_v29, %v3504_v51 }
 0x40a   : > { %v1576_v55 = vpop.f32.mrf.mxu0 }
 0x40b   : > { %v1577_v57 = vadd.f32 %v3987_v42, %v1576_v55  ;;  %v1688_v55 = vsel %vm470_vm1, %v1680_v18, 0.0 }
 0x40d   : > { %v4023_v31 = vadd.f32 %v1577_v57, %v3579_v33 }
 0x412   : > { %v2163_v45 = vpop.f32.mrf.mxu0 }
 0x413   : > { %v4028_v6 = vadd.f32 %v3977_v50, %v2163_v45 }
 0x415   : > { %v2183_v17 = vsel %vm470_vm1, %v4028_v6, 0.0 }
 0x416   : > { %2184 = vadd.xlane.f32.xlu0 %v2183_v17 }
 0x41a   : > { %v2165_v51 = vpop.f32.mrf.mxu0 }
 0x41b   : > { %v4036_v33 = vadd.f32 %v3977_v50, %v2165_v51 }
 0x41d   : > { %v2186_v24 = vsel %vm470_vm1, %v4036_v33, 0.0 }
 0x41e   : > { %2187 = vadd.xlane.f32.xlu2 %v2186_v24  ;;  %1644 = vadd.xlane.f32.xlu0 %v1643_v5 }
 0x422   : > { %v2168_v38 = vpop.f32.mrf.mxu0 }
 0x423   : > { %v4046_v28 = vadd.f32 %v3977_v50, %v2168_v38 }
 0x425   : > { %v2189_v3 = vsel %vm470_vm1, %v4046_v28, 0.0 }
 0x426   : > { %2190 = vadd.xlane.f32.xlu2 %v2189_v3  ;;  %1647 = vadd.xlane.f32.xlu0 %v1646_v36  ;;  %v1635_v36 = vpop.f32.mrf.mxu3 }
 0x42a   : > { %v2170_v39 = vpop.f32.mrf.mxu0 }
 0x42b   : > { %v4056_v25 = vadd.f32 %v3977_v50, %v2170_v39 }
 0x42d   : > { %v2192_v58 = vsel %vm470_vm1, %v4056_v25, 0.0 }
 0x42e   : > { %1650 = vadd.xlane.f32.xlu2 %v1649_v63  ;;  %2193 = vadd.xlane.f32.xlu1 %v2192_v58  ;;  %v4107_v63 = vadd.f32 %v3977_v50, %v1635_v36 }
 0x430   : > { %4765 = vst [vmem:[#allocation10_spill] sm:$0xff] %v4107_v63 }
 0x432   : > { %v2173_v2 = vpop.f32.mrf.mxu0 }
 0x433   : > { %v4067_v15 = vadd.f32 %v3977_v50, %v2173_v2 }
 0x435   : > { %v2195_v1 = vsel %vm470_vm1, %v4067_v15, 0.0 }
 0x436   : > { %1653 = vadd.xlane.f32.xlu2 %v1652_v44  ;;  %2196 = vadd.xlane.f32.xlu1 %v2195_v1  ;;  %v1658_v44 = vsel %vm470_vm1, %v4107_v63, 0.0 }
 0x43a   : > { %v2175_v8 = vpop.f32.mrf.mxu0 }
 0x43b   : > { %v4082_v46 = vadd.f32 %v3977_v50, %v2175_v8 }
 0x43d   : > { %v2198_v29 = vsel %vm470_vm1, %v4082_v46, 0.0 }
 0x43e   : > { %2199 = vadd.xlane.f32.xlu0 %v2198_v29  ;;  %1656 = vadd.xlane.f32.xlu1 %v1655_v19  ;;  %v1637_v29 = vpop.f32.mrf.mxu3 }
 0x43f   : > { %1689 = vadd.xlane.f32.xlu2 %v1688_v55 }
 0x442   : > { %v2178_v57 = vpop.f32.mrf.mxu0 }
 0x443   : > { %v4090_v26 = vadd.f32 %v3977_v50, %v2178_v57 }
 0x445   : > { %v2201_v45 = vsel %vm470_vm1, %v4090_v26, 0.0 }
 0x446   : > { %2202 = vadd.xlane.f32.xlu1 %v2201_v45 }
 0x44a   : > { %v2180_v17 = vpop.f32.mrf.mxu0 }
 0x44b   : > { %v4095_v10 = vadd.f32 %v3977_v50, %v2180_v17  ;;  %v4130_v17 = vadd.f32 %v3977_v50, %v1637_v29 }
 0x44d   : > { %v2204_v51 = vsel %vm470_vm1, %v4095_v10, 0.0  ;;  %4766 = vst [vmem:[#allocation11_spill] sm:$0xff] %v4130_v17 }
 0x44e   : > { %2205 = vadd.xlane.f32.xlu0 %v2204_v51 }
 0x489   : > { %v2185_v24 = vpop.xlane.xlu0 %2184 }
 0x48a   : > { %v2207_v5 = vmul.f32 %v2185_v24, %v3417_v48 }
 0x48c   : > { %v4101_v54 = vsub.f32 %v4028_v6, %v2207_v5 }
 0x48e   : > { %v2223_v38 = vmul.f32 %v4101_v54, %v4101_v54 }
 0x490   : > { %v2231_v3 = vsel %vm470_vm1, %v2223_v38, 0.0 }
 0x491   : > { %v2188_v39 = vpop.xlane.xlu2 %2187  ;;  %2232 = vadd.xlane.f32.xlu0 %v2231_v3  ;;  %v1645_v53 = vpop.xlane.xlu0 %1644  ;;  %v1661_v3 = vsel %vm470_vm1, %v4130_v17, 0.0 }
 0x492   : > { %v2208_v58 = vmul.f32 %v2188_v39, %v3417_v48  ;;  %v1665_v12 = vmul.f32 %v1645_v53, %v3417_v48 }
 0x494   : > { %v4112_v60 = vsub.f32 %v4036_v33, %v2208_v58  ;;  %v4115_v2 = vsub.f32 %v4033_v35, %v1665_v12 }
 0x496   : > { %v1681_v43 = vmul.f32 %v4115_v2, %v4115_v2  ;;  %v2224_v1 = vmul.f32 %v4112_v60, %v4112_v60 }
 0x498   : > { %v1691_v8 = vsel %vm470_vm1, %v1681_v43, 0.0  ;;  %v2234_v18 = vsel %vm470_vm1, %v2224_v1, 0.0 }
 0x499   : > { %v2191_v19 = vpop.xlane.xlu2 %2190  ;;  %1659 = vadd.xlane.f32.xlu0 %v1658_v44  ;;  %1692 = vadd.xlane.f32.xlu1 %v1691_v8  ;;  %v1648_v57 = vpop.xlane.xlu0 %1647 }
 0x49a   : > { %v2209_v55 = vmul.f32 %v2191_v19, %v3417_v48  ;;  %2235 = vadd.xlane.f32.xlu2 %v2234_v18  ;;  %v1666_v51 = vmul.f32 %v1648_v57, %v3417_v48 }
 0x49c   : > { %v4127_v45 = vsub.f32 %v4046_v28, %v2209_v55  ;;  %v4137_v38 = vsub.f32 %v4043_v13, %v1666_v51 }
 0x49e   : > { %v2225_v24 = vmul.f32 %v4127_v45, %v4127_v45  ;;  %v1682_v44 = vmul.f32 %v4137_v38, %v4137_v38 }
 0x4a0   : > { %v2237_v5 = vsel %vm470_vm1, %v2225_v24, 0.0  ;;  %v1694_v29 = vsel %vm470_vm1, %v1682_v44, 0.0 }
 0x4a1   : > { %v1651_v36 = vpop.xlane.xlu2 %1650  ;;  %2238 = vadd.xlane.f32.xlu1 %v2237_v5  ;;  %v2194_v39 = vpop.xlane.xlu1 %2193 }
 0x4a2   : > { %v1667_v53 = vmul.f32 %v1651_v36, %v3417_v48  ;;  %1662 = vadd.xlane.f32.xlu2 %v1661_v3  ;;  %v2210_v50 = vmul.f32 %v2194_v39, %v3417_v48 }
 0x4a4   : > { %v4144_v58 = vsub.f32 %v4053_v21, %v1667_v53  ;;  %v4147_v12 = vsub.f32 %v4056_v25, %v2210_v50 }
 0x4a6   : > { %v1683_v43 = vmul.f32 %v4144_v58, %v4144_v58  ;;  %v2226_v1 = vmul.f32 %v4147_v12, %v4147_v12 }
 0x4a8   : > { %v1697_v8 = vsel %vm470_vm1, %v1683_v43, 0.0  ;;  %v2240_v18 = vsel %vm470_vm1, %v2226_v1, 0.0 }
 0x4a9   : > { %v1654_v19 = vpop.xlane.xlu2 %1653  ;;  %1698 = vadd.xlane.f32.xlu1 %v1697_v8  ;;  %2241 = vadd.xlane.f32.xlu0 %v2240_v18  ;;  %v2197_v55 = vpop.xlane.xlu1 %2196 }
 0x4aa   : > { %v1668_v57 = vmul.f32 %v1654_v19, %v3417_v48  ;;  %1695 = vadd.xlane.f32.xlu2 %v1694_v29  ;;  %v2211_v51 = vmul.f32 %v2197_v55, %v3417_v48 }
 0x4ac   : > { %v4161_v24 = vsub.f32 %v4063_v49, %v1668_v57  ;;  %v4164_v5 = vsub.f32 %v4067_v15, %v2211_v51 }
 0x4ae   : > { %v1684_v36 = vmul.f32 %v4161_v24, %v4161_v24  ;;  %v2227_v3 = vmul.f32 %v4164_v5, %v4164_v5 }
 0x4b0   : > { %v1700_v39 = vsel %vm470_vm1, %v1684_v36, 0.0  ;;  %v2243_v53 = vsel %vm470_vm1, %v2227_v3, 0.0 }
 0x4b1   : > { %v2200_v50 = vpop.xlane.xlu0 %2199  ;;  %1701 = vadd.xlane.f32.xlu1 %v1700_v39  ;;  %2244 = vadd.xlane.f32.xlu0 %v2243_v53  ;;  %v1657_v44 = vpop.xlane.xlu1 %1656 }
 0x4b2   : > { %v2212_v43 = vmul.f32 %v2200_v50, %v3417_v48  ;;  %v1669_v1 = vmul.f32 %v1657_v44, %v3417_v48 }
 0x4b4   : > { %v4175_v8 = vsub.f32 %v4082_v46, %v2212_v43  ;;  %v4178_v18 = vsub.f32 %v4077_v22, %v1669_v1 }
 0x4b6   : > { %v2228_v19 = vmul.f32 %v4175_v8, %v4175_v8  ;;  %v1685_v29 = vmul.f32 %v4178_v18, %v4178_v18 }
 0x4b8   : > { %v2246_v55 = vsel %vm470_vm1, %v2228_v19, 0.0  ;;  %v1703_v57 = vsel %vm470_vm1, %v1685_v29, 0.0  ;;  %v1690_v29 = vpop.xlane.xlu2 %1689 }
 0x4b9   : > { %2247 = vadd.xlane.f32.xlu2 %v2246_v55  ;;  %1704 = vadd.xlane.f32.xlu0 %v1703_v57  ;;  %v2203_v51 = vpop.xlane.xlu1 %2202  ;;  %v1712_v55 = vmul.f32 %v1690_v29, %v3417_v48 }
 0x4ba   : > { %v2213_v36 = vmul.f32 %v2203_v51, %v3417_v48 }
 0x4bb   : > { %v1720_v57 = vadd.f32 1e-06, %v1712_v55 }
 0x4bc   : > { %v4188_v3 = vsub.f32 %v4090_v26, %v2213_v36 }
 0x4bd   : > { %3191 = vrsqrt.f32 %v1720_v57  ;;  %vm1734_vm10 = vweird.f32 %v1720_v57 }
 0x4be   : > { %v2229_v39 = vmul.f32 %v4188_v3, %v4188_v3 }
 0x4c0   : > { %v2249_v53 = vsel %vm470_vm1, %v2229_v39, 0.0 }
 0x4c1   : > { %v2206_v50 = vpop.xlane.xlu0 %2205  ;;  %2250 = vadd.xlane.f32.xlu2 %v2249_v53 }
 0x4c2   : > { %v2214_v44 = vmul.f32 %v2206_v50, %v3417_v48 }
 0x4c3   : > { %v3192_v51 = vpop.eup %3191 }
 0x4c4   : > { %v4195_v43 = vsub.f32 %v4095_v10, %v2214_v44  ;;  %v1729_v39 = vmul.f32 %v3192_v51, %v1720_v57  ;;  %vm1735_vm9 = vweird.f32 %v3192_v51 }
 0x4c5   : > { %vm4219_vm11 = vmor %vm1734_vm10, %vm1735_vm9 }
 0x4c6   : > { %v2230_v1 = vmul.f32 %v4195_v43, %v4195_v43  ;;  %v1730_v44 = vmul.f32 %v3192_v51, %v1729_v39 }
 0x4c8   : > { %v2252_v19 = vsel %vm470_vm1, %v2230_v1, 0.0  ;;  %v1731_v32 = vmul.f32 0.5, %v1730_v44 }
 0x4c9   : > { %2253 = vadd.xlane.f32.xlu1 %v2252_v19 }
 0x4e2   : > { %3061 = vrot.lane.b32.xlu1 %v3060_v59, %s3277_s17 }
 0x504   : > { %v2233_v36 = vpop.xlane.xlu0 %2232 }
 0x505   : > { %v2255_v53 = vmul.f32 %v2233_v36, %v3417_v48 }
 0x507   : > { %v2263_v50 = vadd.f32 1e-06, %v2255_v53  ;;  %v1732_v53 = vsub.f32 1.5, %v1731_v32 }
 0x509   : > { %3193 = vrsqrt.f32 %v2263_v50  ;;  %vm2277_vm13 = vweird.f32 %v2263_v50 }
 0x50c   : > { %v1660_v1 = vpop.xlane.xlu0 %1659  ;;  %v1693_v19 = vpop.xlane.xlu1 %1692 }
 0x50d   : > { %v1670_v56 = vmul.f32 %v1660_v1, %v3417_v48  ;;  %v2236_v4 = vpop.xlane.xlu2 %2235  ;;  %v1713_v11 = vmul.f32 %v1693_v19, %v3417_v48 }
 0x50e   : > { %v2256_v59 = vmul.f32 %v2236_v4, %v3417_v48  ;;  %v1733_v4 = vmul.f32 %v3192_v51, %v1732_v53 }
 0x50f   : > { %v3194_v29 = vpop.eup %3193  ;;  %v4210_v55 = vsub.f32 %v4107_v63, %v1670_v56  ;;  %v1721_v37 = vadd.f32 1e-06, %v1713_v11 }
 0x510   : > { %v2272_v0 = vmul.f32 %v3194_v29, %v2263_v50  ;;  %v2264_v36 = vadd.f32 1e-06, %v2256_v59  ;;  %v1737_v53 = vsel %vm4219_vm11, %v3192_v51, %v1733_v4  ;;  %vm2278_vm12 = vweird.f32 %v3194_v29 }
 0x511   : > { %3195 = vrsqrt.f32 %v1721_v37  ;;  %v1686_v39 = vmul.f32 %v4210_v55, %v4210_v55  ;;  %vm4233_vm14 = vmor %vm2277_vm13, %vm2278_vm12  ;;  %vm1744_vm3 = vweird.f32 %v1721_v37 }
 0x512   : > { %v2273_v44 = vmul.f32 %v3194_v29, %v2272_v0  ;;  %3197 = vrsqrt.f32 %v2264_v36  ;;  %vm2287_vm4 = vweird.f32 %v2264_v36 }
 0x513   : > { %v1706_v1 = vsel %vm470_vm1, %v1686_v39, 0.0 }
 0x514   : > { %v2274_v40 = vmul.f32 0.5, %v2273_v44  ;;  %1707 = vadd.xlane.f32.xlu0 %v1706_v1  ;;  %v2239_v19 = vpop.xlane.xlu1 %2238 }
 0x515   : > { %v1663_v30 = vpop.xlane.xlu2 %1662  ;;  %v2257_v56 = vmul.f32 %v2239_v19, %v3417_v48 }
 0x516   : > { %v2275_v11 = vsub.f32 1.5, %v2274_v40  ;;  %v1671_v59 = vmul.f32 %v1663_v30, %v3417_v48 }
 0x517   : > { %v3196_v32 = vpop.eup %3195  ;;  %v4217_v27 = vadd.f32 1e-06, %v2257_v56 }
 0x518   : > { %v3198_v34 = vpop.eup %3197  ;;  %v1739_v39 = vmul.f32 %v3196_v32, %v1721_v37  ;;  %v4224_v44 = vsub.f32 %v4130_v17, %v1671_v59  ;;  %v2276_v30 = vmul.f32 %v3194_v29, %v2275_v11  ;;  %v1808_v17 = vmul.f32 %v1737_v53, %v4074_v62 }
 0x519   : > { %v2282_v1 = vmul.f32 %v3198_v34, %v2264_v36  ;;  %3199 = vrsqrt.f32 %v4217_v27  ;;  %vm1745_vm15 = vweird.f32 %v3196_v32  ;;  %vm2288_vm2 = vweird.f32 %v3198_v34 }
 0x51a   : > { %v1740_v40 = vmul.f32 %v3196_v32, %v1739_v39  ;;  %v1687_v57 = vmul.f32 %v4224_v44, %v4224_v44  ;;  %v2280_v50 = vsel %vm4233_vm14, %v3194_v29, %v2276_v30  ;;  %vm1746_vm5 = vmor %vm1744_vm3, %vm1745_vm15  ;;  %v1570_v37 = vadd.f32 %v3987_v42, %v4013_v61 }
 0x51b   : > { %v2283_v19 = vmul.f32 %v3198_v34, %v2282_v1  ;;  %v2351_v29 = vmul.f32 %v2280_v50, %v4101_v54  ;;  %vm2289_vm6 = vmor %vm2287_vm4, %vm2288_vm2  ;;  %v1572_v54 = vadd.f32 %v3987_v42, %v4015_v14  ;;  %vm2297_vm8 = vweird.f32 %v4217_v27 }
 0x51c   : > { %v1741_v56 = vmul.f32 0.5, %v1740_v40  ;;  %v2242_v23 = vpop.xlane.xlu0 %2241  ;;  %v1709_v20 = vsel %vm470_vm1, %v1687_v57, 0.0  ;;  %v1699_v59 = vpop.xlane.xlu1 %1698 }
 0x51d   : > { %v2284_v4 = vmul.f32 0.5, %v2283_v19  ;;  %v1696_v11 = vpop.xlane.xlu2 %1695  ;;  %v2258_v0 = vmul.f32 %v2242_v23, %v3417_v48  ;;  %1710 = vadd.xlane.f32.xlu2 %v1709_v20  ;;  %v1715_v39 = vmul.f32 %v1699_v59, %v3417_v48 }
 0x51e   : > { %v1742_v1 = vsub.f32 1.5, %v1741_v56  ;;  %v1714_v40 = vmul.f32 %v1696_v11, %v3417_v48 }
 0x51f   : > { %v4242_v57 = vpop.eup %3199  ;;  %v2285_v62 = vsub.f32 1.5, %v2284_v4  ;;  %v4244_v53 = vadd.f32 1e-06, %v2258_v0  ;;  %v4246_v19 = vadd.f32 1e-06, %v1715_v39 }
 0x520   : > { %v1743_v63 = vmul.f32 %v3196_v32, %v1742_v1  ;;  %v2292_v20 = vmul.f32 %v4242_v57, %v4217_v27  ;;  %v4250_v23 = vadd.f32 1e-06, %v1714_v40  ;;  %v4277_v1 = vadd.f32 %v1570_v37, %v3488_v41 }
 0x521   : > { %v2286_v30 = vmul.f32 %v3198_v34, %v2285_v62  ;;  %3201 = vrsqrt.f32 %v4244_v53  ;;  %vm2298_vm7 = vweird.f32 %v4242_v57  ;;  %vm2307_vm9 = vweird.f32 %v4244_v53 }
 0x522   : > { %v1747_v56 = vsel %vm1746_vm5, %v3196_v32, %v1743_v63  ;;  %v2293_v59 = vmul.f32 %v4242_v57, %v2292_v20  ;;  %3203 = vrsqrt.f32 %v4250_v23  ;;  %v4266_v32 = vld [vmem:[%s4734_s3] ss:$0 sm:$0xff]  ;;  %v4286_v20 = vadd.f32 %v1572_v54, %v3499_v47  ;;  %vm4314_vm10 = vmor %vm2297_vm8, %vm2298_vm7 }
 0x523   : > { %v2290_v51 = vsel %vm2289_vm6, %v3198_v34, %v2286_v30  ;;  %v1809_v4 = vmul.f32 %v1747_v56, %v4115_v2  ;;  %3205 = vrsqrt.f32 %v4246_v19  ;;  %v1816_v61 = vmul.f32 %v4266_v32, %v1808_v17 }
 0x524   : > { %v2352_v36 = vmul.f32 %v2290_v51, %v4112_v60  ;;  %v2294_v11 = vmul.f32 0.5, %v2293_v59  ;;  %v2245_v0 = vpop.xlane.xlu0 %2244  ;;  %v1702_v63 = vpop.xlane.xlu1 %1701  ;;  %v2359_v34 = vmul.f32 %v4266_v32, %v2351_v29  ;;  %v4291_v29 = vld [vmem:[%s4735_s4] ss:$0 sm:$0xff]  ;;  %v4771_v56 = vpack.i.bf16 %v4006_v9, %v4003_v52 }
 0x525   : > { %v2259_v2 = vmul.f32 %v2245_v0, %v3417_v48  ;;  %v1716_v39 = vmul.f32 %v1702_v63, %v3417_v48  ;;  %v1817_v42 = vmul.f32 %v4266_v32, %v1809_v4  ;;  %v1824_v4 = vadd.f32 %v4291_v29, %v1816_v61 }
 0x526   : > { %v2360_v14 = vmul.f32 %v4266_v32, %v2352_v36  ;;  %v2295_v60 = vsub.f32 1.5, %v2294_v11  ;;  %v2367_v47 = vadd.f32 %v4291_v29, %v2359_v34  ;;  %vm1764_vm11 = vweird.f32 %v4246_v19 }
 0x527   : > { %v4274_v50 = vpop.eup %3201  ;;  %v4279_v40 = vadd.f32 1e-06, %v2259_v2  ;;  %v4281_v62 = vadd.f32 1e-06, %v1716_v39  ;;  %v1825_v59 = vadd.f32 %v4291_v29, %v1817_v42  ;;  %vm1754_vm15 = vweird.f32 %v4250_v23 }
 0x528   : > { %v4283_v17 = vpop.eup %3203  ;;  %v2368_v30 = vadd.f32 %v4291_v29, %v2360_v14  ;;  %v2302_v41 = vmul.f32 %v4274_v50, %v4244_v53  ;;  %3066 = vrot.lane.b32.xlu0 %v4771_v56, %s3277_s17  ;;  %v2296_v54 = vmul.f32 %v4242_v57, %v2295_v60  ;;  %vm2308_vm12 = vweird.f32 %v4274_v50 }
 0x529   : > { %v3206_v37 = vpop.eup %3205  ;;  %v1749_v51 = vmul.f32 %v4283_v17, %v4250_v23  ;;  %3207 = vrsqrt.f32 %v4279_v40  ;;  %v1832_v63 = vpack.c.bf16 %v1825_v59, %v1824_v4  ;;  %vm1755_vm13 = vweird.f32 %v4283_v17  ;;  %vm2309_vm2 = vmor %vm2307_vm9, %vm2308_vm12 }
 0x52a   : > { %v2303_v36 = vmul.f32 %v4274_v50, %v2302_v41  ;;  %v1759_v52 = vmul.f32 %v3206_v37, %v4246_v19  ;;  %3209 = vrsqrt.f32 %v4281_v62  ;;  %v2375_v61 = vpack.c.bf16 %v2368_v30, %v2367_v47  ;;  %vm1756_vm3 = vmor %vm1754_vm15, %vm1755_vm13 }
 0x52b   : > { %v1750_v9 = vmul.f32 %v4283_v17, %v1749_v51  ;;  %v2300_v60 = vsel %vm4314_vm10, %v4242_v57, %v2296_v54  ;;  %2988 = vmatmul.msk.bf16.vlgmr.msrb.gmra.mxu2 %vm470_vm1, %v1832_v63  ;;  %vm1765_vm14 = vweird.f32 %v3206_v37  ;;  %v3070_v53 = vpack.i.bf16 %v4286_v20, %v4277_v1 }
 0x52c   : > { %v2304_v11 = vmul.f32 0.5, %v2303_v36  ;;  %v1760_v0 = vmul.f32 %v3206_v37, %v1759_v52  ;;  %v2248_v34 = vpop.xlane.xlu2 %2247  ;;  %v1705_v2 = vpop.xlane.xlu0 %1704  ;;  %2996 = vmatmul.msk.bf16.vlgmr.msra.gmra.mxu3 %vm470_vm1, %v2375_v61  ;;  %v4774_v36 = vpack.i.bf16 %v4023_v31, %v4020_v16  ;;  %vm1766_vm4 = vmor %vm1764_vm11, %vm1765_vm14  ;;  %vm2317_vm5 = vweird.f32 %v4279_v40 }
 0x52d   : > { %v1751_v42 = vmul.f32 0.5, %v1750_v9  ;;  %v2260_v27 = vmul.f32 %v2248_v34, %v3417_v48  ;;  %v1717_v14 = vmul.f32 %v1705_v2, %v3417_v48  ;;  %v2353_v9 = vmul.f32 %v2300_v60, %v4127_v45 }
 0x52e   : > { %v2305_v41 = vsub.f32 1.5, %v2304_v11  ;;  %v1761_v30 = vmul.f32 0.5, %v1760_v0  ;;  %vm1774_vm9 = vweird.f32 %v4281_v62 }
 0x52f   : > { %v4327_v56 = vpop.eup %3207  ;;  %v1752_v59 = vsub.f32 1.5, %v1751_v42  ;;  %v4330_v47 = vadd.f32 1e-06, %v2260_v27  ;;  %v4332_v51 = vadd.f32 1e-06, %v1717_v14  ;;  %v2361_v19 = vmul.f32 %v4266_v32, %v2353_v9 }
 0x530   : > { %v2306_v4 = vmul.f32 %v4274_v50, %v2305_v41  ;;  %v1762_v57 = vsub.f32 1.5, %v1761_v30  ;;  %v2312_v54 = vmul.f32 %v4327_v56, %v4279_v40  ;;  %3076 = vrot.lane.b32.xlu0 %v4774_v36, %s3277_s17  ;;  %v4341_v52 = vpop.eup %3209  ;;  %vm2318_vm6 = vweird.f32 %v4327_v56 }
 0x531   : > { %v1753_v11 = vmul.f32 %v4283_v17, %v1752_v59  ;;  %3211 = vrsqrt.f32 %v4330_v47  ;;  %v1769_v45 = vmul.f32 %v4341_v52, %v4281_v62  ;;  %vm1775_vm7 = vweird.f32 %v4341_v52  ;;  %vm4388_vm8 = vmor %vm2317_vm5, %vm2318_vm6 }
 0x532   : > { %v2310_v0 = vsel %vm2309_vm2, %v4274_v50, %v2306_v4  ;;  %v1763_v16 = vmul.f32 %v3206_v37, %v1762_v57  ;;  %v2313_v31 = vmul.f32 %v4327_v56, %v2312_v54  ;;  %3213 = vrsqrt.f32 %v4332_v51  ;;  %vm4396_vm10 = vmor %vm1774_vm9, %vm1775_vm7 }
 0x533   : > { %v1757_v63 = vsel %vm1756_vm3, %v4283_v17, %v1753_v11  ;;  %v2354_v23 = vmul.f32 %v2310_v0, %v4147_v12  ;;  %v1770_v2 = vmul.f32 %v4341_v52, %v1769_v45  ;;  %v2369_v54 = vadd.f32 %v4291_v29, %v2361_v19 }
 0x534   : > { %v1810_v50 = vmul.f32 %v1757_v63, %v4137_v38  ;;  %v1767_v61 = vsel %vm1766_vm4, %v3206_v37, %v1763_v16  ;;  %v2314_v34 = vmul.f32 0.5, %v2313_v31  ;;  %v2251_v39 = vpop.xlane.xlu2 %2250  ;;  %vm2327_vm12 = vweird.f32 %v4330_v47 }
 0x535   : > { %v1811_v17 = vmul.f32 %v1767_v61, %v4144_v58  ;;  %3071 = vrot.lane.b32.xlu2 %v3070_v53, %s3277_s17  ;;  %v2261_v12 = vmul.f32 %v2251_v39, %v3417_v48  ;;  %v2362_v42 = vmul.f32 %v4266_v32, %v2354_v23  ;;  %v1771_v14 = vmul.f32 0.5, %v1770_v2 }
 0x536   : > { %v2315_v27 = vsub.f32 1.5, %v2314_v34  ;;  %v1818_v1 = vmul.f32 %v4266_v32, %v1810_v50  ;;  %vm1784_vm15 = vweird.f32 %v4332_v51 }
 0x537   : > { %v3212_v38 = vpop.eup %3211  ;;  %v4372_v20 = vadd.f32 1e-06, %v2261_v12  ;;  %v1819_v37 = vmul.f32 %v4266_v32, %v1811_v17  ;;  %v2370_v58 = vadd.f32 %v4291_v29, %v2362_v42  ;;  %v1772_v41 = vsub.f32 1.5, %v1771_v14 }
 0x538   : > { %v2316_v60 = vmul.f32 %v4327_v56, %v2315_v27  ;;  %v2322_v30 = vmul.f32 %v3212_v38, %v4330_v47  ;;  %v3214_v59 = vpop.eup %3213  ;;  %v1826_v4 = vadd.f32 %v4291_v29, %v1818_v1  ;;  %vm2328_vm11 = vweird.f32 %v3212_v38 }
 0x539   : > { %3215 = vrsqrt.f32 %v4372_v20  ;;  %v1827_v57 = vadd.f32 %v4291_v29, %v1819_v37  ;;  %v1773_v36 = vmul.f32 %v4341_v52, %v1772_v41  ;;  %v1779_v11 = vmul.f32 %v3214_v59, %v4332_v51  ;;  %vm2329_vm14 = vmor %vm2327_vm12, %vm2328_vm11 }
 0x53a   : > { %v2323_v9 = vmul.f32 %v3212_v38, %v2322_v30  ;;  %v2376_v31 = vpack.c.bf16 %v2370_v58, %v2369_v54  ;;  %v2320_v45 = vsel %vm4388_vm8, %v4327_v56, %v2316_v60  ;;  %vm1785_vm13 = vweird.f32 %v3214_v59 }
 0x53b   : > { %v1833_v16 = vpack.c.bf16 %v1827_v57, %v1826_v4  ;;  %v1780_v23 = vmul.f32 %v3214_v59, %v1779_v11  ;;  %v1777_v61 = vsel %vm4396_vm10, %v4341_v52, %v1773_v36  ;;  %v2355_v56 = vmul.f32 %v2320_v45, %v4164_v5  ;;  %vm1786_vm2 = vmor %vm1784_vm15, %vm1785_vm13 }
 0x53c   : > { %v2324_v63 = vmul.f32 0.5, %v2323_v9  ;;  %v2254_v53 = vpop.xlane.xlu1 %2253  ;;  %2997 = vmatmul.msk.bf16.gmra.mxu3 %vm470_vm1, %v2376_v31  ;;  %v1812_v52 = vmul.f32 %v1777_v61, %v4161_v24  ;;  %vm2337_vm4 = vweird.f32 %v4372_v20  ;;  %vm2789_vm15 = vcmask 785408  }
 0x53d   : > { %v2262_v40 = vmul.f32 %v2254_v53, %v3417_v48  ;;  %v1781_v2 = vmul.f32 0.5, %v1780_v23  ;;  %2989 = vmatmul.msk.bf16.gmra.mxu2 %vm470_vm1, %v1833_v16  ;;  %v2363_v37 = vmul.f32 %v4266_v32, %v2355_v56 }
 0x53e   : > { %v2325_v34 = vsub.f32 1.5, %v2324_v63  ;;  %v1820_v60 = vmul.f32 %v4266_v32, %v1812_v52 }
 0x53f   : > { %v3216_v62 = vpop.eup %3215  ;;  %v2270_v39 = vadd.f32 1e-06, %v2262_v40  ;;  %v1782_v12 = vsub.f32 1.5, %v1781_v2 }
 0x540   : > { %v2326_v17 = vmul.f32 %v3212_v38, %v2325_v34  ;;  %v2332_v19 = vmul.f32 %v3216_v62, %v4372_v20  ;;  %vm2338_vm3 = vweird.f32 %v3216_v62  ;;  %v4431_v34 = vpop.f32.mrf.mxu2 }
 0x541   : > { %3217 = vrsqrt.f32 %v2270_v39  ;;  %v1783_v27 = vmul.f32 %v3214_v59, %v1782_v12  ;;  %vm2339_vm5 = vmor %vm2337_vm4, %vm2338_vm3  ;;  %vm2347_vm7 = vweird.f32 %v2270_v39 }
 0x542   : > { %v2330_v42 = vsel %vm2329_vm14, %v3212_v38, %v2326_v17  ;;  %v2333_v14 = vmul.f32 %v3216_v62, %v2332_v19 }
 0x543   : > { %v2356_v1 = vmul.f32 %v2330_v42, %v4175_v8  ;;  %v1787_v5 = vsel %vm1786_vm2, %v3214_v59, %v1783_v27  ;;  %v2371_v8 = vadd.f32 %v4291_v29, %v2363_v37  ;;  %v1828_v59 = vadd.f32 %v4291_v29, %v1820_v60 }
 0x544   : > { %v2334_v47 = vmul.f32 0.5, %v2333_v14  ;;  %v1813_v58 = vmul.f32 %v1787_v5, %v4178_v18 }
 0x545   : > { %v2364_v24 = vmul.f32 %v4266_v32, %v2356_v1 }
 0x546   : > { %v2335_v41 = vsub.f32 1.5, %v2334_v47  ;;  %v1821_v38 = vmul.f32 %v4266_v32, %v1813_v58 }
 0x547   : > { %v3218_v30 = vpop.eup %3217  ;;  %v2372_v51 = vadd.f32 %v4291_v29, %v2364_v24 }
 0x548   : > { %v2342_v4 = vmul.f32 %v3218_v30, %v2270_v39  ;;  %v2336_v57 = vmul.f32 %v3216_v62, %v2335_v41  ;;  %v1829_v54 = vadd.f32 %v4291_v29, %v1821_v38  ;;  %vm2348_vm6 = vweird.f32 %v3218_v30 }
 0x549   : > { %v2377_v36 = vpack.c.bf16 %v2372_v51, %v2371_v8  ;;  %vm2349_vm8 = vmor %vm2347_vm7, %vm2348_vm6 }
 0x54a   : > { %v2343_v18 = vmul.f32 %v3218_v30, %v2342_v4  ;;  %v1834_v9 = vpack.c.bf16 %v1829_v54, %v1828_v59  ;;  %v2340_v0 = vsel %vm2339_vm5, %v3216_v62, %v2336_v57 }
 0x54b   : > { %v2357_v31 = vmul.f32 %v2340_v0, %v4188_v3  ;;  %v4433_v3 = vpop.f32.mrf.mxu2 }
 0x54c   : > { %v2344_v11 = vmul.f32 0.5, %v2343_v18  ;;  %2998 = vmatmul.msk.bf16.gmra.mxu3 %vm470_vm1, %v2377_v36 }
 0x54d   : > { %2990 = vmatmul.msk.bf16.gmra.mxu2 %vm470_vm1, %v1834_v9  ;;  %v2365_v20 = vmul.f32 %v4266_v32, %v2357_v31 }
 0x54e   : > { %v2345_v16 = vsub.f32 1.5, %v2344_v11 }
 0x54f   : > { %v2373_v40 = vadd.f32 %v4291_v29, %v2365_v20 }
 0x550   : > { %v2346_v45 = vmul.f32 %v3218_v30, %v2345_v16  ;;  %v4459_v16 = vld [vmem:[%s4737_s6] ss:$0 sm:$0xff] }
 0x552   : > { %v2350_v63 = vsel %vm2349_vm8, %v3218_v30, %v2346_v45 }
 0x553   : > { %v2358_v23 = vmul.f32 %v2350_v63, %v4195_v43  ;;  %v4435_v2 = vpop.f32.mrf.mxu2 }
 0x554   : > { %4779 = vst [vmem:[#allocation12_spill] sm:$0xff] %v4435_v2 }
 0x555   : > { %v2366_v53 = vmul.f32 %v4266_v32, %v2358_v23 }
 0x557   : > { %v2374_v50 = vadd.f32 %v4291_v29, %v2366_v53 }
 0x559   : > { %v2378_v61 = vpack.c.bf16 %v2374_v50, %v2373_v40 }
 0x55b   : > { %v4437_v62 = vpop.f32.mrf.mxu2 }
 0x55c   : > { %2999 = vmatmul.msk.bf16.gmra.mxu3 %vm470_vm1, %v2378_v61  ;;  %4780 = vst [vmem:[#allocation13_spill] sm:$0xff] %v4437_v62 }
 0x563   : > { %v4440_v17 = vpop.f32.mrf.mxu2 }
 0x56b   : > { %v4443_v1 = vpop.f32.mrf.mxu2 }
 0x56c   : > { %4781 = vst [vmem:[#allocation14_spill] sm:$0xff] %v4443_v1 }
 0x573   : > { %v4445_v41 = vpop.f32.mrf.mxu2 }
 0x574   : > { %4782 = vst [vmem:[#allocation15_spill] sm:$0xff] %v4445_v41 }
 0x57b   : > { %v4450_v54 = vpop.f32.mrf.mxu2 }
 0x57c   : > { %4783 = vst [vmem:[#allocation16_spill] sm:$0xff] %v4450_v54 }
 0x587   : > { %v1708_v43 = vpop.xlane.xlu0 %1707 }
 0x588   : > { %v1718_v56 = vmul.f32 %v1708_v43, %v3417_v48 }
 0x58a   : > { %v1726_v39 = vadd.f32 1e-06, %v1718_v56 }
 0x58c   : > { %3219 = vrsqrt.f32 %v1726_v39  ;;  %vm1794_vm10 = vweird.f32 %v1726_v39 }
 0x590   : > { %v1711_v12 = vpop.xlane.xlu2 %1710 }
 0x591   : > { %v1719_v19 = vmul.f32 %v1711_v12, %v3417_v48 }
 0x592   : > { %v3220_v52 = vpop.eup %3219 }
 0x593   : > { %v1789_v42 = vmul.f32 %v3220_v52, %v1726_v39  ;;  %v1727_v27 = vadd.f32 1e-06, %v1719_v19  ;;  %vm1795_vm9 = vweird.f32 %v3220_v52 }
 0x594   : > { %vm1796_vm11 = vmor %vm1794_vm10, %vm1795_vm9 }
 0x595   : > { %v1790_v14 = vmul.f32 %v3220_v52, %v1789_v42  ;;  %3221 = vrsqrt.f32 %v1727_v27  ;;  %vm1804_vm13 = vweird.f32 %v1727_v27 }
 0x597   : > { %v1791_v5 = vmul.f32 0.5, %v1790_v14 }
 0x599   : > { %v1792_v47 = vsub.f32 1.5, %v1791_v5 }
 0x59b   : > { %v3222_v37 = vpop.eup %3221  ;;  %v1793_v58 = vmul.f32 %v3220_v52, %v1792_v47 }
 0x59c   : > { %v1799_v60 = vmul.f32 %v3222_v37, %v1727_v27  ;;  %vm1805_vm12 = vweird.f32 %v3222_v37 }
 0x59d   : > { %v1797_v30 = vsel %vm1796_vm11, %v3220_v52, %v1793_v58  ;;  %vm1806_vm14 = vmor %vm1804_vm13, %vm1805_vm12 }
 0x59e   : > { %v1800_v24 = vmul.f32 %v3222_v37, %v1799_v60  ;;  %v1814_v51 = vmul.f32 %v1797_v30, %v4210_v55 }
 0x5a0   : > { %v1801_v48 = vmul.f32 0.5, %v1800_v24  ;;  %v1822_v59 = vmul.f32 %v4266_v32, %v1814_v51 }
 0x5a2   : > { %v1802_v38 = vsub.f32 1.5, %v1801_v48  ;;  %v1830_v36 = vadd.f32 %v4291_v29, %v1822_v59 }
 0x5a4   : > { %v1803_v4 = vmul.f32 %v3222_v37, %v1802_v38 }
 0x5a6   : > { %v1807_v8 = vsel %vm1806_vm14, %v3222_v37, %v1803_v4 }
 0x5a7   : > { %v1815_v57 = vmul.f32 %v1807_v8, %v4224_v44 }
 0x5a9   : > { %v1823_v18 = vmul.f32 %v4266_v32, %v1815_v57 }
 0x5ab   : > { %v1831_v9 = vadd.f32 %v4291_v29, %v1823_v18 }
 0x5ad   : > { %v1835_v11 = vpack.c.bf16 %v1831_v9, %v1830_v36 }
 0x5ae   : > { %v1857_v55 = vpop.f32.mrf.mxu2 }
 0x5af   : > { %2991 = vmatmul.msk.bf16.gmra.mxu2 %vm470_vm1, %v1835_v11  ;;  %v2400_v0 = vpop.f32.mrf.mxu3  ;;  %v1858_v44 = vadd.f32 %v4459_v16, %v1857_v55 }
 0x5b0   : > { %v2401_v31 = vadd.f32 %v4459_v16, %v2400_v0 }
 0x5b1   : > { %v1877_v45 = vpack.c.bf16 %v1858_v44, %v1858_v44 }
 0x5b2   : > { %v2420_v32 = vpack.c.bf16 %v2401_v31, %v2401_v31 }
 0x5b3   : > { %v4463_v63 = vunpack.c.l.bf16 %v1877_v45 }
 0x5b4   : > { %v4465_v23 = vunpack.c.l.bf16 %v2420_v32 }
 0x5b5   : > { %v1893_v29 = vmul.f32 %v4463_v63, %v4463_v63 }
 0x5b6   : > { %v2436_v20 = vmul.f32 %v4465_v23, %v4465_v23  ;;  %v1859_v53 = vpop.f32.mrf.mxu2 }
 0x5b7   : > { %v2402_v50 = vpop.f32.mrf.mxu3  ;;  %v1901_v40 = vpack.c.bf16 %v1893_v29, %v1893_v29  ;;  %v1860_v43 = vadd.f32 %v4459_v16, %v1859_v53 }
 0x5b8   : > { %v2444_v61 = vpack.c.bf16 %v2436_v20, %v2436_v20  ;;  %v2403_v56 = vadd.f32 %v4459_v16, %v2402_v50 }
 0x5b9   : > { %v1909_v39 = vunpack.c.l.bf16 %v1901_v40  ;;  %v1878_v19 = vpack.c.bf16 %v1860_v43, %v1860_v43 }
 0x5ba   : > { %v2452_v12 = vunpack.c.l.bf16 %v2444_v61  ;;  %v2421_v52 = vpack.c.bf16 %v2403_v56, %v2403_v56 }
 0x5bb   : > { %v1917_v42 = vmul.f32 %v1909_v39, %v4463_v63  ;;  %v4475_v14 = vunpack.c.l.bf16 %v1878_v19 }
 0x5bc   : > { %v2460_v27 = vmul.f32 %v2452_v12, %v4465_v23  ;;  %v4477_v5 = vunpack.c.l.bf16 %v2421_v52 }
 0x5bd   : > { %v1925_v47 = vpack.c.bf16 %v1917_v42, %v1917_v42  ;;  %v1894_v58 = vmul.f32 %v4475_v14, %v4475_v14 }
 0x5be   : > { %v2468_v37 = vpack.c.bf16 %v2460_v27, %v2460_v27  ;;  %v2437_v60 = vmul.f32 %v4477_v5, %v4477_v5 }
 0x5bf   : > { %v2405_v30 = vpop.f32.mrf.mxu3  ;;  %v1933_v48 = vunpack.c.l.bf16 %v1925_v47  ;;  %v1902_v51 = vpack.c.bf16 %v1894_v58, %v1894_v58 }
 0x5c0   : > { %v1862_v24 = vpop.f32.mrf.mxu2  ;;  %v2476_v38 = vunpack.c.l.bf16 %v2468_v37  ;;  %v2445_v4 = vpack.c.bf16 %v2437_v60, %v2437_v60  ;;  %v2406_v57 = vadd.f32 %v4459_v16, %v2405_v30 }
 0x5c1   : > { %v1863_v8 = vadd.f32 %v4459_v16, %v1862_v24  ;;  %v1941_v59 = vmul.f32 0.044677734, %v1933_v48  ;;  %v1910_v36 = vunpack.c.l.bf16 %v1902_v51 }
 0x5c2   : > { %v2484_v18 = vmul.f32 0.044677734, %v2476_v38  ;;  %v2453_v9 = vunpack.c.l.bf16 %v2445_v4  ;;  %v2422_v55 = vpack.c.bf16 %v2406_v57, %v2406_v57 }
 0x5c3   : > { %v1879_v11 = vpack.c.bf16 %v1863_v8, %v1863_v8  ;;  %v1949_v0 = vpack.c.bf16 %v1941_v59, %v1941_v59  ;;  %v1918_v31 = vmul.f32 %v1910_v36, %v4475_v14 }
 0x5c4   : > { %v2492_v44 = vpack.c.bf16 %v2484_v18, %v2484_v18  ;;  %v2461_v45 = vmul.f32 %v2453_v9, %v4477_v5  ;;  %v4489_v29 = vunpack.c.l.bf16 %v2422_v55 }
 0x5c5   : > { %v4487_v32 = vunpack.c.l.bf16 %v1879_v11  ;;  %v1957_v20 = vunpack.c.l.bf16 %v1949_v0  ;;  %v1926_v50 = vpack.c.bf16 %v1918_v31, %v1918_v31 }
 0x5c6   : > { %v2500_v53 = vunpack.c.l.bf16 %v2492_v44  ;;  %v2469_v40 = vpack.c.bf16 %v2461_v45, %v2461_v45  ;;  %v2438_v43 = vmul.f32 %v4489_v29, %v4489_v29 }
 0x5c7   : > { %v1895_v61 = vmul.f32 %v4487_v32, %v4487_v32  ;;  %v2407_v39 = vpop.f32.mrf.mxu3  ;;  %v1965_v12 = vadd.f32 %v1957_v20, %v4463_v63  ;;  %v1934_v52 = vunpack.c.l.bf16 %v1926_v50 }
 0x5c8   : > { %v1864_v56 = vpop.f32.mrf.mxu2  ;;  %v2508_v19 = vadd.f32 %v2500_v53, %v4465_v23  ;;  %v2477_v42 = vunpack.c.l.bf16 %v2469_v40  ;;  %v2446_v47 = vpack.c.bf16 %v2438_v43, %v2438_v43  ;;  %v2408_v58 = vadd.f32 %v4459_v16, %v2407_v39 }
 0x5c9   : > { %v1903_v27 = vpack.c.bf16 %v1895_v61, %v1895_v61  ;;  %v1865_v37 = vadd.f32 %v4459_v16, %v1864_v56  ;;  %v1973_v60 = vpack.c.bf16 %v1965_v12, %v1965_v12  ;;  %v1942_v30 = vmul.f32 0.044677734, %v1934_v52 }
 0x5ca   : > { %v2516_v24 = vpack.c.bf16 %v2508_v19, %v2508_v19  ;;  %v2485_v48 = vmul.f32 0.044677734, %v2477_v42  ;;  %v2454_v51 = vunpack.c.l.bf16 %v2446_v47  ;;  %v2423_v8 = vpack.c.bf16 %v2408_v58, %v2408_v58 }
 0x5cb   : > { %v1911_v38 = vunpack.c.l.bf16 %v1903_v27  ;;  %v1880_v4 = vpack.c.bf16 %v1865_v37, %v1865_v37  ;;  %v1981_v57 = vunpack.c.l.bf16 %v1973_v60  ;;  %v1950_v18 = vpack.c.bf16 %v1942_v30, %v1942_v30 }
 0x5cc   : > { %v2524_v59 = vunpack.c.l.bf16 %v2516_v24  ;;  %v2493_v36 = vpack.c.bf16 %v2485_v48, %v2485_v48  ;;  %v2462_v11 = vmul.f32 %v2454_v51, %v4489_v29  ;;  %v4503_v0 = vunpack.c.l.bf16 %v2423_v8 }
 0x5cd   : > { %v1919_v9 = vmul.f32 %v1911_v38, %v4487_v32  ;;  %v4501_v55 = vunpack.c.l.bf16 %v1880_v4  ;;  %v1989_v44 = vmul.f32 0.796875, %v1981_v57  ;;  %v1958_v45 = vunpack.c.l.bf16 %v1950_v18 }
 0x5ce   : > { %v2532_v31 = vmul.f32 0.796875, %v2524_v59  ;;  %v2501_v20 = vunpack.c.l.bf16 %v2493_v36  ;;  %v2470_v50 = vpack.c.bf16 %v2462_v11, %v2462_v11  ;;  %v2439_v61 = vmul.f32 %v4503_v0, %v4503_v0 }
 0x5cf   : > { %v1927_v53 = vpack.c.bf16 %v1919_v9, %v1919_v9  ;;  %v1896_v40 = vmul.f32 %v4501_v55, %v4501_v55  ;;  %v2410_v43 = vpop.f32.mrf.mxu3  ;;  %v1997_v56 = vpack.c.bf16 %v1989_v44, %v1989_v44  ;;  %v1966_v12 = vadd.f32 %v1958_v45, %v4475_v14 }
 0x5d0   : > { %v2540_v39 = vpack.c.bf16 %v2532_v31, %v2532_v31  ;;  %v2509_v19 = vadd.f32 %v2501_v20, %v4477_v5  ;;  %v2478_v42 = vunpack.c.l.bf16 %v2470_v50  ;;  %v2447_v47 = vpack.c.bf16 %v2439_v61, %v2439_v61  ;;  %v1867_v37 = vpop.f32.mrf.mxu2 }
 0x5d1   : > { %v1935_v52 = vunpack.c.l.bf16 %v1927_v53  ;;  %v1904_v27 = vpack.c.bf16 %v1896_v40, %v1896_v40  ;;  %v2005_v58 = vunpack.c.l.bf16 %v1997_v56  ;;  %v1974_v24 = vpack.c.bf16 %v1966_v12, %v1966_v12 }
 0x5d2   : > { %v2548_v60 = vunpack.c.l.bf16 %v2540_v39  ;;  %v2517_v30 = vpack.c.bf16 %v2509_v19, %v2509_v19  ;;  %v2486_v38 = vmul.f32 0.044677734, %v2478_v42  ;;  %v2455_v4 = vunpack.c.l.bf16 %v2447_v47 }
 0x5d3   : > { %v1943_v48 = vmul.f32 0.044677734, %v1935_v52  ;;  %v1912_v51 = vunpack.c.l.bf16 %v1904_v27  ;;  %3223 = vtanh.f32 %v2005_v58  ;;  %v1982_v8 = vunpack.c.l.bf16 %v1974_v24 }
 0x5d4   : > { %v2525_v57 = vunpack.c.l.bf16 %v2517_v30  ;;  %v1868_v59 = vadd.f32 %v4459_v16, %v1867_v37  ;;  %3225 = vtanh.f32 %v2548_v60  ;;  %v2494_v36 = vpack.c.bf16 %v2486_v38, %v2486_v38 }
 0x5d5   : > { %v1951_v18 = vpack.c.bf16 %v1943_v48, %v1943_v48  ;;  %v1920_v9 = vmul.f32 %v1912_v51, %v4501_v55  ;;  %v1990_v11 = vmul.f32 0.796875, %v1982_v8  ;;  %v2463_v31 = vmul.f32 %v2455_v4, %v4503_v0 }
 0x5d6   : > { %v2533_v44 = vmul.f32 0.796875, %v2525_v57  ;;  %v1881_v45 = vpack.c.bf16 %v1868_v59, %v1868_v59  ;;  %v2502_v53 = vunpack.c.l.bf16 %v2494_v36  ;;  %v2411_v40 = vadd.f32 %v4459_v16, %v2410_v43 }
 0x5d7   : > { %v1959_v20 = vunpack.c.l.bf16 %v1951_v18  ;;  %v1928_v50 = vpack.c.bf16 %v1920_v9, %v1920_v9  ;;  %v2412_v61 = vpop.f32.mrf.mxu3  ;;  %v1998_v56 = vpack.c.bf16 %v1990_v11, %v1990_v11  ;;  %v2471_v12 = vpack.c.bf16 %v2463_v31, %v2463_v31 }
 0x5d8   : > { %v2541_v39 = vpack.c.bf16 %v2533_v44, %v2533_v44  ;;  %v4515_v19 = vunpack.c.l.bf16 %v1881_v45  ;;  %v2510_v42 = vadd.f32 %v2502_v53, %v4489_v29  ;;  %v2424_v47 = vpack.c.bf16 %v2411_v40, %v2411_v40  ;;  %v1869_v8 = vpop.f32.mrf.mxu2 }
 0x5d9   : > { %v1967_v52 = vadd.f32 %v1959_v20, %v4487_v32  ;;  %v1936_v27 = vunpack.c.l.bf16 %v1928_v50  ;;  %v3224_v37 = vpop.eup %3223  ;;  %v2006_v58 = vunpack.c.l.bf16 %v1998_v56  ;;  %v2479_v24 = vunpack.c.l.bf16 %v2471_v12 }
 0x5da   : > { %v2549_v60 = vunpack.c.l.bf16 %v2541_v39  ;;  %v1897_v30 = vmul.f32 %v4515_v19, %v4515_v19  ;;  %v4521_v43 = vpop.eup %3225  ;;  %v2021_v48 = vpack.c.bf16 %v3224_v37, %v3224_v37  ;;  %v2518_v51 = vpack.c.bf16 %v2510_v42, %v2510_v42 }
 0x5db   : > { %v1975_v38 = vpack.c.bf16 %v1967_v52, %v1967_v52  ;;  %v1944_v4 = vmul.f32 0.044677734, %v1936_v27  ;;  %3227 = vtanh.f32 %v2006_v58  ;;  %v2487_v59 = vmul.f32 0.044677734, %v2479_v24 }
 0x5dc   : > { %v1905_v18 = vpack.c.bf16 %v1897_v30, %v1897_v30  ;;  %3229 = vtanh.f32 %v2549_v60  ;;  %v2526_v9 = vunpack.c.l.bf16 %v2518_v51  ;;  %v4525_v45 = vunpack.c.l.bf16 %v2424_v47 }
 0x5dd   : > { %v1983_v36 = vunpack.c.l.bf16 %v1975_v38  ;;  %v1952_v11 = vpack.c.bf16 %v1944_v4, %v1944_v4  ;;  %v2495_v44 = vpack.c.bf16 %v2487_v59, %v2487_v59  ;;  %v1870_v20 = vadd.f32 %v4459_v16, %v1869_v8 }
 0x5de   : > { %v1913_v31 = vunpack.c.l.bf16 %v1905_v18  ;;  %v4530_v50 = vmul.f32 0.796875, %v2526_v9  ;;  %v2413_v56 = vadd.f32 %v4459_v16, %v2412_v61  ;;  %v2440_v42 = vmul.f32 %v4525_v45, %v4525_v45 }
 0x5df   : > { %v4528_v53 = vmul.f32 0.796875, %v1983_v36  ;;  %v1960_v40 = vunpack.c.l.bf16 %v1952_v11  ;;  %v2415_v39 = vpop.f32.mrf.mxu3  ;;  %v2503_v12 = vunpack.c.l.bf16 %v2495_v44  ;;  %v1882_v27 = vpack.c.bf16 %v1870_v20, %v1870_v20 }
 0x5e0   : > { %v1921_v52 = vmul.f32 %v1913_v31, %v4515_v19  ;;  %v2425_v60 = vpack.c.bf16 %v2413_v56, %v2413_v56  ;;  %v2448_v38 = vpack.c.bf16 %v2440_v42, %v2440_v42  ;;  %v2416_v36 = vadd.f32 %v4459_v16, %v2415_v39 }
 0x5e1   : > { %v1968_v58 = vadd.f32 %v1960_v40, %v4501_v55  ;;  %v3228_v24 = vpop.eup %3227  ;;  %v2511_v61 = vadd.f32 %v2503_v12, %v4503_v0  ;;  %v4542_v51 = vunpack.c.l.bf16 %v1882_v27 }
 0x5e2   : > { %v1929_v30 = vpack.c.bf16 %v1921_v52, %v1921_v52  ;;  %v4544_v4 = vpop.eup %3229  ;;  %v2022_v8 = vpack.c.bf16 %v3228_v24, %v3228_v24  ;;  %v4546_v18 = vunpack.c.l.bf16 %v2425_v60  ;;  %v2456_v31 = vunpack.c.l.bf16 %v2448_v38 }
 0x5e3   : > { %v1976_v59 = vpack.c.bf16 %v1968_v58, %v1968_v58  ;;  %v2519_v11 = vpack.c.bf16 %v2511_v61, %v2511_v61  ;;  %v1898_v40 = vmul.f32 %v4542_v51, %v4542_v51  ;;  %v2426_v12 = vpack.c.bf16 %v2416_v36, %v2416_v36 }
 0x5e4   : > { %v1937_v44 = vunpack.c.l.bf16 %v1929_v30  ;;  %v2441_v56 = vmul.f32 %v4546_v18, %v4546_v18  ;;  %v2464_v27 = vmul.f32 %v2456_v31, %v4525_v45  ;;  %v2029_v58 = vunpack.c.l.bf16 %v2021_v48 }
 0x5e5   : > { %v1984_v20 = vunpack.c.l.bf16 %v1976_v59  ;;  %v2527_v52 = vunpack.c.l.bf16 %v2519_v11  ;;  %v1906_v60 = vpack.c.bf16 %v1898_v40, %v1898_v40  ;;  %v4558_v61 = vunpack.c.l.bf16 %v2426_v12 }
 0x5e6   : > { %v1945_v42 = vmul.f32 0.044677734, %v1937_v44  ;;  %v2449_v24 = vpack.c.bf16 %v2441_v56, %v2441_v56  ;;  %v2472_v37 = vpack.c.bf16 %v2464_v27, %v2464_v27  ;;  %v2030_v27 = vunpack.c.l.bf16 %v2022_v8 }
 0x5e7   : > { %v4556_v39 = vmul.f32 0.796875, %v1984_v20  ;;  %v2417_v30 = vpop.f32.mrf.mxu3  ;;  %v4560_v38 = vmul.f32 0.796875, %v2527_v52  ;;  %v1914_v11 = vunpack.c.l.bf16 %v1906_v60  ;;  %v2442_v48 = vmul.f32 %v4558_v61, %v4558_v61 }
 0x5e8   : > { %v1953_v59 = vpack.c.bf16 %v1945_v42, %v1945_v42  ;;  %v2418_v47 = vadd.f32 %v4459_v16, %v2417_v30  ;;  %v2457_v44 = vunpack.c.l.bf16 %v2449_v24  ;;  %v2480_v40 = vunpack.c.l.bf16 %v2472_v37 }
 0x5e9   : > { %v1922_v12 = vmul.f32 %v1914_v11, %v4542_v51  ;;  %v2450_v42 = vpack.c.bf16 %v2442_v48, %v2442_v48  ;;  %v2037_v24 = vadd.f32 1.0, %v2029_v58  ;;  %v2038_v54 = vadd.f32 1.0, %v2030_v27 }
 0x5ea   : > { %v1961_v20 = vunpack.c.l.bf16 %v1953_v59  ;;  %v2427_v56 = vpack.c.bf16 %v2418_v47, %v2418_v47  ;;  %v2465_v52 = vmul.f32 %v2457_v44, %v4546_v18  ;;  %v2488_v36 = vmul.f32 0.044677734, %v2480_v40 }
 0x5eb   : > { %v1930_v9 = vpack.c.bf16 %v1922_v12, %v1922_v12  ;;  %v2458_v1 = vunpack.c.l.bf16 %v2450_v42  ;;  %v2045_v37 = vpack.c.bf16 %v2037_v24, %v2037_v24  ;;  %v2046_v48 = vpack.c.bf16 %v2038_v54, %v2038_v54 }
 0x5ec   : > { %v1969_v30 = vadd.f32 %v1961_v20, %v4515_v19  ;;  %v4572_v60 = vunpack.c.l.bf16 %v2427_v56  ;;  %v2473_v57 = vpack.c.bf16 %v2465_v52, %v2465_v52  ;;  %v2496_v59 = vpack.c.bf16 %v2488_v36, %v2488_v36 }
 0x5ed   : > { %v1938_v11 = vunpack.c.l.bf16 %v1930_v9  ;;  %v2466_v8 = vmul.f32 %v2458_v1, %v4558_v61  ;;  %v2053_v41 = vunpack.c.l.bf16 %v2045_v37  ;;  %v2054_v42 = vunpack.c.l.bf16 %v2046_v48 }
 0x5ee   : > { %v1977_v31 = vpack.c.bf16 %v1969_v30, %v1969_v30  ;;  %v2443_v47 = vmul.f32 %v4572_v60, %v4572_v60  ;;  %v2481_v44 = vunpack.c.l.bf16 %v2473_v57  ;;  %v2504_v40 = vunpack.c.l.bf16 %v2496_v59 }
 0x5ef   : > { %v1946_v58 = vmul.f32 0.044677734, %v1938_v11  ;;  %v2474_v52 = vpack.c.bf16 %v2466_v8, %v2466_v8  ;;  %v2061_v62 = vmul.f32 0.5, %v2053_v41  ;;  %v2062_v2 = vmul.f32 0.5, %v2054_v42 }
 0x5f0   : > { %v1985_v20 = vunpack.c.l.bf16 %v1977_v31  ;;  %v2451_v56 = vpack.c.bf16 %v2443_v47, %v2443_v47  ;;  %v2489_v12 = vmul.f32 0.044677734, %v2481_v44  ;;  %v2512_v36 = vadd.f32 %v2504_v40, %v4525_v45 }
 0x5f1   : > { %v1954_v24 = vpack.c.bf16 %v1946_v58, %v1946_v58  ;;  %v2482_v57 = vunpack.c.l.bf16 %v2474_v52  ;;  %v2069_v59 = vpack.c.bf16 %v2061_v62, %v2061_v62  ;;  %v2070_v44 = vpack.c.bf16 %v2062_v2, %v2062_v2 }
 0x5f2   : > { %v4577_v27 = vmul.f32 0.796875, %v1985_v20  ;;  %v2459_v30 = vunpack.c.l.bf16 %v2451_v56  ;;  %v2497_v9 = vpack.c.bf16 %v2489_v12, %v2489_v12  ;;  %v2520_v54 = vpack.c.bf16 %v2512_v36, %v2512_v36 }
 0x5f3   : > { %v1962_v47 = vunpack.c.l.bf16 %v1954_v24  ;;  %v2490_v11 = vmul.f32 0.044677734, %v2482_v57  ;;  %v2077_v20 = vunpack.c.l.bf16 %v2069_v59  ;;  %v4784_v41 = vpack.c.bf16 %v4521_v43, %v4521_v43 }
 0x5f4   : > { %v2001_v1 = vpack.c.bf16 %v4577_v27, %v4577_v27  ;;  %v2467_v31 = vmul.f32 %v2459_v30, %v4572_v60  ;;  %v2505_v37 = vunpack.c.l.bf16 %v2497_v9  ;;  %v2528_v8 = vunpack.c.l.bf16 %v2520_v54 }
 0x5f5   : > { %v2572_v40 = vunpack.c.l.bf16 %v4784_v41  ;;  %v1970_v56 = vadd.f32 %v1962_v47, %v4542_v51  ;;  %v2498_v12 = vpack.c.bf16 %v2490_v11, %v2490_v11  ;;  %v2078_v52 = vunpack.c.l.bf16 %v2070_v44 }
 0x5f6   : > { %v2475_v48 = vpack.c.bf16 %v2467_v31, %v2467_v31  ;;  %v2513_v58 = vadd.f32 %v2505_v37, %v4546_v18  ;;  %v2536_v42 = vmul.f32 0.796875, %v2528_v8  ;;  %v2085_v62 = vmul.f32 %v2077_v20, %v4463_v63 }
 0x5f7   : > { %v4785_v2 = vpack.c.bf16 %v4544_v4, %v4544_v4  ;;  %v1978_v30 = vpack.c.bf16 %v1970_v56, %v1970_v56  ;;  %v2506_v9 = vunpack.c.l.bf16 %v2498_v12  ;;  %v2086_v43 = vmul.f32 %v2078_v52, %v4475_v14 }
 0x5f8   : > { %v2483_v27 = vunpack.c.l.bf16 %v2475_v48  ;;  %v2521_v24 = vpack.c.bf16 %v2513_v58, %v2513_v58  ;;  %v2544_v57 = vpack.c.bf16 %v2536_v42, %v2536_v42  ;;  %v2580_v31 = vadd.f32 1.0, %v2572_v40 }
 0x5f9   : > { %v2573_v36 = vunpack.c.l.bf16 %v4785_v2  ;;  %v1986_v47 = vunpack.c.l.bf16 %v1978_v30  ;;  %v2514_v11 = vadd.f32 %v2506_v9, %v4558_v61  ;;  %v2093_v44 = vpack.c.bf16 %v2086_v43, %v2085_v62 }
 0x5fa   : > { %v2491_v54 = vmul.f32 0.044677734, %v2483_v27  ;;  %v2529_v37 = vunpack.c.l.bf16 %v2521_v24  ;;  %v2588_v63 = vpack.c.bf16 %v2580_v31, %v2580_v31  ;;  %v4786_v4 = vpack.c.bf16 %v4528_v53, %v4528_v53 }
 0x5fb   : > { %v2581_v59 = vadd.f32 1.0, %v2573_v36  ;;  %v1994_v41 = vmul.f32 0.796875, %v1986_v47  ;;  %v2522_v58 = vpack.c.bf16 %v2514_v11, %v2514_v11  ;;  %2105 = vmatmul.bf16.vlgmr.msra.gmra.mxu1 %v2093_v44  ;;  %v4787_v14 = vpack.c.bf16 %v4556_v39, %v4556_v39 }
 0x5fc   : > { %v2499_v8 = vpack.c.bf16 %v2491_v54, %v2491_v54  ;;  %v2007_v20 = vunpack.c.l.bf16 %v4786_v4  ;;  %v2537_v56 = vmul.f32 0.796875, %v2529_v37  ;;  %v2596_v52 = vunpack.c.l.bf16 %v2588_v63 }
 0x5fd   : > { %v2589_v48 = vpack.c.bf16 %v2581_v59, %v2581_v59  ;;  %v2008_v40 = vunpack.c.l.bf16 %v4787_v14  ;;  %v2002_v27 = vpack.c.bf16 %v1994_v41, %v1994_v41  ;;  %v2530_v2 = vunpack.c.l.bf16 %v2522_v58 }
 0x5fe   : > { %v2507_v12 = vunpack.c.l.bf16 %v2499_v8  ;;  %3231 = vtanh.f32 %v2007_v20  ;;  %v2545_v62 = vpack.c.bf16 %v2537_v56, %v2537_v56  ;;  %v2604_v53 = vmul.f32 0.5, %v2596_v52 }
 0x5ff   : > { %v2597_v42 = vunpack.c.l.bf16 %v2589_v48  ;;  %3233 = vtanh.f32 %v2008_v40  ;;  %v4788_v24 = vpack.c.bf16 %v4530_v50, %v4530_v50  ;;  %v2538_v43 = vmul.f32 0.796875, %v2530_v2 }
 0x600   : > { %v2515_v36 = vadd.f32 %v2507_v12, %v4572_v60  ;;  %v4789_v39 = vpack.c.bf16 %v4560_v38, %v4560_v38  ;;  %v2009_v31 = vunpack.c.l.bf16 %v2001_v1  ;;  %v2010_v59 = vunpack.c.l.bf16 %v2002_v27 }
 0x601   : > { %v2605_v30 = vmul.f32 0.5, %v2597_v42  ;;  %v2550_v9 = vunpack.c.l.bf16 %v4788_v24  ;;  %v2612_v37 = vpack.c.bf16 %v2604_v53, %v2604_v53  ;;  %v2546_v44 = vpack.c.bf16 %v2538_v43, %v2538_v43 }
 0x602   : > { %v2551_v54 = vunpack.c.l.bf16 %v4789_v39  ;;  %v2523_v47 = vpack.c.bf16 %v2515_v36, %v2515_v36  ;;  %v2552_v8 = vunpack.c.l.bf16 %v2544_v57  ;;  %v2553_v63 = vunpack.c.l.bf16 %v2545_v62 }
 0x603   : > { %v2613_v11 = vpack.c.bf16 %v2605_v30, %v2605_v30  ;;  %3235 = vtanh.f32 %v2550_v9  ;;  %v2620_v20 = vunpack.c.l.bf16 %v2612_v37  ;;  %v2554_v12 = vunpack.c.l.bf16 %v2546_v44 }
 0x604   : > { %3237 = vtanh.f32 %v2551_v54  ;;  %v3232_v48 = vpop.eup %3231  ;;  %v2531_v4 = vunpack.c.l.bf16 %v2523_v47 }
 0x605   : > { %v2621_v50 = vunpack.c.l.bf16 %v2613_v11  ;;  %3239 = vtanh.f32 %v2009_v31  ;;  %v3234_v41 = vpop.eup %3233  ;;  %v2023_v56 = vpack.c.bf16 %v3232_v48, %v3232_v48  ;;  %v2628_v1 = vmul.f32 %v2620_v20, %v4465_v23 }
 0x606   : > { %3241 = vtanh.f32 %v2010_v59  ;;  %v2539_v38 = vmul.f32 0.796875, %v2531_v4  ;;  %v2024_v14 = vpack.c.bf16 %v3234_v41, %v3234_v41 }
 0x607   : > { %v2629_v58 = vmul.f32 %v2621_v50, %v4477_v5  ;;  %v2031_v40 = vunpack.c.l.bf16 %v2023_v56  ;;  %3243 = vtanh.f32 %v2552_v8 }
 0x608   : > { %v2547_v57 = vpack.c.bf16 %v2539_v38, %v2539_v38  ;;  %v2032_v27 = vunpack.c.l.bf16 %v2024_v14  ;;  %3245 = vtanh.f32 %v2553_v63 }
 0x609   : > { %v3236_v52 = vpop.eup %3235  ;;  %v2636_v42 = vpack.c.bf16 %v2629_v58, %v2628_v1  ;;  %v2039_v2 = vadd.f32 1.0, %v2031_v40  ;;  %3247 = vtanh.f32 %v2554_v12 }
 0x60a   : > { %v3238_v62 = vpop.eup %3237  ;;  %v2566_v36 = vpack.c.bf16 %v3236_v52, %v3236_v52  ;;  %v2040_v30 = vadd.f32 1.0, %v2032_v27  ;;  %v2555_v9 = vunpack.c.l.bf16 %v2547_v57 }
 0x60b   : > { %v3240_v53 = vpop.eup %3239  ;;  %2648 = vmatmul.bf16.vlgmr.msra.gmra.mxu2 %v2636_v42  ;;  %v2567_v24 = vpack.c.bf16 %v3238_v62, %v3238_v62  ;;  %v2047_v43 = vpack.c.bf16 %v2039_v2, %v2039_v2 }
 0x60c   : > { %v3242_v23 = vpop.eup %3241  ;;  %v2574_v5 = vunpack.c.l.bf16 %v2566_v36  ;;  %v2025_v39 = vpack.c.bf16 %v3240_v53, %v3240_v53  ;;  %v2048_v54 = vpack.c.bf16 %v2040_v30, %v2040_v30  ;;  %3249 = vtanh.f32 %v2555_v9 }
 0x60d   : > { %v2575_v31 = vunpack.c.l.bf16 %v2567_v24  ;;  %v2026_v59 = vpack.c.bf16 %v3242_v23, %v3242_v23  ;;  %v3244_v47 = vpop.eup %3243  ;;  %v2055_v37 = vunpack.c.l.bf16 %v2047_v43 }
 0x60e   : > { %v2582_v11 = vadd.f32 1.0, %v2574_v5  ;;  %v2033_v44 = vunpack.c.l.bf16 %v2025_v39  ;;  %v3246_v8 = vpop.eup %3245  ;;  %v2056_v63 = vunpack.c.l.bf16 %v2048_v54  ;;  %v2568_v20 = vpack.c.bf16 %v3244_v47, %v3244_v47 }
 0x60f   : > { %v2583_v48 = vadd.f32 1.0, %v2575_v31  ;;  %v2034_v4 = vunpack.c.l.bf16 %v2026_v59  ;;  %v2063_v50 = vmul.f32 0.5, %v2055_v37  ;;  %v2569_v38 = vpack.c.bf16 %v3246_v8, %v3246_v8  ;;  %v3248_v27 = vpop.eup %3247 }
 0x610   : > { %v2590_v41 = vpack.c.bf16 %v2582_v11, %v2582_v11  ;;  %v2041_v56 = vadd.f32 1.0, %v2033_v44  ;;  %v2064_v1 = vmul.f32 0.5, %v2056_v63  ;;  %v2576_v40 = vunpack.c.l.bf16 %v2568_v20 }
 0x611   : > { %v2591_v58 = vpack.c.bf16 %v2583_v48, %v2583_v48  ;;  %v2042_v14 = vadd.f32 1.0, %v2034_v4  ;;  %v2071_v52 = vpack.c.bf16 %v2063_v50, %v2063_v50  ;;  %v2577_v42 = vunpack.c.l.bf16 %v2569_v38 }
 0x612   : > { %v2598_v12 = vunpack.c.l.bf16 %v2590_v41  ;;  %v2049_v57 = vpack.c.bf16 %v2041_v56, %v2041_v56  ;;  %v2072_v62 = vpack.c.bf16 %v2064_v1, %v2064_v1  ;;  %v2584_v53 = vadd.f32 1.0, %v2576_v40  ;;  %v3250_v30 = vpop.eup %3249 }
 0x613   : > { %v2599_v2 = vunpack.c.l.bf16 %v2591_v58  ;;  %v2050_v36 = vpack.c.bf16 %v2042_v14, %v2042_v14  ;;  %v2079_v24 = vunpack.c.l.bf16 %v2071_v52  ;;  %v2585_v43 = vadd.f32 1.0, %v2577_v42 }
 0x614   : > { %v2606_v9 = vmul.f32 0.5, %v2598_v12  ;;  %v2057_v23 = vunpack.c.l.bf16 %v2049_v57  ;;  %v2080_v5 = vunpack.c.l.bf16 %v2072_v62  ;;  %v2592_v31 = vpack.c.bf16 %v2584_v53, %v2584_v53 }
 0x615   : > { %v2607_v39 = vmul.f32 0.5, %v2599_v2  ;;  %v2058_v54 = vunpack.c.l.bf16 %v2050_v36  ;;  %v2593_v47 = vpack.c.bf16 %v2585_v43, %v2585_v43  ;;  %v2087_v37 = vmul.f32 %v2079_v24, %v4487_v32 }
 0x616   : > { %v2614_v59 = vpack.c.bf16 %v2606_v9, %v2606_v9  ;;  %v2088_v11 = vmul.f32 %v2080_v5, %v4501_v55  ;;  %v2065_v48 = vmul.f32 0.5, %v2057_v23  ;;  %v2600_v41 = vunpack.c.l.bf16 %v2592_v31 }
 0x617   : > { %v2615_v44 = vpack.c.bf16 %v2607_v39, %v2607_v39  ;;  %v2066_v8 = vmul.f32 0.5, %v2058_v54  ;;  %v2601_v4 = vunpack.c.l.bf16 %v2593_v47  ;;  %v2570_v56 = vpack.c.bf16 %v3248_v27, %v3248_v27 }
 0x618   : > { %v2622_v63 = vunpack.c.l.bf16 %v2614_v59  ;;  %v2094_v20 = vpack.c.bf16 %v2088_v11, %v2087_v37  ;;  %v2571_v38 = vpack.c.bf16 %v3250_v30, %v3250_v30  ;;  %v2073_v55 = vpack.c.bf16 %v2065_v48, %v2065_v48 }
 0x619   : > { %v2623_v50 = vunpack.c.l.bf16 %v2615_v44  ;;  %v2074_v14 = vpack.c.bf16 %v2066_v8, %v2066_v8  ;;  %v2609_v40 = vmul.f32 0.5, %v2601_v4  ;;  %v2608_v12 = vmul.f32 0.5, %v2600_v41 }
 0x61a   : > { %2110 = vmatmul.bf16.gmra.mxu1 %v2094_v20  ;;  %v2630_v1 = vmul.f32 %v2622_v63, %v4489_v29  ;;  %v2579_v32 = vunpack.c.l.bf16 %v2571_v38  ;;  %v2578_v57 = vunpack.c.l.bf16 %v2570_v56  ;;  %v2081_v36 = vunpack.c.l.bf16 %v2073_v55 }
 0x61b   : > { %v2631_v58 = vmul.f32 %v2623_v50, %v4503_v0  ;;  %v2082_v42 = vunpack.c.l.bf16 %v2074_v14  ;;  %v2617_v62 = vpack.c.bf16 %v2609_v40, %v2609_v40  ;;  %v2616_v53 = vpack.c.bf16 %v2608_v12, %v2608_v12 }
 0x61c   : > { %v2587_v2 = vadd.f32 1.0, %v2579_v32  ;;  %v2586_v27 = vadd.f32 1.0, %v2578_v57  ;;  %v2089_v0 = vmul.f32 %v2081_v36, %v4515_v19 }
 0x61d   : > { %v2637_v52 = vpack.c.bf16 %v2631_v58, %v2630_v1  ;;  %v2090_v30 = vmul.f32 %v2082_v42, %v4542_v51  ;;  %v2625_v24 = vunpack.c.l.bf16 %v2617_v62  ;;  %v2624_v9 = vunpack.c.l.bf16 %v2616_v53 }
 0x61e   : > { %v2595_v29 = vpack.c.bf16 %v2587_v2, %v2587_v2  ;;  %v2594_v23 = vpack.c.bf16 %v2586_v27, %v2586_v27 }
 0x61f   : > { %2653 = vmatmul.bf16.gmra.mxu2 %v2637_v52  ;;  %v2095_v43 = vpack.c.bf16 %v2090_v30, %v2089_v0  ;;  %v2633_v5 = vmul.f32 %v2625_v24, %v4546_v18  ;;  %v2632_v54 = vmul.f32 %v2624_v9, %v4525_v45 }
 0x620   : > { %v2603_v39 = vunpack.c.l.bf16 %v2595_v29  ;;  %v2602_v31 = vunpack.c.l.bf16 %v2594_v23 }
 0x621   : > { %v2638_v59 = vpack.c.bf16 %v2633_v5, %v2632_v54 }
 0x622   : > { %v2611_v47 = vmul.f32 0.5, %v2603_v39  ;;  %v2610_v37 = vmul.f32 0.5, %v2602_v31 }
 0x624   : > { %v2619_v11 = vpack.c.bf16 %v2611_v47, %v2611_v47  ;;  %v2618_v51 = vpack.c.bf16 %v2610_v37, %v2610_v37 }
 0x626   : > { %v2627_v19 = vunpack.c.l.bf16 %v2619_v11  ;;  %v2626_v48 = vunpack.c.l.bf16 %v2618_v51 }
 0x628   : > { %v2635_v18 = vmul.f32 %v2627_v19, %v4572_v60  ;;  %v2634_v45 = vmul.f32 %v2626_v48, %v4558_v61 }
 0x62a   : > { %2115 = vmatmul.bf16.gmra.mxu1 %v2095_v43  ;;  %v2639_v38 = vpack.c.bf16 %v2635_v18, %v2634_v45 }
 0x62f   : > { %2658 = vmatmul.bf16.gmra.mxu2 %v2638_v59 }
 0x632   : > { %v1872_v44 = vpop.f32.mrf.mxu2 }
 0x633   : > { %v1873_v8 = vadd.f32 %v4459_v16, %v1872_v44 }
 0x635   : > { %v1883_v63 = vpack.c.bf16 %v1873_v8, %v1873_v8 }
 0x637   : > { %v1891_v4 = vunpack.c.l.bf16 %v1883_v63 }
 0x639   : > { %v1899_v20 = vmul.f32 %v1891_v4, %v1891_v4 }
 0x63a   : > { %v1874_v50 = vpop.f32.mrf.mxu2 }
 0x63b   : > { %v1907_v41 = vpack.c.bf16 %v1899_v20, %v1899_v20  ;;  %v1875_v56 = vadd.f32 %v4459_v16, %v1874_v50 }
 0x63d   : > { %v1915_v1 = vunpack.c.l.bf16 %v1907_v41  ;;  %v1884_v58 = vpack.c.bf16 %v1875_v56, %v1875_v56 }
 0x63f   : > { %v1923_v14 = vmul.f32 %v1915_v1, %v1891_v4  ;;  %v1892_v40 = vunpack.c.l.bf16 %v1884_v58  ;;  %2663 = vmatmul.bf16.gmra.mxu2 %v2639_v38 }
 0x641   : > { %v1931_v32 = vpack.c.bf16 %v1923_v14, %v1923_v14  ;;  %v1900_v52 = vmul.f32 %v1892_v40, %v1892_v40 }
 0x643   : > { %v1939_v55 = vunpack.c.l.bf16 %v1931_v32  ;;  %v1908_v12 = vpack.c.bf16 %v1900_v52, %v1900_v52 }
 0x645   : > { %v1947_v57 = vmul.f32 0.044677734, %v1939_v55  ;;  %v1916_v42 = vunpack.c.l.bf16 %v1908_v12  ;;  %v4624_v12 = vld [vmem:[%s4739_s8] ss:$0 sm:$0xff] }
 0x647   : > { %v1955_v60 = vpack.c.bf16 %v1947_v57, %v1947_v57  ;;  %v1924_v62 = vmul.f32 %v1916_v42, %v1892_v40 }
 0x649   : > { %v1963_v2 = vunpack.c.l.bf16 %v1955_v60  ;;  %v1932_v61 = vpack.c.bf16 %v1924_v62, %v1924_v62 }
 0x64b   : > { %v1971_v36 = vadd.f32 %v1963_v2, %v1891_v4  ;;  %v1940_v53 = vunpack.c.l.bf16 %v1932_v61 }
 0x64d   : > { %v1979_v27 = vpack.c.bf16 %v1971_v36, %v1971_v36  ;;  %v1948_v16 = vmul.f32 0.044677734, %v1940_v53 }
 0x64f   : > { %v1987_v30 = vunpack.c.l.bf16 %v1979_v27  ;;  %v1956_v24 = vpack.c.bf16 %v1948_v16, %v1948_v16 }
 0x651   : > { %v1995_v29 = vmul.f32 0.796875, %v1987_v30  ;;  %v1964_v0 = vunpack.c.l.bf16 %v1956_v24 }
 0x653   : > { %v2003_v9 = vpack.c.bf16 %v1995_v29, %v1995_v29  ;;  %v1972_v23 = vadd.f32 %v1964_v0, %v1892_v40 }
 0x655   : > { %v1980_v43 = vpack.c.bf16 %v1972_v23, %v1972_v23  ;;  %v2011_v5 = vunpack.c.l.bf16 %v2003_v9 }
 0x657   : > { %v1988_v39 = vunpack.c.l.bf16 %v1980_v43  ;;  %3251 = vtanh.f32 %v2011_v5 }
 0x659   : > { %v1996_v54 = vmul.f32 0.796875, %v1988_v39 }
 0x65b   : > { %v2004_v31 = vpack.c.bf16 %v1996_v54, %v1996_v54 }
 0x65d   : > { %v3252_v59 = vpop.eup %3251  ;;  %v2012_v47 = vunpack.c.l.bf16 %v2004_v31 }
 0x65e   : > { %v2027_v37 = vpack.c.bf16 %v3252_v59, %v3252_v59 }
 0x65f   : > { %3253 = vtanh.f32 %v2012_v47 }
 0x660   : > { %v2035_v11 = vunpack.c.l.bf16 %v2027_v37 }
 0x662   : > { %v2043_v51 = vadd.f32 1.0, %v2035_v11 }
 0x664   : > { %v2051_v44 = vpack.c.bf16 %v2043_v51, %v2043_v51 }
 0x665   : > { %v3254_v8 = vpop.eup %3253 }
 0x666   : > { %v2028_v19 = vpack.c.bf16 %v3254_v8, %v3254_v8  ;;  %v2059_v63 = vunpack.c.l.bf16 %v2051_v44 }
 0x668   : > { %v2036_v48 = vunpack.c.l.bf16 %v2028_v19  ;;  %v2067_v20 = vmul.f32 0.5, %v2059_v63 }
 0x66a   : > { %v2044_v18 = vadd.f32 1.0, %v2036_v48  ;;  %v2075_v41 = vpack.c.bf16 %v2067_v20, %v2067_v20 }
 0x66c   : > { %v2052_v45 = vpack.c.bf16 %v2044_v18, %v2044_v18  ;;  %v2083_v1 = vunpack.c.l.bf16 %v2075_v41 }
 0x66e   : > { %v2060_v50 = vunpack.c.l.bf16 %v2052_v45  ;;  %v2091_v14 = vmul.f32 %v2083_v1, %v1891_v4 }
 0x670   : > { %v2068_v56 = vmul.f32 0.5, %v2060_v50 }
 0x672   : > { %v2076_v38 = vpack.c.bf16 %v2068_v56, %v2068_v56  ;;  %v4660_v56 = vpop.permute.xlu2 %3071 }
 0x674   : > { %v2084_v58 = vunpack.c.l.bf16 %v2076_v38 }
 0x676   : > { %v2092_v32 = vmul.f32 %v2084_v58, %v1892_v40 }
 0x678   : > { %v2096_v52 = vpack.c.bf16 %v2092_v32, %v2091_v14  ;;  %v2106_v55 = vpop.f32.mrf.mxu1  ;;  %v4790_v32 = vld [vmem:[#allocation10_spill] sm:$0xff] }
 0x679   : > { %v2107_v57 = vadd.f32 %v4624_v12, %v2106_v55  ;;  %v4791_v55 = vld [vmem:[#allocation11_spill] sm:$0xff] }
 0x67a   : > { %2120 = vmatmul.bf16.gmra.mxu1 %v2096_v52 }
 0x67b   : > { %v2126_v62 = vadd.f32 %v2107_v57, %v3980_v7  ;;  %v1019_v57 = vadd.f32 %v4624_v12, %v4433_v3 }
 0x680   : > { %v2108_v42 = vpop.f32.mrf.mxu1 }
 0x681   : > { %v2109_v60 = vadd.f32 %v4624_v12, %v2108_v42 }
 0x683   : > { %v2127_v2 = vadd.f32 %v2109_v60, %v4033_v35 }
 0x685   : > { %v3080_v61 = vpack.i.bf16 %v2127_v2, %v2126_v62 }
 0x687   : > { %3081 = vrot.lane.b32.xlu1 %v3080_v61, %s3275_s24 }
 0x68e   : > { %v2649_v4 = vpop.f32.mrf.mxu2 }
 0x68f   : > { %v2650_v35 = vadd.f32 %v4624_v12, %v2649_v4 }
 0x691   : > { %v2669_v5 = vadd.f32 %v2650_v35, %v4028_v6 }
 0x696   : > { %v2651_v40 = vpop.f32.mrf.mxu2 }
 0x697   : > { %v2111_v36 = vpop.f32.mrf.mxu1  ;;  %v2652_v7 = vadd.f32 %v4624_v12, %v2651_v40  ;;  %v4792_v40 = vld [vmem:[#allocation2_spill] sm:$0xff] }
 0x698   : > { %v2112_v53 = vadd.f32 %v4624_v12, %v2111_v36 }
 0x699   : > { %v2670_v23 = vadd.f32 %v2652_v7, %v4036_v33 }
 0x69a   : > { %v2128_v24 = vadd.f32 %v2112_v53, %v4043_v13  ;;  %v4793_v53 = vld [vmem:[#allocation3_spill] sm:$0xff] }
 0x69b   : > { %v3100_v39 = vpack.i.bf16 %v2670_v23, %v2669_v5  ;;  %v3067_v23 = vpop.permute.xlu0 %3066  ;;  %v1027_v5 = vadd.f32 %v4624_v12, %v4440_v17 }
 0x69f   : > { %v2113_v27 = vpop.f32.mrf.mxu1 }
 0x6a0   : > { %v2114_v16 = vadd.f32 %v4624_v12, %v2113_v27  ;;  %v1037_v27 = vadd.f32 %v1019_v57, %v4793_v53  ;;  %v4802_v57 = vld [vmem:[#allocation9_spill] sm:$0xff]  ;;  %v4803_v53 = vld [vmem:[#allocation14_spill] sm:$0xff] }
 0x6a2   : > { %v2654_v30 = vpop.f32.mrf.mxu2  ;;  %v2129_v29 = vadd.f32 %v2114_v16, %v4053_v21 }
 0x6a3   : > { %v2655_v11 = vadd.f32 %v4624_v12, %v2654_v30 }
 0x6a4   : > { %v3085_v0 = vpack.i.bf16 %v2129_v29, %v2128_v24 }
 0x6a5   : > { %v2671_v8 = vadd.f32 %v2655_v11, %v4046_v28 }
 0x6a6   : > { %3086 = vrot.lane.b32.xlu2 %v3085_v0, %s3275_s24 }
 0x6a7   : > { %v2116_v9 = vpop.f32.mrf.mxu1 }
 0x6a8   : > { %v2117_v54 = vadd.f32 %v4624_v12, %v2116_v9 }
 0x6aa   : > { %v2656_v43 = vpop.f32.mrf.mxu2  ;;  %v2130_v59 = vadd.f32 %v2117_v54, %v4063_v49  ;;  %v4794_v54 = vld [vmem:[#allocation6_spill] sm:$0xff] }
 0x6ab   : > { %v2657_v37 = vadd.f32 %v4624_v12, %v2656_v43  ;;  %v3077_v43 = vpop.permute.xlu0 %3076 }
 0x6ad   : > { %v2672_v6 = vadd.f32 %v2657_v37, %v4056_v25 }
 0x6ae   : > { %3101 = vrot.lane.b32.xlu2 %v3100_v39, %s3278_s28  ;;  %v3073_v39 = vunpack.i.l.bf16 %v4660_v56 }
 0x6af   : > { %v2118_v13 = vpop.f32.mrf.mxu1  ;;  %v3105_v63 = vpack.i.bf16 %v2672_v6, %v2671_v8 }
 0x6b0   : > { %v2119_v21 = vadd.f32 %v4624_v12, %v2118_v13  ;;  %v1040_v13 = vadd.f32 %v1027_v5, %v4794_v54 }
 0x6b2   : > { %v2659_v31 = vpop.f32.mrf.mxu2  ;;  %v2131_v47 = vadd.f32 %v2119_v21, %v4077_v22 }
 0x6b3   : > { %v2660_v51 = vadd.f32 %v4624_v12, %v2659_v31 }
 0x6b4   : > { %v3090_v33 = vpack.i.bf16 %v2131_v47, %v2130_v59  ;;  %v2777_v59 = vsel %vm470_vm1, %v1040_v13, %v3073_v39  ;;  %v4795_v47 = vld [vmem:[#allocation12_spill] sm:$0xff] }
 0x6b5   : > { %v2673_v49 = vadd.f32 %v2660_v51, %v4067_v15  ;;  %v1022_v37 = vadd.f32 %v4624_v12, %v4795_v47  ;;  %v3069_v51 = vunpack.i.h.bf16 %v3067_v23 }
 0x6b6   : > { %3091 = vrot.lane.b32.xlu0 %v3090_v33, %s3275_s24  ;;  %v4796_v33 = vld [vmem:[#allocation13_spill] sm:$0xff] }
 0x6b7   : > { %v1024_v11 = vadd.f32 %v4624_v12, %v4796_v33 }
 0x6ba   : > { %v2661_v44 = vpop.f32.mrf.mxu2 }
 0x6bb   : > { %v2662_v19 = vadd.f32 %v4624_v12, %v2661_v44  ;;  %v3068_v44 = vunpack.i.l.bf16 %v3067_v23 }
 0x6bd   : > { %v2674_v22 = vadd.f32 %v2662_v19, %v4082_v46  ;;  %v3062_v46 = vpop.permute.xlu1 %3061  ;;  %v4797_v19 = vld [vmem:[#allocation4_spill] sm:$0xff] }
 0x6be   : > { %3106 = vrot.lane.b32.xlu0 %v3105_v63, %s3278_s28  ;;  %v3064_v62 = vunpack.i.h.bf16 %v3062_v46  ;;  %v3063_v2 = vunpack.i.l.bf16 %v3062_v46 }
 0x6bf   : > { %v3110_v48 = vpack.i.bf16 %v2674_v22, %v2673_v49  ;;  %v1038_v49 = vadd.f32 %v1022_v37, %v4797_v19  ;;  %v4798_v22 = vld [vmem:[#allocation5_spill] sm:$0xff] }
 0x6c0   : > { %v2774_v16 = vsel %vm470_vm1, %v1037_v27, %v3064_v62  ;;  %v1039_v63 = vadd.f32 %v1024_v11, %v4798_v22  ;;  %v1029_v27 = vadd.f32 %v4624_v12, %v4803_v53 }
 0x6c2   : > { %v2664_v18 = vpop.f32.mrf.mxu2 }
 0x6c3   : > { %v2665_v20 = vadd.f32 %v4624_v12, %v2664_v18  ;;  %v2776_v18 = vsel %vm470_vm1, %v1039_v63, %v3069_v51 }
 0x6c5   : > { %v2675_v50 = vadd.f32 %v2665_v20, %v4090_v26  ;;  %v2775_v20 = vsel %vm470_vm1, %v1038_v49, %v3068_v44 }
 0x6ca   : > { %v2666_v45 = vpop.f32.mrf.mxu2 }
 0x6cb   : > { %v2667_v25 = vadd.f32 %v4624_v12, %v2666_v45 }
 0x6cd   : > { %v2676_v28 = vadd.f32 %v2667_v25, %v4095_v10  ;;  %v1017_v10 = vadd.f32 %v4624_v12, %v4431_v34 }
 0x6cf   : > { %v3115_v41 = vpack.i.bf16 %v2676_v28, %v2675_v50  ;;  %v1036_v36 = vadd.f32 %v1017_v10, %v4792_v40 }
 0x6d1   : > { %3116 = vrot.lane.b32.xlu2 %v3115_v41, %s3278_s28  ;;  %v2773_v30 = vsel %vm470_vm1, %v1036_v36, %v3063_v2 }
 0x6f7   : > { %v2121_v15 = vpop.f32.mrf.mxu1 }
 0x6f8   : > { %v2122_v38 = vadd.f32 %v4624_v12, %v2121_v15 }
 0x6f9   : > { %v3082_v42 = vpop.permute.xlu1 %3081 }
 0x6fa   : > { %v2132_v52 = vadd.f32 %v2122_v38, %v4790_v32  ;;  %v3084_v61 = vunpack.i.h.bf16 %v3082_v42  ;;  %v3083_v4 = vunpack.i.l.bf16 %v3082_v42  ;;  %v4799_v38 = vld [vmem:[#allocation15_spill] sm:$0xff]  ;;  %v3079_v32 = vunpack.i.h.bf16 %v3077_v43 }
 0x6fc   : > { %v2781_v3 = vsel %vm428_vm0, %v2773_v30, %v3083_v4  ;;  %v2782_v24 = vsel %vm428_vm0, %v2774_v16, %v3084_v61 }
 0x6ff   : > { %v2123_v1 = vpop.f32.mrf.mxu1 }
 0x700   : > { %v2124_v58 = vadd.f32 %v4624_v12, %v2123_v1  ;;  %v3087_v14 = vpop.permute.xlu2 %3086  ;;  %v1032_v1 = vadd.f32 %v4624_v12, %v4799_v38 }
 0x701   : > { %v3089_v17 = vunpack.i.h.bf16 %v3087_v14  ;;  %v3088_v8 = vunpack.i.l.bf16 %v3087_v14 }
 0x702   : > { %v2133_v26 = vadd.f32 %v2124_v58, %v4791_v55  ;;  %v4800_v58 = vld [vmem:[#allocation16_spill] sm:$0xff] }
 0x703   : > { %v2784_v50 = vsel %vm428_vm0, %v2776_v18, %v3089_v17  ;;  %v2783_v28 = vsel %vm428_vm0, %v2775_v20, %v3088_v8  ;;  %v1034_v14 = vadd.f32 %v4624_v12, %v4800_v58 }
 0x704   : > { %v3095_v60 = vpack.i.bf16 %v2133_v26, %v2132_v52  ;;  %v3078_v52 = vunpack.i.l.bf16 %v3077_v43  ;;  %v4801_v26 = vld [vmem:[#allocation8_spill] sm:$0xff] }
 0x705   : > { %v1042_v10 = vadd.f32 %v1032_v1, %v4801_v26  ;;  %v1043_v42 = vadd.f32 %v1034_v14, %v4802_v57 }
 0x706   : > { %3096 = vrot.lane.b32.xlu1 %v3095_v60, %s3275_s24  ;;  %s4681_s24 = scalar_lea.vmem %s4740_s9, %s2879_s29 }
 0x707   : > { %v2780_v61 = vsel %vm470_vm1, %v1043_v42, %v3079_v32  ;;  %v2779_v4 = vsel %vm470_vm1, %v1042_v10, %v3078_v52 }
 0x708   : > { %v3102_v34 = vpop.permute.xlu2 %3101 }
 0x709   : > { %v3104_v29 = vunpack.i.h.bf16 %v3102_v34  ;;  %v3103_v7 = vunpack.i.l.bf16 %v3102_v34 }
 0x70b   : > { %v2790_v0 = vsel %vm2789_vm15, %v2781_v3, %v3103_v7  ;;  %v2791_v35 = vsel %vm2789_vm15, %v2782_v24, %v3104_v29  ;;  %v3074_v24 = vunpack.i.h.bf16 %v4660_v56 }
 0x70c   : > { %v3028_v9 = vpack.c.bf16 %v2791_v35, %v2790_v0  ;;  %v4804_v0 = vld [vmem:[#allocation7_spill] sm:$0xff] }
 0x70d   : > { %v1041_v35 = vadd.f32 %v1029_v27, %v4804_v0 }
 0x70e   : > { %3111 = vrot.lane.b32.xlu1 %v3110_v48, %s3278_s28  ;;  %3029 = vst [vmem:[%s4681_s24] sm:$0xff] %v3028_v9  }
 0x70f   : > { %v2778_v23 = vsel %vm470_vm1, %v1041_v35, %v3074_v24 }
 0x728   : > { %v3092_v21 = vpop.permute.xlu0 %3091 }
 0x729   : > { %v3093_v31 = vunpack.i.l.bf16 %v3092_v21  ;;  %v3094_v7 = vunpack.i.h.bf16 %v3092_v21 }
 0x72b   : > { %v2785_v6 = vsel %vm428_vm0, %v2777_v59, %v3093_v31  ;;  %v3117_v55 = vpop.permute.xlu2 %3116  ;;  %v2786_v5 = vsel %vm428_vm0, %v2778_v23, %v3094_v7 }
 0x72c   : > { %v3119_v40 = vunpack.i.h.bf16 %v3117_v55  ;;  %v3118_v36 = vunpack.i.l.bf16 %v3117_v55 }
 0x730   : > { %v3107_v48 = vpop.permute.xlu0 %3106 }
 0x731   : > { %v3109_v45 = vunpack.i.h.bf16 %v3107_v48  ;;  %v3108_v25 = vunpack.i.l.bf16 %v3107_v48 }
 0x733   : > { %v2793_v41 = vsel %vm2789_vm15, %v2784_v50, %v3109_v45  ;;  %v2792_v15 = vsel %vm2789_vm15, %v2783_v28, %v3108_v25 }
 0x734   : > { %v3033_v46 = vpack.c.bf16 %v2793_v41, %v2792_v15 }
 0x736   : > { %3045 = vst [vmem:[%s4681_s24 + $0x8] sm:$0xff] %v3033_v46  }
 0x778   : > { %v3097_v60 = vpop.permute.xlu1 %3096 }
 0x779   : > { %v3099_v62 = vunpack.i.h.bf16 %v3097_v60  ;;  %v3098_v2 = vunpack.i.l.bf16 %v3097_v60 }
 0x77b   : > { %v2788_v16 = vsel %vm428_vm0, %v2780_v61, %v3099_v62  ;;  %v2787_v30 = vsel %vm428_vm0, %v2779_v4, %v3098_v2 }
 0x77c   : > { %v2797_v34 = vsel %vm2789_vm15, %v2788_v16, %v3119_v40  ;;  %v2796_v3 = vsel %vm2789_vm15, %v2787_v30, %v3118_v36 }
 0x77d   : > { %v3043_v29 = vpack.c.bf16 %v2797_v34, %v2796_v3 }
 0x77f   : > { %3047 = vst [vmem:[%s4681_s24 + $0x18] sm:$0xff] %v3043_v29  }
 0x780   : > { %v3112_v9 = vpop.permute.xlu1 %3111 }
 0x781   : > { %v3114_v12 = vunpack.i.h.bf16 %v3112_v9  ;;  %v3113_v43 = vunpack.i.l.bf16 %v3112_v9 }
 0x783   : > { %v2795_v39 = vsel %vm2789_vm15, %v2786_v5, %v3114_v12  ;;  %v2794_v54 = vsel %vm2789_vm15, %v2785_v6, %v3113_v43 }
 0x784   : > { %v3038_v13 = vpack.c.bf16 %v2795_v39, %v2794_v54 }
 0x786   : > { %3046 = vst [vmem:[%s4681_s24 + $0x10] sm:$0xff] %v3038_v13  }
 0x787 PF: > { %s19_s30 = sadd.s32 1, %s3273_s30  }
 0x788   : > { %p16_p4 = scmp.ge.s32.totalorder %s19_s30, 4  }
 0x78a   :  { %18 = sbr.rel (!%p16_p4) target bundleno = 1 (0x1), region = 86 }

// kernel: sam2_image_encoder.5
= control target key start
LH: loop header
LB: loop body
LE: loop exit
PB: predicated region body
PF: predicated region fallthrough
CT: control target
= control target key end

     0   :  { %s1922_s30 = smov 0   ;;  %s2559_s0 = inlined_call_operand.vmem [shape: bf16[32,512], index: 0, kind: input, shape index: {}]   ;;  %s2560_s1 = inlined_call_operand.vmem [shape: bf16[128,64], index: 1, kind: input, shape index: {}]   ;;  %s2561_s2 = inlined_call_operand.vmem [shape: f32[1,64], index: 2, kind: input, shape index: {}]   ;;  %s2562_s3 = inlined_call_operand.vmem [shape: f32[1,64], index: 3, kind: input, shape index: {}]   ;;  %s2563_s4 = inlined_call_operand.vmem [shape: f32[1,64], index: 4, kind: input, shape index: {}]   ;;  %s2564_s5 = inlined_call_operand.vmem [shape: bf16[64,256], index: 5, kind: input, shape index: {}]   ;;  %s2565_s6 = inlined_call_operand.vmem [shape: f32[1,256], index: 6, kind: input, shape index: {}]   ;;  %s2566_s7 = inlined_call_operand.vmem [shape: bf16[256,64], index: 7, kind: input, shape index: {}]   ;;  %s2567_s8 = inlined_call_operand.vmem [shape: f32[1,64], index: 8, kind: input, shape index: {}]   ;;  %s2568_s9 = inlined_call_operand.vmem [shape: bf16[32,256], index: 9, kind: output, shape index: {}]  }
   0x1 LB: > { %s1582_s10 = sadd.s32 4294967295, %s1868_s30   ;;  %p1586_p0 = scmp.ge.s32.totalorder %s1868_s30, 1  ;;  %s1868_s30 = sphi %s1922_s30, %s19_s30  }
   0x2   : > { %p289_p1 = scmp.lt.s32.totalorder %s1868_s30, 3 }
   0x4   : > { %p290_p2 = pnand %p1586_p0, %p289_p1 }
   0x6   : > { %293 = sbr.rel (%p290_p2) target bundleno = 1814 (0x716), region = 56 }
   0xb   : > { %v1933_v0 = vld [vmem:[%s2560_s1 + $0x38] sm:$0xff]  ;;  %v1939_v1 = vld [vmem:[%s2560_s1 + $0x30] sm:$0xff]  ;;  %v1945_v2 = vld [vmem:[%s2560_s1 + $0x28] sm:$0xff]  ;;  %s1587_s17 = sshll.u32 %s1582_s10, 1  ;;  %vm478_vm0 = vcmask 523264   ;;  %v1870_v18 = vmov 64.0  }
   0xc   : > { %464 = vmatpush.bf16.msra.mxu0 %v1933_v0  ;;  %v1951_v3 = vld [vmem:[%s2560_s1 + $0x20] sm:$0xff]  ;;  %p328_p3 = scmp.lt.s32.totalorder %s1587_s17, 3  ;;  %v1957_v4 = vld [vmem:[%s2560_s1 + $0x18] sm:$0xff]  ;;  %v1965_v5 = vld [vmem:[%s2560_s1 + $0x10] sm:$0xff]  ;;  %1809 = vrcp.f32 %v1870_v18  ;;  %s1871_s20 = smov 64  }
   0xd   : > { %v1972_v6 = vld [vmem:[%s2560_s1 + $0x8] sm:$0xff]  ;;  %v1983_v7 = vld [vmem:[%s2560_s1] sm:$0xff]  ;;  %v1767_v35 = vld [vmem:[%s2564_s5 + $0x34] sm:$0xf] }
   0xe   : > { %s2575_s17 = smov (!%p328_p3, %s1587_s17), 3  ;;  %v1991_v11 = vld [vmem:[%s2561_s2] ss:$0 sm:$0xff]  ;;  %v1657_v36 = vld [vmem:[%s2564_s5 + $0x38] sm:$0xf0] }
   0xf   : > { %s1747_s24 = sshll.u32 %s2575_s17, 4  ;;  %v2025_v37 = vor.u32 %v1767_v35, %v1657_v36  ;;  %v1765_v38 = vld [vmem:[%s2564_s5 + $0x24] sm:$0xf]  ;;  %v1649_v39 = vld [vmem:[%s2564_s5 + $0x28] sm:$0xf0]  ;;  %s1748_s21 = sshll.u32 %s2575_s17, 3 }
  0x10   : > { %465 = vmatpush.bf16.msra.mxu0 %v1939_v1  ;;  %s1977_s29 = scalar_lea.vmem %s2559_s0, %s1747_s24  ;;  %v2034_v40 = vor.u32 %v1765_v38, %v1649_v39  ;;  %v1763_v41 = vld [vmem:[%s2564_s5 + $0x14] sm:$0xf]  ;;  %v1641_v42 = vld [vmem:[%s2564_s5 + $0x18] sm:$0xf0]  ;;  %v1761_v44 = vld [vmem:[%s2564_s5 + $0x4] sm:$0xf]  ;;  %s339_s24 = scalar_lea.vmem %s2568_s9, %s1748_s21 }
  0x11   : > { %v1595_v8 = vld [vmem:[%s1977_s29] sm:$0xf]  ;;  %v1751_v9 = vld [vmem:[%s1977_s29 + $0xc] sm:$0xf0]  ;;  %607 = vmatpush.bf16.msra.mxu2 %v2025_v37  ;;  %v2043_v43 = vor.u32 %v1763_v41, %v1641_v42  ;;  %v1633_v45 = vld [vmem:[%s2564_s5 + $0x8] sm:$0xf0] }
  0x12   : > { %v1596_v10 = vor.u32 %v1751_v9, %v1595_v8  ;;  %v1810_v19 = vpop.eup %1809  ;;  %v2052_v46 = vor.u32 %v1761_v44, %v1633_v45  ;;  %v1655_v47 = vld [vmem:[%s2564_s5 + $0x30] sm:$0xf]  ;;  %v1768_v48 = vld [vmem:[%s2564_s5 + $0x34] sm:$0xf0]  ;;  %v1647_v50 = vld [vmem:[%s2564_s5 + $0x20] sm:$0xf] }
  0x13   : > { %v486_v20 = vmul.f32 64.0, %v1810_v19  ;;  %vm490_vm1 = vweird.f32 %v1810_v19  ;;  %v2060_v49 = vor.u32 %v1768_v48, %v1655_v47  ;;  %v1766_v51 = vld [vmem:[%s2564_s5 + $0x24] sm:$0xf0]  ;;  %v1639_v53 = vld [vmem:[%s2564_s5 + $0x10] sm:$0xf] }
  0x14   : > { %466 = vmatpush.bf16.msra.mxu0 %v1945_v2  ;;  %v2071_v52 = vor.u32 %v1766_v51, %v1647_v50  ;;  %v1764_v54 = vld [vmem:[%s2564_s5 + $0x14] sm:$0xf0]  ;;  %v1631_v56 = vld [vmem:[%s2564_s5] sm:$0xf]  ;;  %v1762_v57 = vld [vmem:[%s2564_s5 + $0x4] sm:$0xf0] }
  0x15   : > { %v487_v21 = vsub.f32 1.0, %v486_v20  ;;  %608 = vmatpush.bf16.msra.mxu2 %v2034_v40  ;;  %593 = vmatpush.bf16.msra.mxu3 %v2060_v49  ;;  %v2081_v55 = vor.u32 %v1764_v54, %v1639_v53  ;;  %v2091_v59 = vor.u32 %v1762_v57, %v1631_v56  ;;  %v1727_v38 = vld [vmem:[%s1977_s29 + $0x10] sm:$0xf0]  ;;  %v373_v41 = vld [vmem:[%s2565_s6] sm:$0x3] }
  0x16   : > { %v2136_v42 = vperm.slane %v373_v41, 0  ;;  %v2138_v44 = vperm.slane %v373_v41, 1 }
  0x17   : > { %v488_v22 = vmul.f32 %v1810_v19, %v487_v21 }
  0x18   : > { %467 = vmatpush.bf16.msra.mxu0 %v1951_v3 }
  0x19   : > { %v489_v23 = vadd.f32 %v1810_v19, %v488_v22  ;;  %609 = vmatpush.bf16.msra.mxu2 %v2043_v43  ;;  %594 = vmatpush.bf16.msra.mxu3 %v2071_v52 }
  0x1b   : > { %v2003_v24 = vsel %vm490_vm1, %v1810_v19, %v489_v23 }
  0x1c   : > { %468 = vmatpush.bf16.msra.mxu0 %v1957_v4 }
  0x1d   : > { %610 = vmatpush.bf16.msra.mxu2 %v2052_v46  ;;  %595 = vmatpush.bf16.msra.mxu3 %v2081_v55 }
  0x20   : > { %469 = vmatpush.bf16.msra.mxu0 %v1965_v5 }
  0x21   : > { %842 = vmatpush.bf16.msrb.mxu2 %v1933_v0  ;;  %596 = vmatpush.bf16.msra.mxu3 %v2091_v59 }
  0x24   : > { %470 = vmatpush.bf16.msra.mxu0 %v1972_v6 }
  0x25   : > { %843 = vmatpush.bf16.msrb.mxu2 %v1939_v1 }
  0x28   : > { %471 = vmatpush.bf16.msra.mxu0 %v1983_v7 }
  0x29   : > { %844 = vmatpush.bf16.msrb.mxu2 %v1945_v2 }
  0x2b   : > { %472 = vmatmul.bf16.vlgmr.msra.gmra.mxu0 %v1596_v10 }
  0x2d   : > { %845 = vmatpush.bf16.msrb.mxu2 %v1951_v3 }
  0x31   : > { %846 = vmatpush.bf16.msrb.mxu2 %v1957_v4 }
  0x35   : > { %847 = vmatpush.bf16.msrb.mxu2 %v1965_v5 }
  0x39   : > { %848 = vmatpush.bf16.msrb.mxu2 %v1972_v6 }
  0x3d   : > { %849 = vmatpush.bf16.msrb.mxu2 %v1983_v7 }
  0xa8   : > { %v473_v12 = vpop.f32.mrf.mxu0 }
  0xa9   : > { %v1994_v13 = vadd.f32 %v1991_v11, %v473_v12 }
  0xab   : > { %2570 = vst [vmem:[#allocation2_spill] sm:$0xff] %v1994_v13  ;;  %v479_v14 = vsel %vm478_vm0, %v1994_v13, 0.0 }
  0xac   : > { %480 = vadd.xlane.f32.xlu0 %v479_v14 }
  0xb0   : > { %v475_v15 = vpop.f32.mrf.mxu0 }
  0xb1   : > { %v1999_v16 = vadd.f32 %v1991_v11, %v475_v15 }
  0xb3   : > { %v482_v17 = vsel %vm478_vm0, %v1999_v16, 0.0 }
  0xb4   : > { %483 = vadd.xlane.f32.xlu0 %v482_v17 }
 0x11f   : > { %v481_v25 = vpop.xlane.xlu0 %480 }
 0x120   : > { %v492_v26 = vmul.f32 %v2003_v24, %v481_v25 }
 0x122   : > { %v2007_v27 = vsub.f32 %v1994_v13, %v492_v26  ;;  %v2105_v26 = vld [vmem:[%s2562_s3] ss:$0 sm:$0xff] }
 0x124   : > { %v496_v28 = vmul.f32 %v2007_v27, %v2007_v27 }
 0x126   : > { %v498_v29 = vsel %vm478_vm0, %v496_v28, 0.0 }
 0x127   : > { %499 = vadd.xlane.f32.xlu1 %v498_v29  ;;  %v484_v30 = vpop.xlane.xlu0 %483 }
 0x128   : > { %v493_v31 = vmul.f32 %v2003_v24, %v484_v30 }
 0x12a   : > { %v2014_v32 = vsub.f32 %v1999_v16, %v493_v31 }
 0x12c   : > { %v497_v33 = vmul.f32 %v2014_v32, %v2014_v32 }
 0x12e   : > { %v501_v34 = vsel %vm478_vm0, %v497_v33, 0.0  ;;  %v2112_v33 = vld [vmem:[%s2563_s4] ss:$0 sm:$0xff] }
 0x12f   : > { %502 = vadd.xlane.f32.xlu1 %v501_v34 }
 0x19a   : > { %v500_v58 = vpop.xlane.xlu1 %499 }
 0x19b   : > { %v504_v60 = vmul.f32 %v500_v58, %v2003_v24 }
 0x19d   : > { %v506_v61 = vadd.f32 1e-06, %v504_v60 }
 0x19f   : > { %1811 = vrsqrt.f32 %v506_v61  ;;  %vm514_vm3 = vweird.f32 %v506_v61 }
 0x1a2   : > { %v503_v62 = vpop.xlane.xlu1 %502 }
 0x1a3   : > { %v505_v63 = vmul.f32 %v503_v62, %v2003_v24  ;;  %v2158_v62 = vld [vmem:[%s2566_s7 + $0x78] sm:$0xff] }
 0x1a4   : > { %822 = vmatpush.bf16.msra.mxu1 %v2158_v62 }
 0x1a5   : > { %v1812_v8 = vpop.eup %1811  ;;  %v507_v9 = vadd.f32 1e-06, %v505_v63 }
 0x1a6   : > { %v509_v10 = vmul.f32 %v1812_v8, %v506_v61  ;;  %vm515_vm2 = vweird.f32 %v1812_v8  ;;  %v2153_v61 = vld [vmem:[%s2566_s7 + $0x38] sm:$0xff] }
 0x1a7   : > { %1813 = vrsqrt.f32 %v507_v9  ;;  %vm516_vm4 = vmor %vm514_vm3, %vm515_vm2  ;;  %vm524_vm6 = vweird.f32 %v507_v9  ;;  %808 = vmatpush.bf16.msrb.mxu3 %v2153_v61  ;;  %1028 = vmatpush.bf16.msrb.mxu0 %v2153_v61 }
 0x1a8   : > { %v510_v12 = vmul.f32 %v1812_v8, %v509_v10 }
 0x1aa   : > { %v511_v14 = vmul.f32 0.5, %v510_v12 }
 0x1ac   : > { %v512_v15 = vsub.f32 1.5, %v511_v14 }
 0x1ad   : > { %v1814_v17 = vpop.eup %1813 }
 0x1ae   : > { %v513_v18 = vmul.f32 %v1812_v8, %v512_v15  ;;  %v519_v19 = vmul.f32 %v1814_v17, %v507_v9  ;;  %vm525_vm5 = vweird.f32 %v1814_v17  ;;  %v2168_v15 = vld [vmem:[%s2566_s7 + $0x30] sm:$0xff] }
 0x1af   : > { %vm526_vm7 = vmor %vm524_vm6, %vm525_vm5  ;;  %809 = vmatpush.bf16.msrb.mxu3 %v2168_v15  ;;  %1029 = vmatpush.bf16.msrb.mxu0 %v2168_v15 }
 0x1b0   : > { %v520_v20 = vmul.f32 %v1814_v17, %v519_v19  ;;  %v517_v21 = vsel %vm516_vm4, %v1812_v8, %v513_v18 }
 0x1b1   : > { %v528_v25 = vmul.f32 %v517_v21, %v2007_v27 }
 0x1b2   : > { %v521_v22 = vmul.f32 0.5, %v520_v20 }
 0x1b3   : > { %v533_v31 = vmul.f32 %v2105_v26, %v528_v25 }
 0x1b4   : > { %v522_v23 = vsub.f32 1.5, %v521_v22  ;;  %v2186_v22 = vld [vmem:[%s2566_s7 + $0x28] sm:$0xff] }
 0x1b5   : > { %v538_v34 = vadd.f32 %v2112_v33, %v533_v31  ;;  %810 = vmatpush.bf16.msrb.mxu3 %v2186_v22  ;;  %1030 = vmatpush.bf16.msrb.mxu0 %v2186_v22 }
 0x1b6   : > { %v523_v28 = vmul.f32 %v1814_v17, %v522_v23  ;;  %v2191_v23 = vld [vmem:[%s2566_s7 + $0x68] sm:$0xff] }
 0x1b8   : > { %v527_v29 = vsel %vm526_vm7, %v1814_v17, %v523_v28  ;;  %v2173_v17 = vld [vmem:[%s2566_s7 + $0x70] sm:$0xff] }
 0x1b9   : > { %v529_v30 = vmul.f32 %v527_v29, %v2014_v32  ;;  %v1749_v32 = vld [vmem:[%s1977_s29 + $0x4] sm:$0xf]  ;;  %823 = vmatpush.bf16.msra.mxu1 %v2173_v17 }
 0x1ba   : > { %v1730_v39 = vor.u32 %v1749_v32, %v1727_v38  ;;  %v2211_v32 = vld [vmem:[%s2566_s7 + $0x60] sm:$0xff] }
 0x1bb   : > { %v534_v27 = vmul.f32 %v2105_v26, %v529_v30 }
 0x1bd   : > { %v539_v35 = vadd.f32 %v2112_v33, %v534_v27  ;;  %824 = vmatpush.bf16.msra.mxu1 %v2191_v23 }
 0x1bf   : > { %v540_v36 = vpack.c.bf16 %v539_v35, %v538_v34 }
 0x1c1   : > { %1661 = vmatmul.msk.bf16.vlgmr.msra.gmra.mxu3 %vm478_vm0, %v540_v36  ;;  %1662 = vmatmul.msk.bf16.vlgmr.msra.gmra.mxu2 %vm478_vm0, %v540_v36  ;;  %v2206_v36 = vld [vmem:[%s2566_s7 + $0x20] sm:$0xff] }
 0x1c2   : > { %912 = vmatpush.bf16.msra.mxu2 %v2060_v49  ;;  %811 = vmatpush.bf16.msrb.mxu3 %v2206_v36 }
 0x1c3   : > { %825 = vmatpush.bf16.msra.mxu1 %v2211_v32  ;;  %1031 = vmatpush.bf16.msrb.mxu0 %v2206_v36 }
 0x1c6   : > { %913 = vmatpush.bf16.msra.mxu2 %v2071_v52 }
 0x1ca   : > { %914 = vmatpush.bf16.msra.mxu2 %v2081_v55 }
 0x1ce   : > { %915 = vmatpush.bf16.msra.mxu2 %v2091_v59 }
 0x1d1   : > { %850 = vmatmul.bf16.vlgmr.msrb.gmra.mxu2 %v1730_v39 }
 0x1d2   : > { %1064 = vmatpush.bf16.msrb.mxu2 %v1933_v0 }
 0x1d6   : > { %1065 = vmatpush.bf16.msrb.mxu2 %v1939_v1 }
 0x1da   : > { %1066 = vmatpush.bf16.msrb.mxu2 %v1945_v2 }
 0x1de   : > { %1067 = vmatpush.bf16.msrb.mxu2 %v1951_v3 }
 0x1e2   : > { %1068 = vmatpush.bf16.msrb.mxu2 %v1957_v4 }
 0x1e6   : > { %1069 = vmatpush.bf16.msrb.mxu2 %v1965_v5 }
 0x1ea   : > { %1070 = vmatpush.bf16.msrb.mxu2 %v1972_v6 }
 0x1ee   : > { %1071 = vmatpush.bf16.msrb.mxu2 %v1983_v7 }
 0x244   : > { %v598_v45 = vpop.f32.mrf.mxu3  ;;  %v612_v47 = vpop.f32.mrf.mxu2 }
 0x245   : > { %v599_v48 = vadd.f32 %v598_v45, %v2136_v42  ;;  %v613_v50 = vadd.f32 %v612_v47, %v2138_v44 }
 0x247   : > { %v617_v51 = vpack.c.bf16 %v613_v50, %v599_v48 }
 0x249   : > { %v2142_v53 = vunpack.c.l.bf16 %v617_v51  ;;  %v2144_v54 = vunpack.c.h.bf16 %v617_v51 }
 0x24b   : > { %v623_v56 = vmul.f32 %v2142_v53, %v2142_v53  ;;  %v624_v57 = vmul.f32 %v2144_v54, %v2144_v54 }
 0x24c   : > { %v600_v58 = vpop.f32.mrf.mxu3  ;;  %v614_v60 = vpop.f32.mrf.mxu2 }
 0x24d   : > { %v627_v63 = vpack.c.bf16 %v624_v57, %v623_v56  ;;  %v601_v8 = vadd.f32 %v600_v58, %v2136_v42  ;;  %v615_v9 = vadd.f32 %v614_v60, %v2138_v44  ;;  %v2223_v56 = vld [vmem:[%s2566_s7 + $0x18] sm:$0xff] }
 0x24e   : > { %v2228_v57 = vld [vmem:[%s2566_s7 + $0x58] sm:$0xff]  ;;  %812 = vmatpush.bf16.msrb.mxu3 %v2223_v56  ;;  %1032 = vmatpush.bf16.msrb.mxu0 %v2223_v56 }
 0x24f   : > { %v629_v10 = vunpack.c.l.bf16 %v627_v63  ;;  %v630_v12 = vunpack.c.h.bf16 %v627_v63  ;;  %v618_v14 = vpack.c.bf16 %v615_v9, %v601_v8  ;;  %826 = vmatpush.bf16.msra.mxu1 %v2228_v57 }
 0x251   : > { %v633_v18 = vmul.f32 %v629_v10, %v2142_v53  ;;  %v634_v19 = vmul.f32 %v630_v12, %v2144_v54  ;;  %v2177_v20 = vunpack.c.l.bf16 %v618_v14  ;;  %v2179_v21 = vunpack.c.h.bf16 %v618_v14 }
 0x253   : > { %v637_v25 = vpack.c.bf16 %v634_v19, %v633_v18  ;;  %v625_v28 = vmul.f32 %v2177_v20, %v2177_v20  ;;  %v626_v29 = vmul.f32 %v2179_v21, %v2179_v21  ;;  %v2241_v19 = vld [vmem:[%s2566_s7 + $0x10] sm:$0xff] }
 0x254   : > { %v851_v30 = vpop.f32.mrf.mxu2  ;;  %813 = vmatpush.bf16.msrb.mxu3 %v2241_v19  ;;  %1033 = vmatpush.bf16.msrb.mxu0 %v2241_v19 }
 0x255   : > { %v639_v31 = vunpack.c.l.bf16 %v637_v25  ;;  %v640_v27 = vunpack.c.h.bf16 %v637_v25  ;;  %v628_v34 = vpack.c.bf16 %v626_v29, %v625_v28  ;;  %v2199_v35 = vadd.f32 %v1991_v11, %v851_v30  ;;  %v2246_v25 = vld [vmem:[%s2566_s7 + $0x50] sm:$0xff] }
 0x256   : > { %827 = vmatpush.bf16.msra.mxu1 %v2246_v25 }
 0x257   : > { %v643_v38 = vmul.f32 0.044677734, %v639_v31  ;;  %v644_v39 = vmul.f32 0.044677734, %v640_v27  ;;  %v631_v41 = vunpack.c.l.bf16 %v628_v34  ;;  %v632_v45 = vunpack.c.h.bf16 %v628_v34 }
 0x258   : > { %v856_v47 = vsel %vm478_vm0, %v2199_v35, 0.0 }
 0x259   : > { %v647_v48 = vpack.c.bf16 %v644_v39, %v643_v38  ;;  %v635_v50 = vmul.f32 %v631_v41, %v2177_v20  ;;  %v636_v51 = vmul.f32 %v632_v45, %v2179_v21  ;;  %857 = vadd.xlane.f32.xlu2 %v856_v47  ;;  %v2256_v39 = vld [vmem:[%s2566_s7 + $0x8] sm:$0xff] }
 0x25a   : > { %v2261_v41 = vld [vmem:[%s2566_s7 + $0x48] sm:$0xff]  ;;  %814 = vmatpush.bf16.msrb.mxu3 %v2256_v39  ;;  %1034 = vmatpush.bf16.msrb.mxu0 %v2256_v39 }
 0x25b   : > { %v649_v58 = vunpack.c.l.bf16 %v647_v48  ;;  %v650_v60 = vunpack.c.h.bf16 %v647_v48  ;;  %v638_v63 = vpack.c.bf16 %v636_v51, %v635_v50  ;;  %828 = vmatpush.bf16.msra.mxu1 %v2261_v41 }
 0x25c   : > { %v853_v8 = vpop.f32.mrf.mxu2 }
 0x25d   : > { %v653_v9 = vadd.f32 %v649_v58, %v2142_v53  ;;  %v654_v10 = vadd.f32 %v650_v60, %v2144_v54  ;;  %v641_v12 = vunpack.c.l.bf16 %v638_v63  ;;  %v642_v14 = vunpack.c.h.bf16 %v638_v63  ;;  %v2271_v63 = vld [vmem:[%s2566_s7] sm:$0xff] }
 0x25e   : > { %v2234_v18 = vadd.f32 %v1991_v11, %v853_v8  ;;  %v2276_v8 = vld [vmem:[%s2566_s7 + $0x40] sm:$0xff]  ;;  %815 = vmatpush.bf16.msrb.mxu3 %v2271_v63  ;;  %1035 = vmatpush.bf16.msrb.mxu0 %v2271_v63 }
 0x25f   : > { %v657_v28 = vpack.c.bf16 %v654_v10, %v653_v9  ;;  %v645_v29 = vmul.f32 0.044677734, %v641_v12  ;;  %v646_v30 = vmul.f32 0.044677734, %v642_v14  ;;  %829 = vmatpush.bf16.msra.mxu1 %v2276_v8 }
 0x260   : > { %v859_v31 = vsel %vm478_vm0, %v2234_v18, 0.0 }
 0x261   : > { %v659_v27 = vunpack.c.l.bf16 %v657_v28  ;;  %v660_v34 = vunpack.c.h.bf16 %v657_v28  ;;  %v648_v38 = vpack.c.bf16 %v646_v30, %v645_v29  ;;  %860 = vadd.xlane.f32.xlu2 %v859_v31 }
 0x262   : > { %926 = vmatpush.bf16.msra.mxu3 %v2025_v37  ;;  %1250 = vmatpush.bf16.msra.mxu0 %v2153_v61 }
 0x263   : > { %v663_v45 = vmul.f32 0.796875, %v659_v27  ;;  %v664_v47 = vmul.f32 0.796875, %v660_v34  ;;  %v651_v48 = vunpack.c.l.bf16 %v648_v38  ;;  %v652_v50 = vunpack.c.h.bf16 %v648_v38  ;;  %1042 = vmatpush.bf16.msrb.mxu1 %v2158_v62 }
 0x265   : > { %v667_v51 = vpack.c.bf16 %v664_v47, %v663_v45  ;;  %v655_v58 = vadd.f32 %v651_v48, %v2177_v20  ;;  %v656_v60 = vadd.f32 %v652_v50, %v2179_v21 }
 0x266   : > { %927 = vmatpush.bf16.msra.mxu3 %v2034_v40  ;;  %1251 = vmatpush.bf16.msra.mxu0 %v2168_v15 }
 0x267   : > { %v669_v9 = vunpack.c.l.bf16 %v667_v51  ;;  %v670_v10 = vunpack.c.h.bf16 %v667_v51  ;;  %v658_v12 = vpack.c.bf16 %v656_v60, %v655_v58  ;;  %1043 = vmatpush.bf16.msrb.mxu1 %v2173_v17 }
 0x269   : > { %1815 = vtanh.f32 %v669_v9  ;;  %v661_v14 = vunpack.c.l.bf16 %v658_v12  ;;  %v662_v28 = vunpack.c.h.bf16 %v658_v12 }
 0x26a   : > { %1817 = vtanh.f32 %v670_v10  ;;  %928 = vmatpush.bf16.msra.mxu3 %v2043_v43  ;;  %1252 = vmatpush.bf16.msra.mxu0 %v2186_v22 }
 0x26b   : > { %v665_v29 = vmul.f32 0.796875, %v661_v14  ;;  %v666_v30 = vmul.f32 0.796875, %v662_v28  ;;  %1044 = vmatpush.bf16.msrb.mxu1 %v2191_v23 }
 0x26d   : > { %v668_v31 = vpack.c.bf16 %v666_v30, %v665_v29 }
 0x26e   : > { %929 = vmatpush.bf16.msra.mxu3 %v2052_v46  ;;  %1253 = vmatpush.bf16.msra.mxu0 %v2206_v36 }
 0x26f   : > { %v1816_v27 = vpop.eup %1815  ;;  %v671_v34 = vunpack.c.l.bf16 %v668_v31  ;;  %v672_v38 = vunpack.c.h.bf16 %v668_v31  ;;  %1045 = vmatpush.bf16.msrb.mxu1 %v2211_v32 }
 0x270   : > { %v1818_v45 = vpop.eup %1817 }
 0x271   : > { %1819 = vtanh.f32 %v671_v34  ;;  %v677_v47 = vpack.c.bf16 %v1818_v45, %v1816_v27 }
 0x272   : > { %1821 = vtanh.f32 %v672_v38  ;;  %1254 = vmatpush.bf16.msra.mxu0 %v2223_v56 }
 0x273   : > { %v679_v48 = vunpack.c.l.bf16 %v677_v47  ;;  %v680_v50 = vunpack.c.h.bf16 %v677_v47  ;;  %1046 = vmatpush.bf16.msrb.mxu1 %v2228_v57 }
 0x275   : > { %v683_v51 = vadd.f32 1.0, %v679_v48  ;;  %v684_v58 = vadd.f32 1.0, %v680_v50 }
 0x276   : > { %1255 = vmatpush.bf16.msra.mxu0 %v2241_v19 }
 0x277   : > { %v1820_v60 = vpop.eup %1819  ;;  %v687_v9 = vpack.c.bf16 %v684_v58, %v683_v51  ;;  %1047 = vmatpush.bf16.msrb.mxu1 %v2246_v25 }
 0x278   : > { %v1822_v10 = vpop.eup %1821 }
 0x279   : > { %v678_v12 = vpack.c.bf16 %v1822_v10, %v1820_v60  ;;  %v689_v14 = vunpack.c.l.bf16 %v687_v9  ;;  %v690_v28 = vunpack.c.h.bf16 %v687_v9 }
 0x27a   : > { %1256 = vmatpush.bf16.msra.mxu0 %v2256_v39 }
 0x27b   : > { %v681_v29 = vunpack.c.l.bf16 %v678_v12  ;;  %v682_v30 = vunpack.c.h.bf16 %v678_v12  ;;  %v693_v34 = vmul.f32 0.5, %v689_v14  ;;  %v694_v38 = vmul.f32 0.5, %v690_v28  ;;  %1048 = vmatpush.bf16.msrb.mxu1 %v2261_v41 }
 0x27d   : > { %v685_v31 = vadd.f32 1.0, %v681_v29  ;;  %v686_v27 = vadd.f32 1.0, %v682_v30  ;;  %v697_v50 = vpack.c.bf16 %v694_v38, %v693_v34 }
 0x27e   : > { %1257 = vmatpush.bf16.msra.mxu0 %v2271_v63 }
 0x27f   : > { %v688_v45 = vpack.c.bf16 %v686_v27, %v685_v31  ;;  %v699_v9 = vunpack.c.l.bf16 %v697_v50  ;;  %v700_v10 = vunpack.c.h.bf16 %v697_v50  ;;  %1049 = vmatpush.bf16.msrb.mxu1 %v2276_v8 }
 0x281   : > { %v691_v47 = vunpack.c.l.bf16 %v688_v45  ;;  %v692_v48 = vunpack.c.h.bf16 %v688_v45  ;;  %v703_v28 = vmul.f32 %v699_v9, %v2142_v53  ;;  %v704_v30 = vmul.f32 %v700_v10, %v2144_v54 }
 0x283   : > { %v695_v51 = vmul.f32 0.5, %v691_v47  ;;  %v696_v58 = vmul.f32 0.5, %v692_v48 }
 0x285   : > { %v698_v60 = vpack.c.bf16 %v696_v58, %v695_v51  ;;  %v1808_v58 = vld [vmem:[%s2567_s8] ss:$0 sm:$0xff] }
 0x287   : > { %v701_v12 = vunpack.c.l.bf16 %v698_v60  ;;  %v702_v14 = vunpack.c.h.bf16 %v698_v60 }
 0x289   : > { %v705_v29 = vmul.f32 %v701_v12, %v2177_v20  ;;  %v706_v31 = vmul.f32 %v702_v14, %v2179_v21 }
 0x28b   : > { %v707_v27 = vpack.c.bf16 %v705_v29, %v703_v28  ;;  %v708_v34 = vpack.c.bf16 %v706_v31, %v704_v30 }
 0x28d   : > { %816 = vmatmul.bf16.vlgmr.msrb.gmra.mxu3 %v707_v27  ;;  %830 = vmatmul.bf16.vlgmr.msra.gmra.mxu1 %v708_v34 }
 0x28e   : > { %1134 = vmatpush.bf16.msrb.mxu3 %v2060_v49  ;;  %1264 = vmatpush.bf16.msra.mxu1 %v2158_v62 }
 0x292   : > { %1135 = vmatpush.bf16.msrb.mxu3 %v2071_v52  ;;  %1265 = vmatpush.bf16.msra.mxu1 %v2173_v17 }
 0x296   : > { %1136 = vmatpush.bf16.msrb.mxu3 %v2081_v55  ;;  %1266 = vmatpush.bf16.msra.mxu1 %v2191_v23 }
 0x29a   : > { %1137 = vmatpush.bf16.msrb.mxu3 %v2091_v59  ;;  %1267 = vmatpush.bf16.msra.mxu1 %v2211_v32 }
 0x29e   : > { %1268 = vmatpush.bf16.msra.mxu1 %v2228_v57 }
 0x2a2   : > { %1269 = vmatpush.bf16.msra.mxu1 %v2246_v25 }
 0x2a6   : > { %1270 = vmatpush.bf16.msra.mxu1 %v2261_v41 }
 0x2aa   : > { %1271 = vmatpush.bf16.msra.mxu1 %v2276_v8 }
 0x2cc   : > { %v858_v53 = vpop.xlane.xlu2 %857 }
 0x2cd   : > { %v862_v54 = vmul.f32 %v858_v53, %v2003_v24 }
 0x2cf   : > { %v864_v20 = vsub.f32 %v2199_v35, %v862_v54 }
 0x2d1   : > { %v866_v21 = vmul.f32 %v864_v20, %v864_v20 }
 0x2d3   : > { %v868_v38 = vsel %vm478_vm0, %v866_v21, 0.0 }
 0x2d4   : > { %869 = vadd.xlane.f32.xlu0 %v868_v38  ;;  %v861_v45 = vpop.xlane.xlu2 %860 }
 0x2d5   : > { %v863_v47 = vmul.f32 %v861_v45, %v2003_v24 }
 0x2d7   : > { %v865_v48 = vsub.f32 %v2234_v18, %v863_v47 }
 0x2d9   : > { %v867_v50 = vmul.f32 %v865_v48, %v865_v48 }
 0x2db   : > { %v871_v51 = vsel %vm478_vm0, %v867_v50, 0.0 }
 0x2dc   : > { %872 = vadd.xlane.f32.xlu1 %v871_v51 }
 0x30a   : > { %v831_v10 = vpop.f32.mrf.mxu1 }
 0x310   : > { %v817_v60 = vpop.f32.mrf.mxu3 }
 0x311   : > { %v818_v9 = vadd.f32 %v1808_v58, %v817_v60 }
 0x313   : > { %v2327_v12 = vadd.f32 %v831_v10, %v818_v9 }
 0x315   : > { %2571 = vst [vmem:[#allocation3_spill] sm:$0xff] %v2327_v12 }
 0x347   : > { %v870_v14 = vpop.xlane.xlu0 %869 }
 0x348   : > { %v874_v28 = vmul.f32 %v870_v14, %v2003_v24 }
 0x34a   : > { %v876_v29 = vadd.f32 1e-06, %v874_v28 }
 0x34c   : > { %1823 = vrsqrt.f32 %v876_v29  ;;  %vm884_vm9 = vweird.f32 %v876_v29 }
 0x34f   : > { %v873_v30 = vpop.xlane.xlu1 %872 }
 0x350   : > { %v875_v31 = vmul.f32 %v873_v30, %v2003_v24 }
 0x352   : > { %v1824_v27 = vpop.eup %1823  ;;  %v877_v34 = vadd.f32 1e-06, %v875_v31 }
 0x353   : > { %v879_v53 = vmul.f32 %v1824_v27, %v876_v29  ;;  %vm885_vm8 = vweird.f32 %v1824_v27 }
 0x354   : > { %1825 = vrsqrt.f32 %v877_v34  ;;  %vm886_vm10 = vmor %vm884_vm9, %vm885_vm8  ;;  %vm894_vm12 = vweird.f32 %v877_v34 }
 0x355   : > { %v880_v54 = vmul.f32 %v1824_v27, %v879_v53 }
 0x357   : > { %v881_v21 = vmul.f32 0.5, %v880_v54 }
 0x359   : > { %v882_v38 = vsub.f32 1.5, %v881_v21 }
 0x35a   : > { %v1826_v45 = vpop.eup %1825 }
 0x35b   : > { %v883_v47 = vmul.f32 %v1824_v27, %v882_v38  ;;  %v889_v50 = vmul.f32 %v1826_v45, %v877_v34  ;;  %vm895_vm11 = vweird.f32 %v1826_v45 }
 0x35c   : > { %vm896_vm13 = vmor %vm894_vm12, %vm895_vm11 }
 0x35d   : > { %v890_v51 = vmul.f32 %v1826_v45, %v889_v50  ;;  %v887_v58 = vsel %vm886_vm10, %v1824_v27, %v883_v47 }
 0x35e   : > { %v898_v10 = vmul.f32 %v887_v58, %v864_v20  ;;  %v1735_v20 = vld [vmem:[%s1977_s29 + $0x8] sm:$0xf] }
 0x35f   : > { %v891_v60 = vmul.f32 0.5, %v890_v51 }
 0x360   : > { %v900_v30 = vmul.f32 %v2105_v26, %v898_v10 }
 0x361   : > { %v892_v9 = vsub.f32 1.5, %v891_v60 }
 0x362   : > { %v902_v29 = vadd.f32 %v2112_v33, %v900_v30 }
 0x363   : > { %v893_v14 = vmul.f32 %v1826_v45, %v892_v9 }
 0x365   : > { %v897_v28 = vsel %vm896_vm13, %v1826_v45, %v893_v14 }
 0x366   : > { %v899_v31 = vmul.f32 %v897_v28, %v865_v48  ;;  %v1752_v48 = vld [vmem:[%s1977_s29 + $0x14] sm:$0xf0] }
 0x367   : > { %v1736_v34 = vor.u32 %v1752_v48, %v1735_v20 }
 0x368   : > { %v901_v53 = vmul.f32 %v2105_v26, %v899_v31 }
 0x36a   : > { %v903_v54 = vadd.f32 %v2112_v33, %v901_v53 }
 0x36c   : > { %v904_v27 = vpack.c.bf16 %v903_v54, %v902_v29 }
 0x36e   : > { %1731 = vmatmul.msk.bf16.vlgmr.msra.gmra.mxu2 %vm478_vm0, %v904_v27  ;;  %1732 = vmatmul.msk.bf16.vlgmr.msra.gmra.mxu3 %vm478_vm0, %v904_v27 }
 0x36f   : > { %1284 = vmatpush.bf16.msra.mxu2 %v1933_v0  ;;  %1148 = vmatpush.bf16.msra.mxu3 %v2025_v37  ;;  %v1750_v0 = vld [vmem:[%s1977_s29 + $0xc] sm:$0xf] }
 0x373   : > { %1285 = vmatpush.bf16.msra.mxu2 %v1939_v1  ;;  %1149 = vmatpush.bf16.msra.mxu3 %v2034_v40  ;;  %v1739_v1 = vld [vmem:[%s1977_s29 + $0x18] sm:$0xf0] }
 0x374   : > { %v1742_v21 = vor.u32 %v1750_v0, %v1739_v1 }
 0x377   : > { %1286 = vmatpush.bf16.msra.mxu2 %v1945_v2  ;;  %1150 = vmatpush.bf16.msra.mxu3 %v2043_v43  ;;  %v2353_v2 = vpop.f32.mrf.mxu3 }
 0x37b   : > { %1287 = vmatpush.bf16.msra.mxu2 %v1951_v3  ;;  %1151 = vmatpush.bf16.msra.mxu3 %v2052_v46 }
 0x37e   : > { %1072 = vmatmul.bf16.vlgmr.msrb.gmra.mxu2 %v1736_v34 }
 0x37f   : > { %1288 = vmatpush.bf16.msra.mxu2 %v1957_v4 }
 0x383   : > { %1289 = vmatpush.bf16.msra.mxu2 %v1965_v5 }
 0x387   : > { %1290 = vmatpush.bf16.msra.mxu2 %v1972_v6 }
 0x38b   : > { %1291 = vmatpush.bf16.msra.mxu2 %v1983_v7 }
 0x38e   : > { %1292 = vmatmul.bf16.vlgmr.msra.gmra.mxu2 %v1742_v21 }
 0x3f1   : > { %v917_v38 = vpop.f32.mrf.mxu2  ;;  %v931_v45 = vpop.f32.mrf.mxu3 }
 0x3f2   : > { %v918_v3 = vadd.f32 %v917_v38, %v2136_v42  ;;  %v932_v47 = vadd.f32 %v931_v45, %v2138_v44 }
 0x3f4   : > { %v936_v50 = vpack.c.bf16 %v932_v47, %v918_v3 }
 0x3f6   : > { %v2357_v4 = vunpack.c.l.bf16 %v936_v50  ;;  %v2359_v5 = vunpack.c.h.bf16 %v936_v50 }
 0x3f8   : > { %v942_v6 = vmul.f32 %v2357_v4, %v2357_v4  ;;  %v943_v7 = vmul.f32 %v2359_v5, %v2359_v5 }
 0x3f9   : > { %v919_v51 = vpop.f32.mrf.mxu2  ;;  %v933_v58 = vpop.f32.mrf.mxu3 }
 0x3fa   : > { %v946_v60 = vpack.c.bf16 %v943_v7, %v942_v6  ;;  %v920_v9 = vadd.f32 %v919_v51, %v2136_v42  ;;  %v934_v10 = vadd.f32 %v933_v58, %v2138_v44 }
 0x3fc   : > { %v948_v14 = vunpack.c.l.bf16 %v946_v60  ;;  %v949_v28 = vunpack.c.h.bf16 %v946_v60  ;;  %v937_v30 = vpack.c.bf16 %v934_v10, %v920_v9 }
 0x3fe   : > { %v952_v31 = vmul.f32 %v948_v14, %v2357_v4  ;;  %v953_v53 = vmul.f32 %v949_v28, %v2359_v5  ;;  %v2369_v29 = vunpack.c.l.bf16 %v937_v30  ;;  %v2371_v54 = vunpack.c.h.bf16 %v937_v30 }
 0x400   : > { %v956_v27 = vpack.c.bf16 %v953_v53, %v952_v31  ;;  %v944_v20 = vmul.f32 %v2369_v29, %v2369_v29  ;;  %v945_v48 = vmul.f32 %v2371_v54, %v2371_v54 }
 0x401   : > { %v1073_v34 = vpop.f32.mrf.mxu2 }
 0x402   : > { %v958_v0 = vunpack.c.l.bf16 %v956_v27  ;;  %v959_v1 = vunpack.c.h.bf16 %v956_v27  ;;  %v947_v21 = vpack.c.bf16 %v945_v48, %v944_v20  ;;  %v2378_v38 = vadd.f32 %v1991_v11, %v1073_v34 }
 0x404   : > { %v962_v45 = vmul.f32 0.044677734, %v958_v0  ;;  %v963_v3 = vmul.f32 0.044677734, %v959_v1  ;;  %v950_v47 = vunpack.c.l.bf16 %v947_v21  ;;  %v951_v50 = vunpack.c.h.bf16 %v947_v21 }
 0x405   : > { %v1078_v6 = vsel %vm478_vm0, %v2378_v38, 0.0 }
 0x406   : > { %v966_v7 = vpack.c.bf16 %v963_v3, %v962_v45  ;;  %v954_v51 = vmul.f32 %v950_v47, %v2369_v29  ;;  %v955_v58 = vmul.f32 %v951_v50, %v2371_v54  ;;  %1079 = vadd.xlane.f32.xlu2 %v1078_v6 }
 0x408   : > { %v968_v60 = vunpack.c.l.bf16 %v966_v7  ;;  %v969_v9 = vunpack.c.h.bf16 %v966_v7  ;;  %v957_v10 = vpack.c.bf16 %v955_v58, %v954_v51 }
 0x409   : > { %v1075_v14 = vpop.f32.mrf.mxu2 }
 0x40a   : > { %v972_v28 = vadd.f32 %v968_v60, %v2357_v4  ;;  %v973_v30 = vadd.f32 %v969_v9, %v2359_v5  ;;  %v960_v31 = vunpack.c.l.bf16 %v957_v10  ;;  %v961_v53 = vunpack.c.h.bf16 %v957_v10 }
 0x40b   : > { %v2387_v27 = vadd.f32 %v1991_v11, %v1075_v14 }
 0x40c   : > { %v976_v20 = vpack.c.bf16 %v973_v30, %v972_v28  ;;  %v964_v48 = vmul.f32 0.044677734, %v960_v31  ;;  %v965_v34 = vmul.f32 0.044677734, %v961_v53 }
 0x40d   : > { %v1081_v0 = vsel %vm478_vm0, %v2387_v27, 0.0 }
 0x40e   : > { %v978_v1 = vunpack.c.l.bf16 %v976_v20  ;;  %v979_v21 = vunpack.c.h.bf16 %v976_v20  ;;  %v967_v45 = vpack.c.bf16 %v965_v34, %v964_v48  ;;  %1082 = vadd.xlane.f32.xlu0 %v1081_v0 }
 0x410   : > { %v982_v3 = vmul.f32 0.796875, %v978_v1  ;;  %v983_v47 = vmul.f32 0.796875, %v979_v21  ;;  %v970_v50 = vunpack.c.l.bf16 %v967_v45  ;;  %v971_v6 = vunpack.c.h.bf16 %v967_v45 }
 0x411   : > { %v1293_v7 = vpop.f32.mrf.mxu2 }
 0x412   : > { %v986_v51 = vpack.c.bf16 %v983_v47, %v982_v3  ;;  %v974_v58 = vadd.f32 %v970_v50, %v2369_v29  ;;  %v975_v60 = vadd.f32 %v971_v6, %v2371_v54  ;;  %v2394_v9 = vadd.f32 %v1991_v11, %v1293_v7 }
 0x414   : > { %v988_v10 = vunpack.c.l.bf16 %v986_v51  ;;  %v989_v14 = vunpack.c.h.bf16 %v986_v51  ;;  %v977_v28 = vpack.c.bf16 %v975_v60, %v974_v58  ;;  %v1298_v30 = vsel %vm478_vm0, %v2394_v9, 0.0 }
 0x415   : > { %1299 = vadd.xlane.f32.xlu1 %v1298_v30 }
 0x416   : > { %1827 = vtanh.f32 %v988_v10  ;;  %v980_v31 = vunpack.c.l.bf16 %v977_v28  ;;  %v981_v53 = vunpack.c.h.bf16 %v977_v28 }
 0x417   : > { %1829 = vtanh.f32 %v989_v14 }
 0x418   : > { %v984_v20 = vmul.f32 0.796875, %v980_v31  ;;  %v985_v48 = vmul.f32 0.796875, %v981_v53 }
 0x419   : > { %v1295_v34 = vpop.f32.mrf.mxu2 }
 0x41a   : > { %v987_v0 = vpack.c.bf16 %v985_v48, %v984_v20  ;;  %v2399_v1 = vadd.f32 %v1991_v11, %v1295_v34 }
 0x41c   : > { %v1828_v21 = vpop.eup %1827  ;;  %v990_v45 = vunpack.c.l.bf16 %v987_v0  ;;  %v991_v3 = vunpack.c.h.bf16 %v987_v0  ;;  %v1301_v47 = vsel %vm478_vm0, %v2399_v1, 0.0 }
 0x41d   : > { %v1830_v50 = vpop.eup %1829  ;;  %1302 = vadd.xlane.f32.xlu2 %v1301_v47 }
 0x41e   : > { %1831 = vtanh.f32 %v990_v45  ;;  %v996_v6 = vpack.c.bf16 %v1830_v50, %v1828_v21 }
 0x41f   : > { %1833 = vtanh.f32 %v991_v3 }
 0x420   : > { %v998_v7 = vunpack.c.l.bf16 %v996_v6  ;;  %v999_v51 = vunpack.c.h.bf16 %v996_v6 }
 0x422   : > { %v1002_v58 = vadd.f32 1.0, %v998_v7  ;;  %v1003_v60 = vadd.f32 1.0, %v999_v51 }
 0x424   : > { %v1832_v10 = vpop.eup %1831  ;;  %v1006_v14 = vpack.c.bf16 %v1003_v60, %v1002_v58 }
 0x425   : > { %v1834_v28 = vpop.eup %1833 }
 0x426   : > { %v997_v11 = vpack.c.bf16 %v1834_v28, %v1832_v10  ;;  %v1008_v30 = vunpack.c.l.bf16 %v1006_v14  ;;  %v1009_v31 = vunpack.c.h.bf16 %v1006_v14 }
 0x428   : > { %v1000_v53 = vunpack.c.l.bf16 %v997_v11  ;;  %v1001_v20 = vunpack.c.h.bf16 %v997_v11  ;;  %v1012_v0 = vmul.f32 0.5, %v1008_v30  ;;  %v1013_v12 = vmul.f32 0.5, %v1009_v31 }
 0x42a   : > { %v1004_v48 = vadd.f32 1.0, %v1000_v53  ;;  %v1005_v34 = vadd.f32 1.0, %v1001_v20  ;;  %v1016_v3 = vpack.c.bf16 %v1013_v12, %v1012_v0 }
 0x42c   : > { %v1007_v47 = vpack.c.bf16 %v1005_v34, %v1004_v48  ;;  %v1018_v51 = vunpack.c.l.bf16 %v1016_v3  ;;  %v1019_v13 = vunpack.c.h.bf16 %v1016_v3 }
 0x42e   : > { %v1010_v45 = vunpack.c.l.bf16 %v1007_v47  ;;  %v1011_v21 = vunpack.c.h.bf16 %v1007_v47  ;;  %v1022_v10 = vmul.f32 %v1018_v51, %v2357_v4  ;;  %v1023_v28 = vmul.f32 %v1019_v13, %v2359_v5 }
 0x430   : > { %v1014_v50 = vmul.f32 0.5, %v1010_v45  ;;  %v1015_v6 = vmul.f32 0.5, %v1011_v21 }
 0x432   : > { %v1017_v7 = vpack.c.bf16 %v1015_v6, %v1014_v50 }
 0x434   : > { %v1020_v58 = vunpack.c.l.bf16 %v1017_v7  ;;  %v1021_v60 = vunpack.c.h.bf16 %v1017_v7 }
 0x436   : > { %v1024_v14 = vmul.f32 %v1020_v58, %v2369_v29  ;;  %v1025_v11 = vmul.f32 %v1021_v60, %v2371_v54 }
 0x438   : > { %v1026_v30 = vpack.c.bf16 %v1024_v14, %v1022_v10  ;;  %v1027_v31 = vpack.c.bf16 %v1025_v11, %v1023_v28 }
 0x43a   : > { %1036 = vmatmul.bf16.vlgmr.msrb.gmra.mxu0 %v1026_v30  ;;  %1050 = vmatmul.bf16.vlgmr.msrb.gmra.mxu1 %v1027_v31 }
 0x43b   : > { %1470 = vmatpush.bf16.msrb.mxu0 %v2153_v61  ;;  %1484 = vmatpush.bf16.msrb.mxu1 %v2158_v62 }
 0x43f   : > { %1471 = vmatpush.bf16.msrb.mxu0 %v2168_v15  ;;  %1485 = vmatpush.bf16.msrb.mxu1 %v2173_v17 }
 0x443   : > { %1472 = vmatpush.bf16.msrb.mxu0 %v2186_v22  ;;  %1486 = vmatpush.bf16.msrb.mxu1 %v2191_v23 }
 0x447   : > { %1473 = vmatpush.bf16.msrb.mxu0 %v2206_v36  ;;  %1487 = vmatpush.bf16.msrb.mxu1 %v2211_v32 }
 0x44b   : > { %1474 = vmatpush.bf16.msrb.mxu0 %v2223_v56  ;;  %1488 = vmatpush.bf16.msrb.mxu1 %v2228_v57 }
 0x44f   : > { %1475 = vmatpush.bf16.msrb.mxu0 %v2241_v19  ;;  %1489 = vmatpush.bf16.msrb.mxu1 %v2246_v25 }
 0x453   : > { %1476 = vmatpush.bf16.msrb.mxu0 %v2256_v39  ;;  %1490 = vmatpush.bf16.msrb.mxu1 %v2261_v41 }
 0x457   : > { %1477 = vmatpush.bf16.msrb.mxu0 %v2271_v63  ;;  %1491 = vmatpush.bf16.msrb.mxu1 %v2276_v8 }
 0x479   : > { %v1080_v13 = vpop.xlane.xlu2 %1079 }
 0x47a   : > { %v1084_v61 = vmul.f32 %v1080_v13, %v2003_v24 }
 0x47c   : > { %v1086_v62 = vsub.f32 %v2378_v38, %v1084_v61 }
 0x47e   : > { %v1088_v15 = vmul.f32 %v1086_v62, %v1086_v62 }
 0x480   : > { %v1090_v17 = vsel %vm478_vm0, %v1088_v15, 0.0 }
 0x481   : > { %v1083_v22 = vpop.xlane.xlu0 %1082  ;;  %1091 = vadd.xlane.f32.xlu0 %v1090_v17 }
 0x482   : > { %v1085_v23 = vmul.f32 %v1083_v22, %v2003_v24 }
 0x484   : > { %v1087_v36 = vsub.f32 %v2387_v27, %v1085_v23 }
 0x486   : > { %v1089_v32 = vmul.f32 %v1087_v36, %v1087_v36 }
 0x488   : > { %v1300_v56 = vpop.xlane.xlu1 %1299  ;;  %v1093_v57 = vsel %vm478_vm0, %v1089_v32, 0.0 }
 0x489   : > { %v1304_v19 = vmul.f32 %v1300_v56, %v2003_v24  ;;  %1094 = vadd.xlane.f32.xlu1 %v1093_v57 }
 0x48b   : > { %v2431_v25 = vsub.f32 %v2394_v9, %v1304_v19 }
 0x48d   : > { %v1308_v39 = vmul.f32 %v2431_v25, %v2431_v25 }
 0x48f   : > { %v1310_v41 = vsel %vm478_vm0, %v1308_v39, 0.0 }
 0x490   : > { %1311 = vadd.xlane.f32.xlu2 %v1310_v41  ;;  %v1303_v63 = vpop.xlane.xlu2 %1302 }
 0x491   : > { %v1305_v8 = vmul.f32 %v1303_v63, %v2003_v24 }
 0x493   : > { %v2438_v12 = vsub.f32 %v2399_v1, %v1305_v8 }
 0x495   : > { %v1309_v4 = vmul.f32 %v2438_v12, %v2438_v12 }
 0x497   : > { %v1313_v5 = vsel %vm478_vm0, %v1309_v4, 0.0 }
 0x498   : > { %1314 = vadd.xlane.f32.xlu0 %v1313_v5 }
 0x4f4   : > { %v1092_v29 = vpop.xlane.xlu0 %1091 }
 0x4f5   : > { %v1096_v54 = vmul.f32 %v1092_v29, %v2003_v24 }
 0x4f7   : > { %v1098_v53 = vadd.f32 1e-06, %v1096_v54 }
 0x4f9   : > { %1835 = vrsqrt.f32 %v1098_v53  ;;  %vm1106_vm15 = vweird.f32 %v1098_v53 }
 0x4fc   : > { %v1095_v20 = vpop.xlane.xlu1 %1094 }
 0x4fd   : > { %v1097_v48 = vmul.f32 %v1095_v20, %v2003_v24 }
 0x4ff   : > { %v1836_v34 = vpop.eup %1835  ;;  %v1099_v0 = vadd.f32 1e-06, %v1097_v48  ;;  %v1860_v48 = vld [vmem:[%s2563_s4] ss:$0 sm:$0xff] }
 0x500   : > { %v1101_v47 = vmul.f32 %v1836_v34, %v1098_v53  ;;  %vm1107_vm14 = vweird.f32 %v1836_v34  ;;  %v1859_v53 = vld [vmem:[%s2562_s3] ss:$0 sm:$0xff] }
 0x501   : > { %1837 = vrsqrt.f32 %v1099_v0  ;;  %vm1108_vm1 = vmor %vm1106_vm15, %vm1107_vm14  ;;  %vm1116_vm3 = vweird.f32 %v1099_v0 }
 0x502   : > { %v1102_v45 = vmul.f32 %v1836_v34, %v1101_v47 }
 0x503   : > { %v1312_v3 = vpop.xlane.xlu2 %1311 }
 0x504   : > { %v1103_v21 = vmul.f32 0.5, %v1102_v45  ;;  %v1316_v7 = vmul.f32 %v1312_v3, %v2003_v24 }
 0x506   : > { %v1104_v50 = vsub.f32 1.5, %v1103_v21  ;;  %v1318_v10 = vadd.f32 1e-06, %v1316_v7 }
 0x507   : > { %v1838_v6 = vpop.eup %1837 }
 0x508   : > { %v1105_v51 = vmul.f32 %v1836_v34, %v1104_v50  ;;  %v1111_v58 = vmul.f32 %v1838_v6, %v1099_v0  ;;  %vm1117_vm2 = vweird.f32 %v1838_v6  ;;  %1839 = vrsqrt.f32 %v1318_v10 }
 0x509   : > { %vm1118_vm4 = vmor %vm1116_vm3, %vm1117_vm2  ;;  %vm1326_vm9 = vweird.f32 %v1318_v10 }
 0x50a   : > { %v1112_v60 = vmul.f32 %v1838_v6, %v1111_v58  ;;  %v1109_v28 = vsel %vm1108_vm1, %v1836_v34, %v1105_v51 }
 0x50b   : > { %v1315_v14 = vpop.xlane.xlu0 %1314  ;;  %v1120_v61 = vmul.f32 %v1109_v28, %v1086_v62 }
 0x50c   : > { %v1113_v11 = vmul.f32 0.5, %v1112_v60  ;;  %v1317_v30 = vmul.f32 %v1315_v14, %v2003_v24 }
 0x50d   : > { %v1122_v22 = vmul.f32 %v2105_v26, %v1120_v61 }
 0x50e   : > { %v1114_v31 = vsub.f32 1.5, %v1113_v11  ;;  %v1319_v13 = vadd.f32 1e-06, %v1317_v30  ;;  %v1840_v32 = vpop.eup %1839 }
 0x50f   : > { %v1124_v19 = vadd.f32 %v2112_v33, %v1122_v22  ;;  %v1321_v41 = vmul.f32 %v1840_v32, %v1318_v10  ;;  %vm1327_vm6 = vweird.f32 %v1840_v32 }
 0x510   : > { %v1115_v15 = vmul.f32 %v1838_v6, %v1114_v31  ;;  %1841 = vrsqrt.f32 %v1319_v13  ;;  %vm1336_vm7 = vweird.f32 %v1319_v13  ;;  %vm1328_vm10 = vmor %vm1326_vm9, %vm1327_vm6 }
 0x511   : > { %v1322_v8 = vmul.f32 %v1840_v32, %v1321_v41 }
 0x512   : > { %v1119_v17 = vsel %vm1118_vm4, %v1838_v6, %v1115_v15 }
 0x513   : > { %v1121_v23 = vmul.f32 %v1119_v17, %v1087_v36  ;;  %v1323_v5 = vmul.f32 0.5, %v1322_v8 }
 0x515   : > { %v1123_v56 = vmul.f32 %v2105_v26, %v1121_v23  ;;  %v1324_v26 = vsub.f32 1.5, %v1323_v5 }
 0x516   : > { %v1842_v57 = vpop.eup %1841 }
 0x517   : > { %v1125_v24 = vadd.f32 %v2112_v33, %v1123_v56  ;;  %v1331_v39 = vmul.f32 %v1842_v57, %v1319_v13  ;;  %vm1337_vm5 = vweird.f32 %v1842_v57  ;;  %v1325_v33 = vmul.f32 %v1840_v32, %v1324_v26 }
 0x518   : > { %vm1338_vm8 = vmor %vm1336_vm7, %vm1337_vm5 }
 0x519   : > { %v1126_v62 = vpack.c.bf16 %v1125_v24, %v1124_v19  ;;  %v1332_v63 = vmul.f32 %v1842_v57, %v1331_v39 }
 0x51b   : > { %1737 = vmatmul.msk.bf16.vlgmr.msrb.gmra.mxu3 %vm478_vm0, %v1126_v62  ;;  %v1333_v4 = vmul.f32 0.5, %v1332_v63 }
 0x51c   : > { %1354 = vmatpush.bf16.msrb.mxu3 %v2060_v49  ;;  %v1329_v49 = vsel %vm1328_vm10, %v1840_v32, %v1325_v33 }
 0x51d   : > { %v1334_v36 = vsub.f32 1.5, %v1333_v4 }
 0x51f   : > { %v1335_v29 = vmul.f32 %v1842_v57, %v1334_v36 }
 0x520   : > { %1355 = vmatpush.bf16.msrb.mxu3 %v2071_v52 }
 0x521   : > { %v1339_v54 = vsel %vm1338_vm8, %v1842_v57, %v1335_v29 }
 0x522   : > { %v1341_v52 = vmul.f32 %v1339_v54, %v2438_v12 }
 0x524   : > { %1356 = vmatpush.bf16.msrb.mxu3 %v2081_v55  ;;  %v1340_v55 = vmul.f32 %v1329_v49, %v2431_v25 }
 0x526   : > { %v1342_v20 = vmul.f32 %v1859_v53, %v1340_v55 }
 0x528   : > { %1357 = vmatpush.bf16.msrb.mxu3 %v2091_v59  ;;  %v1343_v59 = vmul.f32 %v1859_v53, %v1341_v52 }
 0x52a   : > { %v1345_v34 = vadd.f32 %v1860_v48, %v1343_v59 }
 0x52b   : > { %1738 = vmatmul.msk.bf16.vlgmr.msra.gmra.mxu3 %vm478_vm0, %v1126_v62 }
 0x52c   : > { %1368 = vmatpush.bf16.msra.mxu3 %v2025_v37  ;;  %v1344_v37 = vadd.f32 %v1860_v48, %v1342_v20 }
 0x52e   : > { %v1346_v12 = vpack.c.bf16 %v1345_v34, %v1344_v37 }
 0x530   : > { %1369 = vmatpush.bf16.msra.mxu3 %v2034_v40 }
 0x534   : > { %1370 = vmatpush.bf16.msra.mxu3 %v2043_v43 }
 0x538   : > { %1371 = vmatpush.bf16.msra.mxu3 %v2052_v46 }
 0x53b   : > { %1743 = vmatmul.msk.bf16.vlgmr.msrb.gmra.mxu3 %vm478_vm0, %v1346_v12 }
 0x54b   : > { %1744 = vmatmul.msk.bf16.vlgmr.msra.gmra.mxu3 %vm478_vm0, %v1346_v12 }
 0x59e   : > { %v1139_v40 = vpop.f32.mrf.mxu3 }
 0x59f   : > { %v1140_v47 = vadd.f32 %v1139_v40, %v2136_v42 }
 0x5a6   : > { %v1141_v25 = vpop.f32.mrf.mxu3 }
 0x5a7   : > { %v1142_v7 = vadd.f32 %v1141_v25, %v2136_v42 }
 0x5ae   : > { %v1153_v0 = vpop.f32.mrf.mxu3 }
 0x5af   : > { %v1154_v43 = vadd.f32 %v1153_v0, %v2138_v44 }
 0x5b1   : > { %v1158_v45 = vpack.c.bf16 %v1154_v43, %v1140_v47 }
 0x5b3   : > { %v2473_v21 = vunpack.c.l.bf16 %v1158_v45  ;;  %v2475_v3 = vunpack.c.h.bf16 %v1158_v45 }
 0x5b5   : > { %v1164_v46 = vmul.f32 %v2473_v21, %v2473_v21  ;;  %v1165_v50 = vmul.f32 %v2475_v3, %v2475_v3 }
 0x5b6   : > { %v1155_v6 = vpop.f32.mrf.mxu3 }
 0x5b7   : > { %v1168_v51 = vpack.c.bf16 %v1165_v50, %v1164_v46  ;;  %v1156_v58 = vadd.f32 %v1155_v6, %v2138_v44 }
 0x5b9   : > { %v1170_v60 = vunpack.c.l.bf16 %v1168_v51  ;;  %v1171_v10 = vunpack.c.h.bf16 %v1168_v51  ;;  %v1159_v14 = vpack.c.bf16 %v1156_v58, %v1142_v7 }
 0x5bb   : > { %v1174_v28 = vmul.f32 %v1170_v60, %v2473_v21  ;;  %v1175_v11 = vmul.f32 %v1171_v10, %v2475_v3  ;;  %v2485_v30 = vunpack.c.l.bf16 %v1159_v14  ;;  %v2487_v31 = vunpack.c.h.bf16 %v1159_v14 }
 0x5bd   : > { %v1178_v13 = vpack.c.bf16 %v1175_v11, %v1174_v28  ;;  %v1166_v61 = vmul.f32 %v2485_v30, %v2485_v30  ;;  %v1167_v15 = vmul.f32 %v2487_v31, %v2487_v31 }
 0x5be   : > { %v1359_v17 = vpop.f32.mrf.mxu3 }
 0x5bf   : > { %v1180_v22 = vunpack.c.l.bf16 %v1178_v13  ;;  %v1181_v23 = vunpack.c.h.bf16 %v1178_v13  ;;  %v1169_v32 = vpack.c.bf16 %v1167_v15, %v1166_v61  ;;  %v1360_v12 = vadd.f32 %v1359_v17, %v2136_v42 }
 0x5c1   : > { %v1184_v56 = vmul.f32 0.044677734, %v1180_v22  ;;  %v1185_v57 = vmul.f32 0.044677734, %v1181_v23  ;;  %v1172_v19 = vunpack.c.l.bf16 %v1169_v32  ;;  %v1173_v24 = vunpack.c.h.bf16 %v1169_v32 }
 0x5c3   : > { %v1188_v39 = vpack.c.bf16 %v1185_v57, %v1184_v56  ;;  %v1176_v41 = vmul.f32 %v1172_v19, %v2485_v30  ;;  %v1177_v62 = vmul.f32 %v1173_v24, %v2487_v31 }
 0x5c5   : > { %v1190_v63 = vunpack.c.l.bf16 %v1188_v39  ;;  %v1191_v8 = vunpack.c.h.bf16 %v1188_v39  ;;  %v1179_v4 = vpack.c.bf16 %v1177_v62, %v1176_v41 }
 0x5c6   : > { %v1361_v5 = vpop.f32.mrf.mxu3 }
 0x5c7   : > { %v1194_v36 = vadd.f32 %v1190_v63, %v2473_v21  ;;  %v1195_v26 = vadd.f32 %v1191_v8, %v2475_v3  ;;  %v1182_v29 = vunpack.c.l.bf16 %v1179_v4  ;;  %v1183_v33 = vunpack.c.h.bf16 %v1179_v4 }
 0x5c8   : > { %v1362_v15 = vadd.f32 %v1361_v5, %v2136_v42 }
 0x5c9   : > { %v1198_v54 = vpack.c.bf16 %v1195_v26, %v1194_v36  ;;  %v1186_v49 = vmul.f32 0.044677734, %v1182_v29  ;;  %v1187_v52 = vmul.f32 0.044677734, %v1183_v33 }
 0x5cb   : > { %v1200_v55 = vunpack.c.l.bf16 %v1198_v54  ;;  %v1201_v53 = vunpack.c.h.bf16 %v1198_v54  ;;  %v1189_v59 = vpack.c.bf16 %v1187_v52, %v1186_v49 }
 0x5cd   : > { %v1204_v20 = vmul.f32 0.796875, %v1200_v55  ;;  %v1205_v48 = vmul.f32 0.796875, %v1201_v53  ;;  %v1192_v34 = vunpack.c.l.bf16 %v1189_v59  ;;  %v1193_v37 = vunpack.c.h.bf16 %v1189_v59 }
 0x5ce   : > { %v1373_v40 = vpop.f32.mrf.mxu3 }
 0x5cf   : > { %v1208_v25 = vpack.c.bf16 %v1205_v48, %v1204_v20  ;;  %v1196_v0 = vadd.f32 %v1192_v34, %v2485_v30  ;;  %v1197_v47 = vadd.f32 %v1193_v37, %v2487_v31  ;;  %v1374_v43 = vadd.f32 %v1373_v40, %v2138_v44 }
 0x5d1   : > { %v1210_v45 = vunpack.c.l.bf16 %v1208_v25  ;;  %v1211_v46 = vunpack.c.h.bf16 %v1208_v25  ;;  %v1199_v50 = vpack.c.bf16 %v1197_v47, %v1196_v0  ;;  %v1378_v6 = vpack.c.bf16 %v1374_v43, %v1360_v12 }
 0x5d3   : > { %1843 = vtanh.f32 %v1210_v45  ;;  %v1202_v7 = vunpack.c.l.bf16 %v1199_v50  ;;  %v1203_v51 = vunpack.c.h.bf16 %v1199_v50  ;;  %v2501_v58 = vunpack.c.l.bf16 %v1378_v6 }
 0x5d4   : > { %1845 = vtanh.f32 %v1211_v46  ;;  %v2503_v60 = vunpack.c.h.bf16 %v1378_v6 }
 0x5d5   : > { %v1206_v10 = vmul.f32 0.796875, %v1202_v7  ;;  %v1207_v14 = vmul.f32 0.796875, %v1203_v51  ;;  %v1384_v28 = vmul.f32 %v2501_v58, %v2501_v58 }
 0x5d6   : > { %v1385_v11 = vmul.f32 %v2503_v60, %v2503_v60  ;;  %v1375_v13 = vpop.f32.mrf.mxu3 }
 0x5d7   : > { %v1209_v61 = vpack.c.bf16 %v1207_v14, %v1206_v10  ;;  %v1376_v17 = vadd.f32 %v1375_v13, %v2138_v44 }
 0x5d8   : > { %v1388_v22 = vpack.c.bf16 %v1385_v11, %v1384_v28 }
 0x5d9   : > { %v1844_v23 = vpop.eup %1843  ;;  %v1212_v32 = vunpack.c.l.bf16 %v1209_v61  ;;  %v1213_v56 = vunpack.c.h.bf16 %v1209_v61  ;;  %v1379_v57 = vpack.c.bf16 %v1376_v17, %v1362_v15 }
 0x5da   : > { %v1846_v19 = vpop.eup %1845  ;;  %v1390_v24 = vunpack.c.l.bf16 %v1388_v22  ;;  %v1391_v39 = vunpack.c.h.bf16 %v1388_v22 }
 0x5db   : > { %1847 = vtanh.f32 %v1212_v32  ;;  %v2511_v41 = vunpack.c.l.bf16 %v1379_v57  ;;  %v2513_v62 = vunpack.c.h.bf16 %v1379_v57  ;;  %v1218_v63 = vpack.c.bf16 %v1846_v19, %v1844_v23 }
 0x5dc   : > { %1849 = vtanh.f32 %v1213_v56  ;;  %v1394_v8 = vmul.f32 %v1390_v24, %v2501_v58  ;;  %v1395_v42 = vmul.f32 %v1391_v39, %v2503_v60 }
 0x5dd   : > { %v1386_v44 = vmul.f32 %v2511_v41, %v2511_v41  ;;  %v1387_v4 = vmul.f32 %v2513_v62, %v2513_v62  ;;  %v1220_v5 = vunpack.c.l.bf16 %v1218_v63  ;;  %v1221_v36 = vunpack.c.h.bf16 %v1218_v63 }
 0x5de   : > { %v1398_v26 = vpack.c.bf16 %v1395_v42, %v1394_v8 }
 0x5df   : > { %v1389_v29 = vpack.c.bf16 %v1387_v4, %v1386_v44  ;;  %v1224_v33 = vadd.f32 1.0, %v1220_v5  ;;  %v1225_v54 = vadd.f32 1.0, %v1221_v36 }
 0x5e0   : > { %v1400_v49 = vunpack.c.l.bf16 %v1398_v26  ;;  %v1401_v52 = vunpack.c.h.bf16 %v1398_v26 }
 0x5e1   : > { %v1848_v55 = vpop.eup %1847  ;;  %v1392_v53 = vunpack.c.l.bf16 %v1389_v29  ;;  %v1393_v59 = vunpack.c.h.bf16 %v1389_v29  ;;  %v1228_v20 = vpack.c.bf16 %v1225_v54, %v1224_v33 }
 0x5e2   : > { %v1850_v48 = vpop.eup %1849  ;;  %v1404_v34 = vmul.f32 0.044677734, %v1400_v49  ;;  %v1405_v37 = vmul.f32 0.044677734, %v1401_v52 }
 0x5e3   : > { %v1396_v12 = vmul.f32 %v1392_v53, %v2511_v41  ;;  %v1397_v40 = vmul.f32 %v1393_v59, %v2513_v62  ;;  %v1219_v25 = vpack.c.bf16 %v1850_v48, %v1848_v55  ;;  %v1230_v0 = vunpack.c.l.bf16 %v1228_v20 }
 0x5e4   : > { %v1408_v47 = vpack.c.bf16 %v1405_v37, %v1404_v34  ;;  %v1231_v43 = vunpack.c.h.bf16 %v1228_v20 }
 0x5e5   : > { %v1399_v45 = vpack.c.bf16 %v1397_v40, %v1396_v12  ;;  %v1222_v46 = vunpack.c.l.bf16 %v1219_v25  ;;  %v1223_v50 = vunpack.c.h.bf16 %v1219_v25  ;;  %v1234_v51 = vmul.f32 0.5, %v1230_v0 }
 0x5e6   : > { %v1410_v6 = vunpack.c.l.bf16 %v1408_v47  ;;  %v1411_v7 = vunpack.c.h.bf16 %v1408_v47  ;;  %v1235_v10 = vmul.f32 0.5, %v1231_v43 }
 0x5e7   : > { %v1402_v14 = vunpack.c.l.bf16 %v1399_v45  ;;  %v1403_v28 = vunpack.c.h.bf16 %v1399_v45  ;;  %v1226_v11 = vadd.f32 1.0, %v1222_v46  ;;  %v1227_v13 = vadd.f32 1.0, %v1223_v50 }
 0x5e8   : > { %v1414_v61 = vadd.f32 %v1410_v6, %v2501_v58  ;;  %v1415_v15 = vadd.f32 %v1411_v7, %v2503_v60  ;;  %v1238_v56 = vpack.c.bf16 %v1235_v10, %v1234_v51 }
 0x5e9   : > { %v1406_v17 = vmul.f32 0.044677734, %v1402_v14  ;;  %v1407_v22 = vmul.f32 0.044677734, %v1403_v28  ;;  %v1229_v23 = vpack.c.bf16 %v1227_v13, %v1226_v11 }
 0x5ea   : > { %v1418_v32 = vpack.c.bf16 %v1415_v15, %v1414_v61  ;;  %v1240_v26 = vunpack.c.l.bf16 %v1238_v56  ;;  %v1241_v52 = vunpack.c.h.bf16 %v1238_v56 }
 0x5eb   : > { %v1409_v57 = vpack.c.bf16 %v1407_v22, %v1406_v17  ;;  %v1232_v19 = vunpack.c.l.bf16 %v1229_v23  ;;  %v1233_v24 = vunpack.c.h.bf16 %v1229_v23 }
 0x5ec   : > { %v1420_v39 = vunpack.c.l.bf16 %v1418_v32  ;;  %v1421_v63 = vunpack.c.h.bf16 %v1418_v32  ;;  %v1244_v34 = vmul.f32 %v1240_v26, %v2473_v21  ;;  %v1245_v0 = vmul.f32 %v1241_v52, %v2475_v3 }
 0x5ed   : > { %v1412_v8 = vunpack.c.l.bf16 %v1409_v57  ;;  %v1413_v42 = vunpack.c.h.bf16 %v1409_v57  ;;  %v1236_v44 = vmul.f32 0.5, %v1232_v19  ;;  %v1237_v4 = vmul.f32 0.5, %v1233_v24 }
 0x5ee   : > { %v1424_v5 = vmul.f32 0.796875, %v1420_v39  ;;  %v1425_v36 = vmul.f32 0.796875, %v1421_v63 }
 0x5ef   : > { %v1416_v29 = vadd.f32 %v1412_v8, %v2511_v41  ;;  %v1417_v33 = vadd.f32 %v1413_v42, %v2513_v62  ;;  %v1239_v54 = vpack.c.bf16 %v1237_v4, %v1236_v44 }
 0x5f0   : > { %v1428_v49 = vpack.c.bf16 %v1425_v36, %v1424_v5 }
 0x5f1   : > { %v1419_v55 = vpack.c.bf16 %v1417_v33, %v1416_v29  ;;  %v1242_v53 = vunpack.c.l.bf16 %v1239_v54  ;;  %v1243_v59 = vunpack.c.h.bf16 %v1239_v54 }
 0x5f2   : > { %v1430_v20 = vunpack.c.l.bf16 %v1428_v49  ;;  %v1431_v48 = vunpack.c.h.bf16 %v1428_v49 }
 0x5f3   : > { %v1422_v37 = vunpack.c.l.bf16 %v1419_v55  ;;  %v1423_v12 = vunpack.c.h.bf16 %v1419_v55  ;;  %v1246_v40 = vmul.f32 %v1242_v53, %v2485_v30  ;;  %v1247_v25 = vmul.f32 %v1243_v59, %v2487_v31  ;;  %v833_v59 = vpop.f32.mrf.mxu1 }
 0x5f4   : > { %1851 = vtanh.f32 %v1430_v20  ;;  %v1037_v20 = vpop.f32.mrf.mxu0 }
 0x5f5   : > { %1853 = vtanh.f32 %v1431_v48  ;;  %v1426_v47 = vmul.f32 0.796875, %v1422_v37  ;;  %v1427_v43 = vmul.f32 0.796875, %v1423_v12  ;;  %v1248_v45 = vpack.c.bf16 %v1246_v40, %v1244_v34 }
 0x5f6   : > { %v1249_v46 = vpack.c.bf16 %v1247_v25, %v1245_v0 }
 0x5f7   : > { %v1429_v50 = vpack.c.bf16 %v1427_v43, %v1426_v47  ;;  %1258 = vmatmul.bf16.vlgmr.msra.gmra.mxu0 %v1248_v45 }
 0x5f8   : > { %1272 = vmatmul.bf16.vlgmr.msra.gmra.mxu1 %v1249_v46 }
 0x5f9   : > { %v1432_v6 = vunpack.c.l.bf16 %v1429_v50  ;;  %v1433_v7 = vunpack.c.h.bf16 %v1429_v50 }
 0x5fa   : > { %v1852_v21 = vpop.eup %1851 }
 0x5fb   : > { %v1854_v51 = vpop.eup %1853  ;;  %1855 = vtanh.f32 %v1432_v6  ;;  %v1051_v48 = vpop.f32.mrf.mxu1 }
 0x5fc   : > { %1857 = vtanh.f32 %v1433_v7  ;;  %v1438_v30 = vpack.c.bf16 %v1854_v51, %v1852_v21  ;;  %v1039_v34 = vpop.f32.mrf.mxu0 }
 0x5fe   : > { %v1440_v10 = vunpack.c.l.bf16 %v1438_v30  ;;  %v1441_v31 = vunpack.c.h.bf16 %v1438_v30 }
 0x600   : > { %v1444_v14 = vadd.f32 1.0, %v1440_v10  ;;  %v1445_v28 = vadd.f32 1.0, %v1441_v31 }
 0x601   : > { %v1856_v3 = vpop.eup %1855 }
 0x602   : > { %v1858_v11 = vpop.eup %1857  ;;  %v1448_v13 = vpack.c.bf16 %v1445_v28, %v1444_v14 }
 0x603   : > { %v1439_v61 = vpack.c.bf16 %v1858_v11, %v1856_v3  ;;  %v1053_v37 = vpop.f32.mrf.mxu1 }
 0x604   : > { %v1450_v15 = vunpack.c.l.bf16 %v1448_v13  ;;  %v1451_v17 = vunpack.c.h.bf16 %v1448_v13 }
 0x605   : > { %v1442_v22 = vunpack.c.l.bf16 %v1439_v61  ;;  %v1443_v23 = vunpack.c.h.bf16 %v1439_v61 }
 0x606   : > { %v1454_v57 = vmul.f32 0.5, %v1450_v15  ;;  %v1455_v19 = vmul.f32 0.5, %v1451_v17 }
 0x607   : > { %v1446_v32 = vadd.f32 1.0, %v1442_v22  ;;  %v1447_v56 = vadd.f32 1.0, %v1443_v23 }
 0x608   : > { %v1458_v8 = vpack.c.bf16 %v1455_v19, %v1454_v57  ;;  %v2572_v19 = vld [vmem:[#allocation2_spill] sm:$0xff] }
 0x609   : > { %v1449_v24 = vpack.c.bf16 %v1447_v56, %v1446_v32 }
 0x60a   : > { %v1460_v5 = vunpack.c.l.bf16 %v1458_v8  ;;  %v1461_v36 = vunpack.c.h.bf16 %v1458_v8 }
 0x60b   : > { %v1452_v39 = vunpack.c.l.bf16 %v1449_v24  ;;  %v1453_v63 = vunpack.c.h.bf16 %v1449_v24  ;;  %v2573_v24 = vld [vmem:[#allocation3_spill] sm:$0xff] }
 0x60c   : > { %v1464_v33 = vmul.f32 %v1460_v5, %v2501_v58  ;;  %v1465_v49 = vmul.f32 %v1461_v36, %v2503_v60  ;;  %v1861_v58 = vld [vmem:[%s2567_s8] ss:$0 sm:$0xff] }
 0x60d   : > { %v1456_v42 = vmul.f32 0.5, %v1452_v39  ;;  %v1457_v44 = vmul.f32 0.5, %v1453_v63  ;;  %v1038_v43 = vadd.f32 %v1861_v58, %v1037_v20  ;;  %v1040_v51 = vadd.f32 %v1861_v58, %v1039_v34 }
 0x60e   : > { %v836_v39 = vadd.f32 %v2573_v24, %v2572_v19 }
 0x60f   : > { %v1459_v4 = vpack.c.bf16 %v1457_v44, %v1456_v42  ;;  %v1052_v50 = vadd.f32 %v1051_v48, %v1038_v43  ;;  %v1054_v14 = vadd.f32 %v1053_v37, %v1040_v51 }
 0x611   : > { %v1462_v26 = vunpack.c.l.bf16 %v1459_v4  ;;  %v1463_v29 = vunpack.c.h.bf16 %v1459_v4  ;;  %v1056_v21 = vadd.f32 %v1052_v50, %v2199_v35  ;;  %v1057_v13 = vadd.f32 %v1054_v14, %v2234_v18 }
 0x612   : > { %v820_v35 = vadd.f32 %v1861_v58, %v2353_v2 }
 0x613   : > { %v1466_v54 = vmul.f32 %v1462_v26, %v2511_v41  ;;  %v1467_v52 = vmul.f32 %v1463_v29, %v2513_v62 }
 0x614   : > { %v834_v22 = vadd.f32 %v833_v59, %v820_v35 }
 0x615   : > { %v1468_v55 = vpack.c.bf16 %v1466_v54, %v1464_v33  ;;  %v1469_v53 = vpack.c.bf16 %v1467_v52, %v1465_v49 }
 0x616   : > { %v837_v32 = vadd.f32 %v834_v22, %v1999_v16 }
 0x617   : > { %1478 = vmatmul.bf16.vlgmr.msrb.gmra.mxu0 %v1468_v55  ;;  %1492 = vmatmul.bf16.vlgmr.msrb.gmra.mxu1 %v1469_v53 }
 0x674   : > { %v1259_v12 = vpop.f32.mrf.mxu0 }
 0x675   : > { %v1260_v40 = vadd.f32 %v1861_v58, %v1259_v12  ;;  %v1273_v41 = vpop.f32.mrf.mxu1 }
 0x677   : > { %v1274_v25 = vadd.f32 %v1273_v41, %v1260_v40 }
 0x679   : > { %v1278_v18 = vadd.f32 %v1274_v25, %v2378_v38 }
 0x67c   : > { %v1261_v60 = vpop.f32.mrf.mxu0 }
 0x67d   : > { %v1262_v0 = vadd.f32 %v1861_v58, %v1261_v60  ;;  %v1275_v62 = vpop.f32.mrf.mxu1 }
 0x67f   : > { %v1276_v47 = vadd.f32 %v1275_v62, %v1262_v0 }
 0x681   : > { %v1279_v56 = vadd.f32 %v1276_v47, %v2387_v27 }
 0x694   : > { %v1479_v45 = vpop.f32.mrf.mxu0  ;;  %v1493_v46 = vpop.f32.mrf.mxu1 }
 0x695   : > { %v1480_v6 = vadd.f32 %v1861_v58, %v1479_v45 }
 0x697   : > { %v1494_v7 = vadd.f32 %v1493_v46, %v1480_v6 }
 0x699   : > { %v1498_v30 = vadd.f32 %v1494_v7, %v2394_v9 }
 0x69b   : > { %v1795_v10 = vpack.i.bf16 %v1498_v30, %v1056_v21 }
 0x69c   : > { %v1481_v31 = vpop.f32.mrf.mxu0  ;;  %v1495_v3 = vpop.f32.mrf.mxu1 }
 0x69d   : > { %v1482_v28 = vadd.f32 %v1861_v58, %v1481_v31  ;;  %1796 = vrot.lane.b32.xlu1 %v1795_v10, %s1871_s20 }
 0x69f   : > { %v1496_v11 = vadd.f32 %v1495_v3, %v1482_v28 }
 0x6a1   : > { %v1499_v61 = vadd.f32 %v1496_v11, %v2399_v1 }
 0x6a3   : > { %v1800_v15 = vpack.i.bf16 %v1499_v61, %v1057_v13 }
 0x6a5   : > { %1801 = vrot.lane.b32.xlu2 %v1800_v15, %s1871_s20 }
 0x6ff   : > { %v1802_v17 = vpop.permute.xlu2 %1801 }
 0x700   : > { %v1804_v9 = vunpack.i.h.bf16 %v1802_v17  ;;  %v1803_v23 = vunpack.i.l.bf16 %v1802_v17 }
 0x702   : > { %v1519_v8 = vsel %vm478_vm0, %v1279_v56, %v1804_v9  ;;  %v1517_v2 = vsel %vm478_vm0, %v837_v32, %v1803_v23 }
 0x703   : > { %v1521_v44 = vpack.c.bf16 %v1519_v8, %v1517_v2 }
 0x705   : > { %1523 = vst [vmem:[%s339_s24 + $0x8] sm:$0xff] %v1521_v44 }
 0x70f   : > { %v1797_v57 = vpop.permute.xlu1 %1796 }
 0x710   : > { %v1799_v1 = vunpack.i.h.bf16 %v1797_v57  ;;  %v1798_v63 = vunpack.i.l.bf16 %v1797_v57 }
 0x712   : > { %v1518_v16 = vsel %vm478_vm0, %v1278_v18, %v1799_v1  ;;  %v1516_v27 = vsel %vm478_vm0, %v836_v39, %v1798_v63 }
 0x713   : > { %v1520_v42 = vpack.c.bf16 %v1518_v16, %v1516_v27 }
 0x715   : > { %1522 = vst [vmem:[%s339_s24] sm:$0xff] %v1520_v42 }
 0x716 PF: > { %s19_s30 = sadd.s32 1, %s1868_s30  }
 0x717   : > { %p16_p4 = scmp.ge.s32.totalorder %s19_s30, 4  }
 0x719   :  { %18 = sbr.rel (!%p16_p4) target bundleno = 1 (0x1), region = 86 }

// kernel: sam2_image_encoder.6
= control target key start
LH: loop header
LB: loop body
LE: loop exit
PB: predicated region body
PF: predicated region fallthrough
CT: control target
= control target key end

     0   :  { %s1913_s30 = smov 0   ;;  %s2367_s0 = inlined_call_operand.vmem [shape: bf16[32,256], index: 0, kind: input, shape index: {}]   ;;  %s2368_s1 = inlined_call_operand.vmem [shape: bf16[256,128], index: 1, kind: input, shape index: {}]   ;;  %s2369_s2 = inlined_call_operand.vmem [shape: f32[1,128], index: 2, kind: input, shape index: {}]   ;;  %s2370_s3 = inlined_call_operand.vmem [shape: f32[1,128], index: 3, kind: input, shape index: {}]   ;;  %s2371_s4 = inlined_call_operand.vmem [shape: f32[1,128], index: 4, kind: input, shape index: {}]   ;;  %s2372_s5 = inlined_call_operand.vmem [shape: bf16[128,512], index: 5, kind: input, shape index: {}]   ;;  %s2373_s6 = inlined_call_operand.vmem [shape: f32[1,512], index: 6, kind: input, shape index: {}]   ;;  %s2374_s7 = inlined_call_operand.vmem [shape: bf16[512,128], index: 7, kind: input, shape index: {}]   ;;  %s2375_s8 = inlined_call_operand.vmem [shape: f32[1,128], index: 8, kind: input, shape index: {}]   ;;  %s2376_s9 = inlined_call_operand.vmem [shape: bf16[32,128], index: 9, kind: output, shape index: {}]  }
   0x1 LB: > { %s1391_s10 = sadd.s32 4294967295, %s1860_s30   ;;  %p1395_p0 = scmp.ge.s32.totalorder %s1860_s30, 1  ;;  %s1860_s30 = sphi %s1913_s30, %s19_s30  }
   0x2   : > { %p289_p1 = scmp.lt.s32.totalorder %s1860_s30, 3 }
   0x4   : > { %p290_p2 = pnand %p1395_p0, %p289_p1 }
   0x5   : > { %s1396_s23 = sshll.u32 (!%p290_p2), %s1391_s10, 1 }
   0x6   : > { %293 = sbr.rel (%p290_p2) target bundleno = 806 (0x326), region = 56  ;;  %p327_p3 = scmp.lt.s32.totalorder (!%p290_p2), %s1396_s23, 3 }
   0xb   : > { %v1741_v0 = vld [vmem:[%s2368_s1 + $0x38] sm:$0xff]  ;;  %v1740_v2 = vld [vmem:[%s2368_s1 + $0x30] sm:$0xff]  ;;  %v1739_v4 = vld [vmem:[%s2368_s1 + $0x28] sm:$0xff]  ;;  %s2378_s23 = smov (!%p327_p3, %s1396_s23), 3  ;;  %v1862_v31 = vmov 128.0  }
   0xc   : > { %v1749_v1 = vld [vmem:[%s2368_s1 + $0x78] sm:$0xff]  ;;  %583 = vmatpush.bf16.msra.mxu0 %v1741_v0  ;;  %v1748_v3 = vld [vmem:[%s2368_s1 + $0x70] sm:$0xff]  ;;  %v1747_v5 = vld [vmem:[%s2368_s1 + $0x68] sm:$0xff]  ;;  %s1731_s16 = sshll.u32 %s2378_s23, 3  ;;  %1832 = vrcp.f32 %v1862_v31  ;;  %s1400_s21 = sshll.u32 %s2378_s23, 2 }
   0xd   : > { %597 = vmatpush.bf16.msra.mxu1 %v1749_v1  ;;  %v1738_v6 = vld [vmem:[%s2368_s1 + $0x20] sm:$0xff]  ;;  %v1737_v8 = vld [vmem:[%s2368_s1 + $0x18] sm:$0xff]  ;;  %v1736_v10 = vld [vmem:[%s2368_s1 + $0x10] sm:$0xff]  ;;  %s331_s24 = scalar_lea.vmem %s2367_s0, %s1731_s16  ;;  %s337_s25 = scalar_lea.vmem %s2376_s9, %s1400_s21 }
   0xe   : > { %v1746_v7 = vld [vmem:[%s2368_s1 + $0x60] sm:$0xff]  ;;  %v1745_v9 = vld [vmem:[%s2368_s1 + $0x58] sm:$0xff]  ;;  %v1744_v11 = vld [vmem:[%s2368_s1 + $0x50] sm:$0xff] }
   0xf   : > { %v1735_v12 = vld [vmem:[%s2368_s1 + $0x8] sm:$0xff]  ;;  %v1734_v14 = vld [vmem:[%s2368_s1] sm:$0xff]  ;;  %v1780_v47 = vld [vmem:[%s2372_s5 + $0xec] sm:$0xf0] }
  0x10   : > { %584 = vmatpush.bf16.msra.mxu0 %v1740_v2  ;;  %v1743_v13 = vld [vmem:[%s2368_s1 + $0x48] sm:$0xff]  ;;  %v1742_v15 = vld [vmem:[%s2368_s1 + $0x40] sm:$0xff]  ;;  %v1589_v50 = vld [vmem:[%s2372_s5 + $0xf0] sm:$0xf0] }
  0x11   : > { %598 = vmatpush.bf16.msra.mxu1 %v1748_v3  ;;  %v1403_v16 = vld [vmem:[%s331_s24] sm:$0xf]  ;;  %v1733_v17 = vld [vmem:[%s331_s24 + $0x4] sm:$0xf0]  ;;  %v1732_v18 = vld [vmem:[%s331_s24 + $0x4] sm:$0xf] }
  0x12   : > { %v1405_v19 = vld [vmem:[%s331_s24 + $0x8] sm:$0xf0]  ;;  %v1404_v20 = vor.u32 %v1733_v17, %v1403_v16  ;;  %v1828_v22 = vld [vmem:[%s2369_s2] ss:$0 sm:$0xff]  ;;  %v1833_v32 = vpop.eup %1832  ;;  %v1778_v48 = vld [vmem:[%s2372_s5 + $0xe4] sm:$0xf] }
  0x13   : > { %v1408_v21 = vor.u32 %v1732_v18, %v1405_v19  ;;  %v616_v33 = vmul.f32 128.0, %v1833_v32  ;;  %vm620_vm0 = vweird.f32 %v1833_v32  ;;  %v1587_v46 = vld [vmem:[%s2372_s5 + $0xe0] sm:$0xf]  ;;  %v1595_v51 = vld [vmem:[%s2372_s5 + $0xe8] sm:$0xf]  ;;  %v1592_v53 = vor.u32 %v1778_v48, %v1589_v50 }
  0x14   : > { %585 = vmatpush.bf16.msra.mxu0 %v1739_v4  ;;  %v1588_v49 = vor.u32 %v1780_v47, %v1587_v46  ;;  %v1781_v52 = vld [vmem:[%s2372_s5 + $0xf4] sm:$0xf0]  ;;  %v1779_v55 = vld [vmem:[%s2372_s5 + $0xec] sm:$0xf]  ;;  %v1597_v56 = vld [vmem:[%s2372_s5 + $0xf8] sm:$0xf0] }
  0x15   : > { %599 = vmatpush.bf16.msra.mxu1 %v1747_v5  ;;  %v617_v34 = vsub.f32 1.0, %v616_v33  ;;  %v1596_v54 = vor.u32 %v1781_v52, %v1595_v51  ;;  %v1600_v57 = vor.u32 %v1779_v55, %v1597_v56  ;;  %852 = vmatpush.bf16.msra.mxu3 %v1592_v53  ;;  %v1571_v58 = vld [vmem:[%s2372_s5 + $0xc0] sm:$0xf]  ;;  %v1776_v59 = vld [vmem:[%s2372_s5 + $0xcc] sm:$0xf0] }
  0x16   : > { %838 = vmatpush.bf16.msra.mxu2 %v1588_v49  ;;  %v1774_v60 = vld [vmem:[%s2372_s5 + $0xc4] sm:$0xf]  ;;  %v1572_v61 = vor.u32 %v1776_v59, %v1571_v58  ;;  %v1573_v62 = vld [vmem:[%s2372_s5 + $0xd0] sm:$0xf0]  ;;  %v1579_v63 = vld [vmem:[%s2372_s5 + $0xc8] sm:$0xf] }
  0x17   : > { %v618_v35 = vmul.f32 %v1833_v32, %v617_v34  ;;  %v1777_v0 = vld [vmem:[%s2372_s5 + $0xd4] sm:$0xf0]  ;;  %v1576_v1 = vor.u32 %v1774_v60, %v1573_v62  ;;  %v1775_v3 = vld [vmem:[%s2372_s5 + $0xcc] sm:$0xf]  ;;  %v1581_v4 = vld [vmem:[%s2372_s5 + $0xd8] sm:$0xf0] }
  0x18   : > { %586 = vmatpush.bf16.msra.mxu0 %v1738_v6  ;;  %v1580_v2 = vor.u32 %v1777_v0, %v1579_v63  ;;  %v1584_v5 = vor.u32 %v1775_v3, %v1581_v4  ;;  %v1555_v6 = vld [vmem:[%s2372_s5 + $0xa0] sm:$0xf]  ;;  %v1565_v16 = vld [vmem:[%s2372_s5 + $0xb8] sm:$0xf0]  ;;  %v1768_v19 = vld [vmem:[%s2372_s5 + $0x8c] sm:$0xf0] }
  0x19   : > { %600 = vmatpush.bf16.msra.mxu1 %v1746_v7  ;;  %v619_v36 = vadd.f32 %v1833_v32, %v618_v35  ;;  %853 = vmatpush.bf16.msra.mxu3 %v1576_v1  ;;  %v1772_v7 = vld [vmem:[%s2372_s5 + $0xac] sm:$0xf0]  ;;  %v1539_v18 = vld [vmem:[%s2372_s5 + $0x80] sm:$0xf]  ;;  %v1762_v34 = vld [vmem:[%s2372_s5 + $0x64] sm:$0xf] }
  0x1a   : > { %839 = vmatpush.bf16.msra.mxu2 %v1572_v61  ;;  %v1764_v33 = vld [vmem:[%s2372_s5 + $0x6c] sm:$0xf0]  ;;  %v1507_v47 = vld [vmem:[%s2372_s5 + $0x40] sm:$0xf]  ;;  %v1758_v49 = vld [vmem:[%s2372_s5 + $0x44] sm:$0xf] }
  0x1b   : > { %v1984_v37 = vsel %vm620_vm0, %v1833_v32, %v619_v36  ;;  %v1523_v32 = vld [vmem:[%s2372_s5 + $0x60] sm:$0xf]  ;;  %v1525_v36 = vld [vmem:[%s2372_s5 + $0x70] sm:$0xf0]  ;;  %v1760_v48 = vld [vmem:[%s2372_s5 + $0x4c] sm:$0xf0] }
  0x1c   : > { %587 = vmatpush.bf16.msra.mxu0 %v1737_v8  ;;  %v1770_v8 = vld [vmem:[%s2372_s5 + $0xa4] sm:$0xf]  ;;  %v1524_v35 = vor.u32 %v1764_v33, %v1523_v32  ;;  %v1508_v50 = vor.u32 %v1760_v48, %v1507_v47  ;;  %v1509_v51 = vld [vmem:[%s2372_s5 + $0x50] sm:$0xf0]  ;;  %v1515_v52 = vld [vmem:[%s2372_s5 + $0x48] sm:$0xf] }
  0x1d   : > { %601 = vmatpush.bf16.msra.mxu1 %v1745_v9  ;;  %v1556_v9 = vor.u32 %v1772_v7, %v1555_v6  ;;  %v1761_v53 = vld [vmem:[%s2372_s5 + $0x54] sm:$0xf0]  ;;  %v1759_v56 = vld [vmem:[%s2372_s5 + $0x4c] sm:$0xf]  ;;  %v1491_v59 = vld [vmem:[%s2372_s5 + $0x20] sm:$0xf] }
  0x1e   : > { %v1516_v55 = vor.u32 %v1761_v53, %v1515_v52  ;;  %v1756_v60 = vld [vmem:[%s2372_s5 + $0x2c] sm:$0xf0]  ;;  %v1754_v61 = vld [vmem:[%s2372_s5 + $0x24] sm:$0xf]  ;;  %v1493_v63 = vld [vmem:[%s2372_s5 + $0x30] sm:$0xf0] }
  0x1f   : > { %840 = vmatpush.bf16.msra.mxu2 %v1556_v9  ;;  %v1492_v62 = vor.u32 %v1756_v60, %v1491_v59  ;;  %v1499_v0 = vld [vmem:[%s2372_s5 + $0x28] sm:$0xf]  ;;  %v1757_v1 = vld [vmem:[%s2372_s5 + $0x34] sm:$0xf0]  ;;  %v1755_v4 = vld [vmem:[%s2372_s5 + $0x2c] sm:$0xf] }
  0x20   : > { %588 = vmatpush.bf16.msra.mxu0 %v1736_v10  ;;  %v1557_v10 = vld [vmem:[%s2372_s5 + $0xb0] sm:$0xf0]  ;;  %v1500_v3 = vor.u32 %v1757_v1, %v1499_v0  ;;  %v1475_v6 = vld [vmem:[%s2372_s5] sm:$0xf]  ;;  %v1752_v9 = vld [vmem:[%s2372_s5 + $0xc] sm:$0xf0] }
  0x21   : > { %602 = vmatpush.bf16.msra.mxu1 %v1744_v11  ;;  %v1563_v11 = vld [vmem:[%s2372_s5 + $0xa8] sm:$0xf]  ;;  %v1830_v47 = vld [vmem:[%s2371_s4] ss:$0 sm:$0xff] }
  0x24   : > { %589 = vmatpush.bf16.msra.mxu0 %v1735_v12  ;;  %v1773_v12 = vld [vmem:[%s2372_s5 + $0xb4] sm:$0xf0] }
  0x25   : > { %603 = vmatpush.bf16.msra.mxu1 %v1743_v13  ;;  %v1560_v13 = vor.u32 %v1770_v8, %v1557_v10  ;;  %v1750_v10 = vld [vmem:[%s2372_s5 + $0x4] sm:$0xf] }
  0x27   : > { %854 = vmatpush.bf16.msra.mxu3 %v1560_v13  ;;  %v1476_v13 = vor.u32 %v1752_v9, %v1475_v6 }
  0x28   : > { %590 = vmatpush.bf16.msra.mxu0 %v1734_v14  ;;  %v1564_v14 = vor.u32 %v1773_v12, %v1563_v11  ;;  %v1477_v11 = vld [vmem:[%s2372_s5 + $0x10] sm:$0xf0] }
  0x29   : > { %604 = vmatpush.bf16.msra.mxu1 %v1742_v15  ;;  %v1771_v15 = vld [vmem:[%s2372_s5 + $0xac] sm:$0xf] }
  0x2a   : > { %v1568_v17 = vor.u32 %v1771_v15, %v1565_v16  ;;  %v1483_v15 = vld [vmem:[%s2372_s5 + $0x8] sm:$0xf]  ;;  %v1753_v16 = vld [vmem:[%s2372_s5 + $0x14] sm:$0xf0] }
  0x2b   : > { %591 = vmatmul.bf16.vlgmr.msra.gmra.mxu0 %v1404_v20  ;;  %v1766_v20 = vld [vmem:[%s2372_s5 + $0x84] sm:$0xf] }
  0x2c   : > { %605 = vmatmul.bf16.vlgmr.msra.gmra.mxu1 %v1408_v21  ;;  %866 = vmatpush.bf16.msrb.mxu0 %v1596_v54  ;;  %v1540_v21 = vor.u32 %v1768_v19, %v1539_v18  ;;  %v1512_v54 = vor.u32 %v1758_v49, %v1509_v51  ;;  %v1484_v18 = vor.u32 %v1753_v16, %v1483_v15  ;;  %v1485_v19 = vld [vmem:[%s2372_s5 + $0x18] sm:$0xf0] }
  0x2d   : > { %880 = vmatpush.bf16.msrb.mxu1 %v1600_v57  ;;  %v1517_v57 = vld [vmem:[%s2372_s5 + $0x58] sm:$0xf0] }
  0x2e   : > { %841 = vmatpush.bf16.msra.mxu2 %v1540_v21  ;;  %v1520_v58 = vor.u32 %v1759_v56, %v1517_v57 }
  0x30   : > { %867 = vmatpush.bf16.msrb.mxu0 %v1580_v2  ;;  %v1496_v2 = vor.u32 %v1754_v61, %v1493_v63 }
  0x31   : > { %881 = vmatpush.bf16.msrb.mxu1 %v1584_v5  ;;  %v1501_v5 = vld [vmem:[%s2372_s5 + $0x38] sm:$0xf0] }
  0x32   : > { %842 = vmatpush.bf16.msra.mxu2 %v1524_v35  ;;  %v1504_v8 = vor.u32 %v1755_v4, %v1501_v5 }
  0x34   : > { %868 = vmatpush.bf16.msrb.mxu0 %v1564_v14  ;;  %v1480_v14 = vor.u32 %v1750_v10, %v1477_v11 }
  0x35   : > { %882 = vmatpush.bf16.msrb.mxu1 %v1568_v17  ;;  %v1751_v17 = vld [vmem:[%s2372_s5 + $0xc] sm:$0xf] }
  0x36   : > { %843 = vmatpush.bf16.msra.mxu2 %v1508_v50  ;;  %v1488_v21 = vor.u32 %v1751_v17, %v1485_v19  ;;  %v1804_v19 = vld [vmem:[%s2374_s7 + $0xb0] sm:$0xff] }
  0x3a   : > { %844 = vmatpush.bf16.msra.mxu2 %v1492_v62 }
  0x3e   : > { %845 = vmatpush.bf16.msra.mxu2 %v1476_v13 }
  0xa8   : > { %v592_v23 = vpop.f32.mrf.mxu0 }
  0xa9   : > { %v606_v24 = vpop.f32.mrf.mxu1  ;;  %v593_v25 = vadd.f32 %v1828_v22, %v592_v23  ;;  %v1547_v23 = vld [vmem:[%s2372_s5 + $0x88] sm:$0xf] }
  0xab   : > { %v1978_v26 = vadd.f32 %v606_v24, %v593_v25  ;;  %v1769_v24 = vld [vmem:[%s2372_s5 + $0x94] sm:$0xf0] }
  0xad   : > { %611 = vadd.xlane.f32.xlu0 %v1978_v26 }
  0xb0   : > { %v594_v27 = vpop.f32.mrf.mxu0 }
  0xb1   : > { %v595_v28 = vadd.f32 %v1828_v22, %v594_v27  ;;  %v608_v29 = vpop.f32.mrf.mxu1  ;;  %v1541_v22 = vld [vmem:[%s2372_s5 + $0x90] sm:$0xf0]  ;;  %v1548_v27 = vor.u32 %v1769_v24, %v1547_v23 }
  0xb2   : > { %v1544_v25 = vor.u32 %v1766_v20, %v1541_v22 }
  0xb3   : > { %v1981_v30 = vadd.f32 %v608_v29, %v595_v28  ;;  %v1767_v28 = vld [vmem:[%s2372_s5 + $0x8c] sm:$0xf]  ;;  %v1549_v29 = vld [vmem:[%s2372_s5 + $0x98] sm:$0xf0]  ;;  %869 = vmatpush.bf16.msrb.mxu0 %v1548_v27 }
  0xb4   : > { %v1552_v31 = vor.u32 %v1767_v28, %v1549_v29  ;;  %855 = vmatpush.bf16.msra.mxu3 %v1544_v25 }
  0xb5   : > { %613 = vadd.xlane.f32.xlu0 %v1981_v30 }
  0xb6   : > { %883 = vmatpush.bf16.msrb.mxu1 %v1552_v31 }
 0x120   : > { %v612_v38 = vpop.xlane.xlu0 %611 }
 0x121   : > { %v622_v39 = vmul.f32 %v1984_v37, %v612_v38  ;;  %v1531_v38 = vld [vmem:[%s2372_s5 + $0x68] sm:$0xf] }
 0x123   : > { %v1988_v40 = vsub.f32 %v1978_v26, %v622_v39  ;;  %v1765_v39 = vld [vmem:[%s2372_s5 + $0x74] sm:$0xf0] }
 0x125   : > { %v626_v41 = vmul.f32 %v1988_v40, %v1988_v40 }
 0x127   : > { %628 = vadd.xlane.f32.xlu1 %v626_v41  ;;  %v1528_v41 = vor.u32 %v1762_v34, %v1525_v36 }
 0x128   : > { %v614_v42 = vpop.xlane.xlu0 %613 }
 0x129   : > { %v623_v43 = vmul.f32 %v1984_v37, %v614_v42  ;;  %v1532_v42 = vor.u32 %v1765_v39, %v1531_v38  ;;  %856 = vmatpush.bf16.msra.mxu3 %v1528_v41  ;;  %v1829_v41 = vld [vmem:[%s2370_s3] ss:$0 sm:$0xff] }
 0x12b   : > { %v1994_v44 = vsub.f32 %v1981_v30, %v623_v43  ;;  %v1763_v43 = vld [vmem:[%s2372_s5 + $0x6c] sm:$0xf]  ;;  %870 = vmatpush.bf16.msrb.mxu0 %v1532_v42 }
 0x12d   : > { %v627_v45 = vmul.f32 %v1994_v44, %v1994_v44  ;;  %857 = vmatpush.bf16.msra.mxu3 %v1512_v54 }
 0x12f   : > { %630 = vadd.xlane.f32.xlu1 %v627_v45  ;;  %v1533_v45 = vld [vmem:[%s2372_s5 + $0x78] sm:$0xf0]  ;;  %871 = vmatpush.bf16.msrb.mxu0 %v1516_v55 }
 0x130   : > { %v1536_v46 = vor.u32 %v1763_v43, %v1533_v45 }
 0x131   : > { %858 = vmatpush.bf16.msra.mxu3 %v1496_v2 }
 0x132   : > { %884 = vmatpush.bf16.msrb.mxu1 %v1536_v46 }
 0x133   : > { %872 = vmatpush.bf16.msrb.mxu0 %v1500_v3 }
 0x135   : > { %859 = vmatpush.bf16.msra.mxu3 %v1480_v14 }
 0x136   : > { %885 = vmatpush.bf16.msrb.mxu1 %v1520_v58 }
 0x137   : > { %873 = vmatpush.bf16.msrb.mxu0 %v1484_v18 }
 0x13a   : > { %886 = vmatpush.bf16.msrb.mxu1 %v1504_v8  ;;  %v1813_v8 = vld [vmem:[%s2374_s7 + $0xf8] sm:$0xff] }
 0x13e   : > { %887 = vmatpush.bf16.msrb.mxu1 %v1488_v21 }
 0x142   : > { %1315 = vmatpush.bf16.msra.mxu1 %v1813_v8 }
 0x19a   : > { %v629_v7 = vpop.xlane.xlu1 %628 }
 0x19b   : > { %v632_v12 = vmul.f32 %v629_v7, %v1984_v37  ;;  %v1805_v7 = vld [vmem:[%s2374_s7 + $0xb8] sm:$0xff] }
 0x19c   : > { %1301 = vmatpush.bf16.msra.mxu0 %v1805_v7  ;;  %v1809_v7 = vld [vmem:[%s2374_s7 + $0xd8] sm:$0xff] }
 0x19d   : > { %v634_v20 = vadd.f32 1e-06, %v632_v12 }
 0x19f   : > { %1834 = vrsqrt.f32 %v634_v20  ;;  %vm642_vm2 = vweird.f32 %v634_v20 }
 0x1a0   : > { %1302 = vmatpush.bf16.msra.mxu0 %v1804_v19 }
 0x1a2   : > { %v631_v22 = vpop.xlane.xlu1 %630 }
 0x1a3   : > { %v633_v23 = vmul.f32 %v631_v22, %v1984_v37 }
 0x1a5   : > { %v1835_v24 = vpop.eup %1834  ;;  %v635_v25 = vadd.f32 1e-06, %v633_v23 }
 0x1a6   : > { %v637_v27 = vmul.f32 %v1835_v24, %v634_v20  ;;  %vm643_vm1 = vweird.f32 %v1835_v24  ;;  %v1812_v20 = vld [vmem:[%s2374_s7 + $0xf0] sm:$0xff] }
 0x1a7   : > { %1836 = vrsqrt.f32 %v635_v25  ;;  %vm644_vm3 = vmor %vm642_vm2, %vm643_vm1  ;;  %vm652_vm5 = vweird.f32 %v635_v25  ;;  %1316 = vmatpush.bf16.msra.mxu1 %v1812_v20 }
 0x1a8   : > { %v638_v28 = vmul.f32 %v1835_v24, %v637_v27 }
 0x1aa   : > { %v639_v29 = vmul.f32 0.5, %v638_v28 }
 0x1ac   : > { %v640_v31 = vsub.f32 1.5, %v639_v29 }
 0x1ad   : > { %v1837_v32 = vpop.eup %1836 }
 0x1ae   : > { %v641_v33 = vmul.f32 %v1835_v24, %v640_v31  ;;  %v647_v34 = vmul.f32 %v1837_v32, %v635_v25  ;;  %vm653_vm4 = vweird.f32 %v1837_v32 }
 0x1af   : > { %vm654_vm6 = vmor %vm652_vm5, %vm653_vm4 }
 0x1b0   : > { %v648_v35 = vmul.f32 %v1837_v32, %v647_v34  ;;  %v645_v36 = vsel %vm644_vm3, %v1835_v24, %v641_v33  ;;  %v1797_v33 = vld [vmem:[%s2374_s7 + $0x78] sm:$0xff] }
 0x1b1   : > { %v656_v37 = vmul.f32 %v645_v36, %v1988_v40  ;;  %v408_v40 = vld [vmem:[%s2373_s6] sm:$0xf]  ;;  %1287 = vmatpush.bf16.msrb.mxu3 %v1797_v33 }
 0x1b2   : > { %v649_v38 = vmul.f32 0.5, %v648_v35  ;;  %v672_v52 = vperm.slane %v408_v40, 2  ;;  %v673_v53 = vperm.slane %v408_v40, 3  ;;  %v670_v57 = vperm.slane %v408_v40, 0 }
 0x1b3   : > { %v661_v46 = vmul.f32 %v1829_v41, %v656_v37  ;;  %v671_v58 = vperm.slane %v408_v40, 1  ;;  %v1796_v40 = vld [vmem:[%s2374_s7 + $0x70] sm:$0xff] }
 0x1b4   : > { %v650_v39 = vsub.f32 1.5, %v649_v38 }
 0x1b5   : > { %v666_v49 = vadd.f32 %v1830_v47, %v661_v46  ;;  %1288 = vmatpush.bf16.msrb.mxu3 %v1796_v40  ;;  %v1807_v40 = vld [vmem:[%s2374_s7 + $0xc8] sm:$0xff] }
 0x1b6   : > { %v651_v42 = vmul.f32 %v1837_v32, %v650_v39 }
 0x1b8   : > { %v655_v43 = vsel %vm654_vm6, %v1837_v32, %v651_v42  ;;  %v1789_v32 = vld [vmem:[%s2374_s7 + $0x38] sm:$0xff]  ;;  %v1811_v42 = vld [vmem:[%s2374_s7 + $0xe8] sm:$0xff] }
 0x1b9   : > { %v657_v45 = vmul.f32 %v655_v43, %v1994_v44  ;;  %1273 = vmatpush.bf16.msrb.mxu2 %v1789_v32  ;;  %1317 = vmatpush.bf16.msra.mxu1 %v1811_v42 }
 0x1bb   : > { %v662_v48 = vmul.f32 %v1829_v41, %v657_v45  ;;  %v1803_v41 = vld [vmem:[%s2374_s7 + $0xa8] sm:$0xff] }
 0x1bc   : > { %1303 = vmatpush.bf16.msra.mxu0 %v1803_v41 }
 0x1bd   : > { %v667_v50 = vadd.f32 %v1830_v47, %v662_v48 }
 0x1bf   : > { %v668_v51 = vpack.c.bf16 %v667_v50, %v666_v49 }
 0x1c1   : > { %846 = vmatmul.bf16.vlgmr.msra.gmra.mxu2 %v668_v51  ;;  %860 = vmatmul.bf16.vlgmr.msra.gmra.mxu3 %v668_v51 }
 0x1c2   : > { %874 = vmatmul.bf16.vlgmr.msrb.gmra.mxu0 %v668_v51  ;;  %888 = vmatmul.bf16.vlgmr.msrb.gmra.mxu1 %v668_v51  ;;  %v1788_v51 = vld [vmem:[%s2374_s7 + $0x30] sm:$0xff] }
 0x1c3   : > { %1274 = vmatpush.bf16.msrb.mxu2 %v1788_v51  ;;  %v1799_v51 = vld [vmem:[%s2374_s7 + $0x88] sm:$0xff] }
 0x23f   : > { %v875_v44 = vpop.f32.mrf.mxu0  ;;  %v889_v54 = vpop.f32.mrf.mxu1 }
 0x240   : > { %v876_v55 = vadd.f32 %v875_v44, %v672_v52  ;;  %v890_v56 = vadd.f32 %v889_v54, %v673_v53 }
 0x242   : > { %v895_v59 = vpack.c.bf16 %v890_v56, %v876_v55  ;;  %v1802_v55 = vld [vmem:[%s2374_s7 + $0xa0] sm:$0xff] }
 0x243   : > { %v1810_v56 = vld [vmem:[%s2374_s7 + $0xe0] sm:$0xff]  ;;  %1304 = vmatpush.bf16.msra.mxu0 %v1802_v55 }
 0x244   : > { %v2203_v60 = vunpack.c.l.bf16 %v895_v59  ;;  %v2205_v61 = vunpack.c.h.bf16 %v895_v59  ;;  %v847_v62 = vpop.f32.mrf.mxu2  ;;  %v861_v63 = vpop.f32.mrf.mxu3  ;;  %1318 = vmatpush.bf16.msra.mxu1 %v1810_v56 }
 0x245   : > { %v848_v0 = vadd.f32 %v847_v62, %v670_v57  ;;  %v862_v1 = vadd.f32 %v861_v63, %v671_v58  ;;  %v1787_v62 = vld [vmem:[%s2374_s7 + $0x28] sm:$0xff] }
 0x246   : > { %v908_v2 = vmul.f32 %v2203_v60, %v2203_v60  ;;  %v909_v3 = vmul.f32 %v2205_v61, %v2205_v61  ;;  %v1795_v63 = vld [vmem:[%s2374_s7 + $0x68] sm:$0xff]  ;;  %1275 = vmatpush.bf16.msrb.mxu2 %v1787_v62 }
 0x247   : > { %v894_v4 = vpack.c.bf16 %v862_v1, %v848_v0  ;;  %v877_v5 = vpop.f32.mrf.mxu0  ;;  %v891_v6 = vpop.f32.mrf.mxu1  ;;  %1289 = vmatpush.bf16.msrb.mxu3 %v1795_v63 }
 0x248   : > { %v915_v9 = vpack.c.bf16 %v909_v3, %v908_v2  ;;  %v878_v10 = vadd.f32 %v877_v5, %v672_v52  ;;  %v892_v11 = vadd.f32 %v891_v6, %v673_v53  ;;  %v1801_v6 = vld [vmem:[%s2374_s7 + $0x98] sm:$0xff]  ;;  %1319 = vmatpush.bf16.msra.mxu1 %v1809_v7 }
 0x249   : > { %v2217_v12 = vunpack.c.l.bf16 %v894_v4  ;;  %v2219_v13 = vunpack.c.h.bf16 %v894_v4  ;;  %1305 = vmatpush.bf16.msra.mxu0 %v1801_v6 }
 0x24a   : > { %v920_v14 = vunpack.c.l.bf16 %v915_v9  ;;  %v921_v15 = vunpack.c.h.bf16 %v915_v9  ;;  %v897_v16 = vpack.c.bf16 %v892_v11, %v878_v10 }
 0x24b   : > { %v906_v17 = vmul.f32 %v2217_v12, %v2217_v12  ;;  %v907_v18 = vmul.f32 %v2219_v13, %v2219_v13 }
 0x24c   : > { %v928_v21 = vmul.f32 %v920_v14, %v2203_v60  ;;  %v929_v22 = vmul.f32 %v921_v15, %v2205_v61  ;;  %v2233_v23 = vunpack.c.l.bf16 %v897_v16  ;;  %v2235_v24 = vunpack.c.h.bf16 %v897_v16  ;;  %v849_v25 = vpop.f32.mrf.mxu2  ;;  %v863_v27 = vpop.f32.mrf.mxu3 }
 0x24d   : > { %v914_v28 = vpack.c.bf16 %v907_v18, %v906_v17  ;;  %v850_v29 = vadd.f32 %v849_v25, %v670_v57  ;;  %v864_v31 = vadd.f32 %v863_v27, %v671_v58  ;;  %v1786_v17 = vld [vmem:[%s2374_s7 + $0x20] sm:$0xff] }
 0x24e   : > { %v935_v34 = vpack.c.bf16 %v929_v22, %v928_v21  ;;  %v912_v35 = vmul.f32 %v2233_v23, %v2233_v23  ;;  %v913_v36 = vmul.f32 %v2235_v24, %v2235_v24  ;;  %v1794_v18 = vld [vmem:[%s2374_s7 + $0x60] sm:$0xff]  ;;  %1276 = vmatpush.bf16.msrb.mxu2 %v1786_v17 }
 0x24f   : > { %v918_v38 = vunpack.c.l.bf16 %v914_v28  ;;  %v919_v39 = vunpack.c.h.bf16 %v914_v28  ;;  %v896_v37 = vpack.c.bf16 %v864_v31, %v850_v29  ;;  %v1800_v29 = vld [vmem:[%s2374_s7 + $0x90] sm:$0xff]  ;;  %1290 = vmatpush.bf16.msrb.mxu3 %v1794_v18 }
 0x250   : > { %v940_v43 = vunpack.c.l.bf16 %v935_v34  ;;  %v941_v45 = vunpack.c.h.bf16 %v935_v34  ;;  %v917_v46 = vpack.c.bf16 %v913_v36, %v912_v35  ;;  %v1808_v31 = vld [vmem:[%s2374_s7 + $0xd0] sm:$0xff]  ;;  %1306 = vmatpush.bf16.msra.mxu0 %v1800_v29 }
 0x251   : > { %v926_v47 = vmul.f32 %v918_v38, %v2217_v12  ;;  %v927_v48 = vmul.f32 %v919_v39, %v2219_v13  ;;  %v2255_v49 = vunpack.c.l.bf16 %v896_v37  ;;  %v2257_v50 = vunpack.c.h.bf16 %v896_v37  ;;  %v1785_v39 = vld [vmem:[%s2374_s7 + $0x18] sm:$0xff]  ;;  %1320 = vmatpush.bf16.msra.mxu1 %v1808_v31 }
 0x252   : > { %v948_v52 = vmul.f32 0.044677734, %v940_v43  ;;  %v949_v53 = vmul.f32 0.044677734, %v941_v45  ;;  %v924_v44 = vunpack.c.l.bf16 %v917_v46  ;;  %v925_v54 = vunpack.c.h.bf16 %v917_v46  ;;  %v1793_v37 = vld [vmem:[%s2374_s7 + $0x58] sm:$0xff]  ;;  %1277 = vmatpush.bf16.msrb.mxu2 %v1785_v39 }
 0x253   : > { %v934_v57 = vpack.c.bf16 %v927_v48, %v926_v47  ;;  %v910_v58 = vmul.f32 %v2255_v49, %v2255_v49  ;;  %v911_v59 = vmul.f32 %v2257_v50, %v2257_v50  ;;  %1291 = vmatpush.bf16.msrb.mxu3 %v1793_v37 }
 0x254   : > { %v955_v0 = vpack.c.bf16 %v949_v53, %v948_v52  ;;  %v932_v1 = vmul.f32 %v924_v44, %v2233_v23  ;;  %v933_v2 = vmul.f32 %v925_v54, %v2235_v24  ;;  %1307 = vmatpush.bf16.msra.mxu0 %v1799_v51 }
 0x255   : > { %v938_v3 = vunpack.c.l.bf16 %v934_v57  ;;  %v939_v4 = vunpack.c.h.bf16 %v934_v57  ;;  %v916_v5 = vpack.c.bf16 %v911_v59, %v910_v58  ;;  %v1784_v58 = vld [vmem:[%s2374_s7 + $0x10] sm:$0xff]  ;;  %1321 = vmatpush.bf16.msra.mxu1 %v1807_v40 }
 0x256   : > { %v960_v8 = vunpack.c.l.bf16 %v955_v0  ;;  %v961_v9 = vunpack.c.h.bf16 %v955_v0  ;;  %v937_v10 = vpack.c.bf16 %v933_v2, %v932_v1  ;;  %v1792_v59 = vld [vmem:[%s2374_s7 + $0x50] sm:$0xff]  ;;  %1278 = vmatpush.bf16.msrb.mxu2 %v1784_v58 }
 0x257   : > { %v946_v11 = vmul.f32 0.044677734, %v938_v3  ;;  %v947_v14 = vmul.f32 0.044677734, %v939_v4  ;;  %v922_v15 = vunpack.c.l.bf16 %v916_v5  ;;  %v923_v16 = vunpack.c.h.bf16 %v916_v5  ;;  %v1798_v4 = vld [vmem:[%s2374_s7 + $0x80] sm:$0xff]  ;;  %1292 = vmatpush.bf16.msrb.mxu3 %v1792_v59 }
 0x258   : > { %v968_v19 = vadd.f32 %v960_v8, %v2203_v60  ;;  %v969_v20 = vadd.f32 %v961_v9, %v2205_v61  ;;  %v944_v21 = vunpack.c.l.bf16 %v937_v10  ;;  %v945_v22 = vunpack.c.h.bf16 %v937_v10  ;;  %v1806_v5 = vld [vmem:[%s2374_s7 + $0xc0] sm:$0xff]  ;;  %1308 = vmatpush.bf16.msra.mxu0 %v1798_v4 }
 0x259   : > { %v954_v25 = vpack.c.bf16 %v947_v14, %v946_v11  ;;  %v930_v27 = vmul.f32 %v922_v15, %v2255_v49  ;;  %v931_v28 = vmul.f32 %v923_v16, %v2257_v50  ;;  %v1783_v15 = vld [vmem:[%s2374_s7 + $0x8] sm:$0xff]  ;;  %1322 = vmatpush.bf16.msra.mxu1 %v1806_v5 }
 0x25a   : > { %v975_v32 = vpack.c.bf16 %v969_v20, %v968_v19  ;;  %v952_v33 = vmul.f32 0.044677734, %v944_v21  ;;  %v953_v34 = vmul.f32 0.044677734, %v945_v22  ;;  %v1791_v16 = vld [vmem:[%s2374_s7 + $0x48] sm:$0xff]  ;;  %1279 = vmatpush.bf16.msrb.mxu2 %v1783_v15 }
 0x25b   : > { %v958_v35 = vunpack.c.l.bf16 %v954_v25  ;;  %v959_v36 = vunpack.c.h.bf16 %v954_v25  ;;  %v936_v38 = vpack.c.bf16 %v931_v28, %v930_v27  ;;  %1293 = vmatpush.bf16.msrb.mxu3 %v1791_v16 }
 0x25c   : > { %v980_v41 = vunpack.c.l.bf16 %v975_v32  ;;  %v981_v42 = vunpack.c.h.bf16 %v975_v32  ;;  %v957_v43 = vpack.c.bf16 %v953_v34, %v952_v33  ;;  %v1782_v32 = vld [vmem:[%s2374_s7] sm:$0xff] }
 0x25d   : > { %v966_v45 = vadd.f32 %v958_v35, %v2217_v12  ;;  %v967_v46 = vadd.f32 %v959_v36, %v2219_v13  ;;  %v942_v47 = vunpack.c.l.bf16 %v936_v38  ;;  %v943_v48 = vunpack.c.h.bf16 %v936_v38  ;;  %v1790_v33 = vld [vmem:[%s2374_s7 + $0x40] sm:$0xff] }
 0x25e   : > { %v988_v52 = vmul.f32 0.796875, %v980_v41  ;;  %v989_v53 = vmul.f32 0.796875, %v981_v42  ;;  %v964_v44 = vunpack.c.l.bf16 %v957_v43  ;;  %v965_v54 = vunpack.c.h.bf16 %v957_v43  ;;  %1280 = vmatpush.bf16.msrb.mxu2 %v1782_v32 }
 0x25f   : > { %v974_v55 = vpack.c.bf16 %v967_v46, %v966_v45  ;;  %v950_v56 = vmul.f32 0.044677734, %v942_v47  ;;  %v951_v57 = vmul.f32 0.044677734, %v943_v48  ;;  %1294 = vmatpush.bf16.msrb.mxu3 %v1790_v33 }
 0x260   : > { %v995_v62 = vpack.c.bf16 %v989_v53, %v988_v52  ;;  %v972_v63 = vadd.f32 %v964_v44, %v2233_v23  ;;  %v973_v0 = vadd.f32 %v965_v54, %v2235_v24 }
 0x261   : > { %v978_v1 = vunpack.c.l.bf16 %v974_v55  ;;  %v979_v2 = vunpack.c.h.bf16 %v974_v55  ;;  %v956_v3 = vpack.c.bf16 %v951_v57, %v950_v56 }
 0x262   : > { %v1000_v6 = vunpack.c.l.bf16 %v995_v62  ;;  %v1001_v7 = vunpack.c.h.bf16 %v995_v62  ;;  %v977_v8 = vpack.c.bf16 %v973_v0, %v972_v63 }
 0x263   : > { %v986_v9 = vmul.f32 0.796875, %v978_v1  ;;  %v987_v10 = vmul.f32 0.796875, %v979_v2  ;;  %v962_v11 = vunpack.c.l.bf16 %v956_v3  ;;  %v963_v14 = vunpack.c.h.bf16 %v956_v3 }
 0x264   : > { %1838 = vtanh.f32 %v1000_v6  ;;  %v984_v17 = vunpack.c.l.bf16 %v977_v8  ;;  %v985_v18 = vunpack.c.h.bf16 %v977_v8 }
 0x265   : > { %1840 = vtanh.f32 %v1001_v7  ;;  %v994_v19 = vpack.c.bf16 %v987_v10, %v986_v9  ;;  %v970_v20 = vadd.f32 %v962_v11, %v2255_v49  ;;  %v971_v21 = vadd.f32 %v963_v14, %v2257_v50 }
 0x266   : > { %v992_v22 = vmul.f32 0.796875, %v984_v17  ;;  %v993_v25 = vmul.f32 0.796875, %v985_v18 }
 0x267   : > { %v998_v27 = vunpack.c.l.bf16 %v994_v19  ;;  %v999_v28 = vunpack.c.h.bf16 %v994_v19  ;;  %v976_v29 = vpack.c.bf16 %v971_v21, %v970_v20 }
 0x268   : > { %v997_v31 = vpack.c.bf16 %v993_v25, %v992_v22 }
 0x269   : > { %1842 = vtanh.f32 %v998_v27  ;;  %v982_v34 = vunpack.c.l.bf16 %v976_v29  ;;  %v983_v35 = vunpack.c.h.bf16 %v976_v29 }
 0x26a   : > { %v1839_v36 = vpop.eup %1838  ;;  %1844 = vtanh.f32 %v999_v28  ;;  %v1004_v38 = vunpack.c.l.bf16 %v997_v31  ;;  %v1005_v39 = vunpack.c.h.bf16 %v997_v31 }
 0x26b   : > { %v1841_v37 = vpop.eup %1840  ;;  %v990_v41 = vmul.f32 0.796875, %v982_v34  ;;  %v991_v42 = vmul.f32 0.796875, %v983_v35 }
 0x26c   : > { %1846 = vtanh.f32 %v1004_v38  ;;  %v1015_v43 = vpack.c.bf16 %v1841_v37, %v1839_v36 }
 0x26d   : > { %1848 = vtanh.f32 %v1005_v39  ;;  %v996_v45 = vpack.c.bf16 %v991_v42, %v990_v41 }
 0x26e   : > { %v1020_v46 = vunpack.c.l.bf16 %v1015_v43  ;;  %v1021_v47 = vunpack.c.h.bf16 %v1015_v43 }
 0x26f   : > { %v1843_v48 = vpop.eup %1842  ;;  %v1002_v51 = vunpack.c.l.bf16 %v996_v45  ;;  %v1003_v40 = vunpack.c.h.bf16 %v996_v45 }
 0x270   : > { %v1845_v52 = vpop.eup %1844  ;;  %v1028_v53 = vadd.f32 1.0, %v1020_v46  ;;  %v1029_v44 = vadd.f32 1.0, %v1021_v47 }
 0x271   : > { %1850 = vtanh.f32 %v1002_v51  ;;  %v1014_v54 = vpack.c.bf16 %v1845_v52, %v1843_v48 }
 0x272   : > { %v1847_v55 = vpop.eup %1846  ;;  %1852 = vtanh.f32 %v1003_v40  ;;  %v1035_v56 = vpack.c.bf16 %v1029_v44, %v1028_v53 }
 0x273   : > { %v1849_v57 = vpop.eup %1848  ;;  %v1018_v58 = vunpack.c.l.bf16 %v1014_v54  ;;  %v1019_v59 = vunpack.c.h.bf16 %v1014_v54 }
 0x274   : > { %v1017_v62 = vpack.c.bf16 %v1849_v57, %v1847_v55  ;;  %v1040_v63 = vunpack.c.l.bf16 %v1035_v56  ;;  %v1041_v0 = vunpack.c.h.bf16 %v1035_v56 }
 0x275   : > { %v1026_v1 = vadd.f32 1.0, %v1018_v58  ;;  %v1027_v2 = vadd.f32 1.0, %v1019_v59 }
 0x276   : > { %v1024_v3 = vunpack.c.l.bf16 %v1017_v62  ;;  %v1025_v4 = vunpack.c.h.bf16 %v1017_v62  ;;  %v1048_v10 = vmul.f32 0.5, %v1040_v63  ;;  %v1049_v11 = vmul.f32 0.5, %v1041_v0 }
 0x277   : > { %v1851_v5 = vpop.eup %1850  ;;  %v1034_v6 = vpack.c.bf16 %v1027_v2, %v1026_v1 }
 0x278   : > { %v1853_v7 = vpop.eup %1852  ;;  %v1032_v8 = vadd.f32 1.0, %v1024_v3  ;;  %v1033_v9 = vadd.f32 1.0, %v1025_v4  ;;  %v1055_v22 = vpack.c.bf16 %v1049_v11, %v1048_v10 }
 0x279   : > { %v1016_v14 = vpack.c.bf16 %v1853_v7, %v1851_v5  ;;  %v1038_v15 = vunpack.c.l.bf16 %v1034_v6  ;;  %v1039_v16 = vunpack.c.h.bf16 %v1034_v6 }
 0x27a   : > { %v1037_v17 = vpack.c.bf16 %v1033_v9, %v1032_v8  ;;  %v1060_v35 = vunpack.c.l.bf16 %v1055_v22  ;;  %v1061_v36 = vunpack.c.h.bf16 %v1055_v22 }
 0x27b   : > { %v1022_v18 = vunpack.c.l.bf16 %v1016_v14  ;;  %v1023_v19 = vunpack.c.h.bf16 %v1016_v14  ;;  %v1046_v28 = vmul.f32 0.5, %v1038_v15  ;;  %v1047_v29 = vmul.f32 0.5, %v1039_v16 }
 0x27c   : > { %v1044_v20 = vunpack.c.l.bf16 %v1037_v17  ;;  %v1045_v21 = vunpack.c.h.bf16 %v1037_v17  ;;  %v1068_v46 = vmul.f32 %v1060_v35, %v2203_v60  ;;  %v1069_v48 = vmul.f32 %v1061_v36, %v2205_v61 }
 0x27d   : > { %v1030_v25 = vadd.f32 1.0, %v1022_v18  ;;  %v1031_v27 = vadd.f32 1.0, %v1023_v19  ;;  %v1054_v37 = vpack.c.bf16 %v1047_v29, %v1046_v28 }
 0x27e   : > { %v1052_v31 = vmul.f32 0.5, %v1044_v20  ;;  %v1053_v32 = vmul.f32 0.5, %v1045_v21 }
 0x27f   : > { %v1036_v33 = vpack.c.bf16 %v1031_v27, %v1030_v25  ;;  %v1058_v52 = vunpack.c.l.bf16 %v1054_v37  ;;  %v1059_v53 = vunpack.c.h.bf16 %v1054_v37 }
 0x280   : > { %v1057_v34 = vpack.c.bf16 %v1053_v32, %v1052_v31 }
 0x281   : > { %v1042_v38 = vunpack.c.l.bf16 %v1036_v33  ;;  %v1043_v39 = vunpack.c.h.bf16 %v1036_v33  ;;  %v1066_v57 = vmul.f32 %v1058_v52, %v2217_v12  ;;  %v1067_v60 = vmul.f32 %v1059_v53, %v2219_v13 }
 0x282   : > { %v1064_v41 = vunpack.c.l.bf16 %v1057_v34  ;;  %v1065_v42 = vunpack.c.h.bf16 %v1057_v34 }
 0x283   : > { %v1050_v43 = vmul.f32 0.5, %v1042_v38  ;;  %v1051_v45 = vmul.f32 0.5, %v1043_v39 }
 0x284   : > { %v1072_v47 = vmul.f32 %v1064_v41, %v2233_v23  ;;  %v1073_v51 = vmul.f32 %v1065_v42, %v2235_v24  ;;  %v1831_v24 = vld [vmem:[%s2375_s8] ss:$0 sm:$0xff] }
 0x285   : > { %v1056_v40 = vpack.c.bf16 %v1051_v45, %v1050_v43 }
 0x286   : > { %v1076_v44 = vpack.c.bf16 %v1072_v47, %v1068_v46  ;;  %v1077_v54 = vpack.c.bf16 %v1073_v51, %v1069_v48 }
 0x287   : > { %v1062_v55 = vunpack.c.l.bf16 %v1056_v40  ;;  %v1063_v56 = vunpack.c.h.bf16 %v1056_v40 }
 0x288   : > { %1309 = vmatmul.bf16.vlgmr.msra.gmra.mxu0 %v1076_v44  ;;  %1323 = vmatmul.bf16.vlgmr.msra.gmra.mxu1 %v1077_v54 }
 0x289   : > { %v1070_v58 = vmul.f32 %v1062_v55, %v2255_v49  ;;  %v1071_v23 = vmul.f32 %v1063_v56, %v2257_v50 }
 0x28b   : > { %v1074_v61 = vpack.c.bf16 %v1070_v58, %v1066_v57  ;;  %v1075_v59 = vpack.c.bf16 %v1071_v23, %v1067_v60 }
 0x28d   : > { %1281 = vmatmul.bf16.vlgmr.msrb.gmra.mxu2 %v1074_v61  ;;  %1295 = vmatmul.bf16.vlgmr.msrb.gmra.mxu3 %v1075_v59 }
 0x305   : > { %v1310_v1 = vpop.f32.mrf.mxu0  ;;  %v1324_v12 = vpop.f32.mrf.mxu1 }
 0x30d   : > { %v1312_v5 = vpop.f32.mrf.mxu0  ;;  %v1326_v8 = vpop.f32.mrf.mxu1 }
 0x310   : > { %v1282_v62 = vpop.f32.mrf.mxu2  ;;  %v1296_v63 = vpop.f32.mrf.mxu3 }
 0x311   : > { %v1283_v0 = vadd.f32 %v1831_v24, %v1282_v62 }
 0x313   : > { %v1297_v2 = vadd.f32 %v1296_v63, %v1283_v0 }
 0x315   : > { %v1311_v3 = vadd.f32 %v1310_v1, %v1297_v2 }
 0x317   : > { %v1325_v6 = vadd.f32 %v1324_v12, %v1311_v3 }
 0x318   : > { %v1284_v49 = vpop.f32.mrf.mxu2  ;;  %v1298_v4 = vpop.f32.mrf.mxu3 }
 0x319   : > { %v1285_v13 = vadd.f32 %v1831_v24, %v1284_v49  ;;  %v1329_v10 = vadd.f32 %v1325_v6, %v1978_v26 }
 0x31b   : > { %v1299_v50 = vadd.f32 %v1298_v4, %v1285_v13 }
 0x31d   : > { %v1313_v7 = vadd.f32 %v1312_v5, %v1299_v50 }
 0x31f   : > { %v1327_v9 = vadd.f32 %v1326_v8, %v1313_v7 }
 0x321   : > { %v1330_v11 = vadd.f32 %v1327_v9, %v1981_v30 }
 0x323   : > { %v1817_v14 = vpack.c.bf16 %v1330_v11, %v1329_v10 }
 0x325   : > { %1818 = vst [vmem:[%s337_s25] sm:$0xff] %v1817_v14  }
 0x326 PF: > { %s19_s30 = sadd.s32 1, %s1860_s30  }
 0x327   : > { %p16_p4 = scmp.ge.s32.totalorder %s19_s30, 4  }
 0x329   :  { %18 = sbr.rel (!%p16_p4) target bundleno = 1 (0x1), region = 86 }

// kernel: sam2_image_encoder.7
= control target key start
LH: loop header
LB: loop body
LE: loop exit
PB: predicated region body
PF: predicated region fallthrough
CT: control target
= control target key end

     0   :  { %s3198_s0 = inlined_call_operand.vmem [shape: bf16[32,128], index: 0, kind: input, shape index: {}]   ;;  %s3199_s1 = inlined_call_operand.vmem [shape: bf16[32,256], index: 1, kind: input, shape index: {}]   ;;  %s3200_s2 = inlined_call_operand.vmem [shape: bf16[32,512], index: 2, kind: input, shape index: {}]   ;;  %s3201_s3 = inlined_call_operand.vmem [shape: bf16[128,128], index: 3, kind: input, shape index: {}]   ;;  %s3202_s4 = inlined_call_operand.vmem [shape: f32[1,128], index: 4, kind: input, shape index: {}]   ;;  %s3203_s5 = inlined_call_operand.vmem [shape: bf16[64,128], index: 5, kind: input, shape index: {}]   ;;  %s3204_s6 = inlined_call_operand.vmem [shape: f32[1,128], index: 6, kind: input, shape index: {}]   ;;  %s3205_s7 = inlined_call_operand.vmem [shape: bf16[32,128], index: 7, kind: input, shape index: {}]   ;;  %s3206_s8 = inlined_call_operand.vmem [shape: f32[1,128], index: 8, kind: input, shape index: {}]   ;;  %s3207_s9 = inlined_call_operand.vmem [shape: bf16[128,64], index: 9, kind: input, shape index: {}]   ;;  %s3208_s10 = inlined_call_operand.vmem [shape: f32[1,64], index: 10, kind: input, shape index: {}]   ;;  %s3209_s11 = inlined_call_operand.vmem [shape: bf16[128,32], index: 11, kind: input, shape index: {}]   ;;  %s3210_s12 = inlined_call_operand.vmem [shape: f32[1,32], index: 12, kind: input, shape index: {}]   ;;  %s3211_s13 = inlined_call_operand.hbm [shape: f32[32,128], index: 13, kind: output, shape index: {0}]   ;;  %s3212_s14 = inlined_call_operand.vmem [shape: f32[32,256], index: 14, kind: output, shape index: {1}]   ;;  %s3213_s15 = inlined_call_operand.vmem [shape: f32[32,512], index: 15, kind: output, shape index: {2}]  }
   0x1   :  { %3226 = sst [smem:[#allocation10_spill]] %s3198_s0 }
   0x2   :  { %3227 = sst [smem:[#allocation11_spill]] %s3199_s1 }
   0x3   :  { %3228 = sst [smem:[#allocation12_spill]] %s3200_s2 }
   0x4   :  { %3229 = sst [smem:[#allocation13_spill]] %s3201_s3 }
   0x5   :  { %3230 = sst [smem:[#allocation14_spill]] %s3202_s4 }
   0x6   :  { %21 = vsyncpa [#allocation3], 0 }
   0x7   :  { %23 = vsyncpa [#allocation3 + $0x1], 0  ;;  %s2361_s18 = smov 0   ;;  %s2363_s19 = smov 0  }
   0x8   :  { %s2365_s20 = smov 0   ;;  %s2367_s21 = smov 0  }
   0x9 LB: > { %3231 = sst [smem:[#allocation5_spill]] %s2262_s18  ;;  %s2382_s22 = sadd.s32 4294967295, %s2274_s21   ;;  %s2274_s21 = sphi %s2367_s21, %s3249_s21   ;;  %s2270_s20 = sphi %s2365_s20, %s3251_s20   ;;  %s2266_s19 = sphi %s2363_s19, %s3253_s19   ;;  %s2262_s18 = sphi %s2361_s18, %s3252_s18  }
   0xa   : > { %3232 = sst [smem:[#allocation6_spill]] %s2270_s20  ;;  %s1929_s23 = sadd.s32 4294967294, %s2274_s21  }
   0xb   : > { %s2386_s24 = sadd.s32 1, %s2274_s21   ;;  %s324_s25 = sadd.s32 1, %s2270_s20 }
   0xc   : > { %3233 = sst [smem:[#allocation7_spill]] %s2386_s24  ;;  %s321_s26 = ssub.s32 %s2274_s21, %s2386_s24 }
   0xd   : > { %p334_p0 = scmp.ne.s32.totalorder %s2270_s20, %s2266_s19  ;;  %p322_p1 = scmp.eq.s32.totalorder %s321_s26, 0 }
   0xe   : > { %p335_p2 = scmp.eq.s32.totalorder %s2382_s22, 1  ;;  %p340_p3 = scmp.ne.s32.totalorder %s2266_s19, %s2262_s18 }
   0xf   : > { %p341_p4 = scmp.eq.s32.totalorder %s1929_s23, 1  ;;  %p1932_p7 = scmp.ge.s32.totalorder %s2274_s21, 1 }
  0x10   : > { %s2397_s27 = scalar_select %p322_p1, %s2270_s20, %s324_s25  }
  0x11   : > { %p2399_p5 = por %p335_p2, %p334_p0  ;;  %p2403_p6 = por %p341_p4, %p340_p3 }
  0x12   : > { %3234 = sst [smem:[#allocation8_spill]] %s2397_s27  ;;  %p470_p8 = scmp.lt.s32.totalorder %s2274_s21, 3 }
  0x13   : > { %s3236_s29 = scalar_select %p2403_p6, 1, 0 }
  0x14   : > { %p471_p9 = pnand %p1932_p7, %p470_p8 }
  0x15   : > { %3237 = sst [smem:[#allocation9_spill]] %s3236_s29  ;;  %s1934_s17 = sshll.u32 (!%p471_p9), %s2382_s22, 1 }
  0x16   : > { %474 = sbr.rel (%p471_p9) target bundleno = 1391 (0x56f), region = 72  ;;  %s3238_s3 = sld [smem:[#allocation13_spill]] (!%p471_p9) }
  0x17   : > { %p543_p10 = scmp.lt.s32.totalorder (!%p471_p9), %s1934_s17, 3  ;;  %s3239_s2 = sld [smem:[#allocation12_spill]] (!%p471_p9) }
  0x18   : > { %s3240_s1 = sld [smem:[#allocation11_spill]] (!%p471_p9)  ;;  %s3222_s29 = smov (!%p471_p9), 96  }
  0x19   : > { %s3224_s16 = smov (!%p471_p9), 64   ;;  %s3241_s0 = sld [smem:[#allocation10_spill]] (!%p471_p9) }
  0x1a   : > { %s523_s27 = sand.u32 (!%p471_p9), 1, %s2266_s19   ;;  %s3242_s4 = sld [smem:[#allocation14_spill]] (!%p471_p9) }
  0x1b   : > { %v2416_v1 = vld [vmem:[%s3203_s5 + $0x18] sm:$0xff]  ;;  %v2424_v3 = vld [vmem:[%s3205_s7 + $0x8] sm:$0xff]  ;;  %s3255_s17 = smov (!%p543_p10, %s1934_s17), 3  ;;  %v2432_v4 = vld [vmem:[%s3203_s5 + $0x10] sm:$0xff]  ;;  %vm862_vm0 = vcmask 261120   ;;  %vm756_vm1 = vcmask 523264  }
  0x1c   : > { %v2139_v0 = vld [vmem:[%s3238_s3 + $0x38] sm:$0xff]  ;;  %v2138_v2 = vld [vmem:[%s3238_s3 + $0x30] sm:$0xff]  ;;  %764 = vmatpush.bf16.msra.mxu1 %v2416_v1  ;;  %872 = vmatpush.bf16.msra.mxu3 %v2424_v3  ;;  %v2438_v5 = vld [vmem:[%s3205_s7] sm:$0xff]  ;;  %s3219_s20 = sshll.u32 %s3255_s17, 4  ;;  %s2121_s30 = sshll.u32 %s3255_s17, 3  ;;  %vm1726_vm2 = vcmask 785408  }
  0x1d   : > { %708 = vmatpush.bf16.msra.mxu0 %v2139_v0  ;;  %s2446_s26 = scalar_lea.vmem %s3239_s2, %s3219_s20  ;;  %v2137_v6 = vld [vmem:[%s3238_s3 + $0x28] sm:$0xff]  ;;  %v2136_v11 = vld [vmem:[%s3238_s3 + $0x20] sm:$0xff]  ;;  %v2135_v15 = vld [vmem:[%s3238_s3 + $0x18] sm:$0xff]  ;;  %s1935_s24 = sshll.u32 %s3255_s17, 2 }
  0x1e   : > { %v2039_v7 = vld [vmem:[%s2446_s26] sm:$0xf]  ;;  %v2130_v8 = vld [vmem:[%s2446_s26 + $0xc] sm:$0xf0]  ;;  %v2458_v9 = vld [vmem:[%s3203_s5 + $0x8] sm:$0xff]  ;;  %s2464_s18 = scalar_lea.vmem %s3240_s1, %s2121_s30  ;;  %s3220_s30 = smov 32  }
  0x1f   : > { %v2040_v10 = vor.u32 %v2130_v8, %v2039_v7  ;;  %v2475_v12 = vld [vmem:[%s3203_s5] sm:$0xff]  ;;  %v2127_v14 = vld [vmem:[%s2464_s18 + $0x4] sm:$0xf0]  ;;  %v2134_v17 = vld [vmem:[%s3238_s3 + $0x10] sm:$0xff]  ;;  %s1933_s25 = sshll.u32 %s523_s27, 4  ;;  %s3244_s23 = smov 96  }
  0x20   : > { %765 = vmatpush.bf16.msra.mxu1 %v2432_v4  ;;  %873 = vmatpush.bf16.msra.mxu3 %v2438_v5  ;;  %v1986_v13 = vld [vmem:[%s2464_s18] sm:$0xf]  ;;  %v2133_v18 = vld [vmem:[%s3238_s3 + $0x8] sm:$0xff]  ;;  %v2507_v21 = vld [vmem:[%s3207_s9 + $0x38] sm:$0xff]  ;;  %s2646_s1 = scalar_lea.vmem [#allocation2], %s1933_s25  ;;  %s3245_s20 = smov 32  }
  0x21   : > { %709 = vmatpush.bf16.msra.mxu0 %v2138_v2  ;;  %948 = vrot.lane.b32.xlu0 %v2040_v10, %s3222_s29  ;;  %v1987_v16 = vor.u32 %v2127_v14, %v1986_v13  ;;  %v2132_v19 = vld [vmem:[%s3238_s3] sm:$0xff]  ;;  %v2512_v22 = vld [vmem:[%s3209_s11 + $0x38] sm:$0xff]  ;;  %v2518_v23 = vld [vmem:[%s3207_s9 + $0x30] sm:$0xff]  ;;  %s1756_s25 = scalar_lea.sflag [#allocation3], %s523_s27 }
  0x22   : > { %1020 = vrot.lane.b32.xlu1 %v2040_v10, %s3220_s30  ;;  %828 = vmatpush.bf16.msra.mxu2 %v2507_v21  ;;  %v2524_v24 = vld [vmem:[%s3209_s11 + $0x30] sm:$0xff]  ;;  %v2531_v25 = vld [vmem:[%s3207_s9 + $0x28] sm:$0xff]  ;;  %v2544_v27 = vld [vmem:[%s3207_s9 + $0x20] sm:$0xff]  ;;  %s3246_s30 = sshll.u32 %s3255_s17, 4 }
  0x23   : > { %2049 = vmatmul.msk.bf16.vlgmr.msra.gmra.mxu3 %vm862_vm0, %v2040_v10  ;;  %v2537_v26 = vld [vmem:[%s3209_s11 + $0x28] sm:$0xff]  ;;  %v2550_v28 = vld [vmem:[%s3209_s11 + $0x20] sm:$0xff]  ;;  %v2559_v30 = vld [vmem:[%s3207_s9 + $0x18] sm:$0xff] }
  0x24   : > { %766 = vmatpush.bf16.msra.mxu1 %v2458_v9  ;;  %934 = vmatpush.bf16.msrb.mxu3 %v2512_v22  ;;  %v2566_v31 = vld [vmem:[%s3209_s11 + $0x18] sm:$0xff]  ;;  %v2573_v32 = vld [vmem:[%s3207_s9 + $0x10] sm:$0xff]  ;;  %v2587_v34 = vld [vmem:[%s3207_s9 + $0x8] sm:$0xff] }
  0x25   : > { %710 = vmatpush.bf16.msra.mxu0 %v2137_v6  ;;  %v2579_v33 = vld [vmem:[%s3209_s11 + $0x10] sm:$0xff]  ;;  %v2594_v35 = vld [vmem:[%s3209_s11 + $0x8] sm:$0xff]  ;;  %v2601_v36 = vld [vmem:[%s3207_s9] sm:$0xff] }
  0x26   : > { %829 = vmatpush.bf16.msra.mxu2 %v2518_v23  ;;  %v2607_v37 = vld [vmem:[%s3209_s11] sm:$0xff]  ;;  %v2086_v63 = vld [vmem:[%s2446_s26 + $0x10] sm:$0xf0] }
  0x27   : > { %v2209_v40 = vld [vmem:[%s3242_s4] ss:$0 sm:$0xff]  ;;  %v2128_v62 = vld [vmem:[%s2446_s26 + $0x4] sm:$0xf] }
  0x28   : > { %767 = vmatpush.bf16.msra.mxu1 %v2475_v12  ;;  %935 = vmatpush.bf16.msrb.mxu3 %v2524_v24  ;;  %v2640_v43 = vld [vmem:[%s3204_s6] ss:$0 sm:$0xff]  ;;  %v2089_v0 = vor.u32 %v2128_v62, %v2086_v63 }
  0x29   : > { %711 = vmatpush.bf16.msra.mxu0 %v2136_v11  ;;  %984 = vrot.lane.b32.xlu0 %v2040_v10, %s3224_s16  ;;  %v2655_v46 = vld [vmem:[%s3206_s8] ss:$0 sm:$0xff] }
  0x2a   : > { %1056 = vrot.lane.b32.xlu1 %v1987_v16, %s3224_s16  ;;  %s546_s16 = scalar_lea.vmem %s3241_s0, %s1935_s24  ;;  %830 = vmatpush.bf16.msra.mxu2 %v2531_v25  ;;  %s3243_s24 = smov 64  }
  0x2b   : > { %2004 = vmatmul.msk.bf16.vlgmr.msra.gmra.mxu1 %vm756_vm1, %v1987_v16  ;;  %v2125_v20 = vld [vmem:[%s546_s16] sm:$0xff]  ;;  %1129 = vrot.lane.b32.xlu2 %v2089_v0, %s3244_s23 }
  0x2c   : > { %959 = vmatpush.bf16.msrb.mxu1 %v2424_v3  ;;  %936 = vmatpush.bf16.msrb.mxu3 %v2537_v26 }
  0x2d   : > { %712 = vmatpush.bf16.msra.mxu0 %v2135_v15 }
  0x2e   : > { %831 = vmatpush.bf16.msra.mxu2 %v2544_v27 }
  0x30   : > { %960 = vmatpush.bf16.msrb.mxu1 %v2438_v5  ;;  %937 = vmatpush.bf16.msrb.mxu3 %v2550_v28 }
  0x31   : > { %713 = vmatpush.bf16.msra.mxu0 %v2134_v17  ;;  %1165 = vrot.lane.b32.xlu0 %v2089_v0, %s3243_s24 }
  0x32   : > { %832 = vmatpush.bf16.msra.mxu2 %v2559_v30 }
  0x33   : > { %1201 = vrot.lane.b32.xlu2 %v2089_v0, %s3245_s20 }
  0x34   : > { %995 = vmatpush.bf16.msra.mxu1 %v2424_v3  ;;  %938 = vmatpush.bf16.msrb.mxu3 %v2566_v31 }
  0x35   : > { %714 = vmatpush.bf16.msra.mxu0 %v2133_v18 }
  0x36   : > { %833 = vmatpush.bf16.msra.mxu2 %v2573_v32 }
  0x38   : > { %996 = vmatpush.bf16.msra.mxu1 %v2438_v5  ;;  %939 = vmatpush.bf16.msrb.mxu3 %v2579_v33 }
  0x39   : > { %715 = vmatpush.bf16.msra.mxu0 %v2132_v19 }
  0x3a   : > { %834 = vmatpush.bf16.msra.mxu2 %v2587_v34 }
  0x3c   : > { %716 = vmatmul.bf16.vlgmr.msra.gmra.mxu0 %v2125_v20  ;;  %940 = vmatpush.bf16.msrb.mxu3 %v2594_v35 }
  0x3d   : > { %970 = vmatpush.bf16.msrb.mxu0 %v2512_v22 }
  0x3e   : > { %835 = vmatpush.bf16.msra.mxu2 %v2601_v36 }
  0x40   : > { %941 = vmatpush.bf16.msrb.mxu3 %v2607_v37 }
  0x41   : > { %971 = vmatpush.bf16.msrb.mxu0 %v2524_v24 }
  0x42   : > { %1006 = vmatpush.bf16.msrb.mxu2 %v2512_v22 }
  0x44   : > { %1031 = vmatpush.bf16.msra.mxu3 %v2424_v3 }
  0x45   : > { %972 = vmatpush.bf16.msrb.mxu0 %v2537_v26 }
  0x46   : > { %1007 = vmatpush.bf16.msrb.mxu2 %v2524_v24 }
  0x48   : > { %1032 = vmatpush.bf16.msra.mxu3 %v2438_v5 }
  0x49   : > { %973 = vmatpush.bf16.msrb.mxu0 %v2550_v28 }
  0x4a   : > { %1008 = vmatpush.bf16.msrb.mxu2 %v2537_v26 }
  0x4d   : > { %974 = vmatpush.bf16.msrb.mxu0 %v2566_v31 }
  0x4e   : > { %1009 = vmatpush.bf16.msrb.mxu2 %v2550_v28 }
  0x51   : > { %975 = vmatpush.bf16.msrb.mxu0 %v2579_v33 }
  0x52   : > { %1010 = vmatpush.bf16.msrb.mxu2 %v2566_v31 }
  0x55   : > { %976 = vmatpush.bf16.msrb.mxu0 %v2594_v35 }
  0x56   : > { %1011 = vmatpush.bf16.msrb.mxu2 %v2579_v33 }
  0x59   : > { %977 = vmatpush.bf16.msrb.mxu0 %v2607_v37 }
  0x5a   : > { %1012 = vmatpush.bf16.msrb.mxu2 %v2594_v35 }
  0x5d   : > { %1078 = vmatpush.bf16.msra.mxu0 %v2507_v21 }
  0x5e   : > { %1013 = vmatpush.bf16.msrb.mxu2 %v2607_v37 }
  0x61   : > { %1079 = vmatpush.bf16.msra.mxu0 %v2518_v23 }
  0x65   : > { %1080 = vmatpush.bf16.msra.mxu0 %v2531_v25 }
  0x69   : > { %1081 = vmatpush.bf16.msra.mxu0 %v2544_v27 }
  0x6d   : > { %1082 = vmatpush.bf16.msra.mxu0 %v2559_v30 }
  0x71   : > { %1083 = vmatpush.bf16.msra.mxu0 %v2573_v32 }
  0x75   : > { %1084 = vmatpush.bf16.msra.mxu0 %v2587_v34 }
  0x79   : > { %1085 = vmatpush.bf16.msra.mxu0 %v2601_v36 }
  0x93   : > { %v949_v29 = vpop.permute.xlu0 %948 }
  0x94   : > { %2082 = vmatmul.msk.bf16.vlgmr.msrb.gmra.mxu1 %vm862_vm0, %v949_v29  ;;  %v1021_v60 = vpop.permute.xlu1 %1020 }
  0x95   : > { %1042 = vmatpush.bf16.msrb.mxu1 %v2512_v22 }
  0x99   : > { %1043 = vmatpush.bf16.msrb.mxu1 %v2524_v24 }
  0x9b   : > { %v985_v38 = vpop.permute.xlu0 %984 }
  0x9c   : > { %v1057_v61 = vpop.permute.xlu1 %1056 }
  0x9d   : > { %1044 = vmatpush.bf16.msrb.mxu1 %v2537_v26 }
  0xa1   : > { %1045 = vmatpush.bf16.msrb.mxu1 %v2550_v28 }
  0xa4   : > { %2083 = vmatmul.msk.bf16.vlgmr.msra.gmra.mxu1 %vm862_vm0, %v985_v38 }
  0xa5   : > { %1046 = vmatpush.bf16.msrb.mxu1 %v2566_v31 }
  0xa6   : > { %v875_v41 = vpop.f32.mrf.mxu3 }
  0xa7   : > { %v876_v50 = vadd.f32 %v2655_v46, %v875_v41 }
  0xa8   : > { %v769_v39 = vpop.f32.mrf.mxu1 }
  0xa9   : > { %1047 = vmatpush.bf16.msrb.mxu1 %v2579_v33  ;;  %v770_v45 = vadd.f32 %v2640_v43, %v769_v39 }
  0xad   : > { %1048 = vmatpush.bf16.msrb.mxu1 %v2594_v35 }
  0xae   : > { %v877_v48 = vpop.f32.mrf.mxu3 }
  0xaf   : > { %v878_v54 = vadd.f32 %v2655_v46, %v877_v48 }
  0xb0   : > { %v771_v47 = vpop.f32.mrf.mxu1 }
  0xb1   : > { %1049 = vmatpush.bf16.msrb.mxu1 %v2607_v37  ;;  %v772_v52 = vadd.f32 %v2640_v43, %v771_v47 }
  0xb5   : > { %1140 = vmatpush.bf16.msra.mxu1 %v2424_v3 }
  0xb9   : > { %v717_v42 = vpop.f32.mrf.mxu0  ;;  %1141 = vmatpush.bf16.msra.mxu1 %v2438_v5 }
  0xba   : > { %v2642_v44 = vadd.f32 %v2209_v40, %v717_v42 }
  0xbc   : > { %722 = vst [vmem:[%s2646_s1] sm:$0xff] %v2642_v44  ;;  %v2661_v51 = vadd.f32 %v770_v45, %v2642_v44 }
  0xbe   : > { %v880_v57 = vadd.f32 %v876_v50, %v2661_v51  ;;  %v2131_v50 = vld [vmem:[%s2446_s26 + $0x14] sm:$0xf0] }
  0xc1   : > { %v719_v49 = vpop.f32.mrf.mxu0 }
  0xc2   : > { %v2664_v53 = vadd.f32 %v2209_v40, %v719_v49  ;;  %v2101_v49 = vld [vmem:[%s2446_s26 + $0x8] sm:$0xf] }
  0xc4   : > { %v2669_v55 = vadd.f32 %v772_v52, %v2664_v53  ;;  %723 = vst [vmem:[%s2646_s1 + $0x8] sm:$0xff] %v2664_v53 }
  0xc6   : > { %v776_v56 = vpack.c.bf16 %v2669_v55, %v2661_v51  ;;  %v881_v58 = vadd.f32 %v878_v54, %v2669_v55  ;;  %v2734_v54 = vor.u32 %v2131_v50, %v2101_v49 }
  0xc8   : > { %836 = vmatmul.bf16.vlgmr.msra.gmra.mxu2 %v776_v56  ;;  %v882_v59 = vpack.c.bf16 %v881_v58, %v880_v57  ;;  %1385 = vrot.lane.b32.xlu0 %v2734_v54, %s3245_s20  ;;  %v2129_v56 = vld [vmem:[%s2446_s26 + $0xc] sm:$0xf]  ;;  %v2108_v57 = vld [vmem:[%s2446_s26 + $0x18] sm:$0xf0]  ;;  %s2888_s26 = scalar_lea.vmem %s3212_s14, %s3246_s30 }
  0xc9   : > { %1104 = vmatpush.bf16.msra.mxu2 %v2424_v3  ;;  %1313 = vrot.lane.b32.xlu1 %v2734_v54, %s3244_s23  ;;  %v2094_v58 = vld [vmem:[%s2464_s18 + $0x8] sm:$0xf0] }
  0xca   : > { %942 = vmatmul.bf16.vlgmr.msrb.gmra.mxu3 %v882_v59  ;;  %1349 = vrot.lane.b32.xlu2 %v2734_v54, %s3243_s24 }
  0xcb   : > { %1065 = vmatpush.bf16.msrb.mxu3 %v2416_v1 }
  0xcd   : > { %1105 = vmatpush.bf16.msra.mxu2 %v2438_v5 }
  0xcf   : > { %1066 = vmatpush.bf16.msrb.mxu3 %v2432_v4 }
  0xd3   : > { %1067 = vmatpush.bf16.msrb.mxu3 %v2458_v9 }
  0xd7   : > { %1068 = vmatpush.bf16.msrb.mxu3 %v2475_v12 }
  0xda   : > { %2084 = vmatmul.msk.bf16.vlgmr.msra.gmra.mxu3 %vm862_vm0, %v1021_v60 }
  0xdb   : > { %1115 = vmatpush.bf16.msra.mxu3 %v2512_v22 }
  0xdf   : > { %1116 = vmatpush.bf16.msra.mxu3 %v2524_v24 }
  0xe3   : > { %1117 = vmatpush.bf16.msra.mxu3 %v2537_v26 }
  0xe7   : > { %1118 = vmatpush.bf16.msra.mxu3 %v2550_v28 }
  0xea   : > { %2085 = vmatmul.msk.bf16.vlgmr.msrb.gmra.mxu3 %vm756_vm1, %v1057_v61 }
  0xeb   : > { %1119 = vmatpush.bf16.msra.mxu3 %v2566_v31 }
  0xef   : > { %1120 = vmatpush.bf16.msra.mxu3 %v2579_v33 }
  0xf3   : > { %1121 = vmatpush.bf16.msra.mxu3 %v2594_v35 }
  0xf7   : > { %1122 = vmatpush.bf16.msra.mxu3 %v2607_v37 }
  0xfb   : > { %1212 = vmatpush.bf16.msrb.mxu3 %v2424_v3 }
  0xff   : > { %1213 = vmatpush.bf16.msrb.mxu3 %v2438_v5 }
 0x111   : > { %v962_v2 = vpop.f32.mrf.mxu1 }
 0x112   : > { %v963_v6 = vadd.f32 %v2655_v46, %v962_v2  ;;  %v1130_v2 = vpop.permute.xlu2 %1129 }
 0x114   : > { %v967_v10 = vadd.f32 %v963_v6, %v2661_v51 }
 0x119   : > { %v964_v7 = vpop.f32.mrf.mxu1 }
 0x11a   : > { %v965_v8 = vadd.f32 %v2655_v46, %v964_v7  ;;  %v1166_v7 = vpop.permute.xlu0 %1165  ;;  %v1202_v49 = vpop.permute.xlu2 %1201 }
 0x11c   : > { %v968_v11 = vadd.f32 %v965_v8, %v2669_v55  ;;  %v2793_v8 = vld [vmem:[%s3210_s12] ss:$0 sm:$0xff] }
 0x11e   : > { %v969_v13 = vpack.c.bf16 %v968_v11, %v967_v10 }
 0x120   : > { %978 = vmatmul.bf16.vlgmr.msrb.gmra.mxu0 %v969_v13 }
 0x121   : > { %v998_v14 = vpop.f32.mrf.mxu1  ;;  %1176 = vmatpush.bf16.msrb.mxu0 %v2424_v3 }
 0x122   : > { %v999_v15 = vadd.f32 %v2655_v46, %v998_v14 }
 0x124   : > { %v1003_v18 = vadd.f32 %v999_v15, %v2661_v51 }
 0x125   : > { %1177 = vmatpush.bf16.msrb.mxu0 %v2438_v5 }
 0x129   : > { %v1000_v16 = vpop.f32.mrf.mxu1 }
 0x12a   : > { %v1001_v17 = vadd.f32 %v2655_v46, %v1000_v16 }
 0x12c   : > { %v1004_v19 = vadd.f32 %v1001_v17, %v2669_v55 }
 0x12e   : > { %v1005_v20 = vpack.c.bf16 %v1004_v19, %v1003_v18 }
 0x130   : > { %1014 = vmatmul.bf16.vlgmr.msrb.gmra.mxu2 %v1005_v20 }
 0x131   : > { %1151 = vmatpush.bf16.msrb.mxu2 %v2512_v22 }
 0x135   : > { %1152 = vmatpush.bf16.msrb.mxu2 %v2524_v24 }
 0x139   : > { %1153 = vmatpush.bf16.msrb.mxu2 %v2537_v26 }
 0x13d   : > { %1154 = vmatpush.bf16.msrb.mxu2 %v2550_v28 }
 0x140   : > { %2090 = vmatmul.msk.bf16.vlgmr.msra.gmra.mxu2 %vm862_vm0, %v2089_v0 }
 0x141   : > { %1155 = vmatpush.bf16.msrb.mxu2 %v2566_v31 }
 0x145   : > { %1156 = vmatpush.bf16.msrb.mxu2 %v2579_v33 }
 0x149   : > { %1157 = vmatpush.bf16.msrb.mxu2 %v2594_v35 }
 0x14b   : > { %v2797_v13 = vpop.f32.mrf.mxu2 }
 0x14d   : > { %v2718_v29 = vpop.f32.mrf.mxu3  ;;  %1158 = vmatpush.bf16.msrb.mxu2 %v2607_v37 }
 0x151   : > { %1247 = vmatpush.bf16.msra.mxu2 %v2416_v1 }
 0x153   : > { %v2801_v16 = vpop.f32.mrf.mxu2 }
 0x155   : > { %v2723_v38 = vpop.f32.mrf.mxu3  ;;  %1248 = vmatpush.bf16.msra.mxu2 %v2432_v4 }
 0x159   : > { %1249 = vmatpush.bf16.msra.mxu2 %v2458_v9 }
 0x15d   : > { %v1034_v39 = vpop.f32.mrf.mxu3  ;;  %1250 = vmatpush.bf16.msra.mxu2 %v2475_v12 }
 0x15e   : > { %v1035_v40 = vadd.f32 %v2655_v46, %v1034_v39 }
 0x160   : > { %v1039_v45 = vadd.f32 %v1035_v40, %v2661_v51  ;;  %v2126_v51 = vld [vmem:[%s2464_s18 + $0x4] sm:$0xf]  ;;  %s2124_s18 = sshll.u32 %s3255_s17, 5  ;;  %s2162_s17 = sshll.u32 %s2382_s22, 4 }
 0x161   : > { %v2750_v59 = vor.u32 %v2126_v51, %v2094_v58  ;;  %v2828_v51 = vld [vmem:[%s3208_s10] ss:$0 sm:$0xff]  ;;  %s2903_s30 = scalar_lea.vmem %s3213_s15, %s2124_s18  ;;  %s1779_s16 = scalar_lea.hbm %s3211_s13, %s2162_s17 }
 0x162   : > { %s1782_s18 = sshll.u32 %s1779_s16, 4  ;;  %s2232_s22 = scalar_lea.hbm %s3211_s13, 32  ;;  %s1783_s18 = int_to_ptr.hbm [resolvable:$true] %s1782_s18 }
 0x163   : > { %1421 = vrot.lane.b32.xlu1 %v2750_v59, %s3243_s24  ;;  %s2226_s29 = sshra.s32 %s1783_s18, 4  ;;  %s2227_s29 = int_to_ptr.hbm [resolvable:$true] %s2226_s29 }
 0x164   : > { %p2233_p0 = scmp.lt.s32.totalorder %s2227_s29, %s3211_s13 }
 0x165   : > { %v1036_v41 = vpop.f32.mrf.mxu3 }
 0x166   : > { %v1037_v42 = vadd.f32 %v2655_v46, %v1036_v41 }
 0x168   : > { %v1040_v47 = vadd.f32 %v1037_v42, %v2669_v55  ;;  %v2748_v55 = vor.u32 %v2129_v56, %v2108_v57 }
 0x16a   : > { %v1041_v48 = vpack.c.bf16 %v1040_v47, %v1039_v45  ;;  %1494 = vrot.lane.b32.xlu0 %v2748_v55, %s3244_s23  ;;  %1530 = vrot.lane.b32.xlu2 %v2748_v55, %s3243_s24 }
 0x16b   : > { %1566 = vrot.lane.b32.xlu1 %v2748_v55, %s3245_s20 }
 0x16c   : > { %1050 = vmatmul.bf16.vlgmr.msrb.gmra.mxu1 %v1041_v48 }
 0x16d   : > { %v1070_v52 = vpop.f32.mrf.mxu3  ;;  %1187 = vmatpush.bf16.msrb.mxu1 %v2512_v22 }
 0x16e   : > { %v1071_v60 = vadd.f32 %v2640_v43, %v1070_v52 }
 0x170   : > { %v2760_v63 = vadd.f32 %v1071_v60, %v2642_v44 }
 0x171   : > { %1188 = vmatpush.bf16.msrb.mxu1 %v2524_v24 }
 0x175   : > { %v1072_v61 = vpop.f32.mrf.mxu3  ;;  %1189 = vmatpush.bf16.msrb.mxu1 %v2537_v26 }
 0x176   : > { %v1073_v62 = vadd.f32 %v2640_v43, %v1072_v61 }
 0x178   : > { %v2763_v0 = vadd.f32 %v1073_v62, %v2664_v53 }
 0x179   : > { %1190 = vmatpush.bf16.msrb.mxu1 %v2550_v28 }
 0x17a   : > { %v1077_v6 = vpack.c.bf16 %v2763_v0, %v2760_v63 }
 0x17c   : > { %1086 = vmatmul.bf16.vlgmr.msra.gmra.mxu0 %v1077_v6  ;;  %2091 = vmatmul.msk.bf16.vlgmr.msra.gmra.mxu1 %vm862_vm0, %v1130_v2 }
 0x17d   : > { %1191 = vmatpush.bf16.msrb.mxu1 %v2566_v31  ;;  %1223 = vmatpush.bf16.msra.mxu0 %v2512_v22 }
 0x181   : > { %1192 = vmatpush.bf16.msrb.mxu1 %v2579_v33  ;;  %1224 = vmatpush.bf16.msra.mxu0 %v2524_v24 }
 0x185   : > { %1193 = vmatpush.bf16.msrb.mxu1 %v2594_v35  ;;  %1225 = vmatpush.bf16.msra.mxu0 %v2537_v26 }
 0x189   : > { %1194 = vmatpush.bf16.msrb.mxu1 %v2607_v37  ;;  %1226 = vmatpush.bf16.msra.mxu0 %v2550_v28 }
 0x18c   : > { %2092 = vmatmul.msk.bf16.vlgmr.msrb.gmra.mxu0 %vm862_vm0, %v1166_v7 }
 0x18d   : > { %1288 = vmatpush.bf16.msra.mxu1 %v2424_v3  ;;  %1227 = vmatpush.bf16.msra.mxu0 %v2566_v31 }
 0x191   : > { %1289 = vmatpush.bf16.msra.mxu1 %v2438_v5  ;;  %1228 = vmatpush.bf16.msra.mxu0 %v2579_v33 }
 0x195   : > { %1229 = vmatpush.bf16.msra.mxu0 %v2594_v35 }
 0x199   : > { %1230 = vmatpush.bf16.msra.mxu0 %v2607_v37 }
 0x19d   : > { %1324 = vmatpush.bf16.msrb.mxu0 %v2424_v3  ;;  %v979_v10 = vpop.f32.mrf.mxu0 }
 0x19e   : > { %v980_v11 = vadd.f32 %v2793_v8, %v979_v10 }
 0x1a0   : > { %1628 = vrot.lane.b32.xlu0 %v980_v11, %s3245_s20 }
 0x1a1   : > { %1325 = vmatpush.bf16.msrb.mxu0 %v2438_v5 }
 0x1a5   : > { %v981_v14 = vpop.f32.mrf.mxu0 }
 0x1a6   : > { %v982_v15 = vadd.f32 %v2793_v8, %v981_v14 }
 0x1a8   : > { %1630 = vrot.lane.b32.xlu1 %v982_v15, %s3245_s20 }
 0x1b3   : > { %v1015_v17 = vpop.f32.mrf.mxu2 }
 0x1b4   : > { %v1016_v18 = vadd.f32 %v2793_v8, %v1015_v17 }
 0x1b6   : > { %1636 = vrot.lane.b32.xlu2 %v1016_v18, %s3243_s24 }
 0x1bb   : > { %v1017_v19 = vpop.f32.mrf.mxu2 }
 0x1bc   : > { %v1018_v20 = vadd.f32 %v2793_v8, %v1017_v19 }
 0x1be   : > { %1638 = vrot.lane.b32.xlu0 %v1018_v20, %s3243_s24 }
 0x1c3   : > { %v1107_v39 = vpop.f32.mrf.mxu2 }
 0x1c4   : > { %v1108_v40 = vadd.f32 %v2655_v46, %v1107_v39 }
 0x1c6   : > { %v1112_v45 = vadd.f32 %v1108_v40, %v2760_v63 }
 0x1cb   : > { %v1109_v41 = vpop.f32.mrf.mxu2 }
 0x1cc   : > { %v1110_v42 = vadd.f32 %v2655_v46, %v1109_v41 }
 0x1ce   : > { %v1113_v47 = vadd.f32 %v1110_v42, %v2763_v0  ;;  %v1314_v42 = vpop.permute.xlu1 %1313 }
 0x1d0   : > { %v1114_v48 = vpack.c.bf16 %v1113_v47, %v1112_v45 }
 0x1d2   : > { %1123 = vmatmul.bf16.vlgmr.msra.gmra.mxu3 %v1114_v48 }
 0x1d3   : > { %1260 = vmatpush.bf16.msra.mxu3 %v2507_v21 }
 0x1d6   : > { %v2874_v47 = vpop.permute.xlu1 %1421 }
 0x1d7   : > { %1261 = vmatpush.bf16.msra.mxu3 %v2518_v23 }
 0x1db   : > { %1262 = vmatpush.bf16.msra.mxu3 %v2531_v25 }
 0x1df   : > { %1263 = vmatpush.bf16.msra.mxu3 %v2544_v27 }
 0x1e2   : > { %2093 = vmatmul.msk.bf16.vlgmr.msrb.gmra.mxu3 %vm862_vm0, %v1202_v49 }
 0x1e3   : > { %1264 = vmatpush.bf16.msra.mxu3 %v2559_v30 }
 0x1e7   : > { %1265 = vmatpush.bf16.msra.mxu3 %v2573_v32 }
 0x1e9   : > { %v1051_v50 = vpop.f32.mrf.mxu1 }
 0x1ea   : > { %v1052_v52 = vadd.f32 %v2793_v8, %v1051_v50  ;;  %v2879_v50 = vpop.permute.xlu1 %1566 }
 0x1eb   : > { %1266 = vmatpush.bf16.msra.mxu3 %v2587_v34 }
 0x1ec   : > { %1644 = vrot.lane.b32.xlu1 %v1052_v52, %s3244_s23 }
 0x1ef   : > { %1267 = vmatpush.bf16.msra.mxu3 %v2601_v36 }
 0x1f1   : > { %v1053_v56 = vpop.f32.mrf.mxu1 }
 0x1f2   : > { %v1054_v57 = vadd.f32 %v2793_v8, %v1053_v56 }
 0x1f3   : > { %1360 = vmatpush.bf16.msrb.mxu3 %v2424_v3 }
 0x1f4   : > { %1646 = vrot.lane.b32.xlu2 %v1054_v57, %s3244_s23  ;;  %v944_v57 = vadd.f32 %v2793_v8, %v2718_v29 }
 0x1f7   : > { %1361 = vmatpush.bf16.msrb.mxu3 %v2438_v5 }
 0x1f9   : > { %v1087_v58 = vpop.f32.mrf.mxu0  ;;  %v1143_v60 = vpop.f32.mrf.mxu1 }
 0x1fa   : > { %v1088_v61 = vadd.f32 %v2828_v51, %v1087_v58  ;;  %v1144_v62 = vadd.f32 %v2655_v46, %v1143_v60  ;;  %v946_v60 = vadd.f32 %v2793_v8, %v2723_v38 }
 0x1fc   : > { %1604 = vrot.lane.b32.xlu2 %v1088_v61, %s3243_s24  ;;  %v1148_v11 = vadd.f32 %v1144_v62, %v2760_v63 }
 0x201   : > { %v1089_v2 = vpop.f32.mrf.mxu0  ;;  %v1145_v6 = vpop.f32.mrf.mxu1 }
 0x202   : > { %v1090_v7 = vadd.f32 %v2828_v51, %v1089_v2  ;;  %v1146_v10 = vadd.f32 %v2655_v46, %v1145_v6 }
 0x204   : > { %v1149_v14 = vadd.f32 %v1146_v10, %v2763_v0  ;;  %1606 = vrot.lane.b32.xlu0 %v1090_v7, %s3243_s24 }
 0x206   : > { %v1150_v15 = vpack.c.bf16 %v1149_v14, %v1148_v11 }
 0x208   : > { %1159 = vmatmul.bf16.vlgmr.msrb.gmra.mxu2 %v1150_v15 }
 0x209   : > { %v1179_v17 = vpop.f32.mrf.mxu0  ;;  %1299 = vmatpush.bf16.msrb.mxu2 %v2512_v22 }
 0x20a   : > { %v1180_v18 = vadd.f32 %v2655_v46, %v1179_v17 }
 0x20c   : > { %v1184_v39 = vadd.f32 %v1180_v18, %v2760_v63 }
 0x20d   : > { %1300 = vmatpush.bf16.msrb.mxu2 %v2524_v24 }
 0x211   : > { %v1181_v19 = vpop.f32.mrf.mxu0  ;;  %1301 = vmatpush.bf16.msrb.mxu2 %v2537_v26 }
 0x212   : > { %v1182_v20 = vadd.f32 %v2655_v46, %v1181_v19 }
 0x214   : > { %v1185_v40 = vadd.f32 %v1182_v20, %v2763_v0  ;;  %v840_v20 = vadd.f32 %v2828_v51, %v2801_v16 }
 0x215   : > { %1302 = vmatpush.bf16.msrb.mxu2 %v2550_v28 }
 0x216   : > { %v1186_v41 = vpack.c.bf16 %v1185_v40, %v1184_v39 }
 0x218   : > { %1195 = vmatmul.bf16.vlgmr.msrb.gmra.mxu1 %v1186_v41  ;;  %2098 = vmatmul.msk.bf16.vlgmr.msra.gmra.mxu2 %vm756_vm1, %v2750_v59  ;;  %v2864_v59 = vpop.permute.xlu2 %1349 }
 0x219   : > { %1303 = vmatpush.bf16.msrb.mxu2 %v2566_v31  ;;  %1335 = vmatpush.bf16.msrb.mxu1 %v2512_v22 }
 0x21d   : > { %1304 = vmatpush.bf16.msrb.mxu2 %v2579_v33  ;;  %1336 = vmatpush.bf16.msrb.mxu1 %v2524_v24 }
 0x220   : > { %v2869_v45 = vpop.permute.xlu2 %1530 }
 0x221   : > { %1305 = vmatpush.bf16.msrb.mxu2 %v2594_v35  ;;  %1337 = vmatpush.bf16.msrb.mxu1 %v2537_v26 }
 0x225   : > { %1306 = vmatpush.bf16.msrb.mxu2 %v2607_v37  ;;  %1338 = vmatpush.bf16.msrb.mxu1 %v2550_v28 }
 0x228   : > { %2103 = vmatmul.msk.bf16.vlgmr.msra.gmra.mxu1 %vm862_vm0, %v2734_v54  ;;  %v2872_v54 = vpop.permute.xlu0 %1385  ;;  %v1637_v48 = vpop.permute.xlu2 %1636 }
 0x229   : > { %1396 = vmatpush.bf16.msra.mxu2 %v2424_v3  ;;  %1339 = vmatpush.bf16.msrb.mxu1 %v2566_v31 }
 0x22d   : > { %1397 = vmatpush.bf16.msra.mxu2 %v2438_v5  ;;  %1340 = vmatpush.bf16.msrb.mxu1 %v2579_v33 }
 0x230   : > { %v2877_v49 = vpop.permute.xlu0 %1494 }
 0x231   : > { %1341 = vmatpush.bf16.msrb.mxu1 %v2594_v35 }
 0x235   : > { %1342 = vmatpush.bf16.msrb.mxu1 %v2607_v37 }
 0x238   : > { %v1629_v52 = vpop.permute.xlu0 %1628 }
 0x239   : > { %1430 = vmatpush.bf16.msra.mxu1 %v2416_v1 }
 0x23d   : > { %1431 = vmatpush.bf16.msra.mxu1 %v2432_v4  ;;  %v838_v4 = vadd.f32 %v2828_v51, %v2797_v13  ;;  %v1722_v13 = vsel %vm862_vm0, %v944_v57, %v1629_v52 }
 0x23e   : > { %v1724_v2 = vsel %vm756_vm1, %v1722_v13, %v1637_v48 }
 0x240   : > { %v1639_v61 = vpop.permute.xlu0 %1638 }
 0x241   : > { %1432 = vmatpush.bf16.msra.mxu1 %v2458_v9  ;;  %v1631_v9 = vpop.permute.xlu1 %1630 }
 0x242   : > { %v1723_v62 = vsel %vm862_vm0, %v946_v60, %v1631_v9 }
 0x243   : > { %v1725_v6 = vsel %vm756_vm1, %v1723_v62, %v1639_v61 }
 0x245   : > { %1433 = vmatpush.bf16.msra.mxu1 %v2475_v12 }
 0x24e   : > { %v1647_v1 = vpop.permute.xlu2 %1646 }
 0x24f   : > { %v1728_v38 = vsel %vm1726_vm2, %v1725_v6, %v1647_v1 }
 0x250   : > { %1751 = vst [vmem:[%s2903_s30 + $0x20] sm:$0xff] %v1728_v38 }
 0x255   : > { %v2894_v58 = vpop.f32.mrf.mxu3 }
 0x256   : > { %v1605_v56 = vpop.permute.xlu2 %1604 }
 0x257   : > { %v1618_v12 = vsel %vm756_vm1, %v838_v4, %v1605_v56 }
 0x258   : > { %1622 = vst [vmem:[%s2888_s26] sm:$0xff] %v1618_v12 }
 0x25d   : > { %v2912_v10 = vpop.f32.mrf.mxu3 }
 0x25e   : > { %v1645_v29 = vpop.permute.xlu1 %1644 }
 0x25f   : > { %v1727_v7 = vsel %vm1726_vm2, %v1724_v2, %v1645_v29 }
 0x260   : > { %1747 = vst [vmem:[%s2903_s30] sm:$0xff] %v1727_v7 }
 0x265   : > { %v1215_v11 = vpop.f32.mrf.mxu3 }
 0x266   : > { %v1216_v14 = vadd.f32 %v2655_v46, %v1215_v11 }
 0x268   : > { %v1220_v18 = vadd.f32 %v1216_v14, %v2760_v63 }
 0x26d   : > { %v1217_v15 = vpop.f32.mrf.mxu3 }
 0x26e   : > { %v1218_v17 = vadd.f32 %v2655_v46, %v1217_v15 }
 0x270   : > { %v1221_v19 = vadd.f32 %v1218_v17, %v2763_v0 }
 0x272   : > { %v1222_v39 = vpack.c.bf16 %v1221_v19, %v1220_v18 }
 0x274   : > { %1231 = vmatmul.bf16.vlgmr.msra.gmra.mxu0 %v1222_v39 }
 0x275   : > { %1371 = vmatpush.bf16.msra.mxu0 %v2512_v22 }
 0x276   : > { %v1607_v40 = vpop.permute.xlu0 %1606 }
 0x277   : > { %v1619_v41 = vsel %vm756_vm1, %v840_v20, %v1607_v40 }
 0x278   : > { %1624 = vst [vmem:[%s2888_s26 + $0x10] sm:$0xff] %v1619_v41 }
 0x279   : > { %1372 = vmatpush.bf16.msra.mxu0 %v2524_v24 }
 0x27d   : > { %1373 = vmatpush.bf16.msra.mxu0 %v2537_v26 }
 0x281   : > { %1374 = vmatpush.bf16.msra.mxu0 %v2550_v28 }
 0x284   : > { %2104 = vmatmul.msk.bf16.vlgmr.msrb.gmra.mxu0 %vm862_vm0, %v1314_v42 }
 0x285   : > { %1375 = vmatpush.bf16.msra.mxu0 %v2566_v31 }
 0x289   : > { %1376 = vmatpush.bf16.msra.mxu0 %v2579_v33 }
 0x28b   : > { %v1160_v63 = vpop.f32.mrf.mxu2 }
 0x28c   : > { %v1161_v0 = vadd.f32 %v2793_v8, %v1160_v63 }
 0x28d   : > { %1377 = vmatpush.bf16.msra.mxu0 %v2594_v35 }
 0x28e   : > { %1652 = vrot.lane.b32.xlu0 %v1161_v0, %s3245_s20 }
 0x291   : > { %1378 = vmatpush.bf16.msra.mxu0 %v2607_v37 }
 0x293   : > { %v1162_v16 = vpop.f32.mrf.mxu2 }
 0x294   : > { %v1163_v48 = vadd.f32 %v2793_v8, %v1162_v16 }
 0x295   : > { %v1196_v1 = vpop.f32.mrf.mxu1  ;;  %1469 = vmatpush.bf16.msrb.mxu0 %v2424_v3 }
 0x296   : > { %v1197_v52 = vadd.f32 %v2793_v8, %v1196_v1  ;;  %1654 = vrot.lane.b32.xlu1 %v1163_v48, %s3245_s20 }
 0x298   : > { %1660 = vrot.lane.b32.xlu2 %v1197_v52, %s3243_s24 }
 0x299   : > { %1470 = vmatpush.bf16.msrb.mxu0 %v2438_v5 }
 0x29b   : > { %v1252_v42 = vpop.f32.mrf.mxu2 }
 0x29c   : > { %v1253_v56 = vadd.f32 %v2640_v43, %v1252_v42 }
 0x29d   : > { %v1198_v4 = vpop.f32.mrf.mxu1 }
 0x29e   : > { %v1199_v9 = vadd.f32 %v2793_v8, %v1198_v4  ;;  %v2944_v60 = vadd.f32 %v1253_v56, %v2642_v44 }
 0x2a0   : > { %1662 = vrot.lane.b32.xlu0 %v1199_v9, %s3243_s24  ;;  %v1125_v9 = vadd.f32 %v2793_v8, %v2894_v58 }
 0x2a3   : > { %v1254_v12 = vpop.f32.mrf.mxu2 }
 0x2a4   : > { %v1255_v57 = vadd.f32 %v2640_v43, %v1254_v12 }
 0x2a5   : > { %v1291_v13 = vpop.f32.mrf.mxu1 }
 0x2a6   : > { %v2947_v61 = vadd.f32 %v1255_v57, %v2664_v53  ;;  %v1292_v29 = vadd.f32 %v2655_v46, %v1291_v13 }
 0x2a8   : > { %v1259_v62 = vpack.c.bf16 %v2947_v61, %v2944_v60  ;;  %v1296_v7 = vadd.f32 %v1292_v29, %v2944_v60 }
 0x2aa   : > { %1268 = vmatmul.bf16.vlgmr.msra.gmra.mxu3 %v1259_v62 }
 0x2ab   : > { %1407 = vmatpush.bf16.msra.mxu3 %v2512_v22 }
 0x2ad   : > { %v1293_v2 = vpop.f32.mrf.mxu1 }
 0x2ae   : > { %v1294_v6 = vadd.f32 %v2655_v46, %v1293_v2 }
 0x2af   : > { %1408 = vmatpush.bf16.msra.mxu3 %v2524_v24 }
 0x2b0   : > { %v1297_v38 = vadd.f32 %v1294_v6, %v2947_v61 }
 0x2b2   : > { %v1298_v11 = vpack.c.bf16 %v1297_v38, %v1296_v7 }
 0x2b3   : > { %1409 = vmatpush.bf16.msra.mxu3 %v2537_v26 }
 0x2b4   : > { %1307 = vmatmul.bf16.vlgmr.msrb.gmra.mxu2 %v1298_v11 }
 0x2b5   : > { %1443 = vmatpush.bf16.msrb.mxu2 %v2507_v21 }
 0x2b7   : > { %1410 = vmatpush.bf16.msra.mxu3 %v2550_v28 }
 0x2b9   : > { %1444 = vmatpush.bf16.msrb.mxu2 %v2518_v23 }
 0x2ba   : > { %2105 = vmatmul.msk.bf16.vlgmr.msrb.gmra.mxu3 %vm862_vm0, %v2864_v59 }
 0x2bb   : > { %1411 = vmatpush.bf16.msra.mxu3 %v2566_v31 }
 0x2bd   : > { %1445 = vmatpush.bf16.msrb.mxu2 %v2531_v25 }
 0x2bf   : > { %1412 = vmatpush.bf16.msra.mxu3 %v2579_v33 }
 0x2c1   : > { %1446 = vmatpush.bf16.msrb.mxu2 %v2544_v27 }
 0x2c3   : > { %1413 = vmatpush.bf16.msra.mxu3 %v2594_v35 }
 0x2c4   : > { %2106 = vmatmul.msk.bf16.vlgmr.msra.gmra.mxu2 %vm862_vm0, %v2872_v54 }
 0x2c5   : > { %1447 = vmatpush.bf16.msrb.mxu2 %v2559_v30 }
 0x2c7   : > { %1414 = vmatpush.bf16.msra.mxu3 %v2607_v37 }
 0x2c9   : > { %1448 = vmatpush.bf16.msrb.mxu2 %v2573_v32 }
 0x2cb   : > { %1505 = vmatpush.bf16.msrb.mxu3 %v2424_v3 }
 0x2cd   : > { %1449 = vmatpush.bf16.msrb.mxu2 %v2587_v34 }
 0x2cf   : > { %1506 = vmatpush.bf16.msrb.mxu3 %v2438_v5 }
 0x2d1   : > { %1450 = vmatpush.bf16.msrb.mxu2 %v2601_v36 }
 0x2d5   : > { %1541 = vmatpush.bf16.msra.mxu2 %v2424_v3 }
 0x2d9   : > { %1542 = vmatpush.bf16.msra.mxu2 %v2438_v5 }
 0x2f1   : > { %v1232_v21 = vpop.f32.mrf.mxu0 }
 0x2f2   : > { %v1233_v23 = vadd.f32 %v2793_v8, %v1232_v21  ;;  %v1661_v56 = vpop.permute.xlu2 %1660 }
 0x2f4   : > { %1668 = vrot.lane.b32.xlu1 %v1233_v23, %s3244_s23 }
 0x2f9   : > { %v2981_v25 = vpop.f32.mrf.mxu0 }
 0x300   : > { %v1653_v4 = vpop.permute.xlu0 %1652 }
 0x301   : > { %v1327_v27 = vpop.f32.mrf.mxu0 }
 0x302   : > { %v1328_v30 = vadd.f32 %v2655_v46, %v1327_v27 }
 0x304   : > { %v1332_v34 = vadd.f32 %v1328_v30, %v2944_v60 }
 0x308   : > { %v3026_v42 = vpop.permute.xlu1 %1654 }
 0x309   : > { %v1329_v32 = vpop.f32.mrf.mxu0 }
 0x30a   : > { %v1330_v59 = vadd.f32 %v2655_v46, %v1329_v32 }
 0x30c   : > { %v1333_v36 = vadd.f32 %v1330_v59, %v2947_v61 }
 0x30e   : > { %v1334_v54 = vpack.c.bf16 %v1333_v36, %v1332_v34 }
 0x310   : > { %1343 = vmatmul.bf16.vlgmr.msrb.gmra.mxu1 %v1334_v54 }
 0x311   : > { %1480 = vmatpush.bf16.msrb.mxu1 %v2512_v22 }
 0x315   : > { %1481 = vmatpush.bf16.msrb.mxu1 %v2524_v24 }
 0x319   : > { %1482 = vmatpush.bf16.msrb.mxu1 %v2537_v26 }
 0x31d   : > { %1483 = vmatpush.bf16.msrb.mxu1 %v2550_v28 }
 0x320   : > { %2107 = vmatmul.msk.bf16.vlgmr.msra.gmra.mxu1 %vm756_vm1, %v2874_v47 }
 0x321   : > { %1484 = vmatpush.bf16.msrb.mxu1 %v2566_v31 }
 0x325   : > { %1485 = vmatpush.bf16.msrb.mxu1 %v2579_v33 }
 0x329   : > { %1486 = vmatpush.bf16.msrb.mxu1 %v2594_v35 }
 0x32d   : > { %v2995_v14 = vpop.f32.mrf.mxu3  ;;  %1487 = vmatpush.bf16.msrb.mxu1 %v2607_v37 }
 0x331   : > { %1577 = vmatpush.bf16.msra.mxu1 %v2424_v3 }
 0x335   : > { %v3000_v15 = vpop.f32.mrf.mxu3  ;;  %1578 = vmatpush.bf16.msra.mxu1 %v2438_v5 }
 0x337   : > { %v3003_v17 = vpop.f32.mrf.mxu2 }
 0x33d   : > { %v1363_v18 = vpop.f32.mrf.mxu3 }
 0x33e   : > { %v1364_v19 = vadd.f32 %v2655_v46, %v1363_v18  ;;  %v3085_v18 = vpop.permute.xlu0 %1662 }
 0x33f   : > { %v3005_v47 = vpop.f32.mrf.mxu2 }
 0x340   : > { %v1368_v41 = vadd.f32 %v1364_v19, %v2944_v60  ;;  %v1311_v19 = vadd.f32 %v2793_v8, %v3005_v47  ;;  %v1309_v47 = vadd.f32 %v2793_v8, %v3003_v17 }
 0x345   : > { %v1365_v20 = vpop.f32.mrf.mxu3 }
 0x346   : > { %v1366_v39 = vadd.f32 %v2655_v46, %v1365_v20 }
 0x347   : > { %v1399_v40 = vpop.f32.mrf.mxu2 }
 0x348   : > { %v1369_v63 = vadd.f32 %v1366_v39, %v2947_v61  ;;  %v1400_v5 = vadd.f32 %v2655_v46, %v1399_v40 }
 0x34a   : > { %v1370_v3 = vpack.c.bf16 %v1369_v63, %v1368_v41  ;;  %v1404_v48 = vadd.f32 %v1400_v5, %v2944_v60 }
 0x34c   : > { %1379 = vmatmul.bf16.vlgmr.msra.gmra.mxu0 %v1370_v3 }
 0x34d   : > { %1516 = vmatpush.bf16.msra.mxu0 %v2512_v22 }
 0x34f   : > { %v1401_v0 = vpop.f32.mrf.mxu2 }
 0x350   : > { %v1402_v16 = vadd.f32 %v2655_v46, %v1401_v0 }
 0x351   : > { %1517 = vmatpush.bf16.msra.mxu0 %v2524_v24 }
 0x352   : > { %v1405_v1 = vadd.f32 %v1402_v16, %v2947_v61 }
 0x354   : > { %v1406_v52 = vpack.c.bf16 %v1405_v1, %v1404_v48 }
 0x355   : > { %1518 = vmatpush.bf16.msra.mxu0 %v2537_v26 }
 0x356   : > { %1415 = vmatmul.bf16.vlgmr.msra.gmra.mxu3 %v1406_v52 }
 0x357   : > { %1552 = vmatpush.bf16.msra.mxu3 %v2512_v22 }
 0x359   : > { %1519 = vmatpush.bf16.msra.mxu0 %v2550_v28 }
 0x35b   : > { %1553 = vmatpush.bf16.msra.mxu3 %v2524_v24 }
 0x35c   : > { %2112 = vmatmul.msk.bf16.vlgmr.msrb.gmra.mxu0 %vm862_vm0, %v2748_v55  ;;  %v1729_v55 = vsel %vm862_vm0, %v1125_v9, %v1653_v4 }
 0x35d   : > { %1520 = vmatpush.bf16.msra.mxu0 %v2566_v31  ;;  %v1731_v57 = vsel %vm756_vm1, %v1729_v55, %v1661_v56 }
 0x35f   : > { %1554 = vmatpush.bf16.msra.mxu3 %v2537_v26 }
 0x361   : > { %1521 = vmatpush.bf16.msra.mxu0 %v2579_v33 }
 0x363   : > { %1555 = vmatpush.bf16.msra.mxu3 %v2550_v28 }
 0x365   : > { %1522 = vmatpush.bf16.msra.mxu0 %v2594_v35 }
 0x366   : > { %2113 = vmatmul.msk.bf16.vlgmr.msrb.gmra.mxu3 %vm862_vm0, %v2877_v49  ;;  %v1669_v12 = vpop.permute.xlu1 %1668 }
 0x367   : > { %1556 = vmatpush.bf16.msra.mxu3 %v2566_v31  ;;  %v1733_v13 = vsel %vm1726_vm2, %v1731_v57, %v1669_v12 }
 0x368   : > { %1748 = vst [vmem:[%s2903_s30 + $0x8] sm:$0xff] %v1733_v13 }
 0x369   : > { %1523 = vmatpush.bf16.msra.mxu0 %v2607_v37 }
 0x36b   : > { %1557 = vmatpush.bf16.msra.mxu3 %v2579_v33 }
 0x36f   : > { %1558 = vmatpush.bf16.msra.mxu3 %v2594_v35 }
 0x373   : > { %1559 = vmatpush.bf16.msra.mxu3 %v2607_v37 }
 0x38d   : > { %v1344_v49 = vpop.f32.mrf.mxu1 }
 0x38e   : > { %v1345_v58 = vadd.f32 %v2793_v8, %v1344_v49 }
 0x390   : > { %1676 = vrot.lane.b32.xlu1 %v1345_v58, %s3245_s20 }
 0x395   : > { %v1346_v60 = vpop.f32.mrf.mxu1 }
 0x396   : > { %v1347_v61 = vadd.f32 %v2793_v8, %v1346_v60 }
 0x398   : > { %1678 = vrot.lane.b32.xlu0 %v1347_v61, %s3245_s20 }
 0x39d   : > { %v1435_v62 = vpop.f32.mrf.mxu1 }
 0x39e   : > { %v1436_v29 = vadd.f32 %v2640_v43, %v1435_v62 }
 0x3a0   : > { %v3050_v7 = vadd.f32 %v1436_v29, %v2642_v44 }
 0x3a5   : > { %v1437_v2 = vpop.f32.mrf.mxu1 }
 0x3a6   : > { %v1438_v6 = vadd.f32 %v2640_v43, %v1437_v2 }
 0x3a8   : > { %v3053_v38 = vadd.f32 %v1438_v6, %v2664_v53 }
 0x3aa   : > { %v1442_v11 = vpack.c.bf16 %v3053_v38, %v3050_v7 }
 0x3ac   : > { %1451 = vmatmul.bf16.vlgmr.msrb.gmra.mxu2 %v1442_v11 }
 0x3ad   : > { %1588 = vmatpush.bf16.msrb.mxu2 %v2512_v22 }
 0x3b1   : > { %1589 = vmatpush.bf16.msrb.mxu2 %v2524_v24 }
 0x3b5   : > { %1590 = vmatpush.bf16.msrb.mxu2 %v2537_v26 }
 0x3b9   : > { %1591 = vmatpush.bf16.msrb.mxu2 %v2550_v28 }
 0x3bc   : > { %2114 = vmatmul.msk.bf16.vlgmr.msra.gmra.mxu2 %vm862_vm0, %v2869_v45 }
 0x3bd   : > { %1592 = vmatpush.bf16.msrb.mxu2 %v2566_v31 }
 0x3c1   : > { %1593 = vmatpush.bf16.msrb.mxu2 %v2579_v33 }
 0x3c5   : > { %1594 = vmatpush.bf16.msrb.mxu2 %v2594_v35 }
 0x3c9   : > { %v1380_v43 = vpop.f32.mrf.mxu0  ;;  %1595 = vmatpush.bf16.msrb.mxu2 %v2607_v37 }
 0x3ca   : > { %v1381_v44 = vadd.f32 %v2793_v8, %v1380_v43 }
 0x3cc   : > { %1684 = vrot.lane.b32.xlu1 %v1381_v44, %s3243_s24 }
 0x3d1   : > { %v1382_v22 = vpop.f32.mrf.mxu0 }
 0x3d2   : > { %v1383_v24 = vadd.f32 %v2793_v8, %v1382_v22 }
 0x3d4   : > { %1686 = vrot.lane.b32.xlu2 %v1383_v24, %s3243_s24  ;;  %v1270_v24 = vadd.f32 %v2828_v51, %v2995_v14 }
 0x3d9   : > { %v1416_v26 = vpop.f32.mrf.mxu3  ;;  %v1472_v28 = vpop.f32.mrf.mxu0 }
 0x3da   : > { %v1417_v31 = vadd.f32 %v2793_v8, %v1416_v26  ;;  %v1473_v33 = vadd.f32 %v2655_v46, %v1472_v28  ;;  %v1272_v28 = vadd.f32 %v2828_v51, %v3000_v15 }
 0x3dc   : > { %1692 = vrot.lane.b32.xlu0 %v1417_v31, %s3244_s23  ;;  %v1477_v37 = vadd.f32 %v1473_v33, %v3050_v7 }
 0x3e1   : > { %v3074_v35 = vpop.f32.mrf.mxu3  ;;  %v1474_v53 = vpop.f32.mrf.mxu0 }
 0x3e2   : > { %v1475_v45 = vadd.f32 %v2655_v46, %v1474_v53  ;;  %v1235_v53 = vadd.f32 %v2793_v8, %v2981_v25  ;;  %v1419_v15 = vadd.f32 %v2793_v8, %v3074_v35 }
 0x3e4   : > { %v1478_v21 = vadd.f32 %v1475_v45, %v3053_v38 }
 0x3e6   : > { %v1479_v23 = vpack.c.bf16 %v1478_v21, %v1477_v37 }
 0x3e8   : > { %1488 = vmatmul.bf16.vlgmr.msrb.gmra.mxu1 %v1479_v23 }
 0x3e9   : > { %v1508_v27 = vpop.f32.mrf.mxu3 }
 0x3ea   : > { %v1509_v30 = vadd.f32 %v2655_v46, %v1508_v27 }
 0x3ec   : > { %v1513_v34 = vadd.f32 %v1509_v30, %v3050_v7 }
 0x3f1   : > { %v1510_v32 = vpop.f32.mrf.mxu3 }
 0x3f2   : > { %v1511_v59 = vadd.f32 %v2655_v46, %v1510_v32 }
 0x3f4   : > { %v1514_v36 = vadd.f32 %v1511_v59, %v3053_v38 }
 0x3f6   : > { %v1515_v54 = vpack.c.bf16 %v1514_v36, %v1513_v34 }
 0x3f8   : > { %1524 = vmatmul.bf16.vlgmr.msra.gmra.mxu0 %v1515_v54  ;;  %2115 = vmatmul.msk.bf16.vlgmr.msra.gmra.mxu1 %vm862_vm0, %v2879_v50 }
 0x402   : > { %v1677_v50 = vpop.permute.xlu1 %1676 }
 0x403   : > { %v1735_v52 = vsel %vm862_vm0, %v1309_v47, %v1677_v50 }
 0x40a   : > { %v1679_v20 = vpop.permute.xlu0 %1678 }
 0x40b   : > { %v3090_v39 = vsel %vm862_vm0, %v1311_v19, %v1679_v20 }
 0x42e   : > { %v1687_v22 = vpop.permute.xlu2 %1686 }
 0x42f   : > { %v1452_v40 = vpop.f32.mrf.mxu2 }
 0x430   : > { %v1453_v41 = vadd.f32 %v2828_v51, %v1452_v40 }
 0x432   : > { %1612 = vrot.lane.b32.xlu1 %v1453_v41, %s3243_s24 }
 0x437   : > { %v1454_v63 = vpop.f32.mrf.mxu2 }
 0x438   : > { %v1455_v3 = vadd.f32 %v2828_v51, %v1454_v63 }
 0x43a   : > { %1614 = vrot.lane.b32.xlu2 %v1455_v3, %s3243_s24 }
 0x43e   : > { %v1685_v16 = vpop.permute.xlu1 %1684 }
 0x43f   : > { %v1544_v5 = vpop.f32.mrf.mxu2  ;;  %v1737_v4 = vsel %vm756_vm1, %v1735_v52, %v1685_v16 }
 0x440   : > { %v1545_v0 = vadd.f32 %v2655_v46, %v1544_v5 }
 0x442   : > { %v1549_v9 = vadd.f32 %v1545_v0, %v3050_v7 }
 0x447   : > { %v1546_v48 = vpop.f32.mrf.mxu2 }
 0x448   : > { %v1547_v1 = vadd.f32 %v2655_v46, %v1546_v48 }
 0x44a   : > { %v1550_v55 = vadd.f32 %v1547_v1, %v3053_v38 }
 0x44c   : > { %v1551_v57 = vpack.c.bf16 %v1550_v55, %v1549_v9 }
 0x44e   : > { %v1693_v56 = vpop.permute.xlu0 %1692  ;;  %1560 = vmatmul.bf16.vlgmr.msra.gmra.mxu3 %v1551_v57 }
 0x44f   : > { %v1739_v12 = vsel %vm1726_vm2, %v1737_v4, %v1693_v56 }
 0x450   : > { %1749 = vst [vmem:[%s2903_s30 + $0x10] sm:$0xff] %v1739_v12 }
 0x465   : > { %v3106_v13 = vpop.f32.mrf.mxu1 }
 0x46d   : > { %v3108_v17 = vpop.f32.mrf.mxu1 }
 0x475   : > { %v1525_v49 = vpop.f32.mrf.mxu0  ;;  %v1580_v58 = vpop.f32.mrf.mxu1 }
 0x476   : > { %v1526_v60 = vadd.f32 %v2793_v8, %v1525_v49  ;;  %v1581_v61 = vadd.f32 %v2655_v46, %v1580_v58 }
 0x478   : > { %1700 = vrot.lane.b32.xlu2 %v1526_v60, %s3245_s20  ;;  %v1585_v11 = vadd.f32 %v1581_v61, %v3050_v7 }
 0x47d   : > { %v1527_v62 = vpop.f32.mrf.mxu0  ;;  %v1582_v29 = vpop.f32.mrf.mxu1 }
 0x47e   : > { %v1528_v2 = vadd.f32 %v2793_v8, %v1527_v62  ;;  %v1583_v6 = vadd.f32 %v2655_v46, %v1582_v29 }
 0x480   : > { %v1586_v43 = vadd.f32 %v1583_v6, %v3053_v38  ;;  %1702 = vrot.lane.b32.xlu2 %v1528_v2, %s3245_s20 }
 0x482   : > { %v1587_v44 = vpack.c.bf16 %v1586_v43, %v1585_v11 }
 0x484   : > { %1596 = vmatmul.bf16.vlgmr.msrb.gmra.mxu2 %v1587_v44 }
 0x494   : > { %v1615_v26 = vpop.permute.xlu2 %1614 }
 0x495   : > { %v1621_v7 = vsel %vm756_vm1, %v1272_v28, %v1615_v26 }
 0x496   : > { %1625 = vst [vmem:[%s2888_s26 + $0x18] sm:$0xff] %v1621_v7 }
 0x4a4   : > { %v1613_v31 = vpop.permute.xlu1 %1612 }
 0x4a5   : > { %v1620_v46 = vsel %vm756_vm1, %v1270_v24, %v1613_v31 }
 0x4a6   : > { %1623 = vst [vmem:[%s2888_s26 + $0x8] sm:$0xff] %v1620_v46  ;;  %s1780_s26 = sshll.u32 %s2646_s1, 4  ;;  %s1781_s26 = int_to_ptr.vmem [resolvable:$true] %s1780_s26 }
 0x4d1   : > { %v1561_v38 = vpop.f32.mrf.mxu3 }
 0x4d2   : > { %v1562_v33 = vadd.f32 %v2793_v8, %v1561_v38 }
 0x4d4   : > { %1708 = vrot.lane.b32.xlu0 %v1562_v33, %s3243_s24 }
 0x4d9   : > { %v1563_v14 = vpop.f32.mrf.mxu3 }
 0x4da   : > { %v1564_v51 = vadd.f32 %v2793_v8, %v1563_v14 }
 0x4dc   : > { %1710 = vrot.lane.b32.xlu1 %v1564_v51, %s3243_s24  ;;  %1670 = vrot.lane.b32.xlu0 %v1235_v53, %s3244_s23  ;;  %s2228_s24 = scalar_lea.hbm %s2227_s29, 16 }
 0x4dd   : > { %p2229_p11 = scmp.ne.s32.totalorder %s2227_s29, %s2228_s24  ;;  %p2234_p1 = scmp.lt.s32.totalorder %s2232_s22, %s2228_s24 }
 0x4df   : > { %p2230_p12 = pnand %p2229_p11, %p2399_p5  ;;  %p2235_p2 = por %p2234_p1, %p2233_p0 }
 0x4e1   : > { %p2231_p13 = pneg %p2230_p12 }
 0x4e3   : > { %p2236_p3 = pnand %p2235_p2, %p2231_p13 }
 0x4e4   : > { %1694 = vrot.lane.b32.xlu1 %v1419_v15, %s3244_s23 }
 0x4e5   : > { %2239 = shalt.err (!%p2236_p3)
}
 0x4e6   : > { %s2279_s27 = smov 128   ;;  %s2280_s1 = smov 8   ;;  %v1127_v23 = vadd.f32 %v2793_v8, %v2912_v10  ;;  %v1701_v30 = vpop.permute.xlu2 %1700  ;;  %v1738_v54 = vsel %vm756_vm1, %v3090_v39, %v1687_v22  ;;  %v1492_v39 = vadd.f32 %v2793_v8, %v3108_v17 }
 0x4e7   : > { %2163 = dma.vmem_to_hbm [thread:$0]  (%p2399_p5), %s1781_s26, 256, %s1783_s18, %s1756_s25, %s2279_s27, %s2279_s27, %s2280_s1  }
 0x4e8   : > { %v1730_v27 = vsel %vm862_vm0, %v1127_v23, %v3026_v42  ;;  %v1490_v42 = vadd.f32 %v2793_v8, %v3106_v13 }
 0x4e9   : > { %v1732_v32 = vsel %vm756_vm1, %v1730_v27, %v3085_v18 }
 0x4ea   : > { %v1741_v40 = vsel %vm862_vm0, %v1490_v42, %v1701_v30 }
 0x4ee   : > { %v1703_v20 = vpop.permute.xlu2 %1702 }
 0x4ef   : > { %v1742_v3 = vsel %vm862_vm0, %v1492_v39, %v1703_v20 }
 0x507   : > { %v1597_v25 = vpop.f32.mrf.mxu2 }
 0x508   : > { %v1598_v35 = vadd.f32 %v2793_v8, %v1597_v25 }
 0x50a   : > { %1716 = vrot.lane.b32.xlu2 %v1598_v35, %s3244_s23 }
 0x50f   : > { %v1599_v45 = vpop.f32.mrf.mxu2 }
 0x510   : > { %v1600_v37 = vadd.f32 %v2793_v8, %v1599_v45 }
 0x512   : > { %1718 = vrot.lane.b32.xlu2 %v1600_v37, %s3244_s23 }
 0x546   : > { %v1709_v21 = vpop.permute.xlu0 %1708 }
 0x547   : > { %v1743_v18 = vsel %vm756_vm1, %v1741_v40, %v1709_v21 }
 0x54e   : > { %v1711_v59 = vpop.permute.xlu1 %1710  ;;  %v1671_v34 = vpop.permute.xlu0 %1670 }
 0x54f   : > { %v1734_v36 = vsel %vm1726_vm2, %v1732_v32, %v1671_v34  ;;  %v1744_v50 = vsel %vm756_vm1, %v1742_v3, %v1711_v59 }
 0x550   : > { %1752 = vst [vmem:[%s2903_s30 + $0x28] sm:$0xff] %v1734_v36 }
 0x556   : > { %v1695_v19 = vpop.permute.xlu1 %1694 }
 0x557   : > { %v1740_v10 = vsel %vm1726_vm2, %v1738_v54, %v1695_v19 }
 0x558   : > { %1753 = vst [vmem:[%s2903_s30 + $0x30] sm:$0xff] %v1740_v10 }
 0x564   : > { %v1717_v41 = vpop.permute.xlu2 %1716 }
 0x565   : > { %v1745_v63 = vsel %vm1726_vm2, %v1743_v18, %v1717_v41 }
 0x566   : > { %1750 = vst [vmem:[%s2903_s30 + $0x18] sm:$0xff] %v1745_v63 }
 0x56c   : > { %v1719_v5 = vpop.permute.xlu2 %1718 }
 0x56d   : > { %v1746_v0 = vsel %vm1726_vm2, %v1744_v50, %v1719_v5 }
 0x56e   : > { %1754 = vst [vmem:[%s2903_s30 + $0x38] sm:$0xff] %v1746_v0 }
 0x56f PF: > { %s3247_s0 = sld [smem:[#allocation5_spill]]  ;;  %p2169_p4 = scmp.ge.s32.totalorder %s2274_s21, 2 }
 0x571   : > { %p2166_p5 = pnand %p2169_p4, %p2403_p6 }
 0x573   : > { %p2167_p7 = pneg %p2166_p5 }
 0x575   : > { %s1805_s4 = sand.u32 1, %s3247_s0  }
 0x576   : > { %s1806_s28 = scalar_lea.sflag [#allocation3], %s1805_s4 }
 0x577   : > { %2257 = dma.done.wait (%p2167_p7), %s1806_s28, 256  }
 0x578   : > { %2259 = vsyncadd (%p2167_p7), %s1806_s28, 4294967040  ;;  %s3249_s21 = sld [smem:[#allocation7_spill]]  ;;  %s3252_s18 = smov %s2266_s19 }
 0x579   : > { %s3250_s23 = sld [smem:[#allocation6_spill]] }
 0x57a   : > { %s3251_s20 = sld [smem:[#allocation8_spill]] }
 0x57e   : > { %p26_p8 = scmp.ge.s32.totalorder %s3249_s21, 4  }
 0x57f   : > { %s3253_s19 = smov %s3250_s23 }
 0x580   :  { %28 = sbr.rel (!%p26_p8) target bundleno = 9 (0x9), region = 137 }
 0x585   :  { %1830 = vsyncpa [#allocation3], 1 }
 0x586   :  { %1832 = vsyncpa [#allocation3 + $0x1], 1 }

</bundles_post_ra>
